<compile_context>
chip_gen: v7x
topology: tpu7x:2x2x1
jax: 0.10.0
libtpu: 0.0.40
codegen_flags: <defaults>
</compile_context>

<pallas_src>
import numpy as np
import jax
import jax.numpy as jnp
from jax.experimental import pallas as pl
from jax.experimental.pallas import tpu as pltpu


# ----------------------------------------------------------------------------
# Model configuration (the model_kwargs of the PyTorch module)
# ----------------------------------------------------------------------------
CFG = dict(
    num_nodes=8,
    input_dim=2,
    output_dim=2,
    rnn_units=16,            # DCGRU hidden per node
    rnn_units_gru=16,        # decoder GRU hidden
    r_dim=16,
    z_dim=8,
    seq_len=6,
    batch=8,
    max_diffusion_step=2,
    num_rnn_layers=1,
    num_rnn_layers_gru=1,
    context_percentage=0.5,
    filter_type="laplacian",
)


def _dot(a, b):
    return jnp.dot(a, b, preferred_element_type=jnp.float32)


# ----------------------------------------------------------------------------
# In-kernel building blocks (all operate on the lane-flattened (rows, N*feat) layout)
# ----------------------------------------------------------------------------
def _cheb_cat(v, sd, num_matrices):
    """Chebyshev diffusion terms [T0 | T1 | ...] concatenated along lanes.

    Diffusion is a right-multiply by sd = kron(S^T, I_feat) in the flattened layout,
    so it never mixes batch rows.
    """
    terms = [v]
    if num_matrices >= 2:
        t1 = _dot(v, sd)
        terms.append(t1)
        tkm2, tkm1 = v, t1
        for _ in range(2, num_matrices):
            t2 = 2.0 * _dot(tkm1, sd) - tkm2
            terms.append(t2)
            tkm2, tkm1 = tkm1, t2
    return jnp.concatenate(terms, axis=-1) if len(terms) > 1 else terms[0]


def _dcgru_step(xg, h, sdh, wh_ru, wh_c, dh_f, num_matrices):
    """One DCGRUCell step.  xg: (B, 3*dh_f) pre-computed input-path gate terms (+bias).
    Gate order in xg / weights: [r | u | c], each block dh_f lanes wide."""
    hcat = _cheb_cat(h, sdh, num_matrices)                       # (B, nm*dh_f)
    ru = jax.nn.sigmoid(xg[:, :2 * dh_f] + _dot(hcat, wh_ru))    # one stacked matmul
    r, u = ru[:, :dh_f], ru[:, dh_f:]
    rhcat = _cheb_cat(r * h, sdh, num_matrices)
    c = jnp.tanh(xg[:, 2 * dh_f:] + _dot(rhcat, wh_c))
    return u * h + (1.0 - u) * c


def _gru_step(x, h, wi, wh, bi, bh, hsz):
    """torch.nn.GRU cell with [r|z|n]-stacked weights: 2 matmuls per step."""
    gi = _dot(x, wi) + bi
    gh = _dot(h, wh) + bh
    r = jax.nn.sigmoid(gi[:, :hsz] + gh[:, :hsz])
    z = jax.nn.sigmoid(gi[:, hsz:2 * hsz] + gh[:, hsz:2 * hsz])
    n = jnp.tanh(gi[:, 2 * hsz:] + r * gh[:, 2 * hsz:])
    return (1.0 - z) * n + z * h


# ----------------------------------------------------------------------------
# The single fused kernel (no grid; time loop fully unrolled; one HBM writeback)
# ----------------------------------------------------------------------------
def make_fused_kernel(cfg, n_tgt):
    S = cfg["seq_len"]
    B = cfg["batch"]
    N = cfg["num_nodes"]
    dh = cfg["rnn_units"]
    rdim = cfg["r_dim"]
    zdim = cfg["z_dim"]
    hg = cfg["rnn_units_gru"]
    nL = cfg["num_rnn_layers"]
    nLg = cfg["num_rnn_layers_gru"]
    nm = cfg["max_diffusion_step"] + 1
    dh_f = N * dh

    def kernel(*refs):
        it = iter(refs)
        x2d_ref = next(it)       # (S*B, N*din)
        sdx_ref = next(it)       # (N*din, N*din)
        sdh_ref = next(it)       # (N*dh,  N*dh)
        prev_ref = next(it)      # (S*B, odim)
        y_ref = next(it)         # (S*B, odim)
        masks_ref = next(it)     # (2, B)   normalized 'all' / 'context' mean masks
        tsel_ref = next(it)      # (n_tgt, B) target-row selection
        start_ref = next(it)     # (n_tgt, odim)
        eps_ref = next(it)       # (S, n_tgt, zdim)
        dc = [tuple(next(it) for _ in range(4)) for _ in range(nL)]     # wx, wh_ru, wh_c, b
        outw_ref = next(it)
        outb_ref = next(it)
        enc = [tuple(next(it) for _ in range(4)) for _ in range(nLg)]   # wi, wh, bi, bh
        zw_ref = next(it)
        zb_ref = next(it)
        dec = [tuple(next(it) for _ in range(4)) for _ in range(nLg)]
        fcw_ref = next(it)
        fcb_ref = next(it)
        out_ref = next(it)       # (S, n_tgt, odim)
        z_ref = next(it)         # (S, 2, 2*zdim)  rows: ['all', 'context'] x [mean|var_temp]

        sdh = sdh_ref[...]
        masks = masks_ref[...]
        tsel = tsel_ref[...]

        # ---- hoisted, recurrence-independent x-path of DCGRU layer 0 (all timesteps,
        #      all three gates, one stacked matmul) ----------------------------------
        wx0, whru0, whc0, b0 = dc[0]
        xcat_all = _cheb_cat(x2d_ref[...], sdx_ref[...], nm)     # (S*B, nm*N*din)
        xg_all = _dot(xcat_all, wx0[...]) + b0[...]              # (S*B, 3*dh_f)

        # ---- recurrent states carried as traced values (loop fully unrolled) -------
        h_dc = [jnp.zeros((B, dh_f), jnp.float32) for _ in range(nL)]
        h_enc = [jnp.zeros((B, rdim), jnp.float32) for _ in range(nLg)]
        h_dec = [jnp.zeros((n_tgt, hg), jnp.float32) for _ in range(nLg)]
        dec_prev = start_ref[...]                                # (n_tgt, odim)

        for t in range(S):
            r0, r1 = t * B, (t + 1) * B

            # ---------- DCGRU stack (full batch) ----------
            h_dc[0] = _dcgru_step(xg_all[r0:r1, :], h_dc[0], sdh,
                                  whru0[...], whc0[...], dh_f, nm)
            layer_out = h_dc[0]
            for l in range(1, nL):
                wxl, whrul, whcl, bl = dc[l]
                xg_l = _dot(_cheb_cat(layer_out, sdh, nm), wxl[...]) + bl[...]
                h_dc[l] = _dcgru_step(xg_l, h_dc[l], sdh, whrul[...], whcl[...], dh_f, nm)
                layer_out = h_dc[l]

            # ---------- EmbedModel.output_layer (fused, no reshape: layout is lane-flat)
            oh_t = _dot(layer_out, outw_ref[...]) + outb_ref[...]      # (B, dh)

            # ---------- encoder GRU ('all' + 'context' share the recurrence) + NP z ----
            x_e = jnp.concatenate([oh_t, prev_ref[r0:r1, :], y_ref[r0:r1, :]], axis=-1)
            for l in range(nLg):
                wi, wh, bi, bh = enc[l]
                h_enc[l] = _gru_step(x_e, h_enc[l], wi[...], wh[...], bi[...], bh[...], rdim)
                x_e = h_enc[l]
            r_agg = _dot(masks, h_enc[-1])                             # (2, r_dim)
            zout = _dot(r_agg, zw_ref[...]) + zb_ref[...]              # (2, 2*zdim)
            z_ref[t] = zout

            # ---------- reparameterised z sample ('all' pass) + decoder GRU + fc -------
            z_mean = zout[0:1, :zdim]
            z_var = 0.1 + 0.9 * jax.nn.sigmoid(zout[0:1, zdim:])
            z_t = z_mean + jnp.sqrt(z_var) * eps_ref[t]                # (n_tgt, zdim)

            oh_tgt = _dot(tsel, oh_t)                                  # (n_tgt, dh)
            x_d = jnp.concatenate([oh_tgt, z_t, dec_prev], axis=-1)    # (n_tgt, dec_in)
            for l in range(nLg):
                wi, wh, bi, bh = dec[l]
                h_dec[l] = _gru_step(x_d, h_dec[l], wi[...], wh[...], bi[...], bh[...], hg)
                x_d = h_dec[l]
            dec_prev = _dot(jnp.maximum(h_dec[-1], 0.0), fcw_ref[...]) + fcb_ref[...]
            out_ref[t] = dec_prev

    return kernel


# ----------------------------------------------------------------------------
# Forward pass (DCRNNModel.forward, training path test=False) -- ONE pallas_call
# ----------------------------------------------------------------------------
def dcrnn_forward(params, inputs, labels, inputs0, sdx, sdh, cfg):
    S, B, _ = inputs.shape
    N, din, odim = cfg["num_nodes"], cfg["input_dim"], cfg["output_dim"]
    zdim = cfg["z_dim"]
    dh_f = N * cfg["rnn_units"]
    nm = cfg["max_diffusion_step"] + 1

    # ---- split_context_target (host numpy, identical to the torch module) ----
    np.random.seed(0)
    n_ctx = int(B * cfg["context_percentage"])
    ind = np.arange(B)
    ctx_idx = np.random.choice(ind, size=n_ctx, replace=False)
    tgt_idx = np.delete(ind, ctx_idx)
    n_tgt = int(tgt_idx.shape[0])

    # ---- host-side layout prep (tiny, one-time) ----
    x2d = inputs.reshape(S * B, N * din)
    prev2d = jnp.concatenate([inputs0[None], labels[:-1]], axis=0).reshape(S * B, odim)
    y2d = labels.reshape(S * B, odim)
    mask_all = jnp.full((B,), 1.0 / B, jnp.float32)
    mask_ctx = jnp.zeros((B,), jnp.float32).at[ctx_idx].set(1.0 / n_ctx)
    masks = jnp.stack([mask_all, mask_ctx], axis=0)                       # (2, B)
    tsel = jnp.zeros((n_tgt, B), jnp.float32).at[np.arange(n_tgt), tgt_idx].set(1.0)
    start_t = inputs0[tgt_idx]                                            # (n_tgt, odim)
    y_t = labels[:, tgt_idx, :]
    # TODO(synk): torch.manual_seed(0) + Tensor.normal_() RNG has no JAX bit-parity
    # equivalent; eps is drawn with jax.random.normal(PRNGKey(0)) instead.
    eps = jax.random.normal(jax.random.PRNGKey(0), (S, n_tgt, zdim), jnp.float32)

    weight_args = []
    for l in params["dcgru"]:
        weight_args += [l["wx"], l["wh_ru"], l["wh_c"], l["b"]]
    weight_args += [params["out_w"], params["out_b"]]
    for l in params["enc_gru"]:
        weight_args += [l["wi"], l["wh"], l["bi"], l["bh"]]
    weight_args += [params["zw"], params["zb"]]
    for l in params["dec_gru"]:
        weight_args += [l["wi"], l["wh"], l["bi"], l["bh"]]
    weight_args += [params["fc_w"], params["fc_b"]]

    args = [x2d, sdx, sdh, prev2d, y2d, masks, tsel, start_t, eps] + weight_args
    vmem = pl.BlockSpec(memory_space=pltpu.MemorySpace.VMEM)

    cost = pl.CostEstimate(
        flops=int(S * (4 * (nm - 1) * B * dh_f * dh_f              # h / r*h Chebyshev
                       + 2 * B * nm * dh_f * 3 * dh_f              # stacked gate matmuls
                       + 2 * B * dh_f * cfg["rnn_units"]           # output layer
                       + 6 * B * 64 * cfg["r_dim"]                 # encoder GRU (approx)
                       + 6 * n_tgt * 64 * cfg["rnn_units_gru"]))   # decoder GRU (approx)
              + 2 * S * B * nm * N * din * 3 * dh_f,
        transcendentals=int(S * (4 * B * dh_f + 3 * B * cfg["r_dim"]
                                 + 3 * n_tgt * cfg["rnn_units_gru"] + zdim)),
        bytes_accessed=int(4 * sum(int(a.size) for a in args)
                           + 4 * (S * n_tgt * odim + S * 2 * 2 * zdim)))

    output, zstats = pl.pallas_call(
        make_fused_kernel(cfg, n_tgt),
        out_shape=(jax.ShapeDtypeStruct((S, n_tgt, odim), jnp.float32),
                   jax.ShapeDtypeStruct((S, 2, 2 * zdim), jnp.float32)),
        in_specs=[vmem] * len(args),
        out_specs=(vmem, vmem),
        cost_estimate=cost,
    )(*args)

    z_mean_all = zstats[:, 0, :zdim]
    z_var_temp_all = zstats[:, 0, zdim:]
    z_mean_context = zstats[:, 1, :zdim]
    z_var_temp_context = zstats[:, 1, zdim:]
    return output, y_t, z_mean_all, z_var_temp_all, z_mean_context, z_var_temp_context


# ----------------------------------------------------------------------------
# Deterministic parameter / support construction
# ----------------------------------------------------------------------------
def build_scaled_laplacian(num_nodes):
    rng = np.random.RandomState(0)
    adj = rng.rand(num_nodes, num_nodes).astype(np.float64)
    adj = np.maximum(adj, adj.T)
    np.fill_diagonal(adj, 0.0)
    d = adj.sum(axis=1)
    d_inv_sqrt = np.where(d > 0, 1.0 / np.sqrt(np.maximum(d, 1e-12)), 0.0)
    lap = np.eye(num_nodes) - (d_inv_sqrt[:, None] * adj) * d_inv_sqrt[None, :]
    lam = np.linalg.eigvalsh(lap).max()
    scaled = (2.0 / lam) * lap - np.eye(num_nodes)
    return scaled.astype(np.float32)


def init_params(cfg, key):
    keys = iter(jax.random.split(key, 512))

    def nrm(shape, scale=0.1):
        return scale * jax.random.normal(next(keys), shape, jnp.float32)

    N, din = cfg["num_nodes"], cfg["input_dim"]
    odim, dh = cfg["output_dim"], cfg["rnn_units"]
    rdim, zdim, hg = cfg["r_dim"], cfg["z_dim"], cfg["rnn_units_gru"]
    nm = cfg["max_diffusion_step"] + 1
    I_N = jnp.eye(N, dtype=jnp.float32)

    def kron_n(w):
        # node-shared weight -> block-diagonal weight for the lane-flattened layout
        return jnp.kron(I_N, w)

    # --- DCGRU layers (gate weights stacked [r|u|c] / [r|u], Chebyshev terms stacked) ---
    dcgru = []
    d_in = din
    for _ in range(cfg["num_rnn_layers"]):
        wx_k, whru_k, whc_k = [], [], []
        for _ in range(nm):
            wx_k.append(jnp.concatenate([kron_n(nrm((d_in, dh))) for _ in range(3)], axis=1))
            whru_k.append(jnp.concatenate([kron_n(nrm((dh, dh))) for _ in range(2)], axis=1))
            whc_k.append(kron_n(nrm((dh, dh))))
        b_ruc = jnp.concatenate([jnp.ones((N * dh,), jnp.float32),   # DCGRU bias_start=1.0
                                 jnp.ones((N * dh,), jnp.float32),
                                 jnp.zeros((N * dh,), jnp.float32)])[None, :]
        dcgru.append(dict(wx=jnp.concatenate(wx_k, axis=0),          # (nm*N*d_in, 3*N*dh)
                          wh_ru=jnp.concatenate(whru_k, axis=0),     # (nm*N*dh,   2*N*dh)
                          wh_c=jnp.concatenate(whc_k, axis=0),       # (nm*N*dh,     N*dh)
                          b=b_ruc))
        d_in = dh

    def gru_layers(in_dim, h, n_layers):
        layers, d = [], in_dim
        for _ in range(n_layers):
            layers.append(dict(
                wi=jnp.concatenate([nrm((d, h)) for _ in range(3)], axis=1),   # [r|z|n]
                wh=jnp.concatenate([nrm((h, h)) for _ in range(3)], axis=1),
                bi=jnp.zeros((1, 3 * h), jnp.float32),
                bh=jnp.zeros((1, 3 * h), jnp.float32)))
            d = h
        return layers

    return dict(
        dcgru=dcgru,
        out_w=nrm((N * dh, dh)), out_b=jnp.zeros((1, dh), jnp.float32),
        enc_gru=gru_layers(dh + 2 * odim, rdim, cfg["num_rnn_layers_gru"]),
        zw=jnp.concatenate([nrm((rdim, zdim)), nrm((rdim, zdim))], axis=1),   # [mean|var]
        zb=jnp.zeros((1, 2 * zdim), jnp.float32),
        dec_gru=gru_layers(dh + zdim + odim, hg, cfg["num_rnn_layers_gru"]),
        fc_w=nrm((hg, odim)), fc_b=jnp.zeros((1, odim), jnp.float32))


# ----------------------------------------------------------------------------
if __name__ == "__main__":
    cfg = CFG
    key = jax.random.PRNGKey(0)
    k_in, k_lab, k_in0, k_par = jax.random.split(key, 4)

    S, B = cfg["seq_len"], cfg["batch"]
    N, din, dh = cfg["num_nodes"], cfg["input_dim"], cfg["rnn_units"]

    inputs = jax.random.normal(k_in, (S, B, N * din), jnp.float32)
    labels = jax.random.normal(k_lab, (S, B, cfg["output_dim"]), jnp.float32)
    inputs0 = jax.random.normal(k_in0, (B, cfg["output_dim"]), jnp.float32)

    params = init_params(cfg, k_par)

    # Graph support in the flattened layout: diffusion is right-mult by kron(S^T, I_feat)
    s_node = build_scaled_laplacian(N)
    sdx = jnp.asarray(np.kron(s_node.T, np.eye(din, dtype=np.float32)))   # (N*din, N*din)
    sdh = jnp.asarray(np.kron(s_node.T, np.eye(dh, dtype=np.float32)))    # (N*dh,  N*dh)

    fwd = jax.jit(lambda p, x, y, x0, a, b: dcrnn_forward(p, x, y, x0, a, b, cfg))
    outs = fwd(params, inputs, labels, inputs0, sdx, sdh)
    outs = jax.block_until_ready(outs)

    n_ctx = int(B * cfg["context_percentage"])
    n_tgt = B - n_ctx
    assert outs[0].shape == (S, n_tgt, cfg["output_dim"])   # output
    assert outs[1].shape == (S, n_tgt, cfg["output_dim"])   # truth
    assert outs[2].shape == (S, cfg["z_dim"])               # z_mean_all
    assert outs[3].shape == (S, cfg["z_dim"])               # z_var_temp_all
    assert outs[4].shape == (S, cfg["z_dim"])               # z_mean_context
    assert outs[5].shape == (S, cfg["z_dim"])               # z_var_temp_context
    assert all(bool(jnp.all(jnp.isfinite(o))) for o in outs)
    print("KERNEL_OK")
</pallas_src>

<mosaic_0001>
module attributes {stable_mosaic.version = 11 : i64} {
  func.func @kernel(%arg0: memref<48x16xf32, #tpu.memory_space<vmem>>, %arg1: memref<16x16xf32, #tpu.memory_space<vmem>>, %arg2: memref<128x128xf32, #tpu.memory_space<vmem>>, %arg3: memref<48x2xf32, #tpu.memory_space<vmem>>, %arg4: memref<48x2xf32, #tpu.memory_space<vmem>>, %arg5: memref<2x8xf32, #tpu.memory_space<vmem>>, %arg6: memref<4x8xf32, #tpu.memory_space<vmem>>, %arg7: memref<4x2xf32, #tpu.memory_space<vmem>>, %arg8: memref<6x4x8xf32, #tpu.memory_space<vmem>>, %arg9: memref<48x384xf32, #tpu.memory_space<vmem>>, %arg10: memref<384x256xf32, #tpu.memory_space<vmem>>, %arg11: memref<384x128xf32, #tpu.memory_space<vmem>>, %arg12: memref<1x384xf32, #tpu.memory_space<vmem>>, %arg13: memref<128x16xf32, #tpu.memory_space<vmem>>, %arg14: memref<1x16xf32, #tpu.memory_space<vmem>>, %arg15: memref<20x48xf32, #tpu.memory_space<vmem>>, %arg16: memref<16x48xf32, #tpu.memory_space<vmem>>, %arg17: memref<1x48xf32, #tpu.memory_space<vmem>>, %arg18: memref<1x48xf32, #tpu.memory_space<vmem>>, %arg19: memref<16x16xf32, #tpu.memory_space<vmem>>, %arg20: memref<1x16xf32, #tpu.memory_space<vmem>>, %arg21: memref<26x48xf32, #tpu.memory_space<vmem>>, %arg22: memref<16x48xf32, #tpu.memory_space<vmem>>, %arg23: memref<1x48xf32, #tpu.memory_space<vmem>>, %arg24: memref<1x48xf32, #tpu.memory_space<vmem>>, %arg25: memref<16x2xf32, #tpu.memory_space<vmem>>, %arg26: memref<1x2xf32, #tpu.memory_space<vmem>>, %arg27: memref<6x4x2xf32, #tpu.memory_space<vmem>>, %arg28: memref<6x2x16xf32, #tpu.memory_space<vmem>>) attributes {dimension_semantics = [], scalar_prefetch = 0 : i64, scratch_operands = 0 : i64, tpu.core_type = #tpu.core_type<tc>} {
    %c0 = arith.constant 0 : index
    %c0_0 = arith.constant 0 : index
    %0 = vector.load %arg2[%c0, %c0_0] : memref<128x128xf32, #tpu.memory_space<vmem>>, vector<128x128xf32>
    %c0_1 = arith.constant 0 : index
    %c0_2 = arith.constant 0 : index
    %1 = vector.load %arg5[%c0_1, %c0_2] : memref<2x8xf32, #tpu.memory_space<vmem>>, vector<2x8xf32>
    %c0_3 = arith.constant 0 : index
    %c0_4 = arith.constant 0 : index
    %2 = vector.load %arg6[%c0_3, %c0_4] : memref<4x8xf32, #tpu.memory_space<vmem>>, vector<4x8xf32>
    %c0_5 = arith.constant 0 : index
    %c0_6 = arith.constant 0 : index
    %3 = vector.load %arg0[%c0_5, %c0_6] : memref<48x16xf32, #tpu.memory_space<vmem>>, vector<48x16xf32>
    %c0_7 = arith.constant 0 : index
    %c0_8 = arith.constant 0 : index
    %4 = vector.load %arg1[%c0_7, %c0_8] : memref<16x16xf32, #tpu.memory_space<vmem>>, vector<16x16xf32>
    %cst = arith.constant dense<0.000000e+00> : vector<48x16xf32>
    %5 = tpu.matmul %3, %4, %cst {dimension_numbers = #tpu.dot_dimension_numbers<[1], [0], [0], [1], [0, 0, 1, 1], [], []>} : vector<48x16xf32>, vector<16x16xf32>, vector<48x16xf32> -> vector<48x16xf32>
    %cst_9 = arith.constant dense<0.000000e+00> : vector<48x16xf32>
    %6 = tpu.matmul %5, %4, %cst_9 {dimension_numbers = #tpu.dot_dimension_numbers<[1], [0], [0], [1], [0, 0, 1, 1], [], []>} : vector<48x16xf32>, vector<16x16xf32>, vector<48x16xf32> -> vector<48x16xf32>
    %cst_10 = arith.constant 2.000000e+00 : f32
    %7 = vector.broadcast %cst_10 : f32 to vector<48x16xf32>
    %8 = arith.mulf %7, %6 : vector<48x16xf32>
    %9 = arith.subf %8, %3 : vector<48x16xf32>
    %10 = tpu.concatenate %3, %5, %9 in 1 : vector<48x16xf32>, vector<48x16xf32>, vector<48x16xf32> -> vector<48x48xf32>
    %c0_11 = arith.constant 0 : index
    %c0_12 = arith.constant 0 : index
    %11 = vector.load %arg9[%c0_11, %c0_12] : memref<48x384xf32, #tpu.memory_space<vmem>>, vector<48x384xf32>
    %cst_13 = arith.constant dense<0.000000e+00> : vector<48x384xf32>
    %12 = tpu.matmul %10, %11, %cst_13 {dimension_numbers = #tpu.dot_dimension_numbers<[1], [0], [0], [1], [0, 0, 1, 1], [], []>} : vector<48x48xf32>, vector<48x384xf32>, vector<48x384xf32> -> vector<48x384xf32>
    %c0_14 = arith.constant 0 : index
    %c0_15 = arith.constant 0 : index
    %13 = vector.load %arg12[%c0_14, %c0_15] : memref<1x384xf32, #tpu.memory_space<vmem>>, vector<1x384xf32>
    %14 = vector.broadcast %13 : vector<1x384xf32> to vector<48x384xf32>
    %15 = arith.addf %12, %14 : vector<48x384xf32>
    %cst_16 = arith.constant 0.000000e+00 : f32
    %16 = vector.broadcast %cst_16 : f32 to vector<8x128xf32>
    %cst_17 = arith.constant 0.000000e+00 : f32
    %17 = vector.broadcast %cst_17 : f32 to vector<8x16xf32>
    %cst_18 = arith.constant 0.000000e+00 : f32
    %18 = vector.broadcast %cst_18 : f32 to vector<4x16xf32>
    %c0_19 = arith.constant 0 : index
    %c0_20 = arith.constant 0 : index
    %19 = vector.load %arg7[%c0_19, %c0_20] : memref<4x2xf32, #tpu.memory_space<vmem>>, vector<4x2xf32>
    %20 = vector.extract_strided_slice %15 {offsets = [0, 0], sizes = [8, 384], strides = [1, 1]} : vector<48x384xf32> to vector<8x384xf32>
    %c0_21 = arith.constant 0 : index
    %c0_22 = arith.constant 0 : index
    %21 = vector.load %arg10[%c0_21, %c0_22] : memref<384x256xf32, #tpu.memory_space<vmem>>, vector<384x256xf32>
    %c0_23 = arith.constant 0 : index
    %c0_24 = arith.constant 0 : index
    %22 = vector.load %arg11[%c0_23, %c0_24] : memref<384x128xf32, #tpu.memory_space<vmem>>, vector<384x128xf32>
    %cst_25 = arith.constant dense<0.000000e+00> : vector<8x128xf32>
    %23 = tpu.matmul %16, %0, %cst_25 {dimension_numbers = #tpu.dot_dimension_numbers<[1], [0], [0], [1], [0, 0, 1, 1], [], []>} : vector<8x128xf32>, vector<128x128xf32>, vector<8x128xf32> -> vector<8x128xf32>
    %cst_26 = arith.constant dense<0.000000e+00> : vector<8x128xf32>
    %24 = tpu.matmul %23, %0, %cst_26 {dimension_numbers = #tpu.dot_dimension_numbers<[1], [0], [0], [1], [0, 0, 1, 1], [], []>} : vector<8x128xf32>, vector<128x128xf32>, vector<8x128xf32> -> vector<8x128xf32>
    %cst_27 = arith.constant 2.000000e+00 : f32
    %25 = vector.broadcast %cst_27 : f32 to vector<8x128xf32>
    %26 = arith.mulf %25, %24 : vector<8x128xf32>
    %27 = arith.subf %26, %16 : vector<8x128xf32>
    %28 = tpu.concatenate %16, %23, %27 in 1 : vector<8x128xf32>, vector<8x128xf32>, vector<8x128xf32> -> vector<8x384xf32>
    %29 = vector.extract_strided_slice %20 {offsets = [0, 0], sizes = [8, 256], strides = [1, 1]} : vector<8x384xf32> to vector<8x256xf32>
    %cst_28 = arith.constant dense<0.000000e+00> : vector<8x256xf32>
    %30 = tpu.matmul %28, %21, %cst_28 {dimension_numbers = #tpu.dot_dimension_numbers<[1], [0], [0], [1], [0, 0, 1, 1], [], []>} : vector<8x384xf32>, vector<384x256xf32>, vector<8x256xf32> -> vector<8x256xf32>
    %31 = arith.addf %29, %30 : vector<8x256xf32>
    %32 = arith.negf %31 : vector<8x256xf32>
    %33 = math.exp %32 : vector<8x256xf32>
    %cst_29 = arith.constant 1.000000e+00 : f32
    %34 = vector.broadcast %cst_29 : f32 to vector<8x256xf32>
    %35 = arith.addf %34, %33 : vector<8x256xf32>
    %36 = arith.divf %34, %35 : vector<8x256xf32>
    %37 = vector.extract_strided_slice %36 {offsets = [0, 0], sizes = [8, 128], strides = [1, 1]} : vector<8x256xf32> to vector<8x128xf32>
    %38 = vector.extract_strided_slice %36 {offsets = [0, 128], sizes = [8, 128], strides = [1, 1]} : vector<8x256xf32> to vector<8x128xf32>
    %39 = arith.mulf %37, %16 : vector<8x128xf32>
    %cst_30 = arith.constant dense<0.000000e+00> : vector<8x128xf32>
    %40 = tpu.matmul %39, %0, %cst_30 {dimension_numbers = #tpu.dot_dimension_numbers<[1], [0], [0], [1], [0, 0, 1, 1], [], []>} : vector<8x128xf32>, vector<128x128xf32>, vector<8x128xf32> -> vector<8x128xf32>
    %cst_31 = arith.constant dense<0.000000e+00> : vector<8x128xf32>
    %41 = tpu.matmul %40, %0, %cst_31 {dimension_numbers = #tpu.dot_dimension_numbers<[1], [0], [0], [1], [0, 0, 1, 1], [], []>} : vector<8x128xf32>, vector<128x128xf32>, vector<8x128xf32> -> vector<8x128xf32>
    %cst_32 = arith.constant 2.000000e+00 : f32
    %42 = vector.broadcast %cst_32 : f32 to vector<8x128xf32>
    %43 = arith.mulf %42, %41 : vector<8x128xf32>
    %44 = arith.subf %43, %39 : vector<8x128xf32>
    %45 = tpu.concatenate %39, %40, %44 in 1 : vector<8x128xf32>, vector<8x128xf32>, vector<8x128xf32> -> vector<8x384xf32>
    %46 = vector.extract_strided_slice %20 {offsets = [0, 256], sizes = [8, 128], strides = [1, 1]} : vector<8x384xf32> to vector<8x128xf32>
    %cst_33 = arith.constant dense<0.000000e+00> : vector<8x128xf32>
    %47 = tpu.matmul %45, %22, %cst_33 {dimension_numbers = #tpu.dot_dimension_numbers<[1], [0], [0], [1], [0, 0, 1, 1], [], []>} : vector<8x384xf32>, vector<384x128xf32>, vector<8x128xf32> -> vector<8x128xf32>
    %48 = arith.addf %46, %47 : vector<8x128xf32>
    %49 = math.tanh %48 : vector<8x128xf32>
    %50 = arith.mulf %38, %16 : vector<8x128xf32>
    %cst_34 = arith.constant 1.000000e+00 : f32
    %51 = vector.broadcast %cst_34 : f32 to vector<8x128xf32>
    %52 = arith.subf %51, %38 : vector<8x128xf32>
    %53 = arith.mulf %52, %49 : vector<8x128xf32>
    %54 = arith.addf %50, %53 : vector<8x128xf32>
    %c0_35 = arith.constant 0 : index
    %c0_36 = arith.constant 0 : index
    %55 = vector.load %arg13[%c0_35, %c0_36] : memref<128x16xf32, #tpu.memory_space<vmem>>, vector<128x16xf32>
    %cst_37 = arith.constant dense<0.000000e+00> : vector<8x16xf32>
    %56 = tpu.matmul %54, %55, %cst_37 {dimension_numbers = #tpu.dot_dimension_numbers<[1], [0], [0], [1], [0, 0, 1, 1], [], []>} : vector<8x128xf32>, vector<128x16xf32>, vector<8x16xf32> -> vector<8x16xf32>
    %c0_38 = arith.constant 0 : index
    %c0_39 = arith.constant 0 : index
    %57 = vector.load %arg14[%c0_38, %c0_39] : memref<1x16xf32, #tpu.memory_space<vmem>>, vector<1x16xf32>
    %58 = vector.broadcast %57 : vector<1x16xf32> to vector<8x16xf32>
    %59 = arith.addf %56, %58 : vector<8x16xf32>
    %c0_40 = arith.constant 0 : index
    %c0_41 = arith.constant 0 : index
    %60 = vector.load %arg3[%c0_40, %c0_41] : memref<48x2xf32, #tpu.memory_space<vmem>>, vector<8x2xf32>
    %c0_42 = arith.constant 0 : index
    %c0_43 = arith.constant 0 : index
    %61 = vector.load %arg4[%c0_42, %c0_43] : memref<48x2xf32, #tpu.memory_space<vmem>>, vector<8x2xf32>
    %62 = tpu.concatenate %59, %60, %61 in 1 : vector<8x16xf32>, vector<8x2xf32>, vector<8x2xf32> -> vector<8x20xf32>
    %c0_44 = arith.constant 0 : index
    %c0_45 = arith.constant 0 : index
    %63 = vector.load %arg15[%c0_44, %c0_45] : memref<20x48xf32, #tpu.memory_space<vmem>>, vector<20x48xf32>
    %c0_46 = arith.constant 0 : index
    %c0_47 = arith.constant 0 : index
    %64 = vector.load %arg16[%c0_46, %c0_47] : memref<16x48xf32, #tpu.memory_space<vmem>>, vector<16x48xf32>
    %c0_48 = arith.constant 0 : index
    %c0_49 = arith.constant 0 : index
    %65 = vector.load %arg17[%c0_48, %c0_49] : memref<1x48xf32, #tpu.memory_space<vmem>>, vector<1x48xf32>
    %c0_50 = arith.constant 0 : index
    %c0_51 = arith.constant 0 : index
    %66 = vector.load %arg18[%c0_50, %c0_51] : memref<1x48xf32, #tpu.memory_space<vmem>>, vector<1x48xf32>
    %cst_52 = arith.constant dense<0.000000e+00> : vector<8x48xf32>
    %67 = tpu.matmul %62, %63, %cst_52 {dimension_numbers = #tpu.dot_dimension_numbers<[1], [0], [0], [1], [0, 0, 1, 1], [], []>} : vector<8x20xf32>, vector<20x48xf32>, vector<8x48xf32> -> vector<8x48xf32>
    %68 = vector.broadcast %65 : vector<1x48xf32> to vector<8x48xf32>
    %69 = arith.addf %67, %68 : vector<8x48xf32>
    %cst_53 = arith.constant dense<0.000000e+00> : vector<8x48xf32>
    %70 = tpu.matmul %17, %64, %cst_53 {dimension_numbers = #tpu.dot_dimension_numbers<[1], [0], [0], [1], [0, 0, 1, 1], [], []>} : vector<8x16xf32>, vector<16x48xf32>, vector<8x48xf32> -> vector<8x48xf32>
    %71 = vector.broadcast %66 : vector<1x48xf32> to vector<8x48xf32>
    %72 = arith.addf %70, %71 : vector<8x48xf32>
    %73 = vector.extract_strided_slice %69 {offsets = [0, 0], sizes = [8, 16], strides = [1, 1]} : vector<8x48xf32> to vector<8x16xf32>
    %74 = vector.extract_strided_slice %72 {offsets = [0, 0], sizes = [8, 16], strides = [1, 1]} : vector<8x48xf32> to vector<8x16xf32>
    %75 = arith.addf %73, %74 : vector<8x16xf32>
    %76 = arith.negf %75 : vector<8x16xf32>
    %77 = math.exp %76 : vector<8x16xf32>
    %cst_54 = arith.constant 1.000000e+00 : f32
    %78 = vector.broadcast %cst_54 : f32 to vector<8x16xf32>
    %79 = arith.addf %78, %77 : vector<8x16xf32>
    %80 = arith.divf %78, %79 : vector<8x16xf32>
    %81 = vector.extract_strided_slice %69 {offsets = [0, 16], sizes = [8, 16], strides = [1, 1]} : vector<8x48xf32> to vector<8x16xf32>
    %82 = vector.extract_strided_slice %72 {offsets = [0, 16], sizes = [8, 16], strides = [1, 1]} : vector<8x48xf32> to vector<8x16xf32>
    %83 = arith.addf %81, %82 : vector<8x16xf32>
    %84 = arith.negf %83 : vector<8x16xf32>
    %85 = math.exp %84 : vector<8x16xf32>
    %cst_55 = arith.constant 1.000000e+00 : f32
    %86 = vector.broadcast %cst_55 : f32 to vector<8x16xf32>
    %87 = arith.addf %86, %85 : vector<8x16xf32>
    %88 = arith.divf %86, %87 : vector<8x16xf32>
    %89 = vector.extract_strided_slice %69 {offsets = [0, 32], sizes = [8, 16], strides = [1, 1]} : vector<8x48xf32> to vector<8x16xf32>
    %90 = vector.extract_strided_slice %72 {offsets = [0, 32], sizes = [8, 16], strides = [1, 1]} : vector<8x48xf32> to vector<8x16xf32>
    %91 = arith.mulf %80, %90 : vector<8x16xf32>
    %92 = arith.addf %89, %91 : vector<8x16xf32>
    %93 = math.tanh %92 : vector<8x16xf32>
    %cst_56 = arith.constant 1.000000e+00 : f32
    %94 = vector.broadcast %cst_56 : f32 to vector<8x16xf32>
    %95 = arith.subf %94, %88 : vector<8x16xf32>
    %96 = arith.mulf %95, %93 : vector<8x16xf32>
    %97 = arith.mulf %88, %17 : vector<8x16xf32>
    %98 = arith.addf %96, %97 : vector<8x16xf32>
    %cst_57 = arith.constant dense<0.000000e+00> : vector<2x16xf32>
    %99 = tpu.matmul %1, %98, %cst_57 {dimension_numbers = #tpu.dot_dimension_numbers<[1], [0], [0], [1], [0, 0, 1, 1], [], []>} : vector<2x8xf32>, vector<8x16xf32>, vector<2x16xf32> -> vector<2x16xf32>
    %c0_58 = arith.constant 0 : index
    %c0_59 = arith.constant 0 : index
    %100 = vector.load %arg19[%c0_58, %c0_59] : memref<16x16xf32, #tpu.memory_space<vmem>>, vector<16x16xf32>
    %cst_60 = arith.constant dense<0.000000e+00> : vector<2x16xf32>
    %101 = tpu.matmul %99, %100, %cst_60 {dimension_numbers = #tpu.dot_dimension_numbers<[1], [0], [0], [1], [0, 0, 1, 1], [], []>} : vector<2x16xf32>, vector<16x16xf32>, vector<2x16xf32> -> vector<2x16xf32>
    %c0_61 = arith.constant 0 : index
    %c0_62 = arith.constant 0 : index
    %102 = vector.load %arg20[%c0_61, %c0_62] : memref<1x16xf32, #tpu.memory_space<vmem>>, vector<1x16xf32>
    %103 = vector.broadcast %102 : vector<1x16xf32> to vector<2x16xf32>
    %104 = arith.addf %101, %103 : vector<2x16xf32>
    %c0_63 = arith.constant 0 : index
    %c0_64 = arith.constant 0 : index
    %c0_65 = arith.constant 0 : index
    %105 = vector.load %arg28[%c0_63, %c0_64, %c0_65] : memref<6x2x16xf32, #tpu.memory_space<vmem>>, vector<1x2x16xf32>
    %106 = vector.shape_cast %105 : vector<1x2x16xf32> to vector<2x16xf32>
    %107 = vector.shape_cast %104 : vector<2x16xf32> to vector<1x2x16xf32>
    tpu.vector_store %arg28[%c0_63, %c0_64, %c0_65], %107 {strides = array<i32>} : memref<6x2x16xf32, #tpu.memory_space<vmem>>, vector<1x2x16xf32>,
    %108 = vector.extract_strided_slice %104 {offsets = [0, 0], sizes = [1, 8], strides = [1, 1]} : vector<2x16xf32> to vector<1x8xf32>
    %109 = vector.extract_strided_slice %104 {offsets = [0, 8], sizes = [1, 8], strides = [1, 1]} : vector<2x16xf32> to vector<1x8xf32>
    %110 = arith.negf %109 : vector<1x8xf32>
    %111 = math.exp %110 : vector<1x8xf32>
    %cst_66 = arith.constant 1.000000e+00 : f32
    %112 = vector.broadcast %cst_66 : f32 to vector<1x8xf32>
    %113 = arith.addf %112, %111 : vector<1x8xf32>
    %114 = arith.divf %112, %113 : vector<1x8xf32>
    %cst_67 = arith.constant 0.899999976 : f32
    %115 = vector.broadcast %cst_67 : f32 to vector<1x8xf32>
    %116 = arith.mulf %115, %114 : vector<1x8xf32>
    %cst_68 = arith.constant 1.000000e-01 : f32
    %117 = vector.broadcast %cst_68 : f32 to vector<1x8xf32>
    %118 = arith.addf %117, %116 : vector<1x8xf32>
    %119 = math.sqrt %118 : vector<1x8xf32>
    %c0_69 = arith.constant 0 : index
    %c0_70 = arith.constant 0 : index
    %c0_71 = arith.constant 0 : index
    %120 = vector.load %arg8[%c0_69, %c0_70, %c0_71] : memref<6x4x8xf32, #tpu.memory_space<vmem>>, vector<1x4x8xf32>
    %121 = vector.shape_cast %120 : vector<1x4x8xf32> to vector<4x8xf32>
    %122 = vector.broadcast %119 : vector<1x8xf32> to vector<4x8xf32>
    %123 = arith.mulf %122, %121 : vector<4x8xf32>
    %124 = vector.broadcast %108 : vector<1x8xf32> to vector<4x8xf32>
    %125 = arith.addf %124, %123 : vector<4x8xf32>
    %cst_72 = arith.constant dense<0.000000e+00> : vector<4x16xf32>
    %126 = tpu.matmul %2, %59, %cst_72 {dimension_numbers = #tpu.dot_dimension_numbers<[1], [0], [0], [1], [0, 0, 1, 1], [], []>} : vector<4x8xf32>, vector<8x16xf32>, vector<4x16xf32> -> vector<4x16xf32>
    %127 = tpu.concatenate %126, %125, %19 in 1 : vector<4x16xf32>, vector<4x8xf32>, vector<4x2xf32> -> vector<4x26xf32>
    %c0_73 = arith.constant 0 : index
    %c0_74 = arith.constant 0 : index
    %128 = vector.load %arg21[%c0_73, %c0_74] : memref<26x48xf32, #tpu.memory_space<vmem>>, vector<26x48xf32>
    %c0_75 = arith.constant 0 : index
    %c0_76 = arith.constant 0 : index
    %129 = vector.load %arg22[%c0_75, %c0_76] : memref<16x48xf32, #tpu.memory_space<vmem>>, vector<16x48xf32>
    %c0_77 = arith.constant 0 : index
    %c0_78 = arith.constant 0 : index
    %130 = vector.load %arg23[%c0_77, %c0_78] : memref<1x48xf32, #tpu.memory_space<vmem>>, vector<1x48xf32>
    %c0_79 = arith.constant 0 : index
    %c0_80 = arith.constant 0 : index
    %131 = vector.load %arg24[%c0_79, %c0_80] : memref<1x48xf32, #tpu.memory_space<vmem>>, vector<1x48xf32>
    %cst_81 = arith.constant dense<0.000000e+00> : vector<4x48xf32>
    %132 = tpu.matmul %127, %128, %cst_81 {dimension_numbers = #tpu.dot_dimension_numbers<[1], [0], [0], [1], [0, 0, 1, 1], [], []>} : vector<4x26xf32>, vector<26x48xf32>, vector<4x48xf32> -> vector<4x48xf32>
    %133 = vector.broadcast %130 : vector<1x48xf32> to vector<4x48xf32>
    %134 = arith.addf %132, %133 : vector<4x48xf32>
    %cst_82 = arith.constant dense<0.000000e+00> : vector<4x48xf32>
    %135 = tpu.matmul %18, %129, %cst_82 {dimension_numbers = #tpu.dot_dimension_numbers<[1], [0], [0], [1], [0, 0, 1, 1], [], []>} : vector<4x16xf32>, vector<16x48xf32>, vector<4x48xf32> -> vector<4x48xf32>
    %136 = vector.broadcast %131 : vector<1x48xf32> to vector<4x48xf32>
    %137 = arith.addf %135, %136 : vector<4x48xf32>
    %138 = vector.extract_strided_slice %134 {offsets = [0, 0], sizes = [4, 16], strides = [1, 1]} : vector<4x48xf32> to vector<4x16xf32>
    %139 = vector.extract_strided_slice %137 {offsets = [0, 0], sizes = [4, 16], strides = [1, 1]} : vector<4x48xf32> to vector<4x16xf32>
    %140 = arith.addf %138, %139 : vector<4x16xf32>
    %141 = arith.negf %140 : vector<4x16xf32>
    %142 = math.exp %141 : vector<4x16xf32>
    %cst_83 = arith.constant 1.000000e+00 : f32
    %143 = vector.broadcast %cst_83 : f32 to vector<4x16xf32>
    %144 = arith.addf %143, %142 : vector<4x16xf32>
    %145 = arith.divf %143, %144 : vector<4x16xf32>
    %146 = vector.extract_strided_slice %134 {offsets = [0, 16], sizes = [4, 16], strides = [1, 1]} : vector<4x48xf32> to vector<4x16xf32>
    %147 = vector.extract_strided_slice %137 {offsets = [0, 16], sizes = [4, 16], strides = [1, 1]} : vector<4x48xf32> to vector<4x16xf32>
    %148 = arith.addf %146, %147 : vector<4x16xf32>
    %149 = arith.negf %148 : vector<4x16xf32>
    %150 = math.exp %149 : vector<4x16xf32>
    %cst_84 = arith.constant 1.000000e+00 : f32
    %151 = vector.broadcast %cst_84 : f32 to vector<4x16xf32>
    %152 = arith.addf %151, %150 : vector<4x16xf32>
    %153 = arith.divf %151, %152 : vector<4x16xf32>
    %154 = vector.extract_strided_slice %134 {offsets = [0, 32], sizes = [4, 16], strides = [1, 1]} : vector<4x48xf32> to vector<4x16xf32>
    %155 = vector.extract_strided_slice %137 {offsets = [0, 32], sizes = [4, 16], strides = [1, 1]} : vector<4x48xf32> to vector<4x16xf32>
    %156 = arith.mulf %145, %155 : vector<4x16xf32>
    %157 = arith.addf %154, %156 : vector<4x16xf32>
    %158 = math.tanh %157 : vector<4x16xf32>
    %cst_85 = arith.constant 1.000000e+00 : f32
    %159 = vector.broadcast %cst_85 : f32 to vector<4x16xf32>
    %160 = arith.subf %159, %153 : vector<4x16xf32>
    %161 = arith.mulf %160, %158 : vector<4x16xf32>
    %162 = arith.mulf %153, %18 : vector<4x16xf32>
    %163 = arith.addf %161, %162 : vector<4x16xf32>
    %cst_86 = arith.constant 0.000000e+00 : f32
    %164 = vector.broadcast %cst_86 : f32 to vector<4x16xf32>
    %165 = arith.maximumf %163, %164 : vector<4x16xf32>
    %c0_87 = arith.constant 0 : index
    %c0_88 = arith.constant 0 : index
    %166 = vector.load %arg25[%c0_87, %c0_88] : memref<16x2xf32, #tpu.memory_space<vmem>>, vector<16x2xf32>
    %cst_89 = arith.constant dense<0.000000e+00> : vector<4x2xf32>
    %167 = tpu.matmul %165, %166, %cst_89 {dimension_numbers = #tpu.dot_dimension_numbers<[1], [0], [0], [1], [0, 0, 1, 1], [], []>} : vector<4x16xf32>, vector<16x2xf32>, vector<4x2xf32> -> vector<4x2xf32>
    %c0_90 = arith.constant 0 : index
    %c0_91 = arith.constant 0 : index
    %168 = vector.load %arg26[%c0_90, %c0_91] : memref<1x2xf32, #tpu.memory_space<vmem>>, vector<1x2xf32>
    %169 = vector.broadcast %168 : vector<1x2xf32> to vector<4x2xf32>
    %170 = arith.addf %167, %169 : vector<4x2xf32>
    %c0_92 = arith.constant 0 : index
    %c0_93 = arith.constant 0 : index
    %c0_94 = arith.constant 0 : index
    %171 = vector.load %arg27[%c0_92, %c0_93, %c0_94] : memref<6x4x2xf32, #tpu.memory_space<vmem>>, vector<1x4x2xf32>
    %172 = vector.shape_cast %171 : vector<1x4x2xf32> to vector<4x2xf32>
    %173 = vector.shape_cast %170 : vector<4x2xf32> to vector<1x4x2xf32>
    tpu.vector_store %arg27[%c0_92, %c0_93, %c0_94], %173 {strides = array<i32>} : memref<6x4x2xf32, #tpu.memory_space<vmem>>, vector<1x4x2xf32>,
    %174 = vector.extract_strided_slice %15 {offsets = [8, 0], sizes = [8, 384], strides = [1, 1]} : vector<48x384xf32> to vector<8x384xf32>
    %c0_95 = arith.constant 0 : index
    %c0_96 = arith.constant 0 : index
    %175 = vector.load %arg10[%c0_95, %c0_96] : memref<384x256xf32, #tpu.memory_space<vmem>>, vector<384x256xf32>
    %c0_97 = arith.constant 0 : index
    %c0_98 = arith.constant 0 : index
    %176 = vector.load %arg11[%c0_97, %c0_98] : memref<384x128xf32, #tpu.memory_space<vmem>>, vector<384x128xf32>
    %cst_99 = arith.constant dense<0.000000e+00> : vector<8x128xf32>
    %177 = tpu.matmul %54, %0, %cst_99 {dimension_numbers = #tpu.dot_dimension_numbers<[1], [0], [0], [1], [0, 0, 1, 1], [], []>} : vector<8x128xf32>, vector<128x128xf32>, vector<8x128xf32> -> vector<8x128xf32>
    %cst_100 = arith.constant dense<0.000000e+00> : vector<8x128xf32>
    %178 = tpu.matmul %177, %0, %cst_100 {dimension_numbers = #tpu.dot_dimension_numbers<[1], [0], [0], [1], [0, 0, 1, 1], [], []>} : vector<8x128xf32>, vector<128x128xf32>, vector<8x128xf32> -> vector<8x128xf32>
    %cst_101 = arith.constant 2.000000e+00 : f32
    %179 = vector.broadcast %cst_101 : f32 to vector<8x128xf32>
    %180 = arith.mulf %179, %178 : vector<8x128xf32>
    %181 = arith.subf %180, %54 : vector<8x128xf32>
    %182 = tpu.concatenate %54, %177, %181 in 1 : vector<8x128xf32>, vector<8x128xf32>, vector<8x128xf32> -> vector<8x384xf32>
    %183 = vector.extract_strided_slice %174 {offsets = [0, 0], sizes = [8, 256], strides = [1, 1]} : vector<8x384xf32> to vector<8x256xf32>
    %cst_102 = arith.constant dense<0.000000e+00> : vector<8x256xf32>
    %184 = tpu.matmul %182, %175, %cst_102 {dimension_numbers = #tpu.dot_dimension_numbers<[1], [0], [0], [1], [0, 0, 1, 1], [], []>} : vector<8x384xf32>, vector<384x256xf32>, vector<8x256xf32> -> vector<8x256xf32>
    %185 = arith.addf %183, %184 : vector<8x256xf32>
    %186 = arith.negf %185 : vector<8x256xf32>
    %187 = math.exp %186 : vector<8x256xf32>
    %cst_103 = arith.constant 1.000000e+00 : f32
    %188 = vector.broadcast %cst_103 : f32 to vector<8x256xf32>
    %189 = arith.addf %188, %187 : vector<8x256xf32>
    %190 = arith.divf %188, %189 : vector<8x256xf32>
    %191 = vector.extract_strided_slice %190 {offsets = [0, 0], sizes = [8, 128], strides = [1, 1]} : vector<8x256xf32> to vector<8x128xf32>
    %192 = vector.extract_strided_slice %190 {offsets = [0, 128], sizes = [8, 128], strides = [1, 1]} : vector<8x256xf32> to vector<8x128xf32>
    %193 = arith.mulf %191, %54 : vector<8x128xf32>
    %cst_104 = arith.constant dense<0.000000e+00> : vector<8x128xf32>
    %194 = tpu.matmul %193, %0, %cst_104 {dimension_numbers = #tpu.dot_dimension_numbers<[1], [0], [0], [1], [0, 0, 1, 1], [], []>} : vector<8x128xf32>, vector<128x128xf32>, vector<8x128xf32> -> vector<8x128xf32>
    %cst_105 = arith.constant dense<0.000000e+00> : vector<8x128xf32>
    %195 = tpu.matmul %194, %0, %cst_105 {dimension_numbers = #tpu.dot_dimension_numbers<[1], [0], [0], [1], [0, 0, 1, 1], [], []>} : vector<8x128xf32>, vector<128x128xf32>, vector<8x128xf32> -> vector<8x128xf32>
    %cst_106 = arith.constant 2.000000e+00 : f32
    %196 = vector.broadcast %cst_106 : f32 to vector<8x128xf32>
    %197 = arith.mulf %196, %195 : vector<8x128xf32>
    %198 = arith.subf %197, %193 : vector<8x128xf32>
    %199 = tpu.concatenate %193, %194, %198 in 1 : vector<8x128xf32>, vector<8x128xf32>, vector<8x128xf32> -> vector<8x384xf32>
    %200 = vector.extract_strided_slice %174 {offsets = [0, 256], sizes = [8, 128], strides = [1, 1]} : vector<8x384xf32> to vector<8x128xf32>
    %cst_107 = arith.constant dense<0.000000e+00> : vector<8x128xf32>
    %201 = tpu.matmul %199, %176, %cst_107 {dimension_numbers = #tpu.dot_dimension_numbers<[1], [0], [0], [1], [0, 0, 1, 1], [], []>} : vector<8x384xf32>, vector<384x128xf32>, vector<8x128xf32> -> vector<8x128xf32>
    %202 = arith.addf %200, %201 : vector<8x128xf32>
    %203 = math.tanh %202 : vector<8x128xf32>
    %204 = arith.mulf %192, %54 : vector<8x128xf32>
    %cst_108 = arith.constant 1.000000e+00 : f32
    %205 = vector.broadcast %cst_108 : f32 to vector<8x128xf32>
    %206 = arith.subf %205, %192 : vector<8x128xf32>
    %207 = arith.mulf %206, %203 : vector<8x128xf32>
    %208 = arith.addf %204, %207 : vector<8x128xf32>
    %c0_109 = arith.constant 0 : index
    %c0_110 = arith.constant 0 : index
    %209 = vector.load %arg13[%c0_109, %c0_110] : memref<128x16xf32, #tpu.memory_space<vmem>>, vector<128x16xf32>
    %cst_111 = arith.constant dense<0.000000e+00> : vector<8x16xf32>
    %210 = tpu.matmul %208, %209, %cst_111 {dimension_numbers = #tpu.dot_dimension_numbers<[1], [0], [0], [1], [0, 0, 1, 1], [], []>} : vector<8x128xf32>, vector<128x16xf32>, vector<8x16xf32> -> vector<8x16xf32>
    %c0_112 = arith.constant 0 : index
    %c0_113 = arith.constant 0 : index
    %211 = vector.load %arg14[%c0_112, %c0_113] : memref<1x16xf32, #tpu.memory_space<vmem>>, vector<1x16xf32>
    %212 = vector.broadcast %211 : vector<1x16xf32> to vector<8x16xf32>
    %213 = arith.addf %210, %212 : vector<8x16xf32>
    %c8 = arith.constant 8 : index
    %c0_114 = arith.constant 0 : index
    %214 = vector.load %arg3[%c8, %c0_114] : memref<48x2xf32, #tpu.memory_space<vmem>>, vector<8x2xf32>
    %c8_115 = arith.constant 8 : index
    %c0_116 = arith.constant 0 : index
    %215 = vector.load %arg4[%c8_115, %c0_116] : memref<48x2xf32, #tpu.memory_space<vmem>>, vector<8x2xf32>
    %216 = tpu.concatenate %213, %214, %215 in 1 : vector<8x16xf32>, vector<8x2xf32>, vector<8x2xf32> -> vector<8x20xf32>
    %c0_117 = arith.constant 0 : index
    %c0_118 = arith.constant 0 : index
    %217 = vector.load %arg15[%c0_117, %c0_118] : memref<20x48xf32, #tpu.memory_space<vmem>>, vector<20x48xf32>
    %c0_119 = arith.constant 0 : index
    %c0_120 = arith.constant 0 : index
    %218 = vector.load %arg16[%c0_119, %c0_120] : memref<16x48xf32, #tpu.memory_space<vmem>>, vector<16x48xf32>
    %c0_121 = arith.constant 0 : index
    %c0_122 = arith.constant 0 : index
    %219 = vector.load %arg17[%c0_121, %c0_122] : memref<1x48xf32, #tpu.memory_space<vmem>>, vector<1x48xf32>
    %c0_123 = arith.constant 0 : index
    %c0_124 = arith.constant 0 : index
    %220 = vector.load %arg18[%c0_123, %c0_124] : memref<1x48xf32, #tpu.memory_space<vmem>>, vector<1x48xf32>
    %cst_125 = arith.constant dense<0.000000e+00> : vector<8x48xf32>
    %221 = tpu.matmul %216, %217, %cst_125 {dimension_numbers = #tpu.dot_dimension_numbers<[1], [0], [0], [1], [0, 0, 1, 1], [], []>} : vector<8x20xf32>, vector<20x48xf32>, vector<8x48xf32> -> vector<8x48xf32>
    %222 = vector.broadcast %219 : vector<1x48xf32> to vector<8x48xf32>
    %223 = arith.addf %221, %222 : vector<8x48xf32>
    %cst_126 = arith.constant dense<0.000000e+00> : vector<8x48xf32>
    %224 = tpu.matmul %98, %218, %cst_126 {dimension_numbers = #tpu.dot_dimension_numbers<[1], [0], [0], [1], [0, 0, 1, 1], [], []>} : vector<8x16xf32>, vector<16x48xf32>, vector<8x48xf32> -> vector<8x48xf32>
    %225 = vector.broadcast %220 : vector<1x48xf32> to vector<8x48xf32>
    %226 = arith.addf %224, %225 : vector<8x48xf32>
    %227 = vector.extract_strided_slice %223 {offsets = [0, 0], sizes = [8, 16], strides = [1, 1]} : vector<8x48xf32> to vector<8x16xf32>
    %228 = vector.extract_strided_slice %226 {offsets = [0, 0], sizes = [8, 16], strides = [1, 1]} : vector<8x48xf32> to vector<8x16xf32>
    %229 = arith.addf %227, %228 : vector<8x16xf32>
    %230 = arith.negf %229 : vector<8x16xf32>
    %231 = math.exp %230 : vector<8x16xf32>
    %cst_127 = arith.constant 1.000000e+00 : f32
    %232 = vector.broadcast %cst_127 : f32 to vector<8x16xf32>
    %233 = arith.addf %232, %231 : vector<8x16xf32>
    %234 = arith.divf %232, %233 : vector<8x16xf32>
    %235 = vector.extract_strided_slice %223 {offsets = [0, 16], sizes = [8, 16], strides = [1, 1]} : vector<8x48xf32> to vector<8x16xf32>
    %236 = vector.extract_strided_slice %226 {offsets = [0, 16], sizes = [8, 16], strides = [1, 1]} : vector<8x48xf32> to vector<8x16xf32>
    %237 = arith.addf %235, %236 : vector<8x16xf32>
    %238 = arith.negf %237 : vector<8x16xf32>
    %239 = math.exp %238 : vector<8x16xf32>
    %cst_128 = arith.constant 1.000000e+00 : f32
    %240 = vector.broadcast %cst_128 : f32 to vector<8x16xf32>
    %241 = arith.addf %240, %239 : vector<8x16xf32>
    %242 = arith.divf %240, %241 : vector<8x16xf32>
    %243 = vector.extract_strided_slice %223 {offsets = [0, 32], sizes = [8, 16], strides = [1, 1]} : vector<8x48xf32> to vector<8x16xf32>
    %244 = vector.extract_strided_slice %226 {offsets = [0, 32], sizes = [8, 16], strides = [1, 1]} : vector<8x48xf32> to vector<8x16xf32>
    %245 = arith.mulf %234, %244 : vector<8x16xf32>
    %246 = arith.addf %243, %245 : vector<8x16xf32>
    %247 = math.tanh %246 : vector<8x16xf32>
    %cst_129 = arith.constant 1.000000e+00 : f32
    %248 = vector.broadcast %cst_129 : f32 to vector<8x16xf32>
    %249 = arith.subf %248, %242 : vector<8x16xf32>
    %250 = arith.mulf %249, %247 : vector<8x16xf32>
    %251 = arith.mulf %242, %98 : vector<8x16xf32>
    %252 = arith.addf %250, %251 : vector<8x16xf32>
    %cst_130 = arith.constant dense<0.000000e+00> : vector<2x16xf32>
    %253 = tpu.matmul %1, %252, %cst_130 {dimension_numbers = #tpu.dot_dimension_numbers<[1], [0], [0], [1], [0, 0, 1, 1], [], []>} : vector<2x8xf32>, vector<8x16xf32>, vector<2x16xf32> -> vector<2x16xf32>
    %c0_131 = arith.constant 0 : index
    %c0_132 = arith.constant 0 : index
    %254 = vector.load %arg19[%c0_131, %c0_132] : memref<16x16xf32, #tpu.memory_space<vmem>>, vector<16x16xf32>
    %cst_133 = arith.constant dense<0.000000e+00> : vector<2x16xf32>
    %255 = tpu.matmul %253, %254, %cst_133 {dimension_numbers = #tpu.dot_dimension_numbers<[1], [0], [0], [1], [0, 0, 1, 1], [], []>} : vector<2x16xf32>, vector<16x16xf32>, vector<2x16xf32> -> vector<2x16xf32>
    %c0_134 = arith.constant 0 : index
    %c0_135 = arith.constant 0 : index
    %256 = vector.load %arg20[%c0_134, %c0_135] : memref<1x16xf32, #tpu.memory_space<vmem>>, vector<1x16xf32>
    %257 = vector.broadcast %256 : vector<1x16xf32> to vector<2x16xf32>
    %258 = arith.addf %255, %257 : vector<2x16xf32>
    %c1 = arith.constant 1 : index
    %c0_136 = arith.constant 0 : index
    %c0_137 = arith.constant 0 : index
    %259 = vector.load %arg28[%c1, %c0_136, %c0_137] : memref<6x2x16xf32, #tpu.memory_space<vmem>>, vector<1x2x16xf32>
    %260 = vector.shape_cast %259 : vector<1x2x16xf32> to vector<2x16xf32>
    %261 = vector.shape_cast %258 : vector<2x16xf32> to vector<1x2x16xf32>
    tpu.vector_store %arg28[%c1, %c0_136, %c0_137], %261 {strides = array<i32>} : memref<6x2x16xf32, #tpu.memory_space<vmem>>, vector<1x2x16xf32>,
    %262 = vector.extract_strided_slice %258 {offsets = [0, 0], sizes = [1, 8], strides = [1, 1]} : vector<2x16xf32> to vector<1x8xf32>
    %263 = vector.extract_strided_slice %258 {offsets = [0, 8], sizes = [1, 8], strides = [1, 1]} : vector<2x16xf32> to vector<1x8xf32>
    %264 = arith.negf %263 : vector<1x8xf32>
    %265 = math.exp %264 : vector<1x8xf32>
    %cst_138 = arith.constant 1.000000e+00 : f32
    %266 = vector.broadcast %cst_138 : f32 to vector<1x8xf32>
    %267 = arith.addf %266, %265 : vector<1x8xf32>
    %268 = arith.divf %266, %267 : vector<1x8xf32>
    %cst_139 = arith.constant 0.899999976 : f32
    %269 = vector.broadcast %cst_139 : f32 to vector<1x8xf32>
    %270 = arith.mulf %269, %268 : vector<1x8xf32>
    %cst_140 = arith.constant 1.000000e-01 : f32
    %271 = vector.broadcast %cst_140 : f32 to vector<1x8xf32>
    %272 = arith.addf %271, %270 : vector<1x8xf32>
    %273 = math.sqrt %272 : vector<1x8xf32>
    %c1_141 = arith.constant 1 : index
    %c0_142 = arith.constant 0 : index
    %c0_143 = arith.constant 0 : index
    %274 = vector.load %arg8[%c1_141, %c0_142, %c0_143] : memref<6x4x8xf32, #tpu.memory_space<vmem>>, vector<1x4x8xf32>
    %275 = vector.shape_cast %274 : vector<1x4x8xf32> to vector<4x8xf32>
    %276 = vector.broadcast %273 : vector<1x8xf32> to vector<4x8xf32>
    %277 = arith.mulf %276, %275 : vector<4x8xf32>
    %278 = vector.broadcast %262 : vector<1x8xf32> to vector<4x8xf32>
    %279 = arith.addf %278, %277 : vector<4x8xf32>
    %cst_144 = arith.constant dense<0.000000e+00> : vector<4x16xf32>
    %280 = tpu.matmul %2, %213, %cst_144 {dimension_numbers = #tpu.dot_dimension_numbers<[1], [0], [0], [1], [0, 0, 1, 1], [], []>} : vector<4x8xf32>, vector<8x16xf32>, vector<4x16xf32> -> vector<4x16xf32>
    %281 = tpu.concatenate %280, %279, %170 in 1 : vector<4x16xf32>, vector<4x8xf32>, vector<4x2xf32> -> vector<4x26xf32>
    %c0_145 = arith.constant 0 : index
    %c0_146 = arith.constant 0 : index
    %282 = vector.load %arg21[%c0_145, %c0_146] : memref<26x48xf32, #tpu.memory_space<vmem>>, vector<26x48xf32>
    %c0_147 = arith.constant 0 : index
    %c0_148 = arith.constant 0 : index
    %283 = vector.load %arg22[%c0_147, %c0_148] : memref<16x48xf32, #tpu.memory_space<vmem>>, vector<16x48xf32>
    %c0_149 = arith.constant 0 : index
    %c0_150 = arith.constant 0 : index
    %284 = vector.load %arg23[%c0_149, %c0_150] : memref<1x48xf32, #tpu.memory_space<vmem>>, vector<1x48xf32>
    %c0_151 = arith.constant 0 : index
    %c0_152 = arith.constant 0 : index
    %285 = vector.load %arg24[%c0_151, %c0_152] : memref<1x48xf32, #tpu.memory_space<vmem>>, vector<1x48xf32>
    %cst_153 = arith.constant dense<0.000000e+00> : vector<4x48xf32>
    %286 = tpu.matmul %281, %282, %cst_153 {dimension_numbers = #tpu.dot_dimension_numbers<[1], [0], [0], [1], [0, 0, 1, 1], [], []>} : vector<4x26xf32>, vector<26x48xf32>, vector<4x48xf32> -> vector<4x48xf32>
    %287 = vector.broadcast %284 : vector<1x48xf32> to vector<4x48xf32>
    %288 = arith.addf %286, %287 : vector<4x48xf32>
    %cst_154 = arith.constant dense<0.000000e+00> : vector<4x48xf32>
    %289 = tpu.matmul %163, %283, %cst_154 {dimension_numbers = #tpu.dot_dimension_numbers<[1], [0], [0], [1], [0, 0, 1, 1], [], []>} : vector<4x16xf32>, vector<16x48xf32>, vector<4x48xf32> -> vector<4x48xf32>
    %290 = vector.broadcast %285 : vector<1x48xf32> to vector<4x48xf32>
    %291 = arith.addf %289, %290 : vector<4x48xf32>
    %292 = vector.extract_strided_slice %288 {offsets = [0, 0], sizes = [4, 16], strides = [1, 1]} : vector<4x48xf32> to vector<4x16xf32>
    %293 = vector.extract_strided_slice %291 {offsets = [0, 0], sizes = [4, 16], strides = [1, 1]} : vector<4x48xf32> to vector<4x16xf32>
    %294 = arith.addf %292, %293 : vector<4x16xf32>
    %295 = arith.negf %294 : vector<4x16xf32>
    %296 = math.exp %295 : vector<4x16xf32>
    %cst_155 = arith.constant 1.000000e+00 : f32
    %297 = vector.broadcast %cst_155 : f32 to vector<4x16xf32>
    %298 = arith.addf %297, %296 : vector<4x16xf32>
    %299 = arith.divf %297, %298 : vector<4x16xf32>
    %300 = vector.extract_strided_slice %288 {offsets = [0, 16], sizes = [4, 16], strides = [1, 1]} : vector<4x48xf32> to vector<4x16xf32>
    %301 = vector.extract_strided_slice %291 {offsets = [0, 16], sizes = [4, 16], strides = [1, 1]} : vector<4x48xf32> to vector<4x16xf32>
    %302 = arith.addf %300, %301 : vector<4x16xf32>
    %303 = arith.negf %302 : vector<4x16xf32>
    %304 = math.exp %303 : vector<4x16xf32>
    %cst_156 = arith.constant 1.000000e+00 : f32
    %305 = vector.broadcast %cst_156 : f32 to vector<4x16xf32>
    %306 = arith.addf %305, %304 : vector<4x16xf32>
    %307 = arith.divf %305, %306 : vector<4x16xf32>
    %308 = vector.extract_strided_slice %288 {offsets = [0, 32], sizes = [4, 16], strides = [1, 1]} : vector<4x48xf32> to vector<4x16xf32>
    %309 = vector.extract_strided_slice %291 {offsets = [0, 32], sizes = [4, 16], strides = [1, 1]} : vector<4x48xf32> to vector<4x16xf32>
    %310 = arith.mulf %299, %309 : vector<4x16xf32>
    %311 = arith.addf %308, %310 : vector<4x16xf32>
    %312 = math.tanh %311 : vector<4x16xf32>
    %cst_157 = arith.constant 1.000000e+00 : f32
    %313 = vector.broadcast %cst_157 : f32 to vector<4x16xf32>
    %314 = arith.subf %313, %307 : vector<4x16xf32>
    %315 = arith.mulf %314, %312 : vector<4x16xf32>
    %316 = arith.mulf %307, %163 : vector<4x16xf32>
    %317 = arith.addf %315, %316 : vector<4x16xf32>
    %cst_158 = arith.constant 0.000000e+00 : f32
    %318 = vector.broadcast %cst_158 : f32 to vector<4x16xf32>
    %319 = arith.maximumf %317, %318 : vector<4x16xf32>
    %c0_159 = arith.constant 0 : index
    %c0_160 = arith.constant 0 : index
    %320 = vector.load %arg25[%c0_159, %c0_160] : memref<16x2xf32, #tpu.memory_space<vmem>>, vector<16x2xf32>
    %cst_161 = arith.constant dense<0.000000e+00> : vector<4x2xf32>
    %321 = tpu.matmul %319, %320, %cst_161 {dimension_numbers = #tpu.dot_dimension_numbers<[1], [0], [0], [1], [0, 0, 1, 1], [], []>} : vector<4x16xf32>, vector<16x2xf32>, vector<4x2xf32> -> vector<4x2xf32>
    %c0_162 = arith.constant 0 : index
    %c0_163 = arith.constant 0 : index
    %322 = vector.load %arg26[%c0_162, %c0_163] : memref<1x2xf32, #tpu.memory_space<vmem>>, vector<1x2xf32>
    %323 = vector.broadcast %322 : vector<1x2xf32> to vector<4x2xf32>
    %324 = arith.addf %321, %323 : vector<4x2xf32>
    %c1_164 = arith.constant 1 : index
    %c0_165 = arith.constant 0 : index
    %c0_166 = arith.constant 0 : index
    %325 = vector.load %arg27[%c1_164, %c0_165, %c0_166] : memref<6x4x2xf32, #tpu.memory_space<vmem>>, vector<1x4x2xf32>
    %326 = vector.shape_cast %325 : vector<1x4x2xf32> to vector<4x2xf32>
    %327 = vector.shape_cast %324 : vector<4x2xf32> to vector<1x4x2xf32>
    tpu.vector_store %arg27[%c1_164, %c0_165, %c0_166], %327 {strides = array<i32>} : memref<6x4x2xf32, #tpu.memory_space<vmem>>, vector<1x4x2xf32>,
    %328 = vector.extract_strided_slice %15 {offsets = [16, 0], sizes = [8, 384], strides = [1, 1]} : vector<48x384xf32> to vector<8x384xf32>
    %c0_167 = arith.constant 0 : index
    %c0_168 = arith.constant 0 : index
    %329 = vector.load %arg10[%c0_167, %c0_168] : memref<384x256xf32, #tpu.memory_space<vmem>>, vector<384x256xf32>
    %c0_169 = arith.constant 0 : index
    %c0_170 = arith.constant 0 : index
    %330 = vector.load %arg11[%c0_169, %c0_170] : memref<384x128xf32, #tpu.memory_space<vmem>>, vector<384x128xf32>
    %cst_171 = arith.constant dense<0.000000e+00> : vector<8x128xf32>
    %331 = tpu.matmul %208, %0, %cst_171 {dimension_numbers = #tpu.dot_dimension_numbers<[1], [0], [0], [1], [0, 0, 1, 1], [], []>} : vector<8x128xf32>, vector<128x128xf32>, vector<8x128xf32> -> vector<8x128xf32>
    %cst_172 = arith.constant dense<0.000000e+00> : vector<8x128xf32>
    %332 = tpu.matmul %331, %0, %cst_172 {dimension_numbers = #tpu.dot_dimension_numbers<[1], [0], [0], [1], [0, 0, 1, 1], [], []>} : vector<8x128xf32>, vector<128x128xf32>, vector<8x128xf32> -> vector<8x128xf32>
    %cst_173 = arith.constant 2.000000e+00 : f32
    %333 = vector.broadcast %cst_173 : f32 to vector<8x128xf32>
    %334 = arith.mulf %333, %332 : vector<8x128xf32>
    %335 = arith.subf %334, %208 : vector<8x128xf32>
    %336 = tpu.concatenate %208, %331, %335 in 1 : vector<8x128xf32>, vector<8x128xf32>, vector<8x128xf32> -> vector<8x384xf32>
    %337 = vector.extract_strided_slice %328 {offsets = [0, 0], sizes = [8, 256], strides = [1, 1]} : vector<8x384xf32> to vector<8x256xf32>
    %cst_174 = arith.constant dense<0.000000e+00> : vector<8x256xf32>
    %338 = tpu.matmul %336, %329, %cst_174 {dimension_numbers = #tpu.dot_dimension_numbers<[1], [0], [0], [1], [0, 0, 1, 1], [], []>} : vector<8x384xf32>, vector<384x256xf32>, vector<8x256xf32> -> vector<8x256xf32>
    %339 = arith.addf %337, %338 : vector<8x256xf32>
    %340 = arith.negf %339 : vector<8x256xf32>
    %341 = math.exp %340 : vector<8x256xf32>
    %cst_175 = arith.constant 1.000000e+00 : f32
    %342 = vector.broadcast %cst_175 : f32 to vector<8x256xf32>
    %343 = arith.addf %342, %341 : vector<8x256xf32>
    %344 = arith.divf %342, %343 : vector<8x256xf32>
    %345 = vector.extract_strided_slice %344 {offsets = [0, 0], sizes = [8, 128], strides = [1, 1]} : vector<8x256xf32> to vector<8x128xf32>
    %346 = vector.extract_strided_slice %344 {offsets = [0, 128], sizes = [8, 128], strides = [1, 1]} : vector<8x256xf32> to vector<8x128xf32>
    %347 = arith.mulf %345, %208 : vector<8x128xf32>
    %cst_176 = arith.constant dense<0.000000e+00> : vector<8x128xf32>
    %348 = tpu.matmul %347, %0, %cst_176 {dimension_numbers = #tpu.dot_dimension_numbers<[1], [0], [0], [1], [0, 0, 1, 1], [], []>} : vector<8x128xf32>, vector<128x128xf32>, vector<8x128xf32> -> vector<8x128xf32>
    %cst_177 = arith.constant dense<0.000000e+00> : vector<8x128xf32>
    %349 = tpu.matmul %348, %0, %cst_177 {dimension_numbers = #tpu.dot_dimension_numbers<[1], [0], [0], [1], [0, 0, 1, 1], [], []>} : vector<8x128xf32>, vector<128x128xf32>, vector<8x128xf32> -> vector<8x128xf32>
    %cst_178 = arith.constant 2.000000e+00 : f32
    %350 = vector.broadcast %cst_178 : f32 to vector<8x128xf32>
    %351 = arith.mulf %350, %349 : vector<8x128xf32>
    %352 = arith.subf %351, %347 : vector<8x128xf32>
    %353 = tpu.concatenate %347, %348, %352 in 1 : vector<8x128xf32>, vector<8x128xf32>, vector<8x128xf32> -> vector<8x384xf32>
    %354 = vector.extract_strided_slice %328 {offsets = [0, 256], sizes = [8, 128], strides = [1, 1]} : vector<8x384xf32> to vector<8x128xf32>
    %cst_179 = arith.constant dense<0.000000e+00> : vector<8x128xf32>
    %355 = tpu.matmul %353, %330, %cst_179 {dimension_numbers = #tpu.dot_dimension_numbers<[1], [0], [0], [1], [0, 0, 1, 1], [], []>} : vector<8x384xf32>, vector<384x128xf32>, vector<8x128xf32> -> vector<8x128xf32>
    %356 = arith.addf %354, %355 : vector<8x128xf32>
    %357 = math.tanh %356 : vector<8x128xf32>
    %358 = arith.mulf %346, %208 : vector<8x128xf32>
    %cst_180 = arith.constant 1.000000e+00 : f32
    %359 = vector.broadcast %cst_180 : f32 to vector<8x128xf32>
    %360 = arith.subf %359, %346 : vector<8x128xf32>
    %361 = arith.mulf %360, %357 : vector<8x128xf32>
    %362 = arith.addf %358, %361 : vector<8x128xf32>
    %c0_181 = arith.constant 0 : index
    %c0_182 = arith.constant 0 : index
    %363 = vector.load %arg13[%c0_181, %c0_182] : memref<128x16xf32, #tpu.memory_space<vmem>>, vector<128x16xf32>
    %cst_183 = arith.constant dense<0.000000e+00> : vector<8x16xf32>
    %364 = tpu.matmul %362, %363, %cst_183 {dimension_numbers = #tpu.dot_dimension_numbers<[1], [0], [0], [1], [0, 0, 1, 1], [], []>} : vector<8x128xf32>, vector<128x16xf32>, vector<8x16xf32> -> vector<8x16xf32>
    %c0_184 = arith.constant 0 : index
    %c0_185 = arith.constant 0 : index
    %365 = vector.load %arg14[%c0_184, %c0_185] : memref<1x16xf32, #tpu.memory_space<vmem>>, vector<1x16xf32>
    %366 = vector.broadcast %365 : vector<1x16xf32> to vector<8x16xf32>
    %367 = arith.addf %364, %366 : vector<8x16xf32>
    %c16 = arith.constant 16 : index
    %c0_186 = arith.constant 0 : index
    %368 = vector.load %arg3[%c16, %c0_186] : memref<48x2xf32, #tpu.memory_space<vmem>>, vector<8x2xf32>
    %c16_187 = arith.constant 16 : index
    %c0_188 = arith.constant 0 : index
    %369 = vector.load %arg4[%c16_187, %c0_188] : memref<48x2xf32, #tpu.memory_space<vmem>>, vector<8x2xf32>
    %370 = tpu.concatenate %367, %368, %369 in 1 : vector<8x16xf32>, vector<8x2xf32>, vector<8x2xf32> -> vector<8x20xf32>
    %c0_189 = arith.constant 0 : index
    %c0_190 = arith.constant 0 : index
    %371 = vector.load %arg15[%c0_189, %c0_190] : memref<20x48xf32, #tpu.memory_space<vmem>>, vector<20x48xf32>
    %c0_191 = arith.constant 0 : index
    %c0_192 = arith.constant 0 : index
    %372 = vector.load %arg16[%c0_191, %c0_192] : memref<16x48xf32, #tpu.memory_space<vmem>>, vector<16x48xf32>
    %c0_193 = arith.constant 0 : index
    %c0_194 = arith.constant 0 : index
    %373 = vector.load %arg17[%c0_193, %c0_194] : memref<1x48xf32, #tpu.memory_space<vmem>>, vector<1x48xf32>
    %c0_195 = arith.constant 0 : index
    %c0_196 = arith.constant 0 : index
    %374 = vector.load %arg18[%c0_195, %c0_196] : memref<1x48xf32, #tpu.memory_space<vmem>>, vector<1x48xf32>
    %cst_197 = arith.constant dense<0.000000e+00> : vector<8x48xf32>
    %375 = tpu.matmul %370, %371, %cst_197 {dimension_numbers = #tpu.dot_dimension_numbers<[1], [0], [0], [1], [0, 0, 1, 1], [], []>} : vector<8x20xf32>, vector<20x48xf32>, vector<8x48xf32> -> vector<8x48xf32>
    %376 = vector.broadcast %373 : vector<1x48xf32> to vector<8x48xf32>
    %377 = arith.addf %375, %376 : vector<8x48xf32>
    %cst_198 = arith.constant dense<0.000000e+00> : vector<8x48xf32>
    %378 = tpu.matmul %252, %372, %cst_198 {dimension_numbers = #tpu.dot_dimension_numbers<[1], [0], [0], [1], [0, 0, 1, 1], [], []>} : vector<8x16xf32>, vector<16x48xf32>, vector<8x48xf32> -> vector<8x48xf32>
    %379 = vector.broadcast %374 : vector<1x48xf32> to vector<8x48xf32>
    %380 = arith.addf %378, %379 : vector<8x48xf32>
    %381 = vector.extract_strided_slice %377 {offsets = [0, 0], sizes = [8, 16], strides = [1, 1]} : vector<8x48xf32> to vector<8x16xf32>
    %382 = vector.extract_strided_slice %380 {offsets = [0, 0], sizes = [8, 16], strides = [1, 1]} : vector<8x48xf32> to vector<8x16xf32>
    %383 = arith.addf %381, %382 : vector<8x16xf32>
    %384 = arith.negf %383 : vector<8x16xf32>
    %385 = math.exp %384 : vector<8x16xf32>
    %cst_199 = arith.constant 1.000000e+00 : f32
    %386 = vector.broadcast %cst_199 : f32 to vector<8x16xf32>
    %387 = arith.addf %386, %385 : vector<8x16xf32>
    %388 = arith.divf %386, %387 : vector<8x16xf32>
    %389 = vector.extract_strided_slice %377 {offsets = [0, 16], sizes = [8, 16], strides = [1, 1]} : vector<8x48xf32> to vector<8x16xf32>
    %390 = vector.extract_strided_slice %380 {offsets = [0, 16], sizes = [8, 16], strides = [1, 1]} : vector<8x48xf32> to vector<8x16xf32>
    %391 = arith.addf %389, %390 : vector<8x16xf32>
    %392 = arith.negf %391 : vector<8x16xf32>
    %393 = math.exp %392 : vector<8x16xf32>
    %cst_200 = arith.constant 1.000000e+00 : f32
    %394 = vector.broadcast %cst_200 : f32 to vector<8x16xf32>
    %395 = arith.addf %394, %393 : vector<8x16xf32>
    %396 = arith.divf %394, %395 : vector<8x16xf32>
    %397 = vector.extract_strided_slice %377 {offsets = [0, 32], sizes = [8, 16], strides = [1, 1]} : vector<8x48xf32> to vector<8x16xf32>
    %398 = vector.extract_strided_slice %380 {offsets = [0, 32], sizes = [8, 16], strides = [1, 1]} : vector<8x48xf32> to vector<8x16xf32>
    %399 = arith.mulf %388, %398 : vector<8x16xf32>
    %400 = arith.addf %397, %399 : vector<8x16xf32>
    %401 = math.tanh %400 : vector<8x16xf32>
    %cst_201 = arith.constant 1.000000e+00 : f32
    %402 = vector.broadcast %cst_201 : f32 to vector<8x16xf32>
    %403 = arith.subf %402, %396 : vector<8x16xf32>
    %404 = arith.mulf %403, %401 : vector<8x16xf32>
    %405 = arith.mulf %396, %252 : vector<8x16xf32>
    %406 = arith.addf %404, %405 : vector<8x16xf32>
    %cst_202 = arith.constant dense<0.000000e+00> : vector<2x16xf32>
    %407 = tpu.matmul %1, %406, %cst_202 {dimension_numbers = #tpu.dot_dimension_numbers<[1], [0], [0], [1], [0, 0, 1, 1], [], []>} : vector<2x8xf32>, vector<8x16xf32>, vector<2x16xf32> -> vector<2x16xf32>
    %c0_203 = arith.constant 0 : index
    %c0_204 = arith.constant 0 : index
    %408 = vector.load %arg19[%c0_203, %c0_204] : memref<16x16xf32, #tpu.memory_space<vmem>>, vector<16x16xf32>
    %cst_205 = arith.constant dense<0.000000e+00> : vector<2x16xf32>
    %409 = tpu.matmul %407, %408, %cst_205 {dimension_numbers = #tpu.dot_dimension_numbers<[1], [0], [0], [1], [0, 0, 1, 1], [], []>} : vector<2x16xf32>, vector<16x16xf32>, vector<2x16xf32> -> vector<2x16xf32>
    %c0_206 = arith.constant 0 : index
    %c0_207 = arith.constant 0 : index
    %410 = vector.load %arg20[%c0_206, %c0_207] : memref<1x16xf32, #tpu.memory_space<vmem>>, vector<1x16xf32>
    %411 = vector.broadcast %410 : vector<1x16xf32> to vector<2x16xf32>
    %412 = arith.addf %409, %411 : vector<2x16xf32>
    %c2 = arith.constant 2 : index
    %c0_208 = arith.constant 0 : index
    %c0_209 = arith.constant 0 : index
    %413 = vector.load %arg28[%c2, %c0_208, %c0_209] : memref<6x2x16xf32, #tpu.memory_space<vmem>>, vector<1x2x16xf32>
    %414 = vector.shape_cast %413 : vector<1x2x16xf32> to vector<2x16xf32>
    %415 = vector.shape_cast %412 : vector<2x16xf32> to vector<1x2x16xf32>
    tpu.vector_store %arg28[%c2, %c0_208, %c0_209], %415 {strides = array<i32>} : memref<6x2x16xf32, #tpu.memory_space<vmem>>, vector<1x2x16xf32>,
    %416 = vector.extract_strided_slice %412 {offsets = [0, 0], sizes = [1, 8], strides = [1, 1]} : vector<2x16xf32> to vector<1x8xf32>
    %417 = vector.extract_strided_slice %412 {offsets = [0, 8], sizes = [1, 8], strides = [1, 1]} : vector<2x16xf32> to vector<1x8xf32>
    %418 = arith.negf %417 : vector<1x8xf32>
    %419 = math.exp %418 : vector<1x8xf32>
    %cst_210 = arith.constant 1.000000e+00 : f32
    %420 = vector.broadcast %cst_210 : f32 to vector<1x8xf32>
    %421 = arith.addf %420, %419 : vector<1x8xf32>
    %422 = arith.divf %420, %421 : vector<1x8xf32>
    %cst_211 = arith.constant 0.899999976 : f32
    %423 = vector.broadcast %cst_211 : f32 to vector<1x8xf32>
    %424 = arith.mulf %423, %422 : vector<1x8xf32>
    %cst_212 = arith.constant 1.000000e-01 : f32
    %425 = vector.broadcast %cst_212 : f32 to vector<1x8xf32>
    %426 = arith.addf %425, %424 : vector<1x8xf32>
    %427 = math.sqrt %426 : vector<1x8xf32>
    %c2_213 = arith.constant 2 : index
    %c0_214 = arith.constant 0 : index
    %c0_215 = arith.constant 0 : index
    %428 = vector.load %arg8[%c2_213, %c0_214, %c0_215] : memref<6x4x8xf32, #tpu.memory_space<vmem>>, vector<1x4x8xf32>
    %429 = vector.shape_cast %428 : vector<1x4x8xf32> to vector<4x8xf32>
    %430 = vector.broadcast %427 : vector<1x8xf32> to vector<4x8xf32>
    %431 = arith.mulf %430, %429 : vector<4x8xf32>
    %432 = vector.broadcast %416 : vector<1x8xf32> to vector<4x8xf32>
    %433 = arith.addf %432, %431 : vector<4x8xf32>
    %cst_216 = arith.constant dense<0.000000e+00> : vector<4x16xf32>
    %434 = tpu.matmul %2, %367, %cst_216 {dimension_numbers = #tpu.dot_dimension_numbers<[1], [0], [0], [1], [0, 0, 1, 1], [], []>} : vector<4x8xf32>, vector<8x16xf32>, vector<4x16xf32> -> vector<4x16xf32>
    %435 = tpu.concatenate %434, %433, %324 in 1 : vector<4x16xf32>, vector<4x8xf32>, vector<4x2xf32> -> vector<4x26xf32>
    %c0_217 = arith.constant 0 : index
    %c0_218 = arith.constant 0 : index
    %436 = vector.load %arg21[%c0_217, %c0_218] : memref<26x48xf32, #tpu.memory_space<vmem>>, vector<26x48xf32>
    %c0_219 = arith.constant 0 : index
    %c0_220 = arith.constant 0 : index
    %437 = vector.load %arg22[%c0_219, %c0_220] : memref<16x48xf32, #tpu.memory_space<vmem>>, vector<16x48xf32>
    %c0_221 = arith.constant 0 : index
    %c0_222 = arith.constant 0 : index
    %438 = vector.load %arg23[%c0_221, %c0_222] : memref<1x48xf32, #tpu.memory_space<vmem>>, vector<1x48xf32>
    %c0_223 = arith.constant 0 : index
    %c0_224 = arith.constant 0 : index
    %439 = vector.load %arg24[%c0_223, %c0_224] : memref<1x48xf32, #tpu.memory_space<vmem>>, vector<1x48xf32>
    %cst_225 = arith.constant dense<0.000000e+00> : vector<4x48xf32>
    %440 = tpu.matmul %435, %436, %cst_225 {dimension_numbers = #tpu.dot_dimension_numbers<[1], [0], [0], [1], [0, 0, 1, 1], [], []>} : vector<4x26xf32>, vector<26x48xf32>, vector<4x48xf32> -> vector<4x48xf32>
    %441 = vector.broadcast %438 : vector<1x48xf32> to vector<4x48xf32>
    %442 = arith.addf %440, %441 : vector<4x48xf32>
    %cst_226 = arith.constant dense<0.000000e+00> : vector<4x48xf32>
    %443 = tpu.matmul %317, %437, %cst_226 {dimension_numbers = #tpu.dot_dimension_numbers<[1], [0], [0], [1], [0, 0, 1, 1], [], []>} : vector<4x16xf32>, vector<16x48xf32>, vector<4x48xf32> -> vector<4x48xf32>
    %444 = vector.broadcast %439 : vector<1x48xf32> to vector<4x48xf32>
    %445 = arith.addf %443, %444 : vector<4x48xf32>
    %446 = vector.extract_strided_slice %442 {offsets = [0, 0], sizes = [4, 16], strides = [1, 1]} : vector<4x48xf32> to vector<4x16xf32>
    %447 = vector.extract_strided_slice %445 {offsets = [0, 0], sizes = [4, 16], strides = [1, 1]} : vector<4x48xf32> to vector<4x16xf32>
    %448 = arith.addf %446, %447 : vector<4x16xf32>
    %449 = arith.negf %448 : vector<4x16xf32>
    %450 = math.exp %449 : vector<4x16xf32>
    %cst_227 = arith.constant 1.000000e+00 : f32
    %451 = vector.broadcast %cst_227 : f32 to vector<4x16xf32>
    %452 = arith.addf %451, %450 : vector<4x16xf32>
    %453 = arith.divf %451, %452 : vector<4x16xf32>
    %454 = vector.extract_strided_slice %442 {offsets = [0, 16], sizes = [4, 16], strides = [1, 1]} : vector<4x48xf32> to vector<4x16xf32>
    %455 = vector.extract_strided_slice %445 {offsets = [0, 16], sizes = [4, 16], strides = [1, 1]} : vector<4x48xf32> to vector<4x16xf32>
    %456 = arith.addf %454, %455 : vector<4x16xf32>
    %457 = arith.negf %456 : vector<4x16xf32>
    %458 = math.exp %457 : vector<4x16xf32>
    %cst_228 = arith.constant 1.000000e+00 : f32
    %459 = vector.broadcast %cst_228 : f32 to vector<4x16xf32>
    %460 = arith.addf %459, %458 : vector<4x16xf32>
    %461 = arith.divf %459, %460 : vector<4x16xf32>
    %462 = vector.extract_strided_slice %442 {offsets = [0, 32], sizes = [4, 16], strides = [1, 1]} : vector<4x48xf32> to vector<4x16xf32>
    %463 = vector.extract_strided_slice %445 {offsets = [0, 32], sizes = [4, 16], strides = [1, 1]} : vector<4x48xf32> to vector<4x16xf32>
    %464 = arith.mulf %453, %463 : vector<4x16xf32>
    %465 = arith.addf %462, %464 : vector<4x16xf32>
    %466 = math.tanh %465 : vector<4x16xf32>
    %cst_229 = arith.constant 1.000000e+00 : f32
    %467 = vector.broadcast %cst_229 : f32 to vector<4x16xf32>
    %468 = arith.subf %467, %461 : vector<4x16xf32>
    %469 = arith.mulf %468, %466 : vector<4x16xf32>
    %470 = arith.mulf %461, %317 : vector<4x16xf32>
    %471 = arith.addf %469, %470 : vector<4x16xf32>
    %cst_230 = arith.constant 0.000000e+00 : f32
    %472 = vector.broadcast %cst_230 : f32 to vector<4x16xf32>
    %473 = arith.maximumf %471, %472 : vector<4x16xf32>
    %c0_231 = arith.constant 0 : index
    %c0_232 = arith.constant 0 : index
    %474 = vector.load %arg25[%c0_231, %c0_232] : memref<16x2xf32, #tpu.memory_space<vmem>>, vector<16x2xf32>
    %cst_233 = arith.constant dense<0.000000e+00> : vector<4x2xf32>
    %475 = tpu.matmul %473, %474, %cst_233 {dimension_numbers = #tpu.dot_dimension_numbers<[1], [0], [0], [1], [0, 0, 1, 1], [], []>} : vector<4x16xf32>, vector<16x2xf32>, vector<4x2xf32> -> vector<4x2xf32>
    %c0_234 = arith.constant 0 : index
    %c0_235 = arith.constant 0 : index
    %476 = vector.load %arg26[%c0_234, %c0_235] : memref<1x2xf32, #tpu.memory_space<vmem>>, vector<1x2xf32>
    %477 = vector.broadcast %476 : vector<1x2xf32> to vector<4x2xf32>
    %478 = arith.addf %475, %477 : vector<4x2xf32>
    %c2_236 = arith.constant 2 : index
    %c0_237 = arith.constant 0 : index
    %c0_238 = arith.constant 0 : index
    %479 = vector.load %arg27[%c2_236, %c0_237, %c0_238] : memref<6x4x2xf32, #tpu.memory_space<vmem>>, vector<1x4x2xf32>
    %480 = vector.shape_cast %479 : vector<1x4x2xf32> to vector<4x2xf32>
    %481 = vector.shape_cast %478 : vector<4x2xf32> to vector<1x4x2xf32>
    tpu.vector_store %arg27[%c2_236, %c0_237, %c0_238], %481 {strides = array<i32>} : memref<6x4x2xf32, #tpu.memory_space<vmem>>, vector<1x4x2xf32>,
    %482 = vector.extract_strided_slice %15 {offsets = [24, 0], sizes = [8, 384], strides = [1, 1]} : vector<48x384xf32> to vector<8x384xf32>
    %c0_239 = arith.constant 0 : index
    %c0_240 = arith.constant 0 : index
    %483 = vector.load %arg10[%c0_239, %c0_240] : memref<384x256xf32, #tpu.memory_space<vmem>>, vector<384x256xf32>
    %c0_241 = arith.constant 0 : index
    %c0_242 = arith.constant 0 : index
    %484 = vector.load %arg11[%c0_241, %c0_242] : memref<384x128xf32, #tpu.memory_space<vmem>>, vector<384x128xf32>
    %cst_243 = arith.constant dense<0.000000e+00> : vector<8x128xf32>
    %485 = tpu.matmul %362, %0, %cst_243 {dimension_numbers = #tpu.dot_dimension_numbers<[1], [0], [0], [1], [0, 0, 1, 1], [], []>} : vector<8x128xf32>, vector<128x128xf32>, vector<8x128xf32> -> vector<8x128xf32>
    %cst_244 = arith.constant dense<0.000000e+00> : vector<8x128xf32>
    %486 = tpu.matmul %485, %0, %cst_244 {dimension_numbers = #tpu.dot_dimension_numbers<[1], [0], [0], [1], [0, 0, 1, 1], [], []>} : vector<8x128xf32>, vector<128x128xf32>, vector<8x128xf32> -> vector<8x128xf32>
    %cst_245 = arith.constant 2.000000e+00 : f32
    %487 = vector.broadcast %cst_245 : f32 to vector<8x128xf32>
    %488 = arith.mulf %487, %486 : vector<8x128xf32>
    %489 = arith.subf %488, %362 : vector<8x128xf32>
    %490 = tpu.concatenate %362, %485, %489 in 1 : vector<8x128xf32>, vector<8x128xf32>, vector<8x128xf32> -> vector<8x384xf32>
    %491 = vector.extract_strided_slice %482 {offsets = [0, 0], sizes = [8, 256], strides = [1, 1]} : vector<8x384xf32> to vector<8x256xf32>
    %cst_246 = arith.constant dense<0.000000e+00> : vector<8x256xf32>
    %492 = tpu.matmul %490, %483, %cst_246 {dimension_numbers = #tpu.dot_dimension_numbers<[1], [0], [0], [1], [0, 0, 1, 1], [], []>} : vector<8x384xf32>, vector<384x256xf32>, vector<8x256xf32> -> vector<8x256xf32>
    %493 = arith.addf %491, %492 : vector<8x256xf32>
    %494 = arith.negf %493 : vector<8x256xf32>
    %495 = math.exp %494 : vector<8x256xf32>
    %cst_247 = arith.constant 1.000000e+00 : f32
    %496 = vector.broadcast %cst_247 : f32 to vector<8x256xf32>
    %497 = arith.addf %496, %495 : vector<8x256xf32>
    %498 = arith.divf %496, %497 : vector<8x256xf32>
    %499 = vector.extract_strided_slice %498 {offsets = [0, 0], sizes = [8, 128], strides = [1, 1]} : vector<8x256xf32> to vector<8x128xf32>
    %500 = vector.extract_strided_slice %498 {offsets = [0, 128], sizes = [8, 128], strides = [1, 1]} : vector<8x256xf32> to vector<8x128xf32>
    %501 = arith.mulf %499, %362 : vector<8x128xf32>
    %cst_248 = arith.constant dense<0.000000e+00> : vector<8x128xf32>
    %502 = tpu.matmul %501, %0, %cst_248 {dimension_numbers = #tpu.dot_dimension_numbers<[1], [0], [0], [1], [0, 0, 1, 1], [], []>} : vector<8x128xf32>, vector<128x128xf32>, vector<8x128xf32> -> vector<8x128xf32>
    %cst_249 = arith.constant dense<0.000000e+00> : vector<8x128xf32>
    %503 = tpu.matmul %502, %0, %cst_249 {dimension_numbers = #tpu.dot_dimension_numbers<[1], [0], [0], [1], [0, 0, 1, 1], [], []>} : vector<8x128xf32>, vector<128x128xf32>, vector<8x128xf32> -> vector<8x128xf32>
    %cst_250 = arith.constant 2.000000e+00 : f32
    %504 = vector.broadcast %cst_250 : f32 to vector<8x128xf32>
    %505 = arith.mulf %504, %503 : vector<8x128xf32>
    %506 = arith.subf %505, %501 : vector<8x128xf32>
    %507 = tpu.concatenate %501, %502, %506 in 1 : vector<8x128xf32>, vector<8x128xf32>, vector<8x128xf32> -> vector<8x384xf32>
    %508 = vector.extract_strided_slice %482 {offsets = [0, 256], sizes = [8, 128], strides = [1, 1]} : vector<8x384xf32> to vector<8x128xf32>
    %cst_251 = arith.constant dense<0.000000e+00> : vector<8x128xf32>
    %509 = tpu.matmul %507, %484, %cst_251 {dimension_numbers = #tpu.dot_dimension_numbers<[1], [0], [0], [1], [0, 0, 1, 1], [], []>} : vector<8x384xf32>, vector<384x128xf32>, vector<8x128xf32> -> vector<8x128xf32>
    %510 = arith.addf %508, %509 : vector<8x128xf32>
    %511 = math.tanh %510 : vector<8x128xf32>
    %512 = arith.mulf %500, %362 : vector<8x128xf32>
    %cst_252 = arith.constant 1.000000e+00 : f32
    %513 = vector.broadcast %cst_252 : f32 to vector<8x128xf32>
    %514 = arith.subf %513, %500 : vector<8x128xf32>
    %515 = arith.mulf %514, %511 : vector<8x128xf32>
    %516 = arith.addf %512, %515 : vector<8x128xf32>
    %c0_253 = arith.constant 0 : index
    %c0_254 = arith.constant 0 : index
    %517 = vector.load %arg13[%c0_253, %c0_254] : memref<128x16xf32, #tpu.memory_space<vmem>>, vector<128x16xf32>
    %cst_255 = arith.constant dense<0.000000e+00> : vector<8x16xf32>
    %518 = tpu.matmul %516, %517, %cst_255 {dimension_numbers = #tpu.dot_dimension_numbers<[1], [0], [0], [1], [0, 0, 1, 1], [], []>} : vector<8x128xf32>, vector<128x16xf32>, vector<8x16xf32> -> vector<8x16xf32>
    %c0_256 = arith.constant 0 : index
    %c0_257 = arith.constant 0 : index
    %519 = vector.load %arg14[%c0_256, %c0_257] : memref<1x16xf32, #tpu.memory_space<vmem>>, vector<1x16xf32>
    %520 = vector.broadcast %519 : vector<1x16xf32> to vector<8x16xf32>
    %521 = arith.addf %518, %520 : vector<8x16xf32>
    %c24 = arith.constant 24 : index
    %c0_258 = arith.constant 0 : index
    %522 = vector.load %arg3[%c24, %c0_258] : memref<48x2xf32, #tpu.memory_space<vmem>>, vector<8x2xf32>
    %c24_259 = arith.constant 24 : index
    %c0_260 = arith.constant 0 : index
    %523 = vector.load %arg4[%c24_259, %c0_260] : memref<48x2xf32, #tpu.memory_space<vmem>>, vector<8x2xf32>
    %524 = tpu.concatenate %521, %522, %523 in 1 : vector<8x16xf32>, vector<8x2xf32>, vector<8x2xf32> -> vector<8x20xf32>
    %c0_261 = arith.constant 0 : index
    %c0_262 = arith.constant 0 : index
    %525 = vector.load %arg15[%c0_261, %c0_262] : memref<20x48xf32, #tpu.memory_space<vmem>>, vector<20x48xf32>
    %c0_263 = arith.constant 0 : index
    %c0_264 = arith.constant 0 : index
    %526 = vector.load %arg16[%c0_263, %c0_264] : memref<16x48xf32, #tpu.memory_space<vmem>>, vector<16x48xf32>
    %c0_265 = arith.constant 0 : index
    %c0_266 = arith.constant 0 : index
    %527 = vector.load %arg17[%c0_265, %c0_266] : memref<1x48xf32, #tpu.memory_space<vmem>>, vector<1x48xf32>
    %c0_267 = arith.constant 0 : index
    %c0_268 = arith.constant 0 : index
    %528 = vector.load %arg18[%c0_267, %c0_268] : memref<1x48xf32, #tpu.memory_space<vmem>>, vector<1x48xf32>
    %cst_269 = arith.constant dense<0.000000e+00> : vector<8x48xf32>
    %529 = tpu.matmul %524, %525, %cst_269 {dimension_numbers = #tpu.dot_dimension_numbers<[1], [0], [0], [1], [0, 0, 1, 1], [], []>} : vector<8x20xf32>, vector<20x48xf32>, vector<8x48xf32> -> vector<8x48xf32>
    %530 = vector.broadcast %527 : vector<1x48xf32> to vector<8x48xf32>
    %531 = arith.addf %529, %530 : vector<8x48xf32>
    %cst_270 = arith.constant dense<0.000000e+00> : vector<8x48xf32>
    %532 = tpu.matmul %406, %526, %cst_270 {dimension_numbers = #tpu.dot_dimension_numbers<[1], [0], [0], [1], [0, 0, 1, 1], [], []>} : vector<8x16xf32>, vector<16x48xf32>, vector<8x48xf32> -> vector<8x48xf32>
    %533 = vector.broadcast %528 : vector<1x48xf32> to vector<8x48xf32>
    %534 = arith.addf %532, %533 : vector<8x48xf32>
    %535 = vector.extract_strided_slice %531 {offsets = [0, 0], sizes = [8, 16], strides = [1, 1]} : vector<8x48xf32> to vector<8x16xf32>
    %536 = vector.extract_strided_slice %534 {offsets = [0, 0], sizes = [8, 16], strides = [1, 1]} : vector<8x48xf32> to vector<8x16xf32>
    %537 = arith.addf %535, %536 : vector<8x16xf32>
    %538 = arith.negf %537 : vector<8x16xf32>
    %539 = math.exp %538 : vector<8x16xf32>
    %cst_271 = arith.constant 1.000000e+00 : f32
    %540 = vector.broadcast %cst_271 : f32 to vector<8x16xf32>
    %541 = arith.addf %540, %539 : vector<8x16xf32>
    %542 = arith.divf %540, %541 : vector<8x16xf32>
    %543 = vector.extract_strided_slice %531 {offsets = [0, 16], sizes = [8, 16], strides = [1, 1]} : vector<8x48xf32> to vector<8x16xf32>
    %544 = vector.extract_strided_slice %534 {offsets = [0, 16], sizes = [8, 16], strides = [1, 1]} : vector<8x48xf32> to vector<8x16xf32>
    %545 = arith.addf %543, %544 : vector<8x16xf32>
    %546 = arith.negf %545 : vector<8x16xf32>
    %547 = math.exp %546 : vector<8x16xf32>
    %cst_272 = arith.constant 1.000000e+00 : f32
    %548 = vector.broadcast %cst_272 : f32 to vector<8x16xf32>
    %549 = arith.addf %548, %547 : vector<8x16xf32>
    %550 = arith.divf %548, %549 : vector<8x16xf32>
    %551 = vector.extract_strided_slice %531 {offsets = [0, 32], sizes = [8, 16], strides = [1, 1]} : vector<8x48xf32> to vector<8x16xf32>
    %552 = vector.extract_strided_slice %534 {offsets = [0, 32], sizes = [8, 16], strides = [1, 1]} : vector<8x48xf32> to vector<8x16xf32>
    %553 = arith.mulf %542, %552 : vector<8x16xf32>
    %554 = arith.addf %551, %553 : vector<8x16xf32>
    %555 = math.tanh %554 : vector<8x16xf32>
    %cst_273 = arith.constant 1.000000e+00 : f32
    %556 = vector.broadcast %cst_273 : f32 to vector<8x16xf32>
    %557 = arith.subf %556, %550 : vector<8x16xf32>
    %558 = arith.mulf %557, %555 : vector<8x16xf32>
    %559 = arith.mulf %550, %406 : vector<8x16xf32>
    %560 = arith.addf %558, %559 : vector<8x16xf32>
    %cst_274 = arith.constant dense<0.000000e+00> : vector<2x16xf32>
    %561 = tpu.matmul %1, %560, %cst_274 {dimension_numbers = #tpu.dot_dimension_numbers<[1], [0], [0], [1], [0, 0, 1, 1], [], []>} : vector<2x8xf32>, vector<8x16xf32>, vector<2x16xf32> -> vector<2x16xf32>
    %c0_275 = arith.constant 0 : index
    %c0_276 = arith.constant 0 : index
    %562 = vector.load %arg19[%c0_275, %c0_276] : memref<16x16xf32, #tpu.memory_space<vmem>>, vector<16x16xf32>
    %cst_277 = arith.constant dense<0.000000e+00> : vector<2x16xf32>
    %563 = tpu.matmul %561, %562, %cst_277 {dimension_numbers = #tpu.dot_dimension_numbers<[1], [0], [0], [1], [0, 0, 1, 1], [], []>} : vector<2x16xf32>, vector<16x16xf32>, vector<2x16xf32> -> vector<2x16xf32>
    %c0_278 = arith.constant 0 : index
    %c0_279 = arith.constant 0 : index
    %564 = vector.load %arg20[%c0_278, %c0_279] : memref<1x16xf32, #tpu.memory_space<vmem>>, vector<1x16xf32>
    %565 = vector.broadcast %564 : vector<1x16xf32> to vector<2x16xf32>
    %566 = arith.addf %563, %565 : vector<2x16xf32>
    %c3 = arith.constant 3 : index
    %c0_280 = arith.constant 0 : index
    %c0_281 = arith.constant 0 : index
    %567 = vector.load %arg28[%c3, %c0_280, %c0_281] : memref<6x2x16xf32, #tpu.memory_space<vmem>>, vector<1x2x16xf32>
    %568 = vector.shape_cast %567 : vector<1x2x16xf32> to vector<2x16xf32>
    %569 = vector.shape_cast %566 : vector<2x16xf32> to vector<1x2x16xf32>
    tpu.vector_store %arg28[%c3, %c0_280, %c0_281], %569 {strides = array<i32>} : memref<6x2x16xf32, #tpu.memory_space<vmem>>, vector<1x2x16xf32>,
    %570 = vector.extract_strided_slice %566 {offsets = [0, 0], sizes = [1, 8], strides = [1, 1]} : vector<2x16xf32> to vector<1x8xf32>
    %571 = vector.extract_strided_slice %566 {offsets = [0, 8], sizes = [1, 8], strides = [1, 1]} : vector<2x16xf32> to vector<1x8xf32>
    %572 = arith.negf %571 : vector<1x8xf32>
    %573 = math.exp %572 : vector<1x8xf32>
    %cst_282 = arith.constant 1.000000e+00 : f32
    %574 = vector.broadcast %cst_282 : f32 to vector<1x8xf32>
    %575 = arith.addf %574, %573 : vector<1x8xf32>
    %576 = arith.divf %574, %575 : vector<1x8xf32>
    %cst_283 = arith.constant 0.899999976 : f32
    %577 = vector.broadcast %cst_283 : f32 to vector<1x8xf32>
    %578 = arith.mulf %577, %576 : vector<1x8xf32>
    %cst_284 = arith.constant 1.000000e-01 : f32
    %579 = vector.broadcast %cst_284 : f32 to vector<1x8xf32>
    %580 = arith.addf %579, %578 : vector<1x8xf32>
    %581 = math.sqrt %580 : vector<1x8xf32>
    %c3_285 = arith.constant 3 : index
    %c0_286 = arith.constant 0 : index
    %c0_287 = arith.constant 0 : index
    %582 = vector.load %arg8[%c3_285, %c0_286, %c0_287] : memref<6x4x8xf32, #tpu.memory_space<vmem>>, vector<1x4x8xf32>
    %583 = vector.shape_cast %582 : vector<1x4x8xf32> to vector<4x8xf32>
    %584 = vector.broadcast %581 : vector<1x8xf32> to vector<4x8xf32>
    %585 = arith.mulf %584, %583 : vector<4x8xf32>
    %586 = vector.broadcast %570 : vector<1x8xf32> to vector<4x8xf32>
    %587 = arith.addf %586, %585 : vector<4x8xf32>
    %cst_288 = arith.constant dense<0.000000e+00> : vector<4x16xf32>
    %588 = tpu.matmul %2, %521, %cst_288 {dimension_numbers = #tpu.dot_dimension_numbers<[1], [0], [0], [1], [0, 0, 1, 1], [], []>} : vector<4x8xf32>, vector<8x16xf32>, vector<4x16xf32> -> vector<4x16xf32>
    %589 = tpu.concatenate %588, %587, %478 in 1 : vector<4x16xf32>, vector<4x8xf32>, vector<4x2xf32> -> vector<4x26xf32>
    %c0_289 = arith.constant 0 : index
    %c0_290 = arith.constant 0 : index
    %590 = vector.load %arg21[%c0_289, %c0_290] : memref<26x48xf32, #tpu.memory_space<vmem>>, vector<26x48xf32>
    %c0_291 = arith.constant 0 : index
    %c0_292 = arith.constant 0 : index
    %591 = vector.load %arg22[%c0_291, %c0_292] : memref<16x48xf32, #tpu.memory_space<vmem>>, vector<16x48xf32>
    %c0_293 = arith.constant 0 : index
    %c0_294 = arith.constant 0 : index
    %592 = vector.load %arg23[%c0_293, %c0_294] : memref<1x48xf32, #tpu.memory_space<vmem>>, vector<1x48xf32>
    %c0_295 = arith.constant 0 : index
    %c0_296 = arith.constant 0 : index
    %593 = vector.load %arg24[%c0_295, %c0_296] : memref<1x48xf32, #tpu.memory_space<vmem>>, vector<1x48xf32>
    %cst_297 = arith.constant dense<0.000000e+00> : vector<4x48xf32>
    %594 = tpu.matmul %589, %590, %cst_297 {dimension_numbers = #tpu.dot_dimension_numbers<[1], [0], [0], [1], [0, 0, 1, 1], [], []>} : vector<4x26xf32>, vector<26x48xf32>, vector<4x48xf32> -> vector<4x48xf32>
    %595 = vector.broadcast %592 : vector<1x48xf32> to vector<4x48xf32>
    %596 = arith.addf %594, %595 : vector<4x48xf32>
    %cst_298 = arith.constant dense<0.000000e+00> : vector<4x48xf32>
    %597 = tpu.matmul %471, %591, %cst_298 {dimension_numbers = #tpu.dot_dimension_numbers<[1], [0], [0], [1], [0, 0, 1, 1], [], []>} : vector<4x16xf32>, vector<16x48xf32>, vector<4x48xf32> -> vector<4x48xf32>
    %598 = vector.broadcast %593 : vector<1x48xf32> to vector<4x48xf32>
    %599 = arith.addf %597, %598 : vector<4x48xf32>
    %600 = vector.extract_strided_slice %596 {offsets = [0, 0], sizes = [4, 16], strides = [1, 1]} : vector<4x48xf32> to vector<4x16xf32>
    %601 = vector.extract_strided_slice %599 {offsets = [0, 0], sizes = [4, 16], strides = [1, 1]} : vector<4x48xf32> to vector<4x16xf32>
    %602 = arith.addf %600, %601 : vector<4x16xf32>
    %603 = arith.negf %602 : vector<4x16xf32>
    %604 = math.exp %603 : vector<4x16xf32>
    %cst_299 = arith.constant 1.000000e+00 : f32
    %605 = vector.broadcast %cst_299 : f32 to vector<4x16xf32>
    %606 = arith.addf %605, %604 : vector<4x16xf32>
    %607 = arith.divf %605, %606 : vector<4x16xf32>
    %608 = vector.extract_strided_slice %596 {offsets = [0, 16], sizes = [4, 16], strides = [1, 1]} : vector<4x48xf32> to vector<4x16xf32>
    %609 = vector.extract_strided_slice %599 {offsets = [0, 16], sizes = [4, 16], strides = [1, 1]} : vector<4x48xf32> to vector<4x16xf32>
    %610 = arith.addf %608, %609 : vector<4x16xf32>
    %611 = arith.negf %610 : vector<4x16xf32>
    %612 = math.exp %611 : vector<4x16xf32>
    %cst_300 = arith.constant 1.000000e+00 : f32
    %613 = vector.broadcast %cst_300 : f32 to vector<4x16xf32>
    %614 = arith.addf %613, %612 : vector<4x16xf32>
    %615 = arith.divf %613, %614 : vector<4x16xf32>
    %616 = vector.extract_strided_slice %596 {offsets = [0, 32], sizes = [4, 16], strides = [1, 1]} : vector<4x48xf32> to vector<4x16xf32>
    %617 = vector.extract_strided_slice %599 {offsets = [0, 32], sizes = [4, 16], strides = [1, 1]} : vector<4x48xf32> to vector<4x16xf32>
    %618 = arith.mulf %607, %617 : vector<4x16xf32>
    %619 = arith.addf %616, %618 : vector<4x16xf32>
    %620 = math.tanh %619 : vector<4x16xf32>
    %cst_301 = arith.constant 1.000000e+00 : f32
    %621 = vector.broadcast %cst_301 : f32 to vector<4x16xf32>
    %622 = arith.subf %621, %615 : vector<4x16xf32>
    %623 = arith.mulf %622, %620 : vector<4x16xf32>
    %624 = arith.mulf %615, %471 : vector<4x16xf32>
    %625 = arith.addf %623, %624 : vector<4x16xf32>
    %cst_302 = arith.constant 0.000000e+00 : f32
    %626 = vector.broadcast %cst_302 : f32 to vector<4x16xf32>
    %627 = arith.maximumf %625, %626 : vector<4x16xf32>
    %c0_303 = arith.constant 0 : index
    %c0_304 = arith.constant 0 : index
    %628 = vector.load %arg25[%c0_303, %c0_304] : memref<16x2xf32, #tpu.memory_space<vmem>>, vector<16x2xf32>
    %cst_305 = arith.constant dense<0.000000e+00> : vector<4x2xf32>
    %629 = tpu.matmul %627, %628, %cst_305 {dimension_numbers = #tpu.dot_dimension_numbers<[1], [0], [0], [1], [0, 0, 1, 1], [], []>} : vector<4x16xf32>, vector<16x2xf32>, vector<4x2xf32> -> vector<4x2xf32>
    %c0_306 = arith.constant 0 : index
    %c0_307 = arith.constant 0 : index
    %630 = vector.load %arg26[%c0_306, %c0_307] : memref<1x2xf32, #tpu.memory_space<vmem>>, vector<1x2xf32>
    %631 = vector.broadcast %630 : vector<1x2xf32> to vector<4x2xf32>
    %632 = arith.addf %629, %631 : vector<4x2xf32>
    %c3_308 = arith.constant 3 : index
    %c0_309 = arith.constant 0 : index
    %c0_310 = arith.constant 0 : index
    %633 = vector.load %arg27[%c3_308, %c0_309, %c0_310] : memref<6x4x2xf32, #tpu.memory_space<vmem>>, vector<1x4x2xf32>
    %634 = vector.shape_cast %633 : vector<1x4x2xf32> to vector<4x2xf32>
    %635 = vector.shape_cast %632 : vector<4x2xf32> to vector<1x4x2xf32>
    tpu.vector_store %arg27[%c3_308, %c0_309, %c0_310], %635 {strides = array<i32>} : memref<6x4x2xf32, #tpu.memory_space<vmem>>, vector<1x4x2xf32>,
    %636 = vector.extract_strided_slice %15 {offsets = [32, 0], sizes = [8, 384], strides = [1, 1]} : vector<48x384xf32> to vector<8x384xf32>
    %c0_311 = arith.constant 0 : index
    %c0_312 = arith.constant 0 : index
    %637 = vector.load %arg10[%c0_311, %c0_312] : memref<384x256xf32, #tpu.memory_space<vmem>>, vector<384x256xf32>
    %c0_313 = arith.constant 0 : index
    %c0_314 = arith.constant 0 : index
    %638 = vector.load %arg11[%c0_313, %c0_314] : memref<384x128xf32, #tpu.memory_space<vmem>>, vector<384x128xf32>
    %cst_315 = arith.constant dense<0.000000e+00> : vector<8x128xf32>
    %639 = tpu.matmul %516, %0, %cst_315 {dimension_numbers = #tpu.dot_dimension_numbers<[1], [0], [0], [1], [0, 0, 1, 1], [], []>} : vector<8x128xf32>, vector<128x128xf32>, vector<8x128xf32> -> vector<8x128xf32>
    %cst_316 = arith.constant dense<0.000000e+00> : vector<8x128xf32>
    %640 = tpu.matmul %639, %0, %cst_316 {dimension_numbers = #tpu.dot_dimension_numbers<[1], [0], [0], [1], [0, 0, 1, 1], [], []>} : vector<8x128xf32>, vector<128x128xf32>, vector<8x128xf32> -> vector<8x128xf32>
    %cst_317 = arith.constant 2.000000e+00 : f32
    %641 = vector.broadcast %cst_317 : f32 to vector<8x128xf32>
    %642 = arith.mulf %641, %640 : vector<8x128xf32>
    %643 = arith.subf %642, %516 : vector<8x128xf32>
    %644 = tpu.concatenate %516, %639, %643 in 1 : vector<8x128xf32>, vector<8x128xf32>, vector<8x128xf32> -> vector<8x384xf32>
    %645 = vector.extract_strided_slice %636 {offsets = [0, 0], sizes = [8, 256], strides = [1, 1]} : vector<8x384xf32> to vector<8x256xf32>
    %cst_318 = arith.constant dense<0.000000e+00> : vector<8x256xf32>
    %646 = tpu.matmul %644, %637, %cst_318 {dimension_numbers = #tpu.dot_dimension_numbers<[1], [0], [0], [1], [0, 0, 1, 1], [], []>} : vector<8x384xf32>, vector<384x256xf32>, vector<8x256xf32> -> vector<8x256xf32>
    %647 = arith.addf %645, %646 : vector<8x256xf32>
    %648 = arith.negf %647 : vector<8x256xf32>
    %649 = math.exp %648 : vector<8x256xf32>
    %cst_319 = arith.constant 1.000000e+00 : f32
    %650 = vector.broadcast %cst_319 : f32 to vector<8x256xf32>
    %651 = arith.addf %650, %649 : vector<8x256xf32>
    %652 = arith.divf %650, %651 : vector<8x256xf32>
    %653 = vector.extract_strided_slice %652 {offsets = [0, 0], sizes = [8, 128], strides = [1, 1]} : vector<8x256xf32> to vector<8x128xf32>
    %654 = vector.extract_strided_slice %652 {offsets = [0, 128], sizes = [8, 128], strides = [1, 1]} : vector<8x256xf32> to vector<8x128xf32>
    %655 = arith.mulf %653, %516 : vector<8x128xf32>
    %cst_320 = arith.constant dense<0.000000e+00> : vector<8x128xf32>
    %656 = tpu.matmul %655, %0, %cst_320 {dimension_numbers = #tpu.dot_dimension_numbers<[1], [0], [0], [1], [0, 0, 1, 1], [], []>} : vector<8x128xf32>, vector<128x128xf32>, vector<8x128xf32> -> vector<8x128xf32>
    %cst_321 = arith.constant dense<0.000000e+00> : vector<8x128xf32>
    %657 = tpu.matmul %656, %0, %cst_321 {dimension_numbers = #tpu.dot_dimension_numbers<[1], [0], [0], [1], [0, 0, 1, 1], [], []>} : vector<8x128xf32>, vector<128x128xf32>, vector<8x128xf32> -> vector<8x128xf32>
    %cst_322 = arith.constant 2.000000e+00 : f32
    %658 = vector.broadcast %cst_322 : f32 to vector<8x128xf32>
    %659 = arith.mulf %658, %657 : vector<8x128xf32>
    %660 = arith.subf %659, %655 : vector<8x128xf32>
    %661 = tpu.concatenate %655, %656, %660 in 1 : vector<8x128xf32>, vector<8x128xf32>, vector<8x128xf32> -> vector<8x384xf32>
    %662 = vector.extract_strided_slice %636 {offsets = [0, 256], sizes = [8, 128], strides = [1, 1]} : vector<8x384xf32> to vector<8x128xf32>
    %cst_323 = arith.constant dense<0.000000e+00> : vector<8x128xf32>
    %663 = tpu.matmul %661, %638, %cst_323 {dimension_numbers = #tpu.dot_dimension_numbers<[1], [0], [0], [1], [0, 0, 1, 1], [], []>} : vector<8x384xf32>, vector<384x128xf32>, vector<8x128xf32> -> vector<8x128xf32>
    %664 = arith.addf %662, %663 : vector<8x128xf32>
    %665 = math.tanh %664 : vector<8x128xf32>
    %666 = arith.mulf %654, %516 : vector<8x128xf32>
    %cst_324 = arith.constant 1.000000e+00 : f32
    %667 = vector.broadcast %cst_324 : f32 to vector<8x128xf32>
    %668 = arith.subf %667, %654 : vector<8x128xf32>
    %669 = arith.mulf %668, %665 : vector<8x128xf32>
    %670 = arith.addf %666, %669 : vector<8x128xf32>
    %c0_325 = arith.constant 0 : index
    %c0_326 = arith.constant 0 : index
    %671 = vector.load %arg13[%c0_325, %c0_326] : memref<128x16xf32, #tpu.memory_space<vmem>>, vector<128x16xf32>
    %cst_327 = arith.constant dense<0.000000e+00> : vector<8x16xf32>
    %672 = tpu.matmul %670, %671, %cst_327 {dimension_numbers = #tpu.dot_dimension_numbers<[1], [0], [0], [1], [0, 0, 1, 1], [], []>} : vector<8x128xf32>, vector<128x16xf32>, vector<8x16xf32> -> vector<8x16xf32>
    %c0_328 = arith.constant 0 : index
    %c0_329 = arith.constant 0 : index
    %673 = vector.load %arg14[%c0_328, %c0_329] : memref<1x16xf32, #tpu.memory_space<vmem>>, vector<1x16xf32>
    %674 = vector.broadcast %673 : vector<1x16xf32> to vector<8x16xf32>
    %675 = arith.addf %672, %674 : vector<8x16xf32>
    %c32 = arith.constant 32 : index
    %c0_330 = arith.constant 0 : index
    %676 = vector.load %arg3[%c32, %c0_330] : memref<48x2xf32, #tpu.memory_space<vmem>>, vector<8x2xf32>
    %c32_331 = arith.constant 32 : index
    %c0_332 = arith.constant 0 : index
    %677 = vector.load %arg4[%c32_331, %c0_332] : memref<48x2xf32, #tpu.memory_space<vmem>>, vector<8x2xf32>
    %678 = tpu.concatenate %675, %676, %677 in 1 : vector<8x16xf32>, vector<8x2xf32>, vector<8x2xf32> -> vector<8x20xf32>
    %c0_333 = arith.constant 0 : index
    %c0_334 = arith.constant 0 : index
    %679 = vector.load %arg15[%c0_333, %c0_334] : memref<20x48xf32, #tpu.memory_space<vmem>>, vector<20x48xf32>
    %c0_335 = arith.constant 0 : index
    %c0_336 = arith.constant 0 : index
    %680 = vector.load %arg16[%c0_335, %c0_336] : memref<16x48xf32, #tpu.memory_space<vmem>>, vector<16x48xf32>
    %c0_337 = arith.constant 0 : index
    %c0_338 = arith.constant 0 : index
    %681 = vector.load %arg17[%c0_337, %c0_338] : memref<1x48xf32, #tpu.memory_space<vmem>>, vector<1x48xf32>
    %c0_339 = arith.constant 0 : index
    %c0_340 = arith.constant 0 : index
    %682 = vector.load %arg18[%c0_339, %c0_340] : memref<1x48xf32, #tpu.memory_space<vmem>>, vector<1x48xf32>
    %cst_341 = arith.constant dense<0.000000e+00> : vector<8x48xf32>
    %683 = tpu.matmul %678, %679, %cst_341 {dimension_numbers = #tpu.dot_dimension_numbers<[1], [0], [0], [1], [0, 0, 1, 1], [], []>} : vector<8x20xf32>, vector<20x48xf32>, vector<8x48xf32> -> vector<8x48xf32>
    %684 = vector.broadcast %681 : vector<1x48xf32> to vector<8x48xf32>
    %685 = arith.addf %683, %684 : vector<8x48xf32>
    %cst_342 = arith.constant dense<0.000000e+00> : vector<8x48xf32>
    %686 = tpu.matmul %560, %680, %cst_342 {dimension_numbers = #tpu.dot_dimension_numbers<[1], [0], [0], [1], [0, 0, 1, 1], [], []>} : vector<8x16xf32>, vector<16x48xf32>, vector<8x48xf32> -> vector<8x48xf32>
    %687 = vector.broadcast %682 : vector<1x48xf32> to vector<8x48xf32>
    %688 = arith.addf %686, %687 : vector<8x48xf32>
    %689 = vector.extract_strided_slice %685 {offsets = [0, 0], sizes = [8, 16], strides = [1, 1]} : vector<8x48xf32> to vector<8x16xf32>
    %690 = vector.extract_strided_slice %688 {offsets = [0, 0], sizes = [8, 16], strides = [1, 1]} : vector<8x48xf32> to vector<8x16xf32>
    %691 = arith.addf %689, %690 : vector<8x16xf32>
    %692 = arith.negf %691 : vector<8x16xf32>
    %693 = math.exp %692 : vector<8x16xf32>
    %cst_343 = arith.constant 1.000000e+00 : f32
    %694 = vector.broadcast %cst_343 : f32 to vector<8x16xf32>
    %695 = arith.addf %694, %693 : vector<8x16xf32>
    %696 = arith.divf %694, %695 : vector<8x16xf32>
    %697 = vector.extract_strided_slice %685 {offsets = [0, 16], sizes = [8, 16], strides = [1, 1]} : vector<8x48xf32> to vector<8x16xf32>
    %698 = vector.extract_strided_slice %688 {offsets = [0, 16], sizes = [8, 16], strides = [1, 1]} : vector<8x48xf32> to vector<8x16xf32>
    %699 = arith.addf %697, %698 : vector<8x16xf32>
    %700 = arith.negf %699 : vector<8x16xf32>
    %701 = math.exp %700 : vector<8x16xf32>
    %cst_344 = arith.constant 1.000000e+00 : f32
    %702 = vector.broadcast %cst_344 : f32 to vector<8x16xf32>
    %703 = arith.addf %702, %701 : vector<8x16xf32>
    %704 = arith.divf %702, %703 : vector<8x16xf32>
    %705 = vector.extract_strided_slice %685 {offsets = [0, 32], sizes = [8, 16], strides = [1, 1]} : vector<8x48xf32> to vector<8x16xf32>
    %706 = vector.extract_strided_slice %688 {offsets = [0, 32], sizes = [8, 16], strides = [1, 1]} : vector<8x48xf32> to vector<8x16xf32>
    %707 = arith.mulf %696, %706 : vector<8x16xf32>
    %708 = arith.addf %705, %707 : vector<8x16xf32>
    %709 = math.tanh %708 : vector<8x16xf32>
    %cst_345 = arith.constant 1.000000e+00 : f32
    %710 = vector.broadcast %cst_345 : f32 to vector<8x16xf32>
    %711 = arith.subf %710, %704 : vector<8x16xf32>
    %712 = arith.mulf %711, %709 : vector<8x16xf32>
    %713 = arith.mulf %704, %560 : vector<8x16xf32>
    %714 = arith.addf %712, %713 : vector<8x16xf32>
    %cst_346 = arith.constant dense<0.000000e+00> : vector<2x16xf32>
    %715 = tpu.matmul %1, %714, %cst_346 {dimension_numbers = #tpu.dot_dimension_numbers<[1], [0], [0], [1], [0, 0, 1, 1], [], []>} : vector<2x8xf32>, vector<8x16xf32>, vector<2x16xf32> -> vector<2x16xf32>
    %c0_347 = arith.constant 0 : index
    %c0_348 = arith.constant 0 : index
    %716 = vector.load %arg19[%c0_347, %c0_348] : memref<16x16xf32, #tpu.memory_space<vmem>>, vector<16x16xf32>
    %cst_349 = arith.constant dense<0.000000e+00> : vector<2x16xf32>
    %717 = tpu.matmul %715, %716, %cst_349 {dimension_numbers = #tpu.dot_dimension_numbers<[1], [0], [0], [1], [0, 0, 1, 1], [], []>} : vector<2x16xf32>, vector<16x16xf32>, vector<2x16xf32> -> vector<2x16xf32>
    %c0_350 = arith.constant 0 : index
    %c0_351 = arith.constant 0 : index
    %718 = vector.load %arg20[%c0_350, %c0_351] : memref<1x16xf32, #tpu.memory_space<vmem>>, vector<1x16xf32>
    %719 = vector.broadcast %718 : vector<1x16xf32> to vector<2x16xf32>
    %720 = arith.addf %717, %719 : vector<2x16xf32>
    %c4 = arith.constant 4 : index
    %c0_352 = arith.constant 0 : index
    %c0_353 = arith.constant 0 : index
    %721 = vector.load %arg28[%c4, %c0_352, %c0_353] : memref<6x2x16xf32, #tpu.memory_space<vmem>>, vector<1x2x16xf32>
    %722 = vector.shape_cast %721 : vector<1x2x16xf32> to vector<2x16xf32>
    %723 = vector.shape_cast %720 : vector<2x16xf32> to vector<1x2x16xf32>
    tpu.vector_store %arg28[%c4, %c0_352, %c0_353], %723 {strides = array<i32>} : memref<6x2x16xf32, #tpu.memory_space<vmem>>, vector<1x2x16xf32>,
    %724 = vector.extract_strided_slice %720 {offsets = [0, 0], sizes = [1, 8], strides = [1, 1]} : vector<2x16xf32> to vector<1x8xf32>
    %725 = vector.extract_strided_slice %720 {offsets = [0, 8], sizes = [1, 8], strides = [1, 1]} : vector<2x16xf32> to vector<1x8xf32>
    %726 = arith.negf %725 : vector<1x8xf32>
    %727 = math.exp %726 : vector<1x8xf32>
    %cst_354 = arith.constant 1.000000e+00 : f32
    %728 = vector.broadcast %cst_354 : f32 to vector<1x8xf32>
    %729 = arith.addf %728, %727 : vector<1x8xf32>
    %730 = arith.divf %728, %729 : vector<1x8xf32>
    %cst_355 = arith.constant 0.899999976 : f32
    %731 = vector.broadcast %cst_355 : f32 to vector<1x8xf32>
    %732 = arith.mulf %731, %730 : vector<1x8xf32>
    %cst_356 = arith.constant 1.000000e-01 : f32
    %733 = vector.broadcast %cst_356 : f32 to vector<1x8xf32>
    %734 = arith.addf %733, %732 : vector<1x8xf32>
    %735 = math.sqrt %734 : vector<1x8xf32>
    %c4_357 = arith.constant 4 : index
    %c0_358 = arith.constant 0 : index
    %c0_359 = arith.constant 0 : index
    %736 = vector.load %arg8[%c4_357, %c0_358, %c0_359] : memref<6x4x8xf32, #tpu.memory_space<vmem>>, vector<1x4x8xf32>
    %737 = vector.shape_cast %736 : vector<1x4x8xf32> to vector<4x8xf32>
    %738 = vector.broadcast %735 : vector<1x8xf32> to vector<4x8xf32>
    %739 = arith.mulf %738, %737 : vector<4x8xf32>
    %740 = vector.broadcast %724 : vector<1x8xf32> to vector<4x8xf32>
    %741 = arith.addf %740, %739 : vector<4x8xf32>
    %cst_360 = arith.constant dense<0.000000e+00> : vector<4x16xf32>
    %742 = tpu.matmul %2, %675, %cst_360 {dimension_numbers = #tpu.dot_dimension_numbers<[1], [0], [0], [1], [0, 0, 1, 1], [], []>} : vector<4x8xf32>, vector<8x16xf32>, vector<4x16xf32> -> vector<4x16xf32>
    %743 = tpu.concatenate %742, %741, %632 in 1 : vector<4x16xf32>, vector<4x8xf32>, vector<4x2xf32> -> vector<4x26xf32>
    %c0_361 = arith.constant 0 : index
    %c0_362 = arith.constant 0 : index
    %744 = vector.load %arg21[%c0_361, %c0_362] : memref<26x48xf32, #tpu.memory_space<vmem>>, vector<26x48xf32>
    %c0_363 = arith.constant 0 : index
    %c0_364 = arith.constant 0 : index
    %745 = vector.load %arg22[%c0_363, %c0_364] : memref<16x48xf32, #tpu.memory_space<vmem>>, vector<16x48xf32>
    %c0_365 = arith.constant 0 : index
    %c0_366 = arith.constant 0 : index
    %746 = vector.load %arg23[%c0_365, %c0_366] : memref<1x48xf32, #tpu.memory_space<vmem>>, vector<1x48xf32>
    %c0_367 = arith.constant 0 : index
    %c0_368 = arith.constant 0 : index
    %747 = vector.load %arg24[%c0_367, %c0_368] : memref<1x48xf32, #tpu.memory_space<vmem>>, vector<1x48xf32>
    %cst_369 = arith.constant dense<0.000000e+00> : vector<4x48xf32>
    %748 = tpu.matmul %743, %744, %cst_369 {dimension_numbers = #tpu.dot_dimension_numbers<[1], [0], [0], [1], [0, 0, 1, 1], [], []>} : vector<4x26xf32>, vector<26x48xf32>, vector<4x48xf32> -> vector<4x48xf32>
    %749 = vector.broadcast %746 : vector<1x48xf32> to vector<4x48xf32>
    %750 = arith.addf %748, %749 : vector<4x48xf32>
    %cst_370 = arith.constant dense<0.000000e+00> : vector<4x48xf32>
    %751 = tpu.matmul %625, %745, %cst_370 {dimension_numbers = #tpu.dot_dimension_numbers<[1], [0], [0], [1], [0, 0, 1, 1], [], []>} : vector<4x16xf32>, vector<16x48xf32>, vector<4x48xf32> -> vector<4x48xf32>
    %752 = vector.broadcast %747 : vector<1x48xf32> to vector<4x48xf32>
    %753 = arith.addf %751, %752 : vector<4x48xf32>
    %754 = vector.extract_strided_slice %750 {offsets = [0, 0], sizes = [4, 16], strides = [1, 1]} : vector<4x48xf32> to vector<4x16xf32>
    %755 = vector.extract_strided_slice %753 {offsets = [0, 0], sizes = [4, 16], strides = [1, 1]} : vector<4x48xf32> to vector<4x16xf32>
    %756 = arith.addf %754, %755 : vector<4x16xf32>
    %757 = arith.negf %756 : vector<4x16xf32>
    %758 = math.exp %757 : vector<4x16xf32>
    %cst_371 = arith.constant 1.000000e+00 : f32
    %759 = vector.broadcast %cst_371 : f32 to vector<4x16xf32>
    %760 = arith.addf %759, %758 : vector<4x16xf32>
    %761 = arith.divf %759, %760 : vector<4x16xf32>
    %762 = vector.extract_strided_slice %750 {offsets = [0, 16], sizes = [4, 16], strides = [1, 1]} : vector<4x48xf32> to vector<4x16xf32>
    %763 = vector.extract_strided_slice %753 {offsets = [0, 16], sizes = [4, 16], strides = [1, 1]} : vector<4x48xf32> to vector<4x16xf32>
    %764 = arith.addf %762, %763 : vector<4x16xf32>
    %765 = arith.negf %764 : vector<4x16xf32>
    %766 = math.exp %765 : vector<4x16xf32>
    %cst_372 = arith.constant 1.000000e+00 : f32
    %767 = vector.broadcast %cst_372 : f32 to vector<4x16xf32>
    %768 = arith.addf %767, %766 : vector<4x16xf32>
    %769 = arith.divf %767, %768 : vector<4x16xf32>
    %770 = vector.extract_strided_slice %750 {offsets = [0, 32], sizes = [4, 16], strides = [1, 1]} : vector<4x48xf32> to vector<4x16xf32>
    %771 = vector.extract_strided_slice %753 {offsets = [0, 32], sizes = [4, 16], strides = [1, 1]} : vector<4x48xf32> to vector<4x16xf32>
    %772 = arith.mulf %761, %771 : vector<4x16xf32>
    %773 = arith.addf %770, %772 : vector<4x16xf32>
    %774 = math.tanh %773 : vector<4x16xf32>
    %cst_373 = arith.constant 1.000000e+00 : f32
    %775 = vector.broadcast %cst_373 : f32 to vector<4x16xf32>
    %776 = arith.subf %775, %769 : vector<4x16xf32>
    %777 = arith.mulf %776, %774 : vector<4x16xf32>
    %778 = arith.mulf %769, %625 : vector<4x16xf32>
    %779 = arith.addf %777, %778 : vector<4x16xf32>
    %cst_374 = arith.constant 0.000000e+00 : f32
    %780 = vector.broadcast %cst_374 : f32 to vector<4x16xf32>
    %781 = arith.maximumf %779, %780 : vector<4x16xf32>
    %c0_375 = arith.constant 0 : index
    %c0_376 = arith.constant 0 : index
    %782 = vector.load %arg25[%c0_375, %c0_376] : memref<16x2xf32, #tpu.memory_space<vmem>>, vector<16x2xf32>
    %cst_377 = arith.constant dense<0.000000e+00> : vector<4x2xf32>
    %783 = tpu.matmul %781, %782, %cst_377 {dimension_numbers = #tpu.dot_dimension_numbers<[1], [0], [0], [1], [0, 0, 1, 1], [], []>} : vector<4x16xf32>, vector<16x2xf32>, vector<4x2xf32> -> vector<4x2xf32>
    %c0_378 = arith.constant 0 : index
    %c0_379 = arith.constant 0 : index
    %784 = vector.load %arg26[%c0_378, %c0_379] : memref<1x2xf32, #tpu.memory_space<vmem>>, vector<1x2xf32>
    %785 = vector.broadcast %784 : vector<1x2xf32> to vector<4x2xf32>
    %786 = arith.addf %783, %785 : vector<4x2xf32>
    %c4_380 = arith.constant 4 : index
    %c0_381 = arith.constant 0 : index
    %c0_382 = arith.constant 0 : index
    %787 = vector.load %arg27[%c4_380, %c0_381, %c0_382] : memref<6x4x2xf32, #tpu.memory_space<vmem>>, vector<1x4x2xf32>
    %788 = vector.shape_cast %787 : vector<1x4x2xf32> to vector<4x2xf32>
    %789 = vector.shape_cast %786 : vector<4x2xf32> to vector<1x4x2xf32>
    tpu.vector_store %arg27[%c4_380, %c0_381, %c0_382], %789 {strides = array<i32>} : memref<6x4x2xf32, #tpu.memory_space<vmem>>, vector<1x4x2xf32>,
    %790 = vector.extract_strided_slice %15 {offsets = [40, 0], sizes = [8, 384], strides = [1, 1]} : vector<48x384xf32> to vector<8x384xf32>
    %c0_383 = arith.constant 0 : index
    %c0_384 = arith.constant 0 : index
    %791 = vector.load %arg10[%c0_383, %c0_384] : memref<384x256xf32, #tpu.memory_space<vmem>>, vector<384x256xf32>
    %c0_385 = arith.constant 0 : index
    %c0_386 = arith.constant 0 : index
    %792 = vector.load %arg11[%c0_385, %c0_386] : memref<384x128xf32, #tpu.memory_space<vmem>>, vector<384x128xf32>
    %cst_387 = arith.constant dense<0.000000e+00> : vector<8x128xf32>
    %793 = tpu.matmul %670, %0, %cst_387 {dimension_numbers = #tpu.dot_dimension_numbers<[1], [0], [0], [1], [0, 0, 1, 1], [], []>} : vector<8x128xf32>, vector<128x128xf32>, vector<8x128xf32> -> vector<8x128xf32>
    %cst_388 = arith.constant dense<0.000000e+00> : vector<8x128xf32>
    %794 = tpu.matmul %793, %0, %cst_388 {dimension_numbers = #tpu.dot_dimension_numbers<[1], [0], [0], [1], [0, 0, 1, 1], [], []>} : vector<8x128xf32>, vector<128x128xf32>, vector<8x128xf32> -> vector<8x128xf32>
    %cst_389 = arith.constant 2.000000e+00 : f32
    %795 = vector.broadcast %cst_389 : f32 to vector<8x128xf32>
    %796 = arith.mulf %795, %794 : vector<8x128xf32>
    %797 = arith.subf %796, %670 : vector<8x128xf32>
    %798 = tpu.concatenate %670, %793, %797 in 1 : vector<8x128xf32>, vector<8x128xf32>, vector<8x128xf32> -> vector<8x384xf32>
    %799 = vector.extract_strided_slice %790 {offsets = [0, 0], sizes = [8, 256], strides = [1, 1]} : vector<8x384xf32> to vector<8x256xf32>
    %cst_390 = arith.constant dense<0.000000e+00> : vector<8x256xf32>
    %800 = tpu.matmul %798, %791, %cst_390 {dimension_numbers = #tpu.dot_dimension_numbers<[1], [0], [0], [1], [0, 0, 1, 1], [], []>} : vector<8x384xf32>, vector<384x256xf32>, vector<8x256xf32> -> vector<8x256xf32>
    %801 = arith.addf %799, %800 : vector<8x256xf32>
    %802 = arith.negf %801 : vector<8x256xf32>
    %803 = math.exp %802 : vector<8x256xf32>
    %cst_391 = arith.constant 1.000000e+00 : f32
    %804 = vector.broadcast %cst_391 : f32 to vector<8x256xf32>
    %805 = arith.addf %804, %803 : vector<8x256xf32>
    %806 = arith.divf %804, %805 : vector<8x256xf32>
    %807 = vector.extract_strided_slice %806 {offsets = [0, 0], sizes = [8, 128], strides = [1, 1]} : vector<8x256xf32> to vector<8x128xf32>
    %808 = vector.extract_strided_slice %806 {offsets = [0, 128], sizes = [8, 128], strides = [1, 1]} : vector<8x256xf32> to vector<8x128xf32>
    %809 = arith.mulf %807, %670 : vector<8x128xf32>
    %cst_392 = arith.constant dense<0.000000e+00> : vector<8x128xf32>
    %810 = tpu.matmul %809, %0, %cst_392 {dimension_numbers = #tpu.dot_dimension_numbers<[1], [0], [0], [1], [0, 0, 1, 1], [], []>} : vector<8x128xf32>, vector<128x128xf32>, vector<8x128xf32> -> vector<8x128xf32>
    %cst_393 = arith.constant dense<0.000000e+00> : vector<8x128xf32>
    %811 = tpu.matmul %810, %0, %cst_393 {dimension_numbers = #tpu.dot_dimension_numbers<[1], [0], [0], [1], [0, 0, 1, 1], [], []>} : vector<8x128xf32>, vector<128x128xf32>, vector<8x128xf32> -> vector<8x128xf32>
    %cst_394 = arith.constant 2.000000e+00 : f32
    %812 = vector.broadcast %cst_394 : f32 to vector<8x128xf32>
    %813 = arith.mulf %812, %811 : vector<8x128xf32>
    %814 = arith.subf %813, %809 : vector<8x128xf32>
    %815 = tpu.concatenate %809, %810, %814 in 1 : vector<8x128xf32>, vector<8x128xf32>, vector<8x128xf32> -> vector<8x384xf32>
    %816 = vector.extract_strided_slice %790 {offsets = [0, 256], sizes = [8, 128], strides = [1, 1]} : vector<8x384xf32> to vector<8x128xf32>
    %cst_395 = arith.constant dense<0.000000e+00> : vector<8x128xf32>
    %817 = tpu.matmul %815, %792, %cst_395 {dimension_numbers = #tpu.dot_dimension_numbers<[1], [0], [0], [1], [0, 0, 1, 1], [], []>} : vector<8x384xf32>, vector<384x128xf32>, vector<8x128xf32> -> vector<8x128xf32>
    %818 = arith.addf %816, %817 : vector<8x128xf32>
    %819 = math.tanh %818 : vector<8x128xf32>
    %820 = arith.mulf %808, %670 : vector<8x128xf32>
    %cst_396 = arith.constant 1.000000e+00 : f32
    %821 = vector.broadcast %cst_396 : f32 to vector<8x128xf32>
    %822 = arith.subf %821, %808 : vector<8x128xf32>
    %823 = arith.mulf %822, %819 : vector<8x128xf32>
    %824 = arith.addf %820, %823 : vector<8x128xf32>
    %c0_397 = arith.constant 0 : index
    %c0_398 = arith.constant 0 : index
    %825 = vector.load %arg13[%c0_397, %c0_398] : memref<128x16xf32, #tpu.memory_space<vmem>>, vector<128x16xf32>
    %cst_399 = arith.constant dense<0.000000e+00> : vector<8x16xf32>
    %826 = tpu.matmul %824, %825, %cst_399 {dimension_numbers = #tpu.dot_dimension_numbers<[1], [0], [0], [1], [0, 0, 1, 1], [], []>} : vector<8x128xf32>, vector<128x16xf32>, vector<8x16xf32> -> vector<8x16xf32>
    %c0_400 = arith.constant 0 : index
    %c0_401 = arith.constant 0 : index
    %827 = vector.load %arg14[%c0_400, %c0_401] : memref<1x16xf32, #tpu.memory_space<vmem>>, vector<1x16xf32>
    %828 = vector.broadcast %827 : vector<1x16xf32> to vector<8x16xf32>
    %829 = arith.addf %826, %828 : vector<8x16xf32>
    %c40 = arith.constant 40 : index
    %c0_402 = arith.constant 0 : index
    %830 = vector.load %arg3[%c40, %c0_402] : memref<48x2xf32, #tpu.memory_space<vmem>>, vector<8x2xf32>
    %c40_403 = arith.constant 40 : index
    %c0_404 = arith.constant 0 : index
    %831 = vector.load %arg4[%c40_403, %c0_404] : memref<48x2xf32, #tpu.memory_space<vmem>>, vector<8x2xf32>
    %832 = tpu.concatenate %829, %830, %831 in 1 : vector<8x16xf32>, vector<8x2xf32>, vector<8x2xf32> -> vector<8x20xf32>
    %c0_405 = arith.constant 0 : index
    %c0_406 = arith.constant 0 : index
    %833 = vector.load %arg15[%c0_405, %c0_406] : memref<20x48xf32, #tpu.memory_space<vmem>>, vector<20x48xf32>
    %c0_407 = arith.constant 0 : index
    %c0_408 = arith.constant 0 : index
    %834 = vector.load %arg16[%c0_407, %c0_408] : memref<16x48xf32, #tpu.memory_space<vmem>>, vector<16x48xf32>
    %c0_409 = arith.constant 0 : index
    %c0_410 = arith.constant 0 : index
    %835 = vector.load %arg17[%c0_409, %c0_410] : memref<1x48xf32, #tpu.memory_space<vmem>>, vector<1x48xf32>
    %c0_411 = arith.constant 0 : index
    %c0_412 = arith.constant 0 : index
    %836 = vector.load %arg18[%c0_411, %c0_412] : memref<1x48xf32, #tpu.memory_space<vmem>>, vector<1x48xf32>
    %cst_413 = arith.constant dense<0.000000e+00> : vector<8x48xf32>
    %837 = tpu.matmul %832, %833, %cst_413 {dimension_numbers = #tpu.dot_dimension_numbers<[1], [0], [0], [1], [0, 0, 1, 1], [], []>} : vector<8x20xf32>, vector<20x48xf32>, vector<8x48xf32> -> vector<8x48xf32>
    %838 = vector.broadcast %835 : vector<1x48xf32> to vector<8x48xf32>
    %839 = arith.addf %837, %838 : vector<8x48xf32>
    %cst_414 = arith.constant dense<0.000000e+00> : vector<8x48xf32>
    %840 = tpu.matmul %714, %834, %cst_414 {dimension_numbers = #tpu.dot_dimension_numbers<[1], [0], [0], [1], [0, 0, 1, 1], [], []>} : vector<8x16xf32>, vector<16x48xf32>, vector<8x48xf32> -> vector<8x48xf32>
    %841 = vector.broadcast %836 : vector<1x48xf32> to vector<8x48xf32>
    %842 = arith.addf %840, %841 : vector<8x48xf32>
    %843 = vector.extract_strided_slice %839 {offsets = [0, 0], sizes = [8, 16], strides = [1, 1]} : vector<8x48xf32> to vector<8x16xf32>
    %844 = vector.extract_strided_slice %842 {offsets = [0, 0], sizes = [8, 16], strides = [1, 1]} : vector<8x48xf32> to vector<8x16xf32>
    %845 = arith.addf %843, %844 : vector<8x16xf32>
    %846 = arith.negf %845 : vector<8x16xf32>
    %847 = math.exp %846 : vector<8x16xf32>
    %cst_415 = arith.constant 1.000000e+00 : f32
    %848 = vector.broadcast %cst_415 : f32 to vector<8x16xf32>
    %849 = arith.addf %848, %847 : vector<8x16xf32>
    %850 = arith.divf %848, %849 : vector<8x16xf32>
    %851 = vector.extract_strided_slice %839 {offsets = [0, 16], sizes = [8, 16], strides = [1, 1]} : vector<8x48xf32> to vector<8x16xf32>
    %852 = vector.extract_strided_slice %842 {offsets = [0, 16], sizes = [8, 16], strides = [1, 1]} : vector<8x48xf32> to vector<8x16xf32>
    %853 = arith.addf %851, %852 : vector<8x16xf32>
    %854 = arith.negf %853 : vector<8x16xf32>
    %855 = math.exp %854 : vector<8x16xf32>
    %cst_416 = arith.constant 1.000000e+00 : f32
    %856 = vector.broadcast %cst_416 : f32 to vector<8x16xf32>
    %857 = arith.addf %856, %855 : vector<8x16xf32>
    %858 = arith.divf %856, %857 : vector<8x16xf32>
    %859 = vector.extract_strided_slice %839 {offsets = [0, 32], sizes = [8, 16], strides = [1, 1]} : vector<8x48xf32> to vector<8x16xf32>
    %860 = vector.extract_strided_slice %842 {offsets = [0, 32], sizes = [8, 16], strides = [1, 1]} : vector<8x48xf32> to vector<8x16xf32>
    %861 = arith.mulf %850, %860 : vector<8x16xf32>
    %862 = arith.addf %859, %861 : vector<8x16xf32>
    %863 = math.tanh %862 : vector<8x16xf32>
    %cst_417 = arith.constant 1.000000e+00 : f32
    %864 = vector.broadcast %cst_417 : f32 to vector<8x16xf32>
    %865 = arith.subf %864, %858 : vector<8x16xf32>
    %866 = arith.mulf %865, %863 : vector<8x16xf32>
    %867 = arith.mulf %858, %714 : vector<8x16xf32>
    %868 = arith.addf %866, %867 : vector<8x16xf32>
    %cst_418 = arith.constant dense<0.000000e+00> : vector<2x16xf32>
    %869 = tpu.matmul %1, %868, %cst_418 {dimension_numbers = #tpu.dot_dimension_numbers<[1], [0], [0], [1], [0, 0, 1, 1], [], []>} : vector<2x8xf32>, vector<8x16xf32>, vector<2x16xf32> -> vector<2x16xf32>
    %c0_419 = arith.constant 0 : index
    %c0_420 = arith.constant 0 : index
    %870 = vector.load %arg19[%c0_419, %c0_420] : memref<16x16xf32, #tpu.memory_space<vmem>>, vector<16x16xf32>
    %cst_421 = arith.constant dense<0.000000e+00> : vector<2x16xf32>
    %871 = tpu.matmul %869, %870, %cst_421 {dimension_numbers = #tpu.dot_dimension_numbers<[1], [0], [0], [1], [0, 0, 1, 1], [], []>} : vector<2x16xf32>, vector<16x16xf32>, vector<2x16xf32> -> vector<2x16xf32>
    %c0_422 = arith.constant 0 : index
    %c0_423 = arith.constant 0 : index
    %872 = vector.load %arg20[%c0_422, %c0_423] : memref<1x16xf32, #tpu.memory_space<vmem>>, vector<1x16xf32>
    %873 = vector.broadcast %872 : vector<1x16xf32> to vector<2x16xf32>
    %874 = arith.addf %871, %873 : vector<2x16xf32>
    %c5 = arith.constant 5 : index
    %c0_424 = arith.constant 0 : index
    %c0_425 = arith.constant 0 : index
    %875 = vector.load %arg28[%c5, %c0_424, %c0_425] : memref<6x2x16xf32, #tpu.memory_space<vmem>>, vector<1x2x16xf32>
    %876 = vector.shape_cast %875 : vector<1x2x16xf32> to vector<2x16xf32>
    %877 = vector.shape_cast %874 : vector<2x16xf32> to vector<1x2x16xf32>
    tpu.vector_store %arg28[%c5, %c0_424, %c0_425], %877 {strides = array<i32>} : memref<6x2x16xf32, #tpu.memory_space<vmem>>, vector<1x2x16xf32>,
    %878 = vector.extract_strided_slice %874 {offsets = [0, 0], sizes = [1, 8], strides = [1, 1]} : vector<2x16xf32> to vector<1x8xf32>
    %879 = vector.extract_strided_slice %874 {offsets = [0, 8], sizes = [1, 8], strides = [1, 1]} : vector<2x16xf32> to vector<1x8xf32>
    %880 = arith.negf %879 : vector<1x8xf32>
    %881 = math.exp %880 : vector<1x8xf32>
    %cst_426 = arith.constant 1.000000e+00 : f32
    %882 = vector.broadcast %cst_426 : f32 to vector<1x8xf32>
    %883 = arith.addf %882, %881 : vector<1x8xf32>
    %884 = arith.divf %882, %883 : vector<1x8xf32>
    %cst_427 = arith.constant 0.899999976 : f32
    %885 = vector.broadcast %cst_427 : f32 to vector<1x8xf32>
    %886 = arith.mulf %885, %884 : vector<1x8xf32>
    %cst_428 = arith.constant 1.000000e-01 : f32
    %887 = vector.broadcast %cst_428 : f32 to vector<1x8xf32>
    %888 = arith.addf %887, %886 : vector<1x8xf32>
    %889 = math.sqrt %888 : vector<1x8xf32>
    %c5_429 = arith.constant 5 : index
    %c0_430 = arith.constant 0 : index
    %c0_431 = arith.constant 0 : index
    %890 = vector.load %arg8[%c5_429, %c0_430, %c0_431] : memref<6x4x8xf32, #tpu.memory_space<vmem>>, vector<1x4x8xf32>
    %891 = vector.shape_cast %890 : vector<1x4x8xf32> to vector<4x8xf32>
    %892 = vector.broadcast %889 : vector<1x8xf32> to vector<4x8xf32>
    %893 = arith.mulf %892, %891 : vector<4x8xf32>
    %894 = vector.broadcast %878 : vector<1x8xf32> to vector<4x8xf32>
    %895 = arith.addf %894, %893 : vector<4x8xf32>
    %cst_432 = arith.constant dense<0.000000e+00> : vector<4x16xf32>
    %896 = tpu.matmul %2, %829, %cst_432 {dimension_numbers = #tpu.dot_dimension_numbers<[1], [0], [0], [1], [0, 0, 1, 1], [], []>} : vector<4x8xf32>, vector<8x16xf32>, vector<4x16xf32> -> vector<4x16xf32>
    %897 = tpu.concatenate %896, %895, %786 in 1 : vector<4x16xf32>, vector<4x8xf32>, vector<4x2xf32> -> vector<4x26xf32>
    %c0_433 = arith.constant 0 : index
    %c0_434 = arith.constant 0 : index
    %898 = vector.load %arg21[%c0_433, %c0_434] : memref<26x48xf32, #tpu.memory_space<vmem>>, vector<26x48xf32>
    %c0_435 = arith.constant 0 : index
    %c0_436 = arith.constant 0 : index
    %899 = vector.load %arg22[%c0_435, %c0_436] : memref<16x48xf32, #tpu.memory_space<vmem>>, vector<16x48xf32>
    %c0_437 = arith.constant 0 : index
    %c0_438 = arith.constant 0 : index
    %900 = vector.load %arg23[%c0_437, %c0_438] : memref<1x48xf32, #tpu.memory_space<vmem>>, vector<1x48xf32>
    %c0_439 = arith.constant 0 : index
    %c0_440 = arith.constant 0 : index
    %901 = vector.load %arg24[%c0_439, %c0_440] : memref<1x48xf32, #tpu.memory_space<vmem>>, vector<1x48xf32>
    %cst_441 = arith.constant dense<0.000000e+00> : vector<4x48xf32>
    %902 = tpu.matmul %897, %898, %cst_441 {dimension_numbers = #tpu.dot_dimension_numbers<[1], [0], [0], [1], [0, 0, 1, 1], [], []>} : vector<4x26xf32>, vector<26x48xf32>, vector<4x48xf32> -> vector<4x48xf32>
    %903 = vector.broadcast %900 : vector<1x48xf32> to vector<4x48xf32>
    %904 = arith.addf %902, %903 : vector<4x48xf32>
    %cst_442 = arith.constant dense<0.000000e+00> : vector<4x48xf32>
    %905 = tpu.matmul %779, %899, %cst_442 {dimension_numbers = #tpu.dot_dimension_numbers<[1], [0], [0], [1], [0, 0, 1, 1], [], []>} : vector<4x16xf32>, vector<16x48xf32>, vector<4x48xf32> -> vector<4x48xf32>
    %906 = vector.broadcast %901 : vector<1x48xf32> to vector<4x48xf32>
    %907 = arith.addf %905, %906 : vector<4x48xf32>
    %908 = vector.extract_strided_slice %904 {offsets = [0, 0], sizes = [4, 16], strides = [1, 1]} : vector<4x48xf32> to vector<4x16xf32>
    %909 = vector.extract_strided_slice %907 {offsets = [0, 0], sizes = [4, 16], strides = [1, 1]} : vector<4x48xf32> to vector<4x16xf32>
    %910 = arith.addf %908, %909 : vector<4x16xf32>
    %911 = arith.negf %910 : vector<4x16xf32>
    %912 = math.exp %911 : vector<4x16xf32>
    %cst_443 = arith.constant 1.000000e+00 : f32
    %913 = vector.broadcast %cst_443 : f32 to vector<4x16xf32>
    %914 = arith.addf %913, %912 : vector<4x16xf32>
    %915 = arith.divf %913, %914 : vector<4x16xf32>
    %916 = vector.extract_strided_slice %904 {offsets = [0, 16], sizes = [4, 16], strides = [1, 1]} : vector<4x48xf32> to vector<4x16xf32>
    %917 = vector.extract_strided_slice %907 {offsets = [0, 16], sizes = [4, 16], strides = [1, 1]} : vector<4x48xf32> to vector<4x16xf32>
    %918 = arith.addf %916, %917 : vector<4x16xf32>
    %919 = arith.negf %918 : vector<4x16xf32>
    %920 = math.exp %919 : vector<4x16xf32>
    %cst_444 = arith.constant 1.000000e+00 : f32
    %921 = vector.broadcast %cst_444 : f32 to vector<4x16xf32>
    %922 = arith.addf %921, %920 : vector<4x16xf32>
    %923 = arith.divf %921, %922 : vector<4x16xf32>
    %924 = vector.extract_strided_slice %904 {offsets = [0, 32], sizes = [4, 16], strides = [1, 1]} : vector<4x48xf32> to vector<4x16xf32>
    %925 = vector.extract_strided_slice %907 {offsets = [0, 32], sizes = [4, 16], strides = [1, 1]} : vector<4x48xf32> to vector<4x16xf32>
    %926 = arith.mulf %915, %925 : vector<4x16xf32>
    %927 = arith.addf %924, %926 : vector<4x16xf32>
    %928 = math.tanh %927 : vector<4x16xf32>
    %cst_445 = arith.constant 1.000000e+00 : f32
    %929 = vector.broadcast %cst_445 : f32 to vector<4x16xf32>
    %930 = arith.subf %929, %923 : vector<4x16xf32>
    %931 = arith.mulf %930, %928 : vector<4x16xf32>
    %932 = arith.mulf %923, %779 : vector<4x16xf32>
    %933 = arith.addf %931, %932 : vector<4x16xf32>
    %cst_446 = arith.constant 0.000000e+00 : f32
    %934 = vector.broadcast %cst_446 : f32 to vector<4x16xf32>
    %935 = arith.maximumf %933, %934 : vector<4x16xf32>
    %c0_447 = arith.constant 0 : index
    %c0_448 = arith.constant 0 : index
    %936 = vector.load %arg25[%c0_447, %c0_448] : memref<16x2xf32, #tpu.memory_space<vmem>>, vector<16x2xf32>
    %cst_449 = arith.constant dense<0.000000e+00> : vector<4x2xf32>
    %937 = tpu.matmul %935, %936, %cst_449 {dimension_numbers = #tpu.dot_dimension_numbers<[1], [0], [0], [1], [0, 0, 1, 1], [], []>} : vector<4x16xf32>, vector<16x2xf32>, vector<4x2xf32> -> vector<4x2xf32>
    %c0_450 = arith.constant 0 : index
    %c0_451 = arith.constant 0 : index
    %938 = vector.load %arg26[%c0_450, %c0_451] : memref<1x2xf32, #tpu.memory_space<vmem>>, vector<1x2xf32>
    %939 = vector.broadcast %938 : vector<1x2xf32> to vector<4x2xf32>
    %940 = arith.addf %937, %939 : vector<4x2xf32>
    %c5_452 = arith.constant 5 : index
    %c0_453 = arith.constant 0 : index
    %c0_454 = arith.constant 0 : index
    %941 = vector.load %arg27[%c5_452, %c0_453, %c0_454] : memref<6x4x2xf32, #tpu.memory_space<vmem>>, vector<1x4x2xf32>
    %942 = vector.shape_cast %941 : vector<1x4x2xf32> to vector<4x2xf32>
    %943 = vector.shape_cast %940 : vector<4x2xf32> to vector<1x4x2xf32>
    tpu.vector_store %arg27[%c5_452, %c0_453, %c0_454], %943 {strides = array<i32>} : memref<6x4x2xf32, #tpu.memory_space<vmem>>, vector<1x4x2xf32>,
    return
  }
}

</mosaic_0001>

<bundles_post_ra>
// kernel: _lambda_.1
= control target key start
LH: loop header
LB: loop body
LE: loop exit
PB: predicated region body
PF: predicated region fallthrough
CT: control target
= control target key end

     0   :  { %s18614_s0 = inlined_call_operand.hbm [shape: f32[48,16], index: 0, kind: input, shape index: {}]   ;;  %s18615_s1 = inlined_call_operand.hbm [shape: f32[16,16], index: 1, kind: input, shape index: {}]   ;;  %s18616_s2 = inlined_call_operand.hbm [shape: f32[128,128], index: 2, kind: input, shape index: {}]   ;;  %s18617_s3 = inlined_call_operand.vmem [shape: f32[48,2], index: 3, kind: input, shape index: {}]   ;;  %s18618_s4 = inlined_call_operand.vmem [shape: f32[48,2], index: 4, kind: input, shape index: {}]   ;;  %s18619_s5 = inlined_call_operand.vmem [shape: f32[2,8], index: 5, kind: input, shape index: {}]   ;;  %s18620_s6 = inlined_call_operand.vmem [shape: f32[4,8], index: 6, kind: input, shape index: {}]   ;;  %s18621_s7 = inlined_call_operand.vmem [shape: f32[4,2], index: 7, kind: input, shape index: {}]   ;;  %s18622_s8 = inlined_call_operand.vmem [shape: f32[6,4,8], index: 8, kind: input, shape index: {}]   ;;  %s18623_s9 = inlined_call_operand.vmem [shape: f32[48,384], index: 9, kind: input, shape index: {}]   ;;  %s18624_s10 = inlined_call_operand.hbm [shape: f32[384,256], index: 10, kind: input, shape index: {}]   ;;  %s18625_s11 = inlined_call_operand.vmem [shape: f32[384,128], index: 11, kind: input, shape index: {}]   ;;  %s18626_s12 = inlined_call_operand.hbm [shape: f32[1,384], index: 12, kind: input, shape index: {}]   ;;  %s18627_s13 = inlined_call_operand.vmem [shape: f32[128,16], index: 13, kind: input, shape index: {}]   ;;  %s18628_s14 = inlined_call_operand.hbm [shape: f32[1,16], index: 14, kind: input, shape index: {}]   ;;  %s18629_s15 = inlined_call_operand.hbm [shape: f32[20,48], index: 15, kind: input, shape index: {}]   ;;  %s18630_s16 = inlined_call_operand.vmem [shape: f32[16,48], index: 16, kind: input, shape index: {}]   ;;  %s18631_s17 = inlined_call_operand.hbm [shape: f32[1,48], index: 17, kind: input, shape index: {}]   ;;  %s18632_s18 = inlined_call_operand.vmem [shape: f32[1,48], index: 18, kind: input, shape index: {}]   ;;  %s18633_s19 = inlined_call_operand.hbm [shape: f32[16,16], index: 19, kind: input, shape index: {}]   ;;  %s18634_s20 = inlined_call_operand.hbm [shape: f32[1,16], index: 20, kind: input, shape index: {}]   ;;  %s18635_s21 = inlined_call_operand.hbm [shape: f32[26,48], index: 21, kind: input, shape index: {}]   ;;  %s18636_s22 = inlined_call_operand.vmem [shape: f32[16,48], index: 22, kind: input, shape index: {}]   ;;  %s18637_s23 = inlined_call_operand.hbm [shape: f32[1,48], index: 23, kind: input, shape index: {}]   ;;  %s18638_s24 = inlined_call_operand.vmem [shape: f32[1,48], index: 24, kind: input, shape index: {}]   ;;  %s18639_s25 = inlined_call_operand.vmem [shape: f32[16,2], index: 25, kind: input, shape index: {}]   ;;  %s18640_s26 = inlined_call_operand.vmem [shape: f32[1,2], index: 26, kind: input, shape index: {}]   ;;  %s18641_s27 = inlined_call_operand.vmem [shape: f32[6,4,2], index: 27, kind: output, shape index: {0}]   ;;  %s18642_s28 = inlined_call_operand.vmem [shape: f32[6,2,16], index: 28, kind: output, shape index: {1}]  }
   0x1   :  { %18676 = sst [smem:[#allocation28_spill]] %s18614_s0 }
   0x2   :  { %18677 = sst [smem:[#allocation29_spill]] %s18615_s1 }
   0x3   :  { %18678 = sst [smem:[#allocation30_spill]] %s18616_s2 }
   0x4   :  { %18679 = sst [smem:[#allocation31_spill]] %s18617_s3 }
   0x5   :  { %18680 = sst [smem:[#allocation32_spill]] %s18618_s4 }
   0x6   :  { %18681 = sst [smem:[#allocation33_spill]] %s18619_s5 }
   0x7   :  { %18682 = sst [smem:[#allocation34_spill]] %s18620_s6 }
   0x8   :  { %18683 = sst [smem:[#allocation35_spill]] %s18621_s7 }
   0x9   :  { %18684 = sst [smem:[#allocation36_spill]] %s18622_s8 }
   0xa   :  { %18685 = sst [smem:[#allocation37_spill]] %s18623_s9 }
   0xb   :  { %18686 = sst [smem:[#allocation38_spill]] %s18624_s10 }
   0xc   :  { %18687 = sst [smem:[#allocation39_spill]] %s18625_s11 }
   0xd   :  { %18688 = sst [smem:[#allocation40_spill]] %s18626_s12 }
   0xe   :  { %18689 = sst [smem:[#allocation41_spill]] %s18640_s26 }
   0xf   :  { %18690 = sst [smem:[#allocation42_spill]] %s18641_s27 }
  0x10   :  { %34 = vsyncpa [#allocation3], 0 }
  0x11   :  { %35 = vsyncpa [#allocation5], 0 }
  0x12   :  { %36 = vsyncpa [#allocation8], 0 }
  0x13   :  { %37 = vsyncpa [#allocation11], 0 }
  0x14   :  { %38 = vsyncpa [#allocation14], 0 }
  0x15   :  { %39 = vsyncpa [#allocation17], 0 }
  0x16   :  { %40 = vsyncpa [#allocation20], 0  ;;  %s15488_s8 = smov [#allocation4]   ;;  %s15489_s9 = smov [#allocation7]  }
  0x17   :  { %s58_s5 = sshll.u32 %s15488_s8, 4  ;;  %s96_s30 = sshll.u32 %s15489_s9, 4  ;;  %s59_s5 = int_to_ptr.vmem [resolvable:$true] %s58_s5  ;;  %s15659_s30 = int_to_ptr.vmem [resolvable:$true] %s96_s30 }
  0x18   :  { %s18691_s10 = sld [smem:[#allocation29_spill]] }
  0x1e   :  { %s15210_s0 = scalar_lea.hbm %s18691_s10, 256 }
  0x1f   :  { %p15211_p0 = scmp.ne.s32.totalorder %s18691_s10, %s15210_s0  ;;  %p15214_p1 = scmp.lt.u32.totalorder %s15210_s0, %s18691_s10 }
  0x21   :  { %p15216_p2 = pnand %p15214_p1, %p15211_p0 }
  0x23   :  { %15219 = shalt.err (!%p15216_p2)
}
  0x24   :  { %s15220_s12 = scalar_lea.vmem %s59_s5, 256  ;;  %p15225_p4 = scmp.lt.s32.totalorder %s59_s5, %s59_s5 }
  0x25   :  { %p15221_p3 = scmp.ne.s32.totalorder %s59_s5, %s15220_s12  ;;  %p15226_p5 = scmp.lt.s32.totalorder %s15220_s12, %s15220_s12 }
  0x27   :  { %p15227_p6 = por %p15226_p5, %p15225_p4 }
  0x29   :  { %p15228_p7 = pnand %p15227_p6, %p15221_p3 }
  0x2b   :  { %15231 = shalt.err (!%p15228_p7)
}
  0x2c   :  { %s18656_s1 = smov 128   ;;  %s18658_s4 = smov 8  }
  0x2d   :  { %64 = dma.hbm_to_vmem [thread:$0]  %s18691_s10, 256, %s59_s5, [#allocation5], %s18656_s1, %s18656_s1, %s18658_s4  }
  0x2e   :  { %s18692_s0 = sld [smem:[#allocation38_spill]] }
  0x34   :  { %s15232_s11 = scalar_lea.hbm %s18692_s0, 12288 }
  0x35   :  { %p15233_p8 = scmp.ne.s32.totalorder %s18692_s0, %s15232_s11  ;;  %p15236_p9 = scmp.lt.u32.totalorder %s15232_s11, %s18692_s0 }
  0x37   :  { %p15238_p10 = pnand %p15236_p9, %p15233_p8 }
  0x39   :  { %15241 = shalt.err (!%p15238_p10)
}
  0x3a   :  { %s15242_s27 = scalar_lea.vmem %s15659_s30, 12288  ;;  %p15247_p12 = scmp.lt.s32.totalorder %s15659_s30, %s15659_s30 }
  0x3b   :  { %p15243_p11 = scmp.ne.s32.totalorder %s15659_s30, %s15242_s27  ;;  %p15248_p13 = scmp.lt.s32.totalorder %s15242_s27, %s15242_s27 }
  0x3d   :  { %p15249_p0 = por %p15248_p13, %p15247_p12 }
  0x3f   :  { %p15250_p1 = pnand %p15249_p0, %p15243_p11 }
  0x41   :  { %15253 = shalt.err (!%p15250_p1)
}
  0x42   :  { %s15492_s5 = smov 256   ;;  %s18673_s10 = smov 16  }
  0x43   :  { %102 = dma.hbm_to_vmem [thread:$0]  %s18692_s0, 12288, %s15659_s30, [#allocation8], %s15492_s5, %s15492_s5, %s18673_s10  }
  0x44   :  { %s15494_s3 = smov [#allocation10]   ;;  %s15495_s11 = smov [#allocation13]  }
  0x45   :  { %s123_s6 = sshll.u32 %s15494_s3, 4  ;;  %s147_s29 = sshll.u32 %s15495_s11, 4  ;;  %s124_s6 = int_to_ptr.vmem [resolvable:$true] %s123_s6  ;;  %s148_s29 = int_to_ptr.vmem [resolvable:$true] %s147_s29 }
  0x46   :  { %s15254_s27 = scalar_lea.hbm %s18628_s14, 16 }
  0x47   :  { %p15255_p2 = scmp.ne.s32.totalorder %s18628_s14, %s15254_s27  ;;  %p15258_p3 = scmp.lt.u32.totalorder %s15254_s27, %s18628_s14 }
  0x49   :  { %p15260_p4 = pnand %p15258_p3, %p15255_p2 }
  0x4b   :  { %15263 = shalt.err (!%p15260_p4)
}
  0x4c   :  { %s15264_s30 = scalar_lea.vmem %s124_s6, 16  ;;  %s15268_s0 = scalar_lea.vmem %s124_s6, 32 }
  0x4d   :  { %p15265_p5 = scmp.ne.s32.totalorder %s124_s6, %s15264_s30  ;;  %p15269_p6 = scmp.lt.s32.totalorder %s124_s6, %s124_s6 }
  0x4e   :  { %p15270_p7 = scmp.lt.s32.totalorder %s15268_s0, %s15264_s30 }
  0x50   :  { %p15271_p8 = por %p15270_p7, %p15269_p6 }
  0x52   :  { %p15272_p9 = pnand %p15271_p8, %p15265_p5 }
  0x54   :  { %15275 = shalt.err (!%p15272_p9)
}
  0x55   :  { %126 = dma.hbm_to_vmem [thread:$0]  %s18628_s14, 16, %s124_s6, [#allocation11]  }
  0x56   :  { %s15276_s3 = scalar_lea.hbm %s18631_s17, 16 }
  0x57   :  { %p15277_p10 = scmp.ne.s32.totalorder %s18631_s17, %s15276_s3  ;;  %p15280_p11 = scmp.lt.u32.totalorder %s15276_s3, %s18631_s17 }
  0x59   :  { %p15282_p12 = pnand %p15280_p11, %p15277_p10 }
  0x5b   :  { %15285 = shalt.err (!%p15282_p12)
}
  0x5c   :  { %s15286_s7 = scalar_lea.vmem %s148_s29, 16  ;;  %s15290_s27 = scalar_lea.vmem %s148_s29, 32 }
  0x5d   :  { %p15287_p13 = scmp.ne.s32.totalorder %s148_s29, %s15286_s7  ;;  %p15291_p0 = scmp.lt.s32.totalorder %s148_s29, %s148_s29 }
  0x5e   :  { %p15292_p1 = scmp.lt.s32.totalorder %s15290_s27, %s15286_s7 }
  0x60   :  { %p15293_p2 = por %p15292_p1, %p15291_p0 }
  0x62   :  { %p15294_p3 = pnand %p15293_p2, %p15287_p13 }
  0x64   :  { %15297 = shalt.err (!%p15294_p3)
}
  0x65   :  { %150 = dma.hbm_to_vmem [thread:$0]  %s18631_s17, 16, %s148_s29, [#allocation14]  }
  0x66   :  { %s15496_s12 = smov [#allocation16]   ;;  %s15497_s0 = smov [#allocation2]  }
  0x67   :  { %s171_s30 = sshll.u32 %s15496_s12, 4  ;;  %s46_s5 = sshll.u32 %s15497_s0, 4  ;;  %s172_s30 = int_to_ptr.vmem [resolvable:$true] %s171_s30  ;;  %s15718_s5 = int_to_ptr.vmem [resolvable:$true] %s46_s5 }
  0x68   :  { %s15298_s9 = scalar_lea.hbm %s18634_s20, 16 }
  0x69   :  { %p15299_p4 = scmp.ne.s32.totalorder %s18634_s20, %s15298_s9  ;;  %p15302_p5 = scmp.lt.u32.totalorder %s15298_s9, %s18634_s20 }
  0x6b   :  { %p15304_p6 = pnand %p15302_p5, %p15299_p4 }
  0x6d   :  { %15307 = shalt.err (!%p15304_p6)
}
  0x6e   :  { %s15308_s17 = scalar_lea.vmem %s172_s30, 16  ;;  %s15312_s29 = scalar_lea.vmem %s172_s30, 32 }
  0x6f   :  { %p15309_p7 = scmp.ne.s32.totalorder %s172_s30, %s15308_s17  ;;  %p15313_p8 = scmp.lt.s32.totalorder %s172_s30, %s172_s30 }
  0x70   :  { %p15314_p9 = scmp.lt.s32.totalorder %s15312_s29, %s15308_s17 }
  0x72   :  { %p15315_p10 = por %p15314_p9, %p15313_p8 }
  0x74   :  { %p15316_p11 = pnand %p15315_p10, %p15309_p7 }
  0x76   :  { %15319 = shalt.err (!%p15316_p11)
}
  0x77   :  { %174 = dma.hbm_to_vmem [thread:$0]  %s18634_s20, 16, %s172_s30, [#allocation17]  }
  0x78   :  { %s18693_s6 = sld [smem:[#allocation28_spill]] }
  0x7e   :  { %s15320_s12 = scalar_lea.hbm %s18693_s6, 768 }
  0x7f   :  { %p15321_p12 = scmp.ne.s32.totalorder %s18693_s6, %s15320_s12  ;;  %p15324_p13 = scmp.lt.u32.totalorder %s15320_s12, %s18693_s6 }
  0x81   :  { %p15326_p0 = pnand %p15324_p13, %p15321_p12 }
  0x83   :  { %15329 = shalt.err (!%p15326_p0)
}
  0x84   :  { %s15330_s3 = scalar_lea.vmem %s15718_s5, 768  ;;  %p15335_p2 = scmp.lt.s32.totalorder %s15718_s5, %s15718_s5 }
  0x85   :  { %p15331_p1 = scmp.ne.s32.totalorder %s15718_s5, %s15330_s3  ;;  %p15336_p3 = scmp.lt.s32.totalorder %s15330_s3, %s15330_s3 }
  0x87   :  { %p15337_p4 = por %p15336_p3, %p15335_p2 }
  0x89   :  { %p15338_p5 = pnand %p15337_p4, %p15331_p1 }
  0x8b   :  { %15341 = shalt.err (!%p15338_p5)
}
  0x8c   :  { %s18694_s20 = smov 8   ;;  %s18695_s30 = smov 128  }
  0x8d   :  { %52 = dma.hbm_to_vmem [thread:$0]  %s18693_s6, 768, %s15718_s5, [#allocation3], %s18695_s30, %s18695_s30, %s18694_s20  }
  0x8e   :  { %s15498_s11 = smov [#allocation6]   ;;  %s15499_s29 = smov [#allocation9]  }
  0x8f   :  { %s70_s17 = sshll.u32 %s15498_s11, 4  ;;  %s111_s2 = sshll.u32 %s15499_s29, 4  ;;  %s71_s17 = int_to_ptr.vmem [resolvable:$true] %s70_s17  ;;  %s112_s2 = int_to_ptr.vmem [resolvable:$true] %s111_s2 }
  0x90   :  { %s18696_s14 = sld [smem:[#allocation30_spill]] }
  0x96   :  { %s15342_s12 = scalar_lea.hbm %s18696_s14, 2048 }
  0x97   :  { %p15343_p6 = scmp.ne.s32.totalorder %s18696_s14, %s15342_s12  ;;  %p15346_p7 = scmp.lt.u32.totalorder %s15342_s12, %s18696_s14 }
  0x99   :  { %p15348_p8 = pnand %p15346_p7, %p15343_p6 }
  0x9b   :  { %15351 = shalt.err (!%p15348_p8)
}
  0x9c   :  { %s15352_s5 = scalar_lea.vmem %s71_s17, 2048  ;;  %p15357_p10 = scmp.lt.s32.totalorder %s71_s17, %s71_s17 }
  0x9d   :  { %p15353_p9 = scmp.ne.s32.totalorder %s71_s17, %s15352_s5  ;;  %p15358_p11 = scmp.lt.s32.totalorder %s15352_s5, %s15352_s5 }
  0x9f   :  { %p15359_p12 = por %p15358_p11, %p15357_p10 }
  0xa1   :  { %p15360_p13 = pnand %p15359_p12, %p15353_p9 }
  0xa3   :  { %15363 = shalt.err (!%p15360_p13)
}
  0xa4   :  { %76 = dma.hbm_to_vmem [thread:$0]  %s18696_s14, 2048, %s71_s17, [#allocation5], %s18695_s30, %s18695_s30, %s18694_s20  }
  0xa5   :  { %s18697_s11 = sld [smem:[#allocation40_spill]] }
  0xab   :  { %s15364_s29 = scalar_lea.hbm %s18697_s11, 48 }
  0xac   :  { %p15365_p0 = scmp.ne.s32.totalorder %s18697_s11, %s15364_s29  ;;  %p15368_p1 = scmp.lt.u32.totalorder %s15364_s29, %s18697_s11 }
  0xae   :  { %p15370_p2 = pnand %p15368_p1, %p15365_p0 }
  0xb0   :  { %15373 = shalt.err (!%p15370_p2)
}
  0xb1   :  { %s15374_s8 = scalar_lea.vmem %s112_s2, 48  ;;  %s15378_s1 = scalar_lea.vmem %s112_s2, 64 }
  0xb2   :  { %p15375_p3 = scmp.ne.s32.totalorder %s112_s2, %s15374_s8  ;;  %p15379_p4 = scmp.lt.s32.totalorder %s112_s2, %s112_s2 }
  0xb3   :  { %p15380_p5 = scmp.lt.s32.totalorder %s15378_s1, %s15374_s8 }
  0xb5   :  { %p15381_p6 = por %p15380_p5, %p15379_p4 }
  0xb7   :  { %p15382_p7 = pnand %p15381_p6, %p15375_p3 }
  0xb9   :  { %15385 = shalt.err (!%p15382_p7)
}
  0xba   :  { %114 = dma.hbm_to_vmem [thread:$0]  %s18697_s11, 48, %s112_s2, [#allocation8]  }
  0xbb   :  { %s15500_s9 = smov [#allocation12]   ;;  %s15501_s6 = smov [#allocation15]  }
  0xbc   :  { %s132_s5 = sshll.u32 %s15500_s9, 4  ;;  %s158_s3 = sshll.u32 %s15501_s6, 4  ;;  %s133_s5 = int_to_ptr.vmem [resolvable:$true] %s132_s5  ;;  %s15779_s3 = int_to_ptr.vmem [resolvable:$true] %s158_s3 }
  0xbd   :  { %s15386_s29 = scalar_lea.hbm %s18629_s15, 384 }
  0xbe   :  { %p15387_p8 = scmp.ne.s32.totalorder %s18629_s15, %s15386_s29  ;;  %p15390_p9 = scmp.lt.u32.totalorder %s15386_s29, %s18629_s15 }
  0xc0   :  { %p15392_p10 = pnand %p15390_p9, %p15387_p8 }
  0xc2   :  { %15395 = shalt.err (!%p15392_p10)
}
  0xc3   :  { %s15396_s2 = scalar_lea.vmem %s133_s5, 384  ;;  %p15401_p12 = scmp.lt.s32.totalorder %s133_s5, %s133_s5 }
  0xc4   :  { %p15397_p11 = scmp.ne.s32.totalorder %s133_s5, %s15396_s2  ;;  %p15402_p13 = scmp.lt.s32.totalorder %s15396_s2, %s15396_s2 }
  0xc6   :  { %p15403_p0 = por %p15402_p13, %p15401_p12 }
  0xc8   :  { %p15404_p1 = pnand %p15403_p0, %p15397_p11 }
  0xca   :  { %15407 = shalt.err (!%p15404_p1)
}
  0xcb   :  { %138 = dma.hbm_to_vmem [thread:$0]  %s18629_s15, 384, %s133_s5, [#allocation11], %s18695_s30, %s18695_s30, %s18694_s20  }
  0xcc   :  { %s15408_s14 = scalar_lea.hbm %s18633_s19, 256 }
  0xcd   :  { %p15409_p2 = scmp.ne.s32.totalorder %s18633_s19, %s15408_s14  ;;  %p15412_p3 = scmp.lt.u32.totalorder %s15408_s14, %s18633_s19 }
  0xcf   :  { %p15414_p4 = pnand %p15412_p3, %p15409_p2 }
  0xd1   :  { %15417 = shalt.err (!%p15414_p4)
}
  0xd2   :  { %s15418_s29 = scalar_lea.vmem %s15779_s3, 256  ;;  %p15423_p6 = scmp.lt.s32.totalorder %s15779_s3, %s15779_s3 }
  0xd3   :  { %p15419_p5 = scmp.ne.s32.totalorder %s15779_s3, %s15418_s29  ;;  %p15424_p7 = scmp.lt.s32.totalorder %s15418_s29, %s15418_s29 }
  0xd5   :  { %p15425_p8 = por %p15424_p7, %p15423_p6 }
  0xd7   :  { %p15426_p9 = pnand %p15425_p8, %p15419_p5 }
  0xd9   :  { %15429 = shalt.err (!%p15426_p9)
}
  0xda   :  { %164 = dma.hbm_to_vmem [thread:$0]  %s18633_s19, 256, %s15779_s3, [#allocation14], %s18695_s30, %s18695_s30, %s18694_s20  }
  0xdb   :  { %s15502_s7 = smov [#allocation18]   ;;  %s15503_s12 = smov [#allocation19]  }
  0xdc   :  { %s180_s27 = sshll.u32 %s15502_s7, 4  ;;  %s195_s0 = sshll.u32 %s15503_s12, 4  ;;  %s181_s27 = int_to_ptr.vmem [resolvable:$true] %s180_s27  ;;  %s196_s0 = int_to_ptr.vmem [resolvable:$true] %s195_s0 }
  0xdd   :  { %s15430_s8 = scalar_lea.hbm %s18635_s21, 512 }
  0xde   :  { %p15431_p10 = scmp.ne.s32.totalorder %s18635_s21, %s15430_s8  ;;  %p15434_p11 = scmp.lt.u32.totalorder %s15430_s8, %s18635_s21 }
  0xe0   :  { %p15436_p12 = pnand %p15434_p11, %p15431_p10 }
  0xe2   :  { %15439 = shalt.err (!%p15436_p12)
}
  0xe3   :  { %s15440_s19 = scalar_lea.vmem %s181_s27, 512  ;;  %p15445_p0 = scmp.lt.s32.totalorder %s181_s27, %s181_s27 }
  0xe4   :  { %p15441_p13 = scmp.ne.s32.totalorder %s181_s27, %s15440_s19  ;;  %p15446_p1 = scmp.lt.s32.totalorder %s15440_s19, %s15440_s19 }
  0xe6   :  { %p15447_p2 = por %p15446_p1, %p15445_p0 }
  0xe8   :  { %p15448_p3 = pnand %p15447_p2, %p15441_p13 }
  0xea   :  { %15451 = shalt.err (!%p15448_p3)
}
  0xeb   :  { %186 = dma.hbm_to_vmem [thread:$0]  %s18635_s21, 512, %s181_s27, [#allocation17], %s18695_s30, %s18695_s30, %s18694_s20  }
  0xec   :  { %s15452_s29 = scalar_lea.hbm %s18637_s23, 16 }
  0xed   :  { %p15453_p4 = scmp.ne.s32.totalorder %s18637_s23, %s15452_s29  ;;  %p15456_p5 = scmp.lt.u32.totalorder %s15452_s29, %s18637_s23 }
  0xef   :  { %p15458_p6 = pnand %p15456_p5, %p15453_p4 }
  0xf1   :  { %15461 = shalt.err (!%p15458_p6)
}
  0xf2   :  { %s15462_s2 = scalar_lea.vmem %s196_s0, 16  ;;  %s15466_s11 = scalar_lea.vmem %s196_s0, 32 }
  0xf3   :  { %p15463_p7 = scmp.ne.s32.totalorder %s196_s0, %s15462_s2  ;;  %p15467_p8 = scmp.lt.s32.totalorder %s196_s0, %s196_s0 }
  0xf4   :  { %p15468_p9 = scmp.lt.s32.totalorder %s15466_s11, %s15462_s2 }
  0xf6   :  { %p15469_p10 = por %p15468_p9, %p15467_p8 }
  0xf8   :  { %p15470_p11 = pnand %p15469_p10, %p15463_p7 }
  0xfa   :  { %15473 = shalt.err (!%p15470_p11)
}
  0xfb   :  { %198 = dma.hbm_to_vmem [thread:$0]  %s18637_s23, 16, %s196_s0, [#allocation20]  }
  0xfc   :  { %15474 = dma.done.wait [#allocation3], 768  }
  0xfd   :  { %15475 = vsyncadd [#allocation3], 4294966528 }
  0xfe   :  { %15476 = dma.done.wait [#allocation5], 2304  }
  0xff   :  { %15477 = vsyncadd [#allocation5], 4294964992 }
 0x100   :  { %15478 = dma.done.wait [#allocation8], 12336  }
 0x101   :  { %15479 = vsyncadd [#allocation8], 4294954960 }
 0x102   :  { %15480 = dma.done.wait [#allocation11], 400  }
 0x103   :  { %15481 = vsyncadd [#allocation11], 4294966896 }
 0x104   :  { %15482 = dma.done.wait [#allocation14], 272  }
 0x105   :  { %15483 = vsyncadd [#allocation14], 4294967024 }
 0x106   :  { %15484 = dma.done.wait [#allocation17], 528  }
 0x107   :  { %15485 = vsyncadd [#allocation17], 4294966768 }
 0x108   :  { %15486 = dma.done.wait [#allocation20], 16  }
 0x109   :  { %15487 = vsyncadd [#allocation20], 4294967280  ;;  %vm267_vm0 = vcmask 130048   ;;  %v265_v0 = vld [vmem:[#allocation4] sm:$0xff]  ;;  %v266_v1 = vld [vmem:[#allocation4 + $0x8] sm:$0xff]  ;;  %s18698_s0 = sld [smem:[#allocation37_spill]] }
 0x10a   :  { %v15843_v2 = vld [vmem:[#allocation2] sm:$0xff]  ;;  %v13174_v3 = vpack.c.bf16 %v266_v1, %v265_v0  ;;  %v15847_v4 = vld [vmem:[#allocation2 + $0x8] sm:$0xff]  ;;  %v15849_v5 = vld [vmem:[#allocation2 + $0x10] sm:$0xff]  ;;  %v15504_v42 = vmov 0.0   ;;  %v15505_v43 = vmov 0.0|0.0   ;;  %vm554_vm1 = vcmask 261120  }
 0x10b   :  { %11523 = vmatprep.mubr.msk.f32.mxu0 %vm267_vm0, %v15843_v2  ;;  %v15855_v6 = vld [vmem:[#allocation2 + $0x18] sm:$0xff]  ;;  %v15857_v7 = vld [vmem:[#allocation2 + $0x20] sm:$0xff]  ;;  %v15863_v8 = vld [vmem:[#allocation2 + $0x28] sm:$0xff]  ;;  %vm596_vm2 = vcmask 392192   ;;  %vm15507_vm3 = vmmov 0   ;;  %s18699_s2 = sld [smem:[#allocation39_spill]] }
 0x10c   :  { %13175 = vmatprep.subr.bf16.mxu0 %v13174_v3  ;;  %13179 = vmatprep.subr.bf16.mxu1 %v13174_v3  ;;  %v241_v0 = vld [vmem:[#allocation6] sm:$0xff]  ;;  %v242_v1 = vld [vmem:[#allocation6 + $0x8] sm:$0xff]  ;;  %s18700_s14 = sld [smem:[#allocation31_spill]]  ;;  %s18701_s3 = sld [smem:[#allocation32_spill]]  ;;  %vm1665_vm4 = vcmask 1043456   ;;  %vm1646_vm5 = vcmask 146432  }
 0x10d   :  { %13177 = vmatpush3.bf16.msra.mxu0 %v13174_v3  ;;  %13181 = vmatpush3.bf16.msra.mxu1 %v13174_v3  ;;  %s18671_s6 = smov 18   ;;  %vm1661_vm6 = vcmask 162816   ;;  %s18669_s12 = smov 96   ;;  %vm1848_vm7 = vcmask 64512   ;;  %vm2004_vm8 = vcmask 123904   ;;  %vm2142_vm9 = vcmask 1041408  }
 0x10e   :  { %s18665_s11 = smov 112   ;;  %s18702_s23 = sld [smem:[#allocation33_spill]]  ;;  %vm15511_vm12 = vmmov 1   ;;  %vm2122_vm14 = vcmask 195584   ;;  %vm2138_vm15 = vcmask 211968  }
 0x10f   :  { %v562_v15 = vld [vmem:[%s18698_s0 + $0x8] sm:$0xff]  ;;  %v565_v16 = vld [vmem:[%s18698_s0 + $0x20] sm:$0xff]  ;;  %v564_v19 = vld [vmem:[%s18698_s0 + $0x18] sm:$0xff]  ;;  %s18703_s1 = sld [smem:[#allocation36_spill]]  ;;  %s18704_s19 = sld [smem:[#allocation34_spill]] }
 0x110   :  { %11524 = vmatmul.mubr.msk.f32.vlgmr.msra.gmra.mrb[0].mxu0 %vm267_vm0, %v15847_v4  ;;  %v561_v17 = vld [vmem:[%s18698_s0] sm:$0xff]  ;;  %v13182_v18 = vpack.c.bf16 %v565_v16, %v562_v15  ;;  %v563_v20 = vld [vmem:[%s18698_s0 + $0x10] sm:$0xff]  ;;  %v566_v21 = vld [vmem:[%s18698_s0 + $0x28] sm:$0xff]  ;;  %s18661_s21 = smov 120   ;;  %s18707_s8 = sld [smem:[#allocation35_spill]] }
 0x111   :  { %11526 = vmatprep.mubr.msk.f32.mxu0 %vm267_vm0, %v15849_v5  ;;  %v13184_v22 = vpack.c.bf16 %v564_v19, %v561_v17  ;;  %v13194_v23 = vpack.c.bf16 %v566_v21, %v563_v20  ;;  %v568_v24 = vld [vmem:[%s18698_s0 + $0x38] sm:$0xff]  ;;  %v571_v25 = vld [vmem:[%s18698_s0 + $0x50] sm:$0xff]  ;;  %v570_v28 = vld [vmem:[%s18698_s0 + $0x48] sm:$0xff]  ;;  %s18663_s17 = smov 24   ;;  %s18708_s27 = sld [smem:[#allocation41_spill]] }
 0x112   :  { %v567_v26 = vld [vmem:[%s18698_s0 + $0x30] sm:$0xff]  ;;  %13183 = vmatprep.subr.bf16.mxu0 %v13182_v18  ;;  %v13186_v27 = vpack.c.bf16 %v571_v25, %v568_v24  ;;  %v569_v29 = vld [vmem:[%s18698_s0 + $0x40] sm:$0xff]  ;;  %v572_v30 = vld [vmem:[%s18698_s0 + $0x58] sm:$0xff]  ;;  %s18709_s26 = sld [smem:[#allocation42_spill]]  ;;  %s18710_s4 = smov 24  }
 0x113   :  { %13185 = vmatpush1.bf16.msra.mxu0 %v13184_v22  ;;  %13195 = vmatprep.subr.bf16.mxu1 %v13194_v23  ;;  %v13188_v31 = vpack.c.bf16 %v570_v28, %v567_v26  ;;  %v13198_v32 = vpack.c.bf16 %v572_v30, %v569_v29  ;;  %v574_v33 = vld [vmem:[%s18698_s0 + $0x68] sm:$0xff]  ;;  %v577_v34 = vld [vmem:[%s18698_s0 + $0x80] sm:$0xff]  ;;  %v576_v37 = vld [vmem:[%s18698_s0 + $0x78] sm:$0xff]  ;;  %s18711_s15 = smov 120   ;;  %s18714_s9 = smov 18  }
 0x114   :  { %11527 = vmatmul.mubr.msk.f32.gmra.mrb[2].mxu0 %vm267_vm0, %v15855_v6  ;;  %v573_v35 = vld [vmem:[%s18698_s0 + $0x60] sm:$0xff]  ;;  %13187 = vmatprep.subr.bf16.mxu0 %v13186_v27  ;;  %v13190_v36 = vpack.c.bf16 %v577_v34, %v574_v33  ;;  %v575_v38 = vld [vmem:[%s18698_s0 + $0x70] sm:$0xff]  ;;  %v578_v39 = vld [vmem:[%s18698_s0 + $0x88] sm:$0xff]  ;;  %s18667_s0 = smov 32   ;;  %s18716_s7 = smov 16  }
 0x115   :  { %11529 = vmatprep.mubr.msk.f32.mxu0 %vm267_vm0, %v15857_v7  ;;  %v13202_v40 = vpack.c.bf16 %v578_v39, %v575_v38  ;;  %v13192_v41 = vpack.c.bf16 %v576_v37, %v573_v35  ;;  %v246_v19 = vld [vmem:[#allocation6 + $0x28] sm:$0xff]  ;;  %v248_v25 = vld [vmem:[#allocation6 + $0x38] sm:$0xff]  ;;  %vm16430_vm13 = vmpackc.low %vm2142_vm9, %vm15511_vm12 }
 0x116   :  { %v252_v37 = vld [vmem:[#allocation6 + $0x58] sm:$0xff] }
 0x117   :  { %13189 = vmatpush1.bf16.msra.mxu0 %v13188_v31  ;;  %v250_v31 = vld [vmem:[#allocation6 + $0x48] sm:$0xff] }
 0x118   :  { %11530 = vmatmul.mubr.msk.f32.gmra.mrb[4].mxu0 %vm267_vm0, %v15863_v8  ;;  %13191 = vmatprep.subr.bf16.mxu0 %v13190_v36 }
 0x119   :  { %679 = vmatprep.mubr.f32.mxu0 %v15504_v42 }
 0x11b   :  { %13193 = vmatpush1.bf16.msra.mxu0 %v13192_v41  ;;  %v253_v41 = vld [vmem:[#allocation6 + $0x60] sm:$0xff] }
 0x11c   :  { %13206 = vmatprep.subr.bf16.mxu0 %v15505_v43 }
 0x1e3   :  { %v11525_v9 = vpop.f32.mrb[0].mxu0 }
 0x1e4   :  { %508 = vrot.lane.b32.xlu1 %v11525_v9, %s18673_s10  ;;  %v352_v10 = vpop.f32.mrb[1].mxu0 }
 0x1e5   :  { %506 = vrot.lane.b32.xlu0 %v352_v10, %s18673_s10  ;;  %11536 = vmatprep.mubr.msk.f32.mxu1 %vm267_vm0, %v352_v10 }
 0x1e6   :  { %11537 = vmatmul.mubr.msk.f32.vlgmr.msra.gmra.mrb[0].mxu1 %vm267_vm0, %v11525_v9  ;;  %v15964_v9 = vpack.c.bf16 %v242_v1, %v241_v0  ;;  %v822_v0 = vld [vmem:[#allocation7 + $0x50] sm:$0xff]  ;;  %v825_v1 = vld [vmem:[#allocation7 + $0x68] sm:$0xff] }
 0x1e7   :  { %v15871_v11 = vpop.f32.mrb[2].mxu0  ;;  %13197 = vmatpush3.bf16.msra.mxu1 %v13194_v23 }
 0x1e8   :  { %v15873_v12 = vpop.f32.mrb[3].mxu0  ;;  %13199 = vmatprep.subr.bf16.mxu1 %v13198_v32 }
 0x1e9   :  { %11539 = vmatprep.mubr.msk.f32.mxu1 %vm267_vm0, %v15873_v12 }
 0x1ea   :  { %11540 = vmatmul.mubr.msk.f32.gmra.mrb[2].mxu1 %vm267_vm0, %v15871_v11 }
 0x1eb   :  { %v15879_v13 = vpop.f32.mrb[4].mxu0  ;;  %13201 = vmatpush3.bf16.msra.mxu1 %v13198_v32 }
 0x1ec   :  { %v15881_v14 = vpop.f32.mrb[5].mxu0  ;;  %13203 = vmatprep.subr.bf16.mxu1 %v13202_v40 }
 0x1ed   :  { %11542 = vmatprep.mubr.msk.f32.mxu1 %vm267_vm0, %v15881_v14 }
 0x1ee   :  { %11543 = vmatmul.mubr.msk.f32.gmra.mrb[4].mxu1 %vm267_vm0, %v15879_v13 }
 0x1ef   :  { %13205 = vmatpush3.bf16.msra.mxu1 %v13202_v40 }
 0x1f0   :  { %13230 = vmatprep.subr.bf16.mxu1 %v15505_v43 }
 0x256   :  { %v509_v62 = vpop.permute.xlu1 %508 }
 0x257   :  { %v507_v63 = vpop.permute.xlu0 %506 }
 0x258   :  { %v548_v10 = vsel %vm267_vm0, %v15843_v2, %v507_v63  ;;  %v820_v63 = vld [vmem:[#allocation7 + $0x40] sm:$0xff] }
 0x2b9   :  { %v11538_v44 = vpop.f32.mrb[0].mxu1 }
 0x2ba   :  { %v495_v45 = vmul.f32 2.0, %v11538_v44  ;;  %v465_v46 = vpop.f32.mrb[1].mxu1 }
 0x2bb   :  { %v494_v47 = vmul.f32 2.0, %v465_v46  ;;  %v256_v46 = vld [vmem:[#allocation6 + $0x78] sm:$0xff] }
 0x2bc   :  { %v501_v48 = vsub.f32 %v495_v45, %v15847_v4  ;;  %v255_v45 = vld [vmem:[#allocation6 + $0x70] sm:$0xff] }
 0x2bd   :  { %v500_v49 = vsub.f32 %v494_v47, %v15843_v2  ;;  %v11541_v50 = vpop.f32.mrb[2].mxu1  ;;  %v16042_v47 = vpack.c.bf16 %v256_v46, %v255_v45  ;;  %v846_v45 = vld [vmem:[#allocation7 + $0x110] sm:$0xff]  ;;  %v849_v46 = vld [vmem:[#allocation7 + $0x128] sm:$0xff] }
 0x2be   :  { %532 = vrot.lane.b32.xlu1 %v501_v48, %s18667_s0  ;;  %v475_v51 = vpop.f32.mrb[3].mxu1  ;;  %v497_v52 = vmul.f32 2.0, %v11541_v50  ;;  %v813_v48 = vld [vmem:[#allocation7 + $0x8] sm:$0xff]  ;;  %v812_v50 = vld [vmem:[#allocation7] sm:$0xff] }
 0x2bf   :  { %530 = vrot.lane.b32.xlu0 %v500_v49, %s18667_s0  ;;  %v496_v53 = vmul.f32 2.0, %v475_v51  ;;  %v815_v49 = vld [vmem:[#allocation7 + $0x18] sm:$0xff] }
 0x2c0   :  { %v503_v57 = vsub.f32 %v497_v52, %v15855_v6  ;;  %v13254_v51 = vpack.c.bf16 %v815_v49, %v813_v48  ;;  %v814_v52 = vld [vmem:[#allocation7 + $0x10] sm:$0xff]  ;;  %v851_v48 = vld [vmem:[#allocation7 + $0x138] sm:$0xff] }
 0x2c1   :  { %v502_v54 = vsub.f32 %v496_v53, %v15849_v5  ;;  %v11544_v55 = vpop.f32.mrb[4].mxu1  ;;  %v817_v53 = vld [vmem:[#allocation7 + $0x28] sm:$0xff] }
 0x2c2   :  { %v485_v56 = vpop.f32.mrb[5].mxu1  ;;  %v499_v59 = vmul.f32 2.0, %v11544_v55  ;;  %v13256_v55 = vpack.c.bf16 %v814_v52, %v812_v50  ;;  %v13290_v50 = vpack.c.bf16 %v851_v48, %v849_v46  ;;  %v850_v52 = vld [vmem:[#allocation7 + $0x130] sm:$0xff] }
 0x2c3   :  { %510 = vrot.lane.b32.xlu0 %v15873_v12, %s18673_s10  ;;  %534 = vrot.lane.b32.xlu1 %v502_v54, %s18667_s0  ;;  %v498_v58 = vmul.f32 2.0, %v485_v56  ;;  %v243_v12 = vld [vmem:[#allocation6 + $0x10] sm:$0xff]  ;;  %v819_v54 = vld [vmem:[#allocation7 + $0x38] sm:$0xff] }
 0x2c4   :  { %v505_v61 = vsub.f32 %v499_v59, %v15863_v8  ;;  %v13258_v56 = vpack.c.bf16 %v819_v54, %v817_v53  ;;  %v821_v59 = vld [vmem:[#allocation7 + $0x48] sm:$0xff]  ;;  %v855_v54 = vld [vmem:[#allocation7 + $0x158] sm:$0xff] }
 0x2c5   :  { %v504_v60 = vsub.f32 %v498_v58, %v15857_v7  ;;  %v818_v58 = vld [vmem:[#allocation7 + $0x30] sm:$0xff]  ;;  %v853_v53 = vld [vmem:[#allocation7 + $0x148] sm:$0xff] }
 0x2c7   :  { %512 = vrot.lane.b32.xlu0 %v15871_v11, %s18673_s10  ;;  %536 = vrot.lane.b32.xlu1 %v503_v57, %s18667_s0  ;;  %v816_v57 = vld [vmem:[#allocation7 + $0x20] sm:$0xff] }
 0x2cb   :  { %514 = vrot.lane.b32.xlu0 %v15881_v14, %s18673_s10  ;;  %538 = vrot.lane.b32.xlu1 %v504_v60, %s18667_s0  ;;  %v244_v14 = vld [vmem:[#allocation6 + $0x18] sm:$0xff] }
 0x2cc   :  { %v15976_v17 = vpack.c.bf16 %v244_v14, %v243_v12  ;;  %v823_v60 = vld [vmem:[#allocation7 + $0x58] sm:$0xff]  ;;  %v824_v12 = vld [vmem:[#allocation7 + $0x60] sm:$0xff]  ;;  %v826_v14 = vld [vmem:[#allocation7 + $0x70] sm:$0xff] }
 0x2cf   :  { %516 = vrot.lane.b32.xlu0 %v15879_v13, %s18673_s10  ;;  %540 = vrot.lane.b32.xlu1 %v505_v61, %s18667_s0  ;;  %v549_v13 = vsel %vm267_vm0, %v15847_v4, %v509_v62  ;;  %v245_v4 = vld [vmem:[#allocation6 + $0x20] sm:$0xff]  ;;  %v13260_v61 = vpack.c.bf16 %v818_v58, %v816_v57  ;;  %v13262_v62 = vpack.c.bf16 %v823_v60, %v821_v59  ;;  %v854_v58 = vld [vmem:[#allocation7 + $0x150] sm:$0xff]  ;;  %v857_v59 = vld [vmem:[#allocation7 + $0x168] sm:$0xff] }
 0x2d0   :  { %v15988_v22 = vpack.c.bf16 %v246_v19, %v245_v4  ;;  %v830_v4 = vld [vmem:[#allocation7 + $0x90] sm:$0xff]  ;;  %v833_v19 = vld [vmem:[#allocation7 + $0xa8] sm:$0xff]  ;;  %v852_v57 = vld [vmem:[#allocation7 + $0x140] sm:$0xff] }
 0x2d1   :  { %v859_v60 = vld [vmem:[#allocation7 + $0x178] sm:$0xff] }
 0x330   :  { %v533_v3 = vpop.permute.xlu1 %532 }
 0x331   :  { %v531_v11 = vpop.permute.xlu0 %530  ;;  %v556_v16 = vsel %vm554_vm1, %v549_v13, %v533_v3  ;;  %v827_v3 = vld [vmem:[#allocation7 + $0x78] sm:$0xff]  ;;  %v829_v13 = vld [vmem:[#allocation7 + $0x88] sm:$0xff] }
 0x332   :  { %v555_v15 = vsel %vm554_vm1, %v548_v10, %v531_v11  ;;  %v13264_v10 = vpack.c.bf16 %v822_v0, %v820_v63  ;;  %v13266_v11 = vpack.c.bf16 %v827_v3, %v825_v1  ;;  %v856_v63 = vld [vmem:[#allocation7 + $0x160] sm:$0xff]  ;;  %v858_v0 = vld [vmem:[#allocation7 + $0x170] sm:$0xff]  ;;  %v861_v1 = vld [vmem:[#allocation7 + $0x188] sm:$0xff] }
 0x333   :  { %10362 = vmatmul.mubr.msk.f32.vlgmr.msra.gmra.mrb[6].mxu0 %vm596_vm2, %v555_v15  ;;  %11557 = vmatprep.mubr.msk.f32.mxu1 %vm596_vm2, %v555_v15  ;;  %v831_v15 = vld [vmem:[#allocation7 + $0x98] sm:$0xff] }
 0x334   :  { %13208 = vmatpush3.bf16.msra.mxu0 %v15964_v9  ;;  %11558 = vmatmul.mubr.msk.f32.vlgmr.msra.gmra.mrb[6].mxu1 %vm596_vm2, %v556_v16  ;;  %v863_v3 = vld [vmem:[#allocation7 + $0x198] sm:$0xff] }
 0x335   :  { %v511_v2 = vpop.permute.xlu0 %510  ;;  %685 = vmatprep.mubr.f32.mxu0 %v15504_v42  ;;  %v535_v18 = vpop.permute.xlu1 %534  ;;  %13209 = vmatprep.subr.bf16.mxu0 %v15505_v43 }
 0x336   :  { %v550_v20 = vsel %vm267_vm0, %v15849_v5, %v511_v2  ;;  %13232 = vmatpush3.bf16.msra.mxu1 %v15964_v9  ;;  %v247_v5 = vld [vmem:[#allocation6 + $0x30] sm:$0xff]  ;;  %v13270_v2 = vpack.c.bf16 %v831_v15, %v829_v13  ;;  %v865_v13 = vld [vmem:[#allocation7 + $0x1a8] sm:$0xff]  ;;  %v867_v15 = vld [vmem:[#allocation7 + $0x1b8] sm:$0xff] }
 0x337   :  { %v557_v21 = vsel %vm554_vm1, %v550_v20, %v535_v18  ;;  %10363 = vmatmul.mubr.msk.f32.gmra.mrb[8].mxu0 %vm596_vm2, %v556_v16  ;;  %13233 = vmatprep.subr.bf16.mxu1 %v15505_v43  ;;  %v16000_v28 = vpack.c.bf16 %v248_v25, %v247_v5  ;;  %v13268_v16 = vpack.c.bf16 %v826_v14, %v824_v12  ;;  %v828_v18 = vld [vmem:[#allocation7 + $0x80] sm:$0xff]  ;;  %v835_v20 = vld [vmem:[#allocation7 + $0xb8] sm:$0xff]  ;;  %v834_v5 = vld [vmem:[#allocation7 + $0xb0] sm:$0xff] }
 0x338   :  { %13211 = vmatpush3.bf16.msra.mxu0 %v15976_v17  ;;  %11560 = vmatprep.mubr.msk.f32.mxu1 %vm596_vm2, %v557_v21  ;;  %v837_v25 = vld [vmem:[#allocation7 + $0xc8] sm:$0xff]  ;;  %v860_v12 = vld [vmem:[#allocation7 + $0x180] sm:$0xff]  ;;  %v862_v14 = vld [vmem:[#allocation7 + $0x190] sm:$0xff] }
 0x339   :  { %v513_v23 = vpop.permute.xlu0 %512  ;;  %691 = vmatprep.mubr.f32.mxu0 %v15504_v42  ;;  %v537_v24 = vpop.permute.xlu1 %536  ;;  %13212 = vmatprep.subr.bf16.mxu0 %v15505_v43 }
 0x33a   :  { %v551_v26 = vsel %vm267_vm0, %v15855_v6, %v513_v23  ;;  %13235 = vmatpush3.bf16.msra.mxu1 %v15976_v17  ;;  %v249_v6 = vld [vmem:[#allocation6 + $0x40] sm:$0xff]  ;;  %v13274_v23 = vpack.c.bf16 %v835_v20, %v833_v19  ;;  %v869_v19 = vld [vmem:[#allocation7 + $0x1c8] sm:$0xff]  ;;  %v871_v20 = vld [vmem:[#allocation7 + $0x1d8] sm:$0xff] }
 0x33b   :  { %v558_v27 = vsel %vm554_vm1, %v551_v26, %v537_v24  ;;  %10364 = vmatmul.mubr.msk.f32.gmra.mrb[10].mxu0 %vm596_vm2, %v557_v21  ;;  %13236 = vmatprep.subr.bf16.mxu1 %v15505_v43  ;;  %v16012_v34 = vpack.c.bf16 %v250_v31, %v249_v6  ;;  %v13272_v21 = vpack.c.bf16 %v830_v4, %v828_v18  ;;  %v832_v24 = vld [vmem:[#allocation7 + $0xa0] sm:$0xff]  ;;  %v839_v26 = vld [vmem:[#allocation7 + $0xd8] sm:$0xff]  ;;  %v838_v6 = vld [vmem:[#allocation7 + $0xd0] sm:$0xff] }
 0x33c   :  { %13214 = vmatpush3.bf16.msra.mxu0 %v15988_v22  ;;  %11561 = vmatmul.mubr.msk.f32.gmra.mrb[8].mxu1 %vm596_vm2, %v558_v27  ;;  %v841_v31 = vld [vmem:[#allocation7 + $0xe8] sm:$0xff]  ;;  %v864_v18 = vld [vmem:[#allocation7 + $0x1a0] sm:$0xff]  ;;  %v866_v4 = vld [vmem:[#allocation7 + $0x1b0] sm:$0xff] }
 0x33d   :  { %v515_v29 = vpop.permute.xlu0 %514  ;;  %697 = vmatprep.mubr.f32.mxu0 %v15504_v42  ;;  %v539_v30 = vpop.permute.xlu1 %538  ;;  %13215 = vmatprep.subr.bf16.mxu0 %v15505_v43 }
 0x33e   :  { %v552_v32 = vsel %vm267_vm0, %v15857_v7, %v515_v29  ;;  %13238 = vmatpush3.bf16.msra.mxu1 %v15988_v22  ;;  %v251_v7 = vld [vmem:[#allocation6 + $0x50] sm:$0xff]  ;;  %v13278_v29 = vpack.c.bf16 %v839_v26, %v837_v25  ;;  %v873_v25 = vld [vmem:[#allocation7 + $0x1e8] sm:$0xff]  ;;  %v875_v26 = vld [vmem:[#allocation7 + $0x1f8] sm:$0xff] }
 0x33f   :  { %v559_v33 = vsel %vm554_vm1, %v552_v32, %v539_v30  ;;  %10365 = vmatmul.mubr.msk.f32.gmra.mrb[12].mxu0 %vm596_vm2, %v558_v27  ;;  %13239 = vmatprep.subr.bf16.mxu1 %v15505_v43  ;;  %v16024_v40 = vpack.c.bf16 %v252_v37, %v251_v7  ;;  %v13276_v27 = vpack.c.bf16 %v834_v5, %v832_v24  ;;  %v836_v30 = vld [vmem:[#allocation7 + $0xc0] sm:$0xff]  ;;  %v843_v32 = vld [vmem:[#allocation7 + $0xf8] sm:$0xff]  ;;  %v842_v7 = vld [vmem:[#allocation7 + $0xf0] sm:$0xff] }
 0x340   :  { %13217 = vmatpush3.bf16.msra.mxu0 %v16000_v28  ;;  %11563 = vmatprep.mubr.msk.f32.mxu1 %vm596_vm2, %v559_v33  ;;  %v845_v37 = vld [vmem:[#allocation7 + $0x108] sm:$0xff]  ;;  %v868_v24 = vld [vmem:[#allocation7 + $0x1c0] sm:$0xff]  ;;  %v870_v5 = vld [vmem:[#allocation7 + $0x1d0] sm:$0xff] }
 0x341   :  { %v517_v35 = vpop.permute.xlu0 %516  ;;  %703 = vmatprep.mubr.f32.mxu0 %v15504_v42  ;;  %v541_v36 = vpop.permute.xlu1 %540  ;;  %13218 = vmatprep.subr.bf16.mxu0 %v15505_v43 }
 0x342   :  { %v553_v38 = vsel %vm267_vm0, %v15863_v8, %v517_v35  ;;  %13241 = vmatpush3.bf16.msra.mxu1 %v16000_v28  ;;  %v254_v8 = vld [vmem:[#allocation6 + $0x68] sm:$0xff]  ;;  %v13282_v35 = vpack.c.bf16 %v843_v32, %v841_v31  ;;  %v879_v32 = vld [vmem:[#allocation7 + $0x218] sm:$0xff] }
 0x343   :  { %v560_v39 = vsel %vm554_vm1, %v553_v38, %v541_v36  ;;  %10366 = vmatmul.mubr.msk.f32.gmra.mrb[14].mxu0 %vm596_vm2, %v559_v33  ;;  %13242 = vmatprep.subr.bf16.mxu1 %v15505_v43  ;;  %v16034_v44 = vpack.c.bf16 %v254_v8, %v253_v41  ;;  %v13280_v33 = vpack.c.bf16 %v838_v6, %v836_v30  ;;  %v840_v36 = vld [vmem:[#allocation7 + $0xe0] sm:$0xff]  ;;  %v847_v38 = vld [vmem:[#allocation7 + $0x118] sm:$0xff]  ;;  %v874_v6 = vld [vmem:[#allocation7 + $0x1f0] sm:$0xff]  ;;  %vm2403_vm1 = vcmask 11264  }
 0x344   :  { %13220 = vmatpush3.bf16.msra.mxu0 %v16012_v34  ;;  %11564 = vmatmul.mubr.msk.f32.gmra.mrb[10].mxu1 %vm596_vm2, %v560_v39  ;;  %v13286_v41 = vpack.c.bf16 %v847_v38, %v845_v37  ;;  %v844_v8 = vld [vmem:[#allocation7 + $0x100] sm:$0xff]  ;;  %v877_v31 = vld [vmem:[#allocation7 + $0x208] sm:$0xff] }
 0x345   :  { %709 = vmatprep.mubr.f32.mxu0 %v15504_v42  ;;  %13221 = vmatprep.subr.bf16.mxu0 %v15505_v43  ;;  %v13288_v49 = vpack.c.bf16 %v846_v45, %v844_v8  ;;  %v872_v30 = vld [vmem:[#allocation7 + $0x1e0] sm:$0xff] }
 0x346   :  { %13244 = vmatpush3.bf16.msra.mxu1 %v16012_v34  ;;  %11633 = vmatprep.mubr.msk.f32.mxu1 %vm15507_vm3, %v15504_v42  ;;  %v16054_v38 = vld [vmem:[#allocation9] sm:$0x7] }
 0x347   :  { %10367 = vmatmul.mubr.msk.f32.gmra.mrb[16].mxu0 %vm596_vm2, %v560_v39  ;;  %13245 = vmatprep.subr.bf16.mxu1 %v15505_v43  ;;  %v13284_v39 = vpack.c.bf16 %v842_v7, %v840_v36  ;;  %v581_v36 = vlaneseq }
 0x348   :  { %13223 = vmatpush3.bf16.msra.mxu0 %v16024_v40  ;;  %11598 = vmatprep.mubr.msk.f32.mxu0 %vm15507_vm3, %v15504_v42 }
 0x349   :  { %13224 = vmatprep.subr.bf16.mxu0 %v15505_v43  ;;  %v16051_v7 = vshrl.u32 %v581_v36, 7  ;;  %v900_v36 = vld [vmem:[#allocation7 + $0x2c0] sm:$0xff] }
 0x34a   :  { %13247 = vmatpush3.bf16.msra.mxu1 %v16024_v40 }
 0x34b   :  { %13248 = vmatprep.subr.bf16.mxu1 %v15505_v43  ;;  %v591_v37 = vsub.s32 2, %v16051_v7 }
 0x34c   :  { %13226 = vmatpush3.bf16.msra.mxu0 %v16034_v44 }
 0x34d   :  { %13227 = vmatprep.subr.bf16.mxu0 %v15505_v43 }
 0x34e   :  { %13250 = vmatpush3.bf16.msra.mxu1 %v16034_v44 }
 0x34f   :  { %13251 = vmatprep.subr.bf16.mxu1 %v15505_v43 }
 0x350   :  { %13229 = vmatpush3.bf16.msra.mxu0 %v16042_v47 }
 0x351   :  { %13255 = vmatprep.subr.bf16.mxu0 %v13254_v51  ;;  %v848_v51 = vld [vmem:[#allocation7 + $0x120] sm:$0xff] }
 0x352   :  { %13253 = vmatpush3.bf16.msra.mxu1 %v16042_v47 }
 0x353   :  { %11599 = vmatmul.mubr.f32.vlgmr.msra.gmra.mrb[18].mxu0 %v15504_v42  ;;  %13350 = vmatprep.subr.bf16.mxu1 %v15505_v43 }
 0x354   :  { %13257 = vmatpush1.bf16.msra.mxu0 %v13256_v55  ;;  %v13292_v55 = vpack.c.bf16 %v850_v52, %v848_v51 }
 0x355   :  { %13259 = vmatprep.subr.bf16.mxu0 %v13258_v56  ;;  %v13294_v56 = vpack.c.bf16 %v855_v54, %v853_v53 }
 0x358   :  { %13261 = vmatpush1.bf16.msra.mxu0 %v13260_v61  ;;  %v13296_v61 = vpack.c.bf16 %v854_v58, %v852_v57  ;;  %v881_v57 = vld [vmem:[#allocation7 + $0x228] sm:$0xff]  ;;  %v883_v58 = vld [vmem:[#allocation7 + $0x238] sm:$0xff] }
 0x359   :  { %13263 = vmatprep.subr.bf16.mxu0 %v13262_v62  ;;  %v13298_v62 = vpack.c.bf16 %v859_v60, %v857_v59 }
 0x35c   :  { %13265 = vmatpush1.bf16.msra.mxu0 %v13264_v10  ;;  %v13300_v10 = vpack.c.bf16 %v858_v0, %v856_v63  ;;  %v882_v63 = vld [vmem:[#allocation7 + $0x230] sm:$0xff] }
 0x35d   :  { %13267 = vmatprep.subr.bf16.mxu0 %v13266_v11  ;;  %v13302_v11 = vpack.c.bf16 %v863_v3, %v861_v1  ;;  %v885_v1 = vld [vmem:[#allocation7 + $0x248] sm:$0xff]  ;;  %v887_v3 = vld [vmem:[#allocation7 + $0x258] sm:$0xff] }
 0x360   :  { %13269 = vmatpush1.bf16.msra.mxu0 %v13268_v16  ;;  %v13304_v16 = vpack.c.bf16 %v862_v14, %v860_v12  ;;  %v884_v12 = vld [vmem:[#allocation7 + $0x240] sm:$0xff]  ;;  %v886_v14 = vld [vmem:[#allocation7 + $0x250] sm:$0xff] }
 0x361   :  { %13271 = vmatprep.subr.bf16.mxu0 %v13270_v2  ;;  %v13306_v2 = vpack.c.bf16 %v867_v15, %v865_v13  ;;  %v889_v13 = vld [vmem:[#allocation7 + $0x268] sm:$0xff]  ;;  %v891_v15 = vld [vmem:[#allocation7 + $0x278] sm:$0xff] }
 0x364   :  { %13273 = vmatpush1.bf16.msra.mxu0 %v13272_v21  ;;  %v13308_v21 = vpack.c.bf16 %v866_v4, %v864_v18  ;;  %v888_v18 = vld [vmem:[#allocation7 + $0x260] sm:$0xff]  ;;  %v890_v4 = vld [vmem:[#allocation7 + $0x270] sm:$0xff] }
 0x365   :  { %13275 = vmatprep.subr.bf16.mxu0 %v13274_v23  ;;  %v13310_v23 = vpack.c.bf16 %v871_v20, %v869_v19  ;;  %v893_v19 = vld [vmem:[#allocation7 + $0x288] sm:$0xff]  ;;  %v895_v20 = vld [vmem:[#allocation7 + $0x298] sm:$0xff] }
 0x368   :  { %13277 = vmatpush1.bf16.msra.mxu0 %v13276_v27  ;;  %v13312_v27 = vpack.c.bf16 %v870_v5, %v868_v24  ;;  %v892_v24 = vld [vmem:[#allocation7 + $0x280] sm:$0xff]  ;;  %v894_v5 = vld [vmem:[#allocation7 + $0x290] sm:$0xff] }
 0x369   :  { %13279 = vmatprep.subr.bf16.mxu0 %v13278_v29  ;;  %v13314_v29 = vpack.c.bf16 %v875_v26, %v873_v25  ;;  %v897_v25 = vld [vmem:[#allocation7 + $0x2a8] sm:$0xff]  ;;  %v899_v26 = vld [vmem:[#allocation7 + $0x2b8] sm:$0xff] }
 0x36c   :  { %13281 = vmatpush1.bf16.msra.mxu0 %v13280_v33  ;;  %v13316_v33 = vpack.c.bf16 %v874_v6, %v872_v30  ;;  %v896_v30 = vld [vmem:[#allocation7 + $0x2a0] sm:$0xff]  ;;  %v898_v6 = vld [vmem:[#allocation7 + $0x2b0] sm:$0xff] }
 0x36d   :  { %13283 = vmatprep.subr.bf16.mxu0 %v13282_v35  ;;  %v13318_v35 = vpack.c.bf16 %v879_v32, %v877_v31  ;;  %v901_v31 = vld [vmem:[#allocation7 + $0x2c8] sm:$0xff]  ;;  %v903_v32 = vld [vmem:[#allocation7 + $0x2d8] sm:$0xff] }
 0x370   :  { %13285 = vmatpush1.bf16.msra.mxu0 %v13284_v39  ;;  %v16057_v39 = vrot.slane %v16054_v38, %v591_v37  ;;  %v902_v37 = vld [vmem:[#allocation7 + $0x2d0] sm:$0xff] }
 0x371   :  { %13287 = vmatprep.subr.bf16.mxu0 %v13286_v41 }
 0x374   :  { %13289 = vmatpush1.bf16.msra.mxu0 %v13288_v49 }
 0x375   :  { %13291 = vmatprep.subr.bf16.mxu0 %v13290_v50 }
 0x378   :  { %13293 = vmatpush1.bf16.msra.mxu0 %v13292_v55  ;;  %v876_v55 = vld [vmem:[#allocation7 + $0x200] sm:$0xff] }
 0x379   :  { %13295 = vmatprep.subr.bf16.mxu0 %v13294_v56  ;;  %v878_v56 = vld [vmem:[#allocation7 + $0x210] sm:$0xff] }
 0x37a   :  { %v13320_v59 = vpack.c.bf16 %v878_v56, %v876_v55  ;;  %v906_v55 = vld [vmem:[#allocation7 + $0x2f0] sm:$0xff] }
 0x37c   :  { %13297 = vmatpush1.bf16.msra.mxu0 %v13296_v61  ;;  %v13322_v61 = vpack.c.bf16 %v883_v58, %v881_v57 }
 0x37d   :  { %13299 = vmatprep.subr.bf16.mxu0 %v13298_v62  ;;  %v880_v62 = vld [vmem:[#allocation7 + $0x220] sm:$0xff] }
 0x380   :  { %13301 = vmatpush1.bf16.msra.mxu0 %v13300_v10  ;;  %v13324_v10 = vpack.c.bf16 %v882_v63, %v880_v62 }
 0x381   :  { %13303 = vmatprep.subr.bf16.mxu0 %v13302_v11  ;;  %v13326_v11 = vpack.c.bf16 %v887_v3, %v885_v1 }
 0x384   :  { %13305 = vmatpush1.bf16.msra.mxu0 %v13304_v16  ;;  %v13328_v16 = vpack.c.bf16 %v886_v14, %v884_v12  ;;  %v924_v14 = vld [vmem:[%s18699_s2 + $0x80] sm:$0xff] }
 0x385   :  { %13307 = vmatprep.subr.bf16.mxu0 %v13306_v2  ;;  %v13330_v2 = vpack.c.bf16 %v891_v15, %v889_v13  ;;  %v925_v13 = vld [vmem:[%s18699_s2 + $0x88] sm:$0xff] }
 0x386   :  { %v13398_v15 = vpack.c.bf16 %v925_v13, %v924_v14  ;;  %v931_v14 = vld [vmem:[%s18699_s2 + $0xb8] sm:$0xff] }
 0x388   :  { %13309 = vmatpush1.bf16.msra.mxu0 %v13308_v21  ;;  %v13332_v21 = vpack.c.bf16 %v890_v4, %v888_v18  ;;  %v942_v18 = vld [vmem:[%s18699_s2 + $0x110] sm:$0xff] }
 0x389   :  { %13311 = vmatprep.subr.bf16.mxu0 %v13310_v23  ;;  %v13334_v23 = vpack.c.bf16 %v895_v20, %v893_v19  ;;  %v943_v19 = vld [vmem:[%s18699_s2 + $0x118] sm:$0xff] }
 0x38a   :  { %v13434_v20 = vpack.c.bf16 %v943_v19, %v942_v18  ;;  %v932_v18 = vld [vmem:[%s18699_s2 + $0xc0] sm:$0xff] }
 0x38c   :  { %13313 = vmatpush1.bf16.msra.mxu0 %v13312_v27  ;;  %v13336_v27 = vpack.c.bf16 %v894_v5, %v892_v24  ;;  %v946_v5 = vld [vmem:[%s18699_s2 + $0x130] sm:$0xff] }
 0x38d   :  { %13315 = vmatprep.subr.bf16.mxu0 %v13314_v29  ;;  %v13338_v29 = vpack.c.bf16 %v899_v26, %v897_v25  ;;  %v947_v25 = vld [vmem:[%s18699_s2 + $0x138] sm:$0xff] }
 0x38e   :  { %v13440_v26 = vpack.c.bf16 %v947_v25, %v946_v5  ;;  %v935_v5 = vld [vmem:[%s18699_s2 + $0xd8] sm:$0xff] }
 0x390   :  { %13317 = vmatpush1.bf16.msra.mxu0 %v13316_v33  ;;  %v13340_v33 = vpack.c.bf16 %v898_v6, %v896_v30  ;;  %v950_v6 = vld [vmem:[%s18699_s2 + $0x150] sm:$0xff] }
 0x391   :  { %13319 = vmatprep.subr.bf16.mxu0 %v13318_v35  ;;  %v13342_v35 = vpack.c.bf16 %v903_v32, %v901_v31  ;;  %v951_v31 = vld [vmem:[%s18699_s2 + $0x158] sm:$0xff] }
 0x392   :  { %v13446_v32 = vpack.c.bf16 %v951_v31, %v950_v6  ;;  %v937_v6 = vld [vmem:[%s18699_s2 + $0xe8] sm:$0xff] }
 0x407   :  { %v11559_v41 = vpop.f32.mrb[6].mxu1 }
 0x408   :  { %v16060_v8 = vadd.f32 %v11559_v41, %v16057_v39  ;;  %v16062_v45 = vpop.f32.mrb[7].mxu1  ;;  %v905_v41 = vld [vmem:[#allocation7 + $0x2e8] sm:$0xff] }
 0x40f   :  { %v11562_v46 = vpop.f32.mrb[8].mxu1 }
 0x410   :  { %v16065_v48 = vadd.f32 %v11562_v46, %v16057_v39  ;;  %v792_v49 = vpop.f32.mrb[9].mxu1  ;;  %v907_v46 = vld [vmem:[#allocation7 + $0x2f8] sm:$0xff] }
 0x411   :  { %v16068_v50 = vadd.f32 %v792_v49, %v16057_v39  ;;  %v13344_v49 = vpack.c.bf16 %v902_v37, %v900_v36  ;;  %v908_v37 = vld [vmem:[%s18699_s2] sm:$0xff] }
 0x417   :  { %v11565_v51 = vpop.f32.mrb[10].mxu1 }
 0x418   :  { %v16071_v52 = vadd.f32 %v11565_v51, %v16057_v39  ;;  %v802_v53 = vpop.f32.mrb[11].mxu1  ;;  %v13346_v51 = vpack.c.bf16 %v907_v46, %v905_v41  ;;  %v909_v41 = vld [vmem:[%s18699_s2 + $0x8] sm:$0xff]  ;;  %v926_v46 = vld [vmem:[%s18699_s2 + $0x90] sm:$0xff] }
 0x419   :  { %v16074_v54 = vadd.f32 %v802_v53, %v16057_v39  ;;  %v904_v53 = vld [vmem:[#allocation7 + $0x2e0] sm:$0xff] }
 0x41a   :  { %v13348_v56 = vpack.c.bf16 %v906_v55, %v904_v53  ;;  %v910_v55 = vld [vmem:[%s18699_s2 + $0x10] sm:$0xff] }
 0x426   :  { %v1022_v60 = vpop.f32.mrb[18].mxu0 }
 0x427   :  { %v11600_v0 = vpop.f32.mrb[19].mxu0  ;;  %11634 = vmatmul.mubr.f32.vlgmr.msra.gmra.mrb[12].mxu1 %v1022_v60  ;;  %1161 = vmatprep.mubr.f32.mxu0 %v1022_v60  ;;  %v16100_v60 = vsub.s32 0, %v16051_v7 }
 0x428   :  { %1162 = vmatmul.mubr.f32.vlgmr.msra.gmra.mrb[6].mxu0 %v15504_v42  ;;  %13352 = vmatpush3.bf16.msra.mxu1 %v15964_v9 }
 0x429   :  { %13321 = vmatpush1.bf16.msra.mxu0 %v13320_v59  ;;  %1232 = vmatprep.mubr.f32.mxu0 %v15504_v42 }
 0x42a   :  { %13323 = vmatprep.subr.bf16.mxu0 %v13322_v61  ;;  %13353 = vmatprep.subr.bf16.mxu1 %v15505_v43  ;;  %v16104_v61 = vrot.slane %v16054_v38, %v16100_v60 }
 0x42b   :  { %11668 = vmatprep.mubr.msk.f32.mxu1 %vm15507_vm3, %v15504_v42 }
 0x42c   :  { %13355 = vmatpush3.bf16.msra.mxu1 %v15976_v17 }
 0x42d   :  { %13325 = vmatpush1.bf16.msra.mxu0 %v13324_v10  ;;  %13356 = vmatprep.subr.bf16.mxu1 %v15505_v43 }
 0x42e   :  { %13327 = vmatprep.subr.bf16.mxu0 %v13326_v11 }
 0x430   :  { %13358 = vmatpush3.bf16.msra.mxu1 %v15988_v22 }
 0x431   :  { %13329 = vmatpush1.bf16.msra.mxu0 %v13328_v16  ;;  %13359 = vmatprep.subr.bf16.mxu1 %v15505_v43  ;;  %v940_v16 = vld [vmem:[%s18699_s2 + $0x100] sm:$0xff] }
 0x432   :  { %13331 = vmatprep.subr.bf16.mxu0 %v13330_v2  ;;  %v941_v2 = vld [vmem:[%s18699_s2 + $0x108] sm:$0xff] }
 0x433   :  { %v13431_v4 = vpack.c.bf16 %v941_v2, %v940_v16  ;;  %v914_v16 = vld [vmem:[%s18699_s2 + $0x30] sm:$0xff]  ;;  %v915_v2 = vld [vmem:[%s18699_s2 + $0x38] sm:$0xff] }
 0x434   :  { %13361 = vmatpush3.bf16.msra.mxu1 %v16000_v28  ;;  %v13412_v19 = vpack.c.bf16 %v915_v2, %v914_v16 }
 0x435   :  { %13333 = vmatpush1.bf16.msra.mxu0 %v13332_v21  ;;  %13362 = vmatprep.subr.bf16.mxu1 %v15505_v43  ;;  %v944_v21 = vld [vmem:[%s18699_s2 + $0x120] sm:$0xff] }
 0x436   :  { %13335 = vmatprep.subr.bf16.mxu0 %v13334_v23  ;;  %v945_v23 = vld [vmem:[%s18699_s2 + $0x128] sm:$0xff] }
 0x437   :  { %v13437_v24 = vpack.c.bf16 %v945_v23, %v944_v21  ;;  %v916_v21 = vld [vmem:[%s18699_s2 + $0x40] sm:$0xff]  ;;  %v917_v23 = vld [vmem:[%s18699_s2 + $0x48] sm:$0xff] }
 0x438   :  { %13364 = vmatpush3.bf16.msra.mxu1 %v16012_v34  ;;  %v13416_v25 = vpack.c.bf16 %v917_v23, %v916_v21  ;;  %v1549_v21 = vld [vmem:[%s18627_s13 + $0x38] sm:$0xff] }
 0x439   :  { %13337 = vmatpush1.bf16.msra.mxu0 %v13336_v27  ;;  %13365 = vmatprep.subr.bf16.mxu1 %v15505_v43  ;;  %v948_v27 = vld [vmem:[%s18699_s2 + $0x140] sm:$0xff] }
 0x43a   :  { %13339 = vmatprep.subr.bf16.mxu0 %v13338_v29  ;;  %v949_v29 = vld [vmem:[%s18699_s2 + $0x148] sm:$0xff] }
 0x43b   :  { %v13443_v30 = vpack.c.bf16 %v949_v29, %v948_v27  ;;  %v918_v27 = vld [vmem:[%s18699_s2 + $0x50] sm:$0xff]  ;;  %v919_v29 = vld [vmem:[%s18699_s2 + $0x58] sm:$0xff] }
 0x43c   :  { %13367 = vmatpush3.bf16.msra.mxu1 %v16024_v40  ;;  %v13420_v31 = vpack.c.bf16 %v919_v29, %v918_v27  ;;  %v1554_v29 = vld [vmem:[%s18627_s13 + $0x60] sm:$0xff] }
 0x43d   :  { %13341 = vmatpush1.bf16.msra.mxu0 %v13340_v33  ;;  %13368 = vmatprep.subr.bf16.mxu1 %v15505_v43  ;;  %v952_v33 = vld [vmem:[%s18699_s2 + $0x160] sm:$0xff] }
 0x43e   :  { %13343 = vmatprep.subr.bf16.mxu0 %v13342_v35  ;;  %v953_v35 = vld [vmem:[%s18699_s2 + $0x168] sm:$0xff] }
 0x43f   :  { %v13449_v36 = vpack.c.bf16 %v953_v35, %v952_v33  ;;  %v920_v33 = vld [vmem:[%s18699_s2 + $0x60] sm:$0xff]  ;;  %v921_v35 = vld [vmem:[%s18699_s2 + $0x68] sm:$0xff] }
 0x440   :  { %13370 = vmatpush3.bf16.msra.mxu1 %v16034_v44 }
 0x441   :  { %13345 = vmatpush1.bf16.msra.mxu0 %v13344_v49  ;;  %13371 = vmatprep.subr.bf16.mxu1 %v15505_v43  ;;  %v927_v49 = vld [vmem:[%s18699_s2 + $0x98] sm:$0xff] }
 0x442   :  { %13347 = vmatprep.subr.bf16.mxu0 %v13346_v51  ;;  %v13400_v51 = vpack.c.bf16 %v909_v41, %v908_v37  ;;  %v13402_v53 = vpack.c.bf16 %v927_v49, %v926_v46  ;;  %v939_v37 = vld [vmem:[%s18699_s2 + $0xf8] sm:$0xff]  ;;  %v13424_v41 = vpack.c.bf16 %v921_v35, %v920_v33  ;;  %v922_v49 = vld [vmem:[%s18699_s2 + $0x70] sm:$0xff]  ;;  %v1635_v35 = vld [vmem:[%s18700_s14] sm:$0xff] }
 0x443   :  { %1638 = vrot.lane.b32.xlu0 %v1635_v35, %s18673_s10 }
 0x444   :  { %13373 = vmatpush3.bf16.msra.mxu1 %v16042_v47 }
 0x445   :  { %13374 = vmatprep.subr.bf16.mxu1 %v15505_v43  ;;  %13349 = vmatpush1.bf16.msra.mxu0 %v13348_v56  ;;  %v911_v56 = vld [vmem:[%s18699_s2 + $0x18] sm:$0xff] }
 0x446   :  { %13430 = vmatprep.subr.bf16.mxu0 %v15505_v43 }
 0x4fa   :  { %v1092_v57 = vpop.f32.mrb[12].mxu1 }
 0x4fb   :  { %v1096_v58 = vmul.f32 2.0, %v1092_v57  ;;  %v11635_v59 = vpop.f32.mrb[13].mxu1 }
 0x4fc   :  { %v929_v59 = vld [vmem:[%s18699_s2 + $0xa8] sm:$0xff] }
 0x4fd   :  { %1233 = vmatmul.mubr.f32.vlgmr.msra.gmra.mrb[6].mxu0 %v1096_v58  ;;  %v928_v58 = vld [vmem:[%s18699_s2 + $0xa0] sm:$0xff] }
 0x4fe   :  { %11738 = vmatprep.mubr.msk.f32.mxu0 %vm15507_vm3, %v15504_v42  ;;  %13432 = vmatpush3.bf16.msra.mxu0 %v13431_v4  ;;  %v933_v4 = vld [vmem:[%s18699_s2 + $0xc8] sm:$0xff] }
 0x4ff   :  { %13433 = vmatprep.subr.bf16.mxu0 %v15505_v43 }
 0x502   :  { %13435 = vmatpush3.bf16.msra.mxu0 %v13434_v20  ;;  %v13414_v20 = vpack.c.bf16 %v933_v4, %v932_v18 }
 0x503   :  { %13436 = vmatprep.subr.bf16.mxu0 %v15505_v43 }
 0x506   :  { %13438 = vmatpush3.bf16.msra.mxu0 %v13437_v24  ;;  %v934_v24 = vld [vmem:[%s18699_s2 + $0xd0] sm:$0xff] }
 0x507   :  { %13439 = vmatprep.subr.bf16.mxu0 %v15505_v43 }
 0x50a   :  { %13441 = vmatpush3.bf16.msra.mxu0 %v13440_v26  ;;  %v13418_v26 = vpack.c.bf16 %v935_v5, %v934_v24  ;;  %v1551_v24 = vld [vmem:[%s18627_s13 + $0x48] sm:$0xff] }
 0x50b   :  { %13442 = vmatprep.subr.bf16.mxu0 %v15505_v43 }
 0x50e   :  { %13444 = vmatpush3.bf16.msra.mxu0 %v13443_v30  ;;  %v936_v30 = vld [vmem:[%s18699_s2 + $0xe0] sm:$0xff] }
 0x50f   :  { %13445 = vmatprep.subr.bf16.mxu0 %v15505_v43 }
 0x512   :  { %13447 = vmatpush3.bf16.msra.mxu0 %v13446_v32  ;;  %v13422_v32 = vpack.c.bf16 %v937_v6, %v936_v30  ;;  %v1555_v30 = vld [vmem:[%s18627_s13 + $0x68] sm:$0xff] }
 0x513   :  { %13448 = vmatprep.subr.bf16.mxu0 %v15505_v43  ;;  %v13473_v6 = vpack.c.bf16 %v1555_v30, %v1554_v29 }
 0x516   :  { %13450 = vmatpush3.bf16.msra.mxu0 %v13449_v36  ;;  %v938_v36 = vld [vmem:[%s18699_s2 + $0xf0] sm:$0xff] }
 0x517   :  { %13451 = vmatprep.subr.bf16.mxu0 %v15505_v43  ;;  %v13426_v46 = vpack.c.bf16 %v939_v37, %v938_v36  ;;  %v1636_v36 = vld [vmem:[%s18701_s3] sm:$0xff]  ;;  %v587_v37 = vsub.s32 1, %v16051_v7 }
 0x518   :  { %1642 = vrot.lane.b32.xlu1 %v1636_v36, %s18671_s6 }
 0x5d0   :  { %v1234_v62 = vpop.f32.mrb[6].mxu0 }
 0x5d1   :  { %v14970_v63 = vadd.f32 %v1234_v62, %v16104_v61  ;;  %v16107_v0 = vpop.f32.mrb[7].mxu0 }
 0x5d3   :  { %v10374_v1 = vmul.f32 -1.442695, %v14970_v63  ;;  %v13404_v63 = vpack.c.bf16 %v911_v56, %v910_v55  ;;  %v954_v55 = vld [vmem:[%s18699_s2 + $0x170] sm:$0xff]  ;;  %v955_v56 = vld [vmem:[%s18699_s2 + $0x178] sm:$0xff] }
 0x5d5   :  { %15032 = vpow2.f32 %v10374_v1  ;;  %v13406_v1 = vpack.c.bf16 %v929_v59, %v928_v58  ;;  %v1542_v58 = vld [vmem:[%s18627_s13] sm:$0xff]  ;;  %v1543_v59 = vld [vmem:[%s18627_s13 + $0x8] sm:$0xff] }
 0x5df   :  { %v15033_v3 = vpop.eup %15032 }
 0x5e0   :  { %v1247_v10 = vadd.f32 1.0, %v15033_v3  ;;  %v912_v3 = vld [vmem:[%s18699_s2 + $0x20] sm:$0xff] }
 0x5e2   :  { %15034 = vrcp.f32 %v1247_v10  ;;  %v913_v10 = vld [vmem:[%s18699_s2 + $0x28] sm:$0xff] }
 0x5e3   :  { %v13408_v13 = vpack.c.bf16 %v913_v10, %v912_v3  ;;  %v1546_v10 = vld [vmem:[%s18627_s13 + $0x20] sm:$0xff] }
 0x5ec   :  { %v15035_v11 = vpop.eup %15034 }
 0x5ed   :  { %v16109_v12 = vmul.f32 0.0, %v15035_v11  ;;  %v930_v11 = vld [vmem:[%s18699_s2 + $0xb0] sm:$0xff] }
 0x5ef   :  { %11669 = vmatmul.mubr.f32.vlgmr.msra.gmra.mrb[14].mxu1 %v16109_v12 }
 0x5f0   :  { %13376 = vmatpush3.bf16.msra.mxu1 %v15964_v9  ;;  %11703 = vmatprep.mubr.msk.f32.mxu1 %vm15507_vm3, %v15504_v42 }
 0x5f1   :  { %13377 = vmatprep.subr.bf16.mxu1 %v15505_v43 }
 0x5f4   :  { %13379 = vmatpush3.bf16.msra.mxu1 %v15976_v17 }
 0x5f5   :  { %13380 = vmatprep.subr.bf16.mxu1 %v15505_v43 }
 0x5f8   :  { %13382 = vmatpush3.bf16.msra.mxu1 %v15988_v22 }
 0x5f9   :  { %13383 = vmatprep.subr.bf16.mxu1 %v15505_v43 }
 0x5fc   :  { %13385 = vmatpush3.bf16.msra.mxu1 %v16000_v28 }
 0x5fd   :  { %13386 = vmatprep.subr.bf16.mxu1 %v15505_v43 }
 0x600   :  { %13388 = vmatpush3.bf16.msra.mxu1 %v16012_v34 }
 0x601   :  { %13389 = vmatprep.subr.bf16.mxu1 %v15505_v43 }
 0x604   :  { %13391 = vmatpush3.bf16.msra.mxu1 %v16024_v40 }
 0x605   :  { %13392 = vmatprep.subr.bf16.mxu1 %v15505_v43 }
 0x608   :  { %13394 = vmatpush3.bf16.msra.mxu1 %v16034_v44 }
 0x609   :  { %13395 = vmatprep.subr.bf16.mxu1 %v15505_v43 }
 0x60c   :  { %13397 = vmatpush3.bf16.msra.mxu1 %v16042_v47 }
 0x60d   :  { %13399 = vmatprep.subr.bf16.mxu1 %v13398_v15  ;;  %v13410_v15 = vpack.c.bf16 %v931_v14, %v930_v11  ;;  %v1547_v11 = vld [vmem:[%s18627_s13 + $0x28] sm:$0xff] }
 0x60e   :  { %v13461_v14 = vpack.c.bf16 %v1547_v11, %v1546_v10  ;;  %v1649_v11 = vld [vmem:[#allocation12 + $0x8] sm:$0xff] }
 0x6c2   :  { %v1320_v57 = vpop.f32.mrb[14].mxu1 }
 0x6c3   :  { %v11670_v62 = vpop.f32.mrb[15].mxu1  ;;  %11704 = vmatmul.mubr.f32.vlgmr.msra.gmra.mrb[16].mxu1 %v1320_v57 }
 0x6c4   :  { %13401 = vmatpush3.bf16.msra.mxu1 %v13400_v51  ;;  %1460 = vmatprep.mubr.f32.mxu1 %v1320_v57  ;;  %v923_v51 = vld [vmem:[%s18699_s2 + $0x78] sm:$0xff]  ;;  %v13452_v57 = vpack.c.bf16 %v955_v56, %v954_v55  ;;  %v1544_v62 = vld [vmem:[%s18627_s13 + $0x10] sm:$0xff]  ;;  %v783_v56 = vadd.f32 %v16062_v45, %v16057_v39  ;;  %v1648_v45 = vld [vmem:[#allocation12] sm:$0xff] }
 0x6c5   :  { %13403 = vmatprep.subr.bf16.mxu1 %v13402_v53  ;;  %v13428_v53 = vpack.c.bf16 %v923_v51, %v922_v49 }
 0x6c6   :  { %13453 = vmatpush3.bf16.msra.mxu0 %v13452_v57 }
 0x6c7   :  { %13478 = vmatprep.subr.bf16.mxu0 %v15505_v43 }
 0x6c8   :  { %13405 = vmatpush3.bf16.msra.mxu1 %v13404_v63  ;;  %v13455_v63 = vpack.c.bf16 %v1543_v59, %v1542_v58 }
 0x6c9   :  { %13407 = vmatprep.subr.bf16.mxu1 %v13406_v1  ;;  %v1545_v1 = vld [vmem:[%s18627_s13 + $0x18] sm:$0xff] }
 0x6ca   :  { %v13458_v3 = vpack.c.bf16 %v1545_v1, %v1544_v62 }
 0x6cc   :  { %13409 = vmatpush3.bf16.msra.mxu1 %v13408_v13 }
 0x6cd   :  { %13411 = vmatprep.subr.bf16.mxu1 %v13410_v15 }
 0x6d0   :  { %13413 = vmatpush3.bf16.msra.mxu1 %v13412_v19 }
 0x6d1   :  { %13415 = vmatprep.subr.bf16.mxu1 %v13414_v20  ;;  %v1548_v20 = vld [vmem:[%s18627_s13 + $0x30] sm:$0xff] }
 0x6d2   :  { %v13464_v23 = vpack.c.bf16 %v1549_v21, %v1548_v20  ;;  %v10380_v20 = vld [vmem:[%s18632_s18] ss:$0 sm:$0xff] }
 0x6d4   :  { %13417 = vmatpush3.bf16.msra.mxu1 %v13416_v25  ;;  %v1552_v25 = vld [vmem:[%s18627_s13 + $0x50] sm:$0xff] }
 0x6d5   :  { %13419 = vmatprep.subr.bf16.mxu1 %v13418_v26  ;;  %v1553_v26 = vld [vmem:[%s18627_s13 + $0x58] sm:$0xff] }
 0x6d6   :  { %v13470_v27 = vpack.c.bf16 %v1553_v26, %v1552_v25  ;;  %v10377_v25 = vld [vmem:[#allocation13] ss:$0 sm:$0xff] }
 0x6d8   :  { %13421 = vmatpush3.bf16.msra.mxu1 %v13420_v31  ;;  %v1556_v31 = vld [vmem:[%s18627_s13 + $0x70] sm:$0xff] }
 0x6d9   :  { %13423 = vmatprep.subr.bf16.mxu1 %v13422_v32  ;;  %v1557_v32 = vld [vmem:[%s18627_s13 + $0x78] sm:$0xff] }
 0x6da   :  { %v13476_v33 = vpack.c.bf16 %v1557_v32, %v1556_v31 }
 0x6dc   :  { %13425 = vmatpush3.bf16.msra.mxu1 %v13424_v41  ;;  %v16354_v41 = vrot.slane %v16054_v38, %v587_v37  ;;  %v1651_v38 = vld [vmem:[%s18630_s16] sm:$0xff] }
 0x6dd   :  { %13427 = vmatprep.subr.bf16.mxu1 %v13426_v46 }
 0x6de   :  { %v14971_v46 = vadd.f32 %v16107_v0, %v16354_v41  ;;  %v1652_v0 = vld [vmem:[%s18630_s16 + $0x8] sm:$0xff] }
 0x6df   :  { %v13482_v10 = vpack.c.bf16 %v1652_v0, %v1651_v38  ;;  %v2021_v0 = vld [vmem:[%s18703_s1] sm:$0xf] }
 0x6e0   :  { %13429 = vmatpush3.bf16.msra.mxu1 %v13428_v53  ;;  %v10375_v49 = vmul.f32 -1.442695, %v14971_v46 }
 0x6e1   :  { %13454 = vmatprep.subr.bf16.mxu1 %v15505_v43 }
 0x6e2   :  { %15036 = vpow2.f32 %v10375_v49 }
 0x6e3   :  { %1461 = vmatmul.mubr.f32.vlgmr.msra.gmra.mrb[18].mxu1 %v16109_v12 }
 0x6e4   :  { %11773 = vmatprep.mubr.msk.f32.mxu1 %vm15507_vm3, %v15504_v42  ;;  %13456 = vmatpush3.bf16.msra.mxu1 %v13455_v63 }
 0x6e5   :  { %13457 = vmatprep.subr.bf16.mxu1 %v15505_v43 }
 0x6e8   :  { %13459 = vmatpush3.bf16.msra.mxu1 %v13458_v3 }
 0x6e9   :  { %13460 = vmatprep.subr.bf16.mxu1 %v15505_v43 }
 0x6ec   :  { %13462 = vmatpush3.bf16.msra.mxu1 %v13461_v14  ;;  %v15037_v51 = vpop.eup %15036  ;;  %v13479_v14 = vpack.c.bf16 %v1649_v11, %v1648_v45 }
 0x6ed   :  { %13463 = vmatprep.subr.bf16.mxu1 %v15505_v43  ;;  %v1248_v53 = vadd.f32 1.0, %v15037_v51  ;;  %v1922_v51 = vld [vmem:[#allocation15] sm:$0xff] }
 0x6ef   :  { %15038 = vrcp.f32 %v1248_v53  ;;  %v1923_v53 = vld [vmem:[#allocation15 + $0x8] sm:$0xff] }
 0x6f0   :  { %13465 = vmatpush3.bf16.msra.mxu1 %v13464_v23 }
 0x6f1   :  { %13466 = vmatprep.subr.bf16.mxu1 %v15505_v43 }
 0x6f9   :  { %v15039_v7 = vpop.eup %15038 }
 0x6fa   :  { %v1539_v62 = vsub.f32 1.0, %v15039_v7  ;;  %v1538_v1 = vmul.f32 0.0, %v15039_v7 }
 0x796   :  { %v1390_v13 = vpop.f32.mrb[16].mxu1 }
 0x797   :  { %v1394_v15 = vmul.f32 2.0, %v1390_v13  ;;  %v11705_v16 = vpop.f32.mrb[17].mxu1  ;;  %v1650_v13 = vld [vmem:[#allocation12 + $0x10] sm:$0xf] }
 0x799   :  { %v1395_v2 = vsub.f32 %v1394_v15, %v16109_v12  ;;  %v1550_v12 = vld [vmem:[%s18627_s13 + $0x40] sm:$0xff] }
 0x79a   :  { %v13467_v5 = vpack.c.bf16 %v1551_v24, %v1550_v12  ;;  %v10376_v15 = vld [vmem:[#allocation10] ss:$0 sm:$0xff] }
 0x79b   :  { %11739 = vmatmul.mubr.f32.vlgmr.msra.gmra.mrb[20].mxu0 %v1395_v2  ;;  %v1639_v2 = vpop.permute.xlu0 %1638 }
 0x79c   :  { %11782 = vmatprep.mubr.msk.f32.mxu0 %vm15507_vm3, %v15504_v42  ;;  %13468 = vmatpush3.bf16.msra.mxu1 %v13467_v5 }
 0x79d   :  { %13469 = vmatprep.subr.bf16.mxu1 %v15505_v43  ;;  %13480 = vmatpush3.bf16.msra.mxu0 %v13479_v14 }
 0x79e   :  { %11780 = vmatprep.subr.mxu0 %v15504_v42 }
 0x7a0   :  { %13471 = vmatpush3.bf16.msra.mxu1 %v13470_v27 }
 0x7a1   :  { %13472 = vmatprep.subr.bf16.mxu1 %v15505_v43  ;;  %11781 = vmatpush3.msk.msra.mxu0 %vm1665_vm4, %v1650_v13 }
 0x7a2   :  { %13484 = vmatprep.subr.bf16.mxu0 %v15505_v43 }
 0x7a4   :  { %13474 = vmatpush3.bf16.msra.mxu1 %v13473_v6 }
 0x7a5   :  { %13475 = vmatprep.subr.bf16.mxu1 %v15505_v43 }
 0x7a8   :  { %13477 = vmatpush3.bf16.msra.mxu1 %v13476_v33 }
 0x7a9   :  { %13481 = vmatprep.subr.bf16.mxu1 %v15505_v43 }
 0x7b6   :  { %v10647_v18 = vpop.f32.mrb[18].mxu1 }
 0x7b7   :  { %v10648_v4 = vpop.f32.mrb[19].mxu1 }
 0x7b8   :  { %v10649_v19 = vadd.f32 %v10648_v4, %v10647_v18 }
 0x86e   :  { %v1532_v55 = vpop.f32.mrb[20].mxu0 }
 0x86f   :  { %v1533_v57 = vadd.f32 %v10649_v19, %v1532_v55  ;;  %v11740_v58 = vpop.f32.mrb[21].mxu0  ;;  %v1643_v19 = vpop.permute.xlu1 %1642  ;;  %v13485_v55 = vpack.c.bf16 %v1923_v53, %v1922_v51 }
 0x871   :  { %v1536_v59 = vadd.f32 %v1533_v57, %v783_v56 }
 0x873   :  { %15040 = vtanh.f32 %v1536_v59 }
 0x87d   :  { %v15041_v63 = vpop.eup %15040 }
 0x87e   :  { %v1540_v3 = vmul.f32 %v15041_v63, %v1539_v62  ;;  %v257_v62 = vld [vmem:[%s18702_s23] sm:$0x3] }
 0x880   :  { %v16366_v39 = vadd.f32 %v1540_v3, %v1538_v1  ;;  %v258_v3 = vld [vmem:[%s18704_s19] sm:$0xf] }
 0x882   :  { %11774 = vmatmul.mubr.f32.vlgmr.msra.gmra.mrb[20].mxu1 %v16366_v39 }
 0x883   :  { %13483 = vmatpush3.bf16.msra.mxu1 %v13482_v10  ;;  %11789 = vmatprep.mubr.msk.f32.mxu1 %vm15507_vm3, %v15504_v42  ;;  %v10383_v10 = vld [vmem:[#allocation16] ss:$0 sm:$0xff] }
 0x884   :  { %11792 = vmatprep.subr.mxu1 %v15504_v42 }
 0x886   :  { %11790 = vmatmul.mubr.f32.vlgmr.msra.gmra.mrb[22].mxu1 %v15504_v42 }
 0x887   :  { %11794 = vmatprep.mubr.msk.f32.mxu1 %vm15507_vm3, %v15504_v42 }
 0x955   :  { %v1631_v16 = vpop.f32.mrb[20].mxu1 }
 0x956   :  { %v1632_v18 = vadd.f32 %v10376_v15, %v1631_v16  ;;  %v11775_v4 = vpop.f32.mrb[21].mxu1 }
 0x958   :  { %v1645_v21 = vsel %vm267_vm0, %v1632_v18, %v1639_v2 }
 0x959   :  { %v1647_v23 = vsel %vm1646_vm5, %v1645_v21, %v1643_v19  ;;  %v1814_v12 = vpop.f32.mrb[22].mxu1  ;;  %v2128_v19 = vld [vmem:[%s18636_s22] sm:$0xff] }
 0x95a   :  { %11783 = vmatmul.mubr.msk.f32.vlgmr.msra.gmra.mrb[22].mxu0 %vm1661_vm6, %v1647_v23  ;;  %v1815_v24 = vadd.f32 %v10380_v20, %v1814_v12  ;;  %v11791_v5 = vpop.f32.mrb[23].mxu1  ;;  %v2129_v20 = vld [vmem:[%s18636_s22 + $0x8] sm:$0xff]  ;;  %v2124_v23 = vld [vmem:[#allocation18] sm:$0xff]  ;;  %v2125_v12 = vld [vmem:[#allocation18 + $0x8] sm:$0xff] }
 0x95b   :  { %11801 = vmatprep.mubr.msk.f32.mxu0 %vm15507_vm3, %v15504_v42  ;;  %13486 = vmatpush3.bf16.msra.mxu0 %v13485_v55  ;;  %v13495_v21 = vpack.c.bf16 %v2129_v20, %v2128_v19  ;;  %v2414_v19 = vld [vmem:[#allocation7 + $0x48] sm:$0xff]  ;;  %v2416_v20 = vld [vmem:[#allocation7 + $0x58] sm:$0xff] }
 0x95c   :  { %1826 = vrot.lane.b32.xlu0 %v1815_v24, %s18669_s12  ;;  %13487 = vmatprep.subr.bf16.mxu0 %v15505_v43 }
 0x9ce   :  { %v1827_v33 = vpop.permute.xlu0 %1826 }
 0xa2d   :  { %v1735_v26 = vpop.f32.mrb[22].mxu0 }
 0xa2e   :  { %v1736_v27 = vadd.f32 %v10377_v25, %v1735_v26  ;;  %v11784_v29 = vpop.f32.mrb[23].mxu0  ;;  %v13488_v25 = vpack.c.bf16 %v2125_v12, %v2124_v23  ;;  %v2127_v26 = vld [vmem:[#allocation18 + $0x18] sm:$0x3]  ;;  %v13556_v23 = vpack.c.bf16 %v2416_v20, %v2414_v19  ;;  %v2413_v12 = vld [vmem:[#allocation7 + $0x40] sm:$0xff]  ;;  %v2439_v19 = vld [vmem:[#allocation7 + $0x110] sm:$0xff] }
 0xa30   :  { %v1818_v30 = vadd.f32 %v1815_v24, %v1736_v27  ;;  %v2126_v24 = vld [vmem:[#allocation18 + $0x10] sm:$0xff] }
 0xa32   :  { %v10381_v6 = vmul.f32 -1.442695, %v1818_v30  ;;  %v13491_v30 = vpack.c.bf16 %v2127_v26, %v2126_v24  ;;  %v2415_v24 = vld [vmem:[#allocation7 + $0x50] sm:$0xff] }
 0xa33   :  { %v13558_v26 = vpack.c.bf16 %v2415_v24, %v2413_v12  ;;  %v2441_v24 = vld [vmem:[#allocation7 + $0x120] sm:$0xff] }
 0xa34   :  { %15042 = vpow2.f32 %v10381_v6 }
 0xa3e   :  { %v15043_v31 = vpop.eup %15042 }
 0xa3f   :  { %v1822_v32 = vadd.f32 1.0, %v15043_v31 }
 0xa41   :  { %15044 = vrcp.f32 %v1822_v32 }
 0xa4b   :  { %v15045_v35 = vpop.eup %15044 }
 0xa4c   :  { %v1829_v36 = vmul.f32 %v15045_v35, %v1827_v33  ;;  %v1836_v56 = vsub.f32 1.0, %v15045_v35  ;;  %v1842_v58 = vmul.f32 0.0, %v15045_v35 }
 0xa4e   :  { %1831 = vrot.lane.b32.xlu1 %v1829_v36, %s18667_s0 }
 0xac0   :  { %v1832_v37 = vpop.permute.xlu1 %1831 }
 0xac1   :  { %v1834_v46 = vadd.f32 %v1832_v37, %v1736_v27  ;;  %v811_v37 = vld [vmem:[%s18707_s8] sm:$0xf] }
 0xac3   :  { %15046 = vtanh.f32 %v1834_v46 }
 0xacd   :  { %v15047_v49 = vpop.eup %15046 }
 0xace   :  { %1838 = vrot.lane.b32.xlu0 %v15047_v49, %s18665_s11 }
 0xad2   :  { %2027 = vrot.lane.b32.xlu0 %v2021_v0, %s18694_s20 }
 0xb40   :  { %v1839_v57 = vpop.permute.xlu0 %1838 }
 0xb41   :  { %v1841_v59 = vmul.f32 %v1839_v57, %v1836_v56  ;;  %v10390_v56 = vld [vmem:[%s18638_s24] ss:$0 sm:$0xff] }
 0xb43   :  { %v16390_v7 = vadd.f32 %v1842_v58, %v1841_v59 }
 0xb44   :  { %v2028_v32 = vpop.permute.xlu0 %2027 }
 0xb45   :  { %1845 = vrot.lane.b32.xlu1 %v16390_v7, %s18665_s11 }
 0xbb7   :  { %v16397_v38 = vpop.permute.xlu1 %1845 }
 0xbb8   :  { %11793 = vmatpush3.msra.mxu1 %v16397_v38 }
 0xbb9   :  { %11795 = vmatmul.mubr.msk.f32.vlgmr.msra.gmra.mrb[24].mxu1 %vm1848_vm7, %v257_v62  ;;  %11804 = vmatprep.subr.mxu1 %v15504_v42 }
 0xbba   :  { %11805 = vmatpush3.msra.mxu1 %v1632_v18  ;;  %11806 = vmatprep.mubr.msk.f32.mxu1 %vm15507_vm3, %v15504_v42 }
 0xbbb   :  { %13494 = vmatprep.subr.bf16.mxu1 %v15505_v43 }
 0xbbd   :  { %11807 = vmatmul.mubr.msk.f32.vlgmr.msra.gmra.mrb[26].mxu1 %vm1848_vm7, %v258_v3  ;;  %v2406_v3 = vld [vmem:[#allocation7 + $0x8] sm:$0xff] }
 0xbbe   :  { %11824 = vmatprep.mubr.msk.f32.mxu1 %vm15507_vm3, %v15504_v42  ;;  %13496 = vmatpush3.bf16.msra.mxu1 %v13495_v21 }
 0xbbf   :  { %13497 = vmatprep.subr.bf16.mxu1 %v15505_v43 }
 0xbc1   :  { %11825 = vmatmul.mubr.f32.vlgmr.msra.gmra.mrb[28].mxu1 %v15504_v42 }
 0xbc2   :  { %11831 = vmatprep.mubr.msk.f32.mxu1 %vm15507_vm3, %v15504_v42 }
 0xc8c   :  { %v1918_v63 = vpop.f32.mrb[24].mxu1 }
 0xc8d   :  { %v11796_v1 = vpop.f32.mrb[25].mxu1  ;;  %11802 = vmatmul.mubr.msk.f32.vlgmr.msra.gmra.mrb[24].mxu0 %vm267_vm0, %v1918_v63 }
 0xc8e   :  { %11817 = vmatprep.mubr.msk.f32.mxu0 %vm15507_vm3, %v15504_v42  ;;  %13489 = vmatpush3.bf16.msra.mxu0 %v13488_v25  ;;  %v2420_v25 = vld [vmem:[#allocation7 + $0x78] sm:$0xff] }
 0xc8f   :  { %13490 = vmatprep.subr.bf16.mxu0 %v15505_v43 }
 0xc90   :  { %v2109_v46 = vpop.f32.mrb[26].mxu1 }
 0xc91   :  { %v11808_v49 = vpop.f32.mrb[27].mxu1 }
 0xc92   :  { %13493 = vmatpush3.bf16.msk.msra.mxu0 %vm16430_vm13, %v13491_v30  ;;  %v2419_v30 = vld [vmem:[#allocation7 + $0x70] sm:$0xff]  ;;  %v2428_v49 = vld [vmem:[#allocation7 + $0xb8] sm:$0xff] }
 0xc93   :  { %13500 = vmatprep.subr.bf16.mxu0 %v15505_v43 }
 0xc94   :  { %v2288_v57 = vpop.f32.mrb[28].mxu1 }
 0xc95   :  { %v16451_v58 = vadd.f32 %v10390_v56, %v2288_v57  ;;  %v11826_v59 = vpop.f32.mrb[29].mxu1  ;;  %v2427_v56 = vld [vmem:[#allocation7 + $0xb0] sm:$0xff]  ;;  %v2430_v57 = vld [vmem:[#allocation7 + $0xc8] sm:$0xff] }
 0xc96   :  { %v2432_v59 = vld [vmem:[#allocation7 + $0xd8] sm:$0xff] }
 0xd60   :  { %v2000_v45 = vpop.f32.mrb[24].mxu0 }
 0xd61   :  { %v2001_v11 = vadd.f32 %v10383_v10, %v2000_v45  ;;  %v11803_v14 = vpop.f32.mrb[25].mxu0  ;;  %v2408_v10 = vld [vmem:[#allocation7 + $0x18] sm:$0xff] }
 0xd62   :  { %v13548_v45 = vpack.c.bf16 %v2408_v10, %v2406_v3  ;;  %v2407_v14 = vld [vmem:[#allocation7 + $0x10] sm:$0xff]  ;;  %v2434_v3 = vld [vmem:[#allocation7 + $0xe8] sm:$0xff]  ;;  %v2436_v10 = vld [vmem:[#allocation7 + $0xf8] sm:$0xff] }
 0xd63   :  { %2005 = vst.msk [vmem:[%s18642_s28] sm:$0x3] %vm2004_vm8, %v2001_v11  ;;  %v10385_v13 = vmul.f32 -1.442695, %v2001_v11  ;;  %v2034_v51 = vrot.slane %v2001_v11, %v16100_v60  ;;  %v2405_v11 = vld [vmem:[#allocation7] sm:$0xff] }
 0xd65   :  { %15048 = vpow2.f32 %v10385_v13  ;;  %v2410_v13 = vld [vmem:[#allocation7 + $0x28] sm:$0xff] }
 0xd6f   :  { %v15049_v15 = vpop.eup %15048 }
 0xd70   :  { %v2009_v16 = vadd.f32 1.0, %v15049_v15  ;;  %v2412_v15 = vld [vmem:[#allocation7 + $0x38] sm:$0xff] }
 0xd72   :  { %15050 = vrcp.f32 %v2009_v16  ;;  %v13550_v16 = vpack.c.bf16 %v2407_v14, %v2405_v11  ;;  %v13576_v11 = vpack.c.bf16 %v2436_v10, %v2434_v3  ;;  %v2433_v14 = vld [vmem:[#allocation7 + $0xe0] sm:$0xff]  ;;  %v2459_v3 = vld [vmem:[#allocation7 + $0x1b0] sm:$0xff]  ;;  %v2462_v10 = vld [vmem:[#allocation7 + $0x1c8] sm:$0xff] }
 0xd7c   :  { %v15051_v2 = vpop.eup %15050 }
 0xd7d   :  { %v2012_v18 = vmul.f32 0.9, %v15051_v2  ;;  %v13552_v2 = vpack.c.bf16 %v2412_v15, %v2410_v13  ;;  %v2435_v13 = vld [vmem:[#allocation7 + $0xf0] sm:$0xff] }
 0xd7e   :  { %v13578_v15 = vpack.c.bf16 %v2435_v13, %v2433_v14  ;;  %v2461_v14 = vld [vmem:[#allocation7 + $0x1c0] sm:$0xff]  ;;  %v2463_v13 = vld [vmem:[#allocation7 + $0x1d0] sm:$0xff] }
 0xd7f   :  { %v2013_v4 = vadd.f32 0.1, %v2012_v18  ;;  %v2409_v18 = vld [vmem:[#allocation7 + $0x20] sm:$0xff] }
 0xd81   :  { %15052 = vrsqrt.f32 %v2013_v4  ;;  %vm2016_vm10 = vcmp.eq.f32.partialorder %v2013_v4, inf  ;;  %v2019_v29 = vand.u32 2147483648, %v2013_v4  ;;  %vm2018_vm11 = vcmp.eq.f32.partialorder %v2013_v4, 0.0 }
 0xd8b   :  { %v15053_v5 = vpop.eup %15052 }
 0xd8c   :  { %v2015_v27 = vmul.f32 %v15053_v5, %v2013_v4  ;;  %v2418_v5 = vld [vmem:[#allocation7 + $0x68] sm:$0xff] }
 0xd8e   :  { %v2017_v6 = vsel %vm2016_vm10, %v2013_v4, %v2015_v27  ;;  %v2411_v4 = vld [vmem:[#allocation7 + $0x30] sm:$0xff]  ;;  %v13560_v27 = vpack.c.bf16 %v2420_v25, %v2418_v5 }
 0xd8f   :  { %v2020_v33 = vsel %vm2018_vm11, %v2019_v29, %v2017_v6  ;;  %v13554_v21 = vpack.c.bf16 %v2411_v4, %v2409_v18  ;;  %v2417_v29 = vld [vmem:[#allocation7 + $0x60] sm:$0xff]  ;;  %v2422_v6 = vld [vmem:[#allocation7 + $0x88] sm:$0xff]  ;;  %v2443_v5 = vld [vmem:[#allocation7 + $0x130] sm:$0xff] }
 0xd90   :  { %v2025_v35 = vrot.slane %v2020_v33, %v16100_v60  ;;  %v13562_v33 = vpack.c.bf16 %v2419_v30, %v2417_v29  ;;  %v2437_v4 = vld [vmem:[#allocation7 + $0x100] sm:$0xff]  ;;  %v13586_v25 = vpack.c.bf16 %v2443_v5, %v2441_v24 }
 0xd91   :  { %v13582_v20 = vpack.c.bf16 %v2439_v19, %v2437_v4  ;;  %v2445_v30 = vld [vmem:[#allocation7 + $0x140] sm:$0xff] }
 0xd92   :  { %v2030_v36 = vmul.f32 %v2028_v32, %v2025_v35  ;;  %v2424_v32 = vld [vmem:[#allocation7 + $0x98] sm:$0xff]  ;;  %v2465_v19 = vld [vmem:[#allocation7 + $0x1e0] sm:$0xff] }
 0xd93   :  { %v13564_v35 = vpack.c.bf16 %v2424_v32, %v2422_v6  ;;  %v2447_v6 = vld [vmem:[#allocation7 + $0x150] sm:$0xff] }
 0xd94   :  { %2036 = vrot.lane.b32.xlu1 %v2030_v36, %s18661_s21  ;;  %v2421_v36 = vld [vmem:[#allocation7 + $0x80] sm:$0xff]  ;;  %v13590_v32 = vpack.c.bf16 %v2447_v6, %v2445_v30  ;;  %s18715_s21 = smov 96  }
 0xd98   :  { %2118 = vrot.lane.b32.xlu1 %v811_v37, %s18663_s17  ;;  %v2423_v37 = vld [vmem:[#allocation7 + $0x90] sm:$0xff] }
 0xe06   :  { %v2037_v53 = vpop.permute.xlu1 %2036 }
 0xe07   :  { %v2039_v55 = vadd.f32 %v2037_v53, %v2034_v51  ;;  %v13566_v51 = vpack.c.bf16 %v2423_v37, %v2421_v36  ;;  %v2449_v37 = vld [vmem:[#allocation7 + $0x160] sm:$0xff] }
 0xe09   :  { %2114 = vrot.lane.b32.xlu0 %v2039_v55, %s18673_s10  ;;  %v2425_v55 = vld [vmem:[#allocation7 + $0xa0] sm:$0xff] }
 0xe0a   :  { %v2119_v62 = vpop.permute.xlu1 %2118 }
 0xe0d   :  { %2300 = vrot.lane.b32.xlu0 %v16451_v58, %s18669_s12 }
 0xe7b   :  { %v2115_v0 = vpop.permute.xlu0 %2114 }
 0xe7c   :  { %v2121_v63 = vsel %vm267_vm0, %v2109_v46, %v2115_v0  ;;  %v2426_v46 = vld [vmem:[#allocation7 + $0xa8] sm:$0xff]  ;;  %v13572_v0 = vpack.c.bf16 %v2432_v59, %v2430_v57  ;;  %v2455_v57 = vld [vmem:[#allocation7 + $0x190] sm:$0xff] }
 0xe7d   :  { %v2123_v1 = vsel %vm2122_vm14, %v2121_v63, %v2119_v62  ;;  %v13568_v53 = vpack.c.bf16 %v2428_v49, %v2426_v46  ;;  %v13570_v62 = vpack.c.bf16 %v2427_v56, %v2425_v55  ;;  %v2429_v63 = vld [vmem:[#allocation7 + $0xc0] sm:$0xff]  ;;  %v2451_v46 = vld [vmem:[#allocation7 + $0x170] sm:$0xff] }
 0xe7e   :  { %11818 = vmatmul.mubr.msk.f32.vlgmr.msra.gmra.mrb[26].mxu0 %vm2138_vm15, %v2123_v1  ;;  %v2431_v1 = vld [vmem:[#allocation7 + $0xd0] sm:$0xff]  ;;  %v13594_v49 = vpack.c.bf16 %v2451_v46, %v2449_v37  ;;  %v2453_v56 = vld [vmem:[#allocation7 + $0x180] sm:$0xff]  ;;  %v2320_v46 = vld [vmem:[%s18639_s25 + $0x8] sm:$0xff] }
 0xe7f   :  { %13502 = vmatpush3.bf16.msra.mxu0 %v15964_v9  ;;  %11866 = vmatprep.mubr.msk.f32.mxu0 %vm15507_vm3, %v15504_v42  ;;  %v13598_v59 = vpack.c.bf16 %v2455_v57, %v2453_v56  ;;  %v2301_v30 = vpop.permute.xlu0 %2300 }
 0xe80   :  { %13503 = vmatprep.subr.bf16.mxu0 %v15505_v43 }
 0xe83   :  { %13505 = vmatpush3.bf16.msra.mxu0 %v15976_v17 }
 0xe84   :  { %13506 = vmatprep.subr.bf16.mxu0 %v15505_v43 }
 0xe87   :  { %13508 = vmatpush3.bf16.msra.mxu0 %v15988_v22 }
 0xe88   :  { %13509 = vmatprep.subr.bf16.mxu0 %v15505_v43 }
 0xe8b   :  { %13511 = vmatpush3.bf16.msra.mxu0 %v16000_v28 }
 0xe8c   :  { %13512 = vmatprep.subr.bf16.mxu0 %v15505_v43 }
 0xe8f   :  { %13514 = vmatpush3.bf16.msra.mxu0 %v16012_v34 }
 0xe90   :  { %13515 = vmatprep.subr.bf16.mxu0 %v15505_v43 }
 0xe93   :  { %13517 = vmatpush3.bf16.msra.mxu0 %v16024_v40 }
 0xe94   :  { %13518 = vmatprep.subr.bf16.mxu0 %v15505_v43 }
 0xe97   :  { %13520 = vmatpush3.bf16.msra.mxu0 %v16034_v44 }
 0xe98   :  { %13521 = vmatprep.subr.bf16.mxu0 %v15505_v43 }
 0xe9b   :  { %13523 = vmatpush3.bf16.msra.mxu0 %v16042_v47 }
 0xe9c   :  { %13549 = vmatprep.subr.bf16.mxu0 %v13548_v45  ;;  %v13574_v45 = vpack.c.bf16 %v2431_v1, %v2429_v63  ;;  %v2457_v1 = vld [vmem:[#allocation7 + $0x1a0] sm:$0xff] }
 0xe9e   :  { %11867 = vmatmul.mubr.f32.vlgmr.msra.gmra.mrb[28].mxu0 %v16366_v39 }
 0xe9f   :  { %13551 = vmatpush1.bf16.msra.mxu0 %v13550_v16  ;;  %v2438_v16 = vld [vmem:[#allocation7 + $0x108] sm:$0xff] }
 0xea0   :  { %13553 = vmatprep.subr.bf16.mxu0 %v13552_v2  ;;  %v2440_v2 = vld [vmem:[#allocation7 + $0x118] sm:$0xff] }
 0xea1   :  { %v13580_v18 = vpack.c.bf16 %v2440_v2, %v2438_v16  ;;  %v2466_v16 = vld [vmem:[#allocation7 + $0x1e8] sm:$0xff]  ;;  %v2468_v2 = vld [vmem:[#allocation7 + $0x1f8] sm:$0xff] }
 0xea2   :  { %v13608_v4 = vpack.c.bf16 %v2468_v2, %v2466_v16  ;;  %v2475_v16 = vld [vmem:[#allocation7 + $0x230] sm:$0xff] }
 0xea3   :  { %13555 = vmatpush1.bf16.msra.mxu0 %v13554_v21  ;;  %v2442_v21 = vld [vmem:[#allocation7 + $0x128] sm:$0xff] }
 0xea4   :  { %13557 = vmatprep.subr.bf16.mxu0 %v13556_v23  ;;  %v2444_v23 = vld [vmem:[#allocation7 + $0x138] sm:$0xff] }
 0xea5   :  { %v13584_v12 = vpack.c.bf16 %v2444_v23, %v2442_v21  ;;  %v10387_v23 = vld [vmem:[#allocation19] ss:$0 sm:$0xff] }
 0xea7   :  { %13559 = vmatpush1.bf16.msra.mxu0 %v13558_v26  ;;  %v2446_v26 = vld [vmem:[#allocation7 + $0x148] sm:$0xff] }
 0xea8   :  { %13561 = vmatprep.subr.bf16.mxu0 %v13560_v27  ;;  %v2448_v27 = vld [vmem:[#allocation7 + $0x158] sm:$0xff] }
 0xea9   :  { %v13588_v29 = vpack.c.bf16 %v2448_v27, %v2446_v26 }
 0xeab   :  { %13563 = vmatpush1.bf16.msra.mxu0 %v13562_v33  ;;  %v2450_v33 = vld [vmem:[#allocation7 + $0x168] sm:$0xff] }
 0xeac   :  { %13565 = vmatprep.subr.bf16.mxu0 %v13564_v35  ;;  %v2452_v35 = vld [vmem:[#allocation7 + $0x178] sm:$0xff] }
 0xead   :  { %v13592_v36 = vpack.c.bf16 %v2452_v35, %v2450_v33 }
 0xeaf   :  { %13567 = vmatpush1.bf16.msra.mxu0 %v13566_v51  ;;  %v2454_v51 = vld [vmem:[#allocation7 + $0x188] sm:$0xff] }
 0xeb0   :  { %13569 = vmatprep.subr.bf16.mxu0 %v13568_v53  ;;  %v2456_v53 = vld [vmem:[#allocation7 + $0x198] sm:$0xff] }
 0xeb1   :  { %v13596_v55 = vpack.c.bf16 %v2456_v53, %v2454_v51 }
 0xeb3   :  { %13571 = vmatpush1.bf16.msra.mxu0 %v13570_v62  ;;  %v2458_v62 = vld [vmem:[#allocation7 + $0x1a8] sm:$0xff] }
 0xeb4   :  { %13573 = vmatprep.subr.bf16.mxu0 %v13572_v0  ;;  %v2460_v0 = vld [vmem:[#allocation7 + $0x1b8] sm:$0xff] }
 0xeb5   :  { %v13600_v63 = vpack.c.bf16 %v2460_v0, %v2458_v62 }
 0xeb7   :  { %13575 = vmatpush1.bf16.msra.mxu0 %v13574_v45  ;;  %v13602_v45 = vpack.c.bf16 %v2459_v3, %v2457_v1  ;;  %v2472_v1 = vld [vmem:[#allocation7 + $0x218] sm:$0xff] }
 0xeb8   :  { %13577 = vmatprep.subr.bf16.mxu0 %v13576_v11  ;;  %v2464_v11 = vld [vmem:[#allocation7 + $0x1d8] sm:$0xff] }
 0xebb   :  { %13579 = vmatpush1.bf16.msra.mxu0 %v13578_v15  ;;  %v13604_v15 = vpack.c.bf16 %v2464_v11, %v2462_v10  ;;  %v2469_v10 = vld [vmem:[#allocation7 + $0x200] sm:$0xff]  ;;  %v2474_v11 = vld [vmem:[#allocation7 + $0x228] sm:$0xff] }
 0xebc   :  { %13581 = vmatprep.subr.bf16.mxu0 %v13580_v18  ;;  %v13606_v18 = vpack.c.bf16 %v2463_v13, %v2461_v14  ;;  %v2476_v13 = vld [vmem:[#allocation7 + $0x238] sm:$0xff] }
 0xebd   :  { %v13616_v2 = vpack.c.bf16 %v2476_v13, %v2474_v11  ;;  %v2497_v11 = vld [vmem:[#allocation7 + $0x2e0] sm:$0xff] }
 0xebf   :  { %13583 = vmatpush1.bf16.msra.mxu0 %v13582_v20  ;;  %v2467_v20 = vld [vmem:[#allocation7 + $0x1f0] sm:$0xff] }
 0xec0   :  { %13585 = vmatprep.subr.bf16.mxu0 %v13584_v12  ;;  %v13610_v21 = vpack.c.bf16 %v2467_v20, %v2465_v19 }
 0xec3   :  { %13587 = vmatpush1.bf16.msra.mxu0 %v13586_v25 }
 0xec4   :  { %13589 = vmatprep.subr.bf16.mxu0 %v13588_v29 }
 0xec7   :  { %13591 = vmatpush1.bf16.msra.mxu0 %v13590_v32 }
 0xec8   :  { %13593 = vmatprep.subr.bf16.mxu0 %v13592_v36 }
 0xecb   :  { %13595 = vmatpush1.bf16.msra.mxu0 %v13594_v49 }
 0xecc   :  { %13597 = vmatprep.subr.bf16.mxu0 %v13596_v55 }
 0xecf   :  { %13599 = vmatpush1.bf16.msra.mxu0 %v13598_v59 }
 0xed0   :  { %13601 = vmatprep.subr.bf16.mxu0 %v13600_v63  ;;  %v2470_v63 = vld [vmem:[#allocation7 + $0x208] sm:$0xff] }
 0xed1   :  { %v13612_v3 = vpack.c.bf16 %v2472_v1, %v2470_v63  ;;  %v2495_v63 = vld [vmem:[#allocation7 + $0x2d0] sm:$0xff] }
 0xed3   :  { %13603 = vmatpush1.bf16.msra.mxu0 %v13602_v45  ;;  %v2471_v45 = vld [vmem:[#allocation7 + $0x210] sm:$0xff] }
 0xed4   :  { %13605 = vmatprep.subr.bf16.mxu0 %v13604_v15  ;;  %v13614_v14 = vpack.c.bf16 %v2471_v45, %v2469_v10  ;;  %v2473_v15 = vld [vmem:[#allocation7 + $0x220] sm:$0xff]  ;;  %v2500_v10 = vld [vmem:[#allocation7 + $0x2f8] sm:$0xff] }
 0xed5   :  { %v13618_v19 = vpack.c.bf16 %v2475_v16, %v2473_v15  ;;  %v10392_v15 = vld [vmem:[%s18708_s27] ss:$0 sm:$0xff] }
 0xed7   :  { %13607 = vmatpush1.bf16.msra.mxu0 %v13606_v18  ;;  %v2478_v18 = vld [vmem:[#allocation7 + $0x248] sm:$0xff] }
 0xed8   :  { %13609 = vmatprep.subr.bf16.mxu0 %v13608_v4  ;;  %v2480_v4 = vld [vmem:[#allocation7 + $0x258] sm:$0xff] }
 0xed9   :  { %v13620_v20 = vpack.c.bf16 %v2480_v4, %v2478_v18 }
 0xedb   :  { %13611 = vmatpush1.bf16.msra.mxu0 %v13610_v21  ;;  %v2477_v21 = vld [vmem:[#allocation7 + $0x240] sm:$0xff] }
 0xedc   :  { %13613 = vmatprep.subr.bf16.mxu0 %v13612_v3  ;;  %v2498_v3 = vld [vmem:[#allocation7 + $0x2e8] sm:$0xff] }
 0xedd   :  { %v13640_v45 = vpack.c.bf16 %v2500_v10, %v2498_v3  ;;  %v2543_v3 = vld [vmem:[%s18699_s2 + $0x150] sm:$0xff]  ;;  %v2544_v10 = vld [vmem:[%s18699_s2 + $0x158] sm:$0xff] }
 0xf51   :  { %v2212_v12 = vpop.f32.mrb[26].mxu0 }
 0xf52   :  { %v2213_v24 = vadd.f32 %v10387_v23, %v2212_v12  ;;  %v11819_v5 = vpop.f32.mrb[27].mxu0  ;;  %v2479_v23 = vld [vmem:[#allocation7 + $0x250] sm:$0xff]  ;;  %v2482_v12 = vld [vmem:[#allocation7 + $0x268] sm:$0xff] }
 0xf53   :  { %v13622_v5 = vpack.c.bf16 %v2479_v23, %v2477_v21 }
 0xf54   :  { %v2292_v25 = vadd.f32 %v16451_v58, %v2213_v24  ;;  %v2319_v58 = vld [vmem:[%s18639_s25] sm:$0xff] }
 0xf55   :  { %v16486_v49 = vpack.c.bf16 %v2320_v46, %v2319_v58 }
 0xf56   :  { %v10391_v26 = vmul.f32 -1.442695, %v2292_v25 }
 0xf57   :  { %13499 = vmatpush3.bf16.msra.mxu1 %v16486_v49 }
 0xf58   :  { %15054 = vpow2.f32 %v10391_v26  ;;  %13524 = vmatprep.subr.bf16.mxu1 %v15505_v43  ;;  %v2481_v26 = vld [vmem:[#allocation7 + $0x260] sm:$0xff] }
 0xf62   :  { %v15055_v27 = vpop.eup %15054 }
 0xf63   :  { %v2296_v29 = vadd.f32 1.0, %v15055_v27  ;;  %v2483_v27 = vld [vmem:[#allocation7 + $0x270] sm:$0xff] }
 0xf65   :  { %15056 = vrcp.f32 %v2296_v29  ;;  %v2486_v29 = vld [vmem:[#allocation7 + $0x288] sm:$0xff] }
 0xf6f   :  { %v15057_v6 = vpop.eup %15056 }
 0xf70   :  { %v2303_v32 = vmul.f32 %v15057_v6, %v2301_v30  ;;  %v2310_v53 = vsub.f32 1.0, %v15057_v6  ;;  %v2316_v56 = vmul.f32 0.0, %v15057_v6  ;;  %v2488_v30 = vld [vmem:[#allocation7 + $0x298] sm:$0xff]  ;;  %v13626_v6 = vpack.c.bf16 %v2483_v27, %v2481_v26 }
 0xf71   :  { %v2615_v33 = vpop.f32.mrb[28].mxu0 }
 0xf72   :  { %v11868_v35 = vpop.f32.mrb[29].mxu0  ;;  %2755 = vmatprep.mubr.f32.mxu0 %v2615_v33  ;;  %2305 = vrot.lane.b32.xlu1 %v2303_v32, %s18667_s0  ;;  %v13628_v32 = vpack.c.bf16 %v2488_v30, %v2486_v29  ;;  %v2517_v30 = vld [vmem:[%s18699_s2 + $0x80] sm:$0xff] }
 0xf73   :  { %2756 = vmatmul.mubr.f32.vlgmr.msra.gmra.mrb[8].mxu0 %v16366_v39  ;;  %v2487_v35 = vld [vmem:[#allocation7 + $0x290] sm:$0xff] }
 0xf74   :  { %2826 = vmatprep.mubr.f32.mxu0 %v15504_v42  ;;  %13615 = vmatpush1.bf16.msra.mxu0 %v13614_v14  ;;  %v2499_v14 = vld [vmem:[#allocation7 + $0x2f0] sm:$0xff] }
 0xf75   :  { %13617 = vmatprep.subr.bf16.mxu0 %v13616_v2  ;;  %v13642_v13 = vpack.c.bf16 %v2499_v14, %v2497_v11  ;;  %v2545_v11 = vld [vmem:[%s18699_s2 + $0x160] sm:$0xff]  ;;  %v2546_v14 = vld [vmem:[%s18699_s2 + $0x168] sm:$0xff] }
 0xf78   :  { %13619 = vmatpush1.bf16.msra.mxu0 %v13618_v19 }
 0xf79   :  { %13621 = vmatprep.subr.bf16.mxu0 %v13620_v20 }
 0xf7c   :  { %13623 = vmatpush1.bf16.msra.mxu0 %v13622_v5 }
 0xfe4   :  { %v2306_v36 = vpop.permute.xlu1 %2305 }
 0xfe5   :  { %v2308_v37 = vadd.f32 %v2306_v36, %v2213_v24  ;;  %v2484_v24 = vld [vmem:[#allocation7 + $0x278] sm:$0xff]  ;;  %v2490_v36 = vld [vmem:[#allocation7 + $0x2a8] sm:$0xff] }
 0xfe6   :  { %v13624_v25 = vpack.c.bf16 %v2484_v24, %v2482_v12 }
 0xfe7   :  { %15058 = vtanh.f32 %v2308_v37  ;;  %v2492_v37 = vld [vmem:[#allocation7 + $0x2b8] sm:$0xff] }
 0xfe8   :  { %13625 = vmatprep.subr.bf16.mxu0 %v13624_v25  ;;  %v13632_v46 = vpack.c.bf16 %v2492_v37, %v2490_v36  ;;  %v2535_v36 = vld [vmem:[%s18699_s2 + $0x110] sm:$0xff] }
 0xfe9   :  { %13627 = vmatpush1.bf16.msra.mxu0 %v13626_v6  ;;  %v2518_v6 = vld [vmem:[%s18699_s2 + $0x88] sm:$0xff] }
 0xfea   :  { %13629 = vmatprep.subr.bf16.mxu0 %v13628_v32  ;;  %v13692_v32 = vpack.c.bf16 %v2518_v6, %v2517_v30  ;;  %v2505_v6 = vld [vmem:[%s18699_s2 + $0x20] sm:$0xff] }
 0xff1   :  { %v15059_v51 = vpop.eup %15058 }
 0xff2   :  { %2312 = vrot.lane.b32.xlu0 %v15059_v51, %s18665_s11  ;;  %v2489_v51 = vld [vmem:[#allocation7 + $0x2a0] sm:$0xff] }
0x1064   :  { %v2313_v55 = vpop.permute.xlu0 %2312 }
0x1065   :  { %v2315_v57 = vmul.f32 %v2313_v55, %v2310_v53  ;;  %v2491_v53 = vld [vmem:[#allocation7 + $0x2b0] sm:$0xff]  ;;  %v2494_v55 = vld [vmem:[#allocation7 + $0x2c8] sm:$0xff] }
0x1067   :  { %v16491_v59 = vadd.f32 %v2316_v56, %v2315_v57  ;;  %v2496_v56 = vld [vmem:[#allocation7 + $0x2d8] sm:$0xff]  ;;  %v13634_v57 = vpack.c.bf16 %v2491_v53, %v2489_v51  ;;  %v2537_v51 = vld [vmem:[%s18699_s2 + $0x120] sm:$0xff]  ;;  %v2538_v53 = vld [vmem:[%s18699_s2 + $0x128] sm:$0xff] }
0x1069   :  { %v2318_v62 = vmax.f32 %v16491_v59, 0.0 }
0x106b   :  { %2329 = vrot.lane.b32.xlu1 %v2318_v62, %s18665_s11  ;;  %v13636_v62 = vpack.c.bf16 %v2496_v56, %v2494_v55  ;;  %v13731_v55 = vpack.c.bf16 %v2538_v53, %v2537_v51  ;;  %v2539_v56 = vld [vmem:[%s18699_s2 + $0x130] sm:$0xff]  ;;  %v2525_v51 = vld [vmem:[%s18699_s2 + $0xc0] sm:$0xff]  ;;  %v2526_v53 = vld [vmem:[%s18699_s2 + $0xc8] sm:$0xff] }
0x10dd   :  { %v2330_v0 = vpop.permute.xlu1 %2329 }
0x10de   :  { %11832 = vmatmul.mubr.msk.f32.vlgmr.msra.gmra.mrb[30].mxu1 %vm267_vm0, %v2330_v0  ;;  %v2493_v0 = vld [vmem:[#allocation7 + $0x2c0] sm:$0xff] }
0x10df   :  { %13526 = vmatpush3.bf16.msra.mxu1 %v15964_v9  ;;  %11901 = vmatprep.mubr.msk.f32.mxu1 %vm15507_vm3, %v15504_v42  ;;  %v13638_v1 = vpack.c.bf16 %v2495_v63, %v2493_v0  ;;  %v2541_v0 = vld [vmem:[%s18699_s2 + $0x140] sm:$0xff]  ;;  %v2542_v63 = vld [vmem:[%s18699_s2 + $0x148] sm:$0xff] }
0x10e0   :  { %13527 = vmatprep.subr.bf16.mxu1 %v15505_v43 }
0x10e3   :  { %13529 = vmatpush3.bf16.msra.mxu1 %v15976_v17 }
0x10e4   :  { %13530 = vmatprep.subr.bf16.mxu1 %v15505_v43 }
0x10e7   :  { %13532 = vmatpush3.bf16.msra.mxu1 %v15988_v22 }
0x10e8   :  { %13533 = vmatprep.subr.bf16.mxu1 %v15505_v43 }
0x10eb   :  { %13535 = vmatpush3.bf16.msra.mxu1 %v16000_v28 }
0x10ec   :  { %13536 = vmatprep.subr.bf16.mxu1 %v15505_v43 }
0x10ef   :  { %13538 = vmatpush3.bf16.msra.mxu1 %v16012_v34 }
0x10f0   :  { %13539 = vmatprep.subr.bf16.mxu1 %v15505_v43 }
0x10f3   :  { %13541 = vmatpush3.bf16.msra.mxu1 %v16024_v40 }
0x10f4   :  { %13542 = vmatprep.subr.bf16.mxu1 %v15505_v43 }
0x10f7   :  { %13544 = vmatpush3.bf16.msra.mxu1 %v16034_v44 }
0x10f8   :  { %13545 = vmatprep.subr.bf16.mxu1 %v15505_v43 }
0x10fb   :  { %13547 = vmatpush3.bf16.msra.mxu1 %v16042_v47 }
0x10fc   :  { %13644 = vmatprep.subr.bf16.mxu1 %v15505_v43 }
0x10fe   :  { %11902 = vmatmul.mubr.f32.vlgmr.msra.gmra.mrb[32].mxu1 %v2615_v33  ;;  %v2485_v33 = vld [vmem:[#allocation7 + $0x280] sm:$0xff] }
0x10ff   :  { %13646 = vmatpush3.bf16.msra.mxu1 %v15964_v9  ;;  %11936 = vmatprep.mubr.msk.f32.mxu1 %vm15507_vm3, %v15504_v42  ;;  %v13630_v58 = vpack.c.bf16 %v2487_v35, %v2485_v33  ;;  %v2533_v33 = vld [vmem:[%s18699_s2 + $0x100] sm:$0xff]  ;;  %v2534_v35 = vld [vmem:[%s18699_s2 + $0x108] sm:$0xff] }
0x1100   :  { %13647 = vmatprep.subr.bf16.mxu1 %v15505_v43  ;;  %v13725_v37 = vpack.c.bf16 %v2534_v35, %v2533_v33  ;;  %v2523_v33 = vld [vmem:[%s18699_s2 + $0xb0] sm:$0xff]  ;;  %v2524_v35 = vld [vmem:[%s18699_s2 + $0xb8] sm:$0xff] }
0x1101   :  { %13631 = vmatpush1.bf16.msra.mxu0 %v13630_v58  ;;  %v2536_v58 = vld [vmem:[%s18699_s2 + $0x118] sm:$0xff] }
0x1102   :  { %13633 = vmatprep.subr.bf16.mxu0 %v13632_v46  ;;  %v13728_v46 = vpack.c.bf16 %v2536_v58, %v2535_v36  ;;  %v2507_v58 = vld [vmem:[%s18699_s2 + $0x30] sm:$0xff] }
0x1103   :  { %13649 = vmatpush3.bf16.msra.mxu1 %v15976_v17 }
0x1104   :  { %13650 = vmatprep.subr.bf16.mxu1 %v15505_v43 }
0x1105   :  { %13635 = vmatpush1.bf16.msra.mxu0 %v13634_v57  ;;  %v2540_v57 = vld [vmem:[%s18699_s2 + $0x138] sm:$0xff] }
0x1106   :  { %13637 = vmatprep.subr.bf16.mxu0 %v13636_v62  ;;  %v13734_v62 = vpack.c.bf16 %v2540_v57, %v2539_v56  ;;  %v13708_v56 = vpack.c.bf16 %v2526_v53, %v2525_v51  ;;  %v2509_v57 = vld [vmem:[%s18699_s2 + $0x40] sm:$0xff] }
0x1107   :  { %13652 = vmatpush3.bf16.msra.mxu1 %v15988_v22 }
0x1108   :  { %13653 = vmatprep.subr.bf16.mxu1 %v15505_v43 }
0x1109   :  { %13639 = vmatpush1.bf16.msra.mxu0 %v13638_v1  ;;  %v13737_v1 = vpack.c.bf16 %v2542_v63, %v2541_v0  ;;  %v2527_v0 = vld [vmem:[%s18699_s2 + $0xd0] sm:$0xff]  ;;  %v2528_v63 = vld [vmem:[%s18699_s2 + $0xd8] sm:$0xff] }
0x110a   :  { %13641 = vmatprep.subr.bf16.mxu0 %v13640_v45  ;;  %v13740_v45 = vpack.c.bf16 %v2544_v10, %v2543_v3  ;;  %v13712_v3 = vpack.c.bf16 %v2528_v63, %v2527_v0  ;;  %v2511_v10 = vld [vmem:[%s18699_s2 + $0x50] sm:$0xff] }
0x110b   :  { %13655 = vmatpush3.bf16.msra.mxu1 %v16000_v28  ;;  %v3142_v63 = vld [vmem:[%s18627_s13 + $0x30] sm:$0xff] }
0x110c   :  { %13656 = vmatprep.subr.bf16.mxu1 %v15505_v43 }
0x110d   :  { %13643 = vmatpush1.bf16.msra.mxu0 %v13642_v13  ;;  %v13743_v13 = vpack.c.bf16 %v2546_v14, %v2545_v11  ;;  %v2529_v11 = vld [vmem:[%s18699_s2 + $0xe0] sm:$0xff]  ;;  %v2530_v14 = vld [vmem:[%s18699_s2 + $0xe8] sm:$0xff] }
0x110e   :  { %13724 = vmatprep.subr.bf16.mxu0 %v15505_v43 }
0x110f   :  { %13658 = vmatpush3.bf16.msra.mxu1 %v16012_v34 }
0x1110   :  { %13659 = vmatprep.subr.bf16.mxu1 %v15505_v43 }
0x1113   :  { %13661 = vmatpush3.bf16.msra.mxu1 %v16024_v40 }
0x1114   :  { %13662 = vmatprep.subr.bf16.mxu1 %v15505_v43 }
0x1117   :  { %13664 = vmatpush3.bf16.msra.mxu1 %v16034_v44 }
0x1118   :  { %13665 = vmatprep.subr.bf16.mxu1 %v15505_v43 }
0x111b   :  { %13667 = vmatpush3.bf16.msra.mxu1 %v16042_v47 }
0x111c   :  { %13668 = vmatprep.subr.bf16.mxu1 %v15505_v43 }
0x11b1   :  { %v2399_v16 = vpop.f32.mrb[30].mxu1 }
0x11b2   :  { %v16536_v2 = vadd.f32 %v10392_v15, %v2399_v16  ;;  %v11833_v18 = vpop.f32.mrb[31].mxu1  ;;  %v2501_v15 = vld [vmem:[%s18699_s2] sm:$0xff]  ;;  %v2502_v16 = vld [vmem:[%s18699_s2 + $0x8] sm:$0xff] }
0x11b3   :  { %v2519_v18 = vld [vmem:[%s18699_s2 + $0x90] sm:$0xff] }
0x11b4   :  { %2404 = vst.msk [vmem:[%s18709_s26] sm:$0xf] %vm2403_vm1, %v16536_v2 }
0x11d1   :  { %v2685_v4 = vpop.f32.mrb[32].mxu1 }
0x11d2   :  { %v2689_v19 = vmul.f32 2.0, %v2685_v4  ;;  %v11903_v20 = vpop.f32.mrb[33].mxu1  ;;  %v2520_v4 = vld [vmem:[%s18699_s2 + $0x98] sm:$0xff] }
0x11d3   :  { %v13696_v20 = vpack.c.bf16 %v2520_v4, %v2519_v18  ;;  %v2514_v18 = vld [vmem:[%s18699_s2 + $0x68] sm:$0xff]  ;;  %v2531_v4 = vld [vmem:[%s18699_s2 + $0xf0] sm:$0xff] }
0x11d4   :  { %v2690_v21 = vsub.f32 %v2689_v19, %v16366_v39  ;;  %v13694_v19 = vpack.c.bf16 %v2502_v16, %v2501_v15  ;;  %v13716_v15 = vpack.c.bf16 %v2530_v14, %v2529_v11  ;;  %v2513_v16 = vld [vmem:[%s18699_s2 + $0x60] sm:$0xff]  ;;  %v3146_v11 = vld [vmem:[%s18627_s13 + $0x50] sm:$0xff]  ;;  %v3147_v14 = vld [vmem:[%s18627_s13 + $0x58] sm:$0xff] }
0x11d6   :  { %2827 = vmatmul.mubr.f32.vlgmr.msra.gmra.mrb[8].mxu0 %v2690_v21  ;;  %v2503_v21 = vld [vmem:[%s18699_s2 + $0x10] sm:$0xff] }
0x11d7   :  { %12006 = vmatprep.mubr.msk.f32.mxu0 %vm15507_vm3, %v15504_v42  ;;  %13726 = vmatpush3.bf16.msra.mxu0 %v13725_v37  ;;  %v13704_v37 = vpack.c.bf16 %v2524_v35, %v2523_v33  ;;  %v3139_v35 = vld [vmem:[%s18627_s13 + $0x18] sm:$0xff] }
0x11d8   :  { %13727 = vmatprep.subr.bf16.mxu0 %v15505_v43 }
0x11db   :  { %13729 = vmatpush3.bf16.msra.mxu0 %v13728_v46  ;;  %v2508_v46 = vld [vmem:[%s18699_s2 + $0x38] sm:$0xff] }
0x11dc   :  { %13730 = vmatprep.subr.bf16.mxu0 %v15505_v43 }
0x11df   :  { %13732 = vmatpush3.bf16.msra.mxu0 %v13731_v55  ;;  %v13706_v55 = vpack.c.bf16 %v2508_v46, %v2507_v58  ;;  %v3141_v58 = vld [vmem:[%s18627_s13 + $0x28] sm:$0xff] }
0x11e0   :  { %13733 = vmatprep.subr.bf16.mxu0 %v15505_v43 }
0x11e3   :  { %13735 = vmatpush3.bf16.msra.mxu0 %v13734_v62  ;;  %v2510_v62 = vld [vmem:[%s18699_s2 + $0x48] sm:$0xff] }
0x11e4   :  { %13736 = vmatprep.subr.bf16.mxu0 %v15505_v43 }
0x11e7   :  { %13738 = vmatpush3.bf16.msra.mxu0 %v13737_v1  ;;  %v13710_v1 = vpack.c.bf16 %v2510_v62, %v2509_v57 }
0x11e8   :  { %13739 = vmatprep.subr.bf16.mxu0 %v15505_v43 }
0x11eb   :  { %13741 = vmatpush3.bf16.msra.mxu0 %v13740_v45  ;;  %v2512_v45 = vld [vmem:[%s18699_s2 + $0x58] sm:$0xff] }
0x11ec   :  { %13742 = vmatprep.subr.bf16.mxu0 %v15505_v43 }
0x11ef   :  { %13744 = vmatpush3.bf16.msra.mxu0 %v13743_v13  ;;  %v13714_v13 = vpack.c.bf16 %v2512_v45, %v2511_v10  ;;  %v3145_v10 = vld [vmem:[%s18627_s13 + $0x48] sm:$0xff] }
0x11f0   :  { %13745 = vmatprep.subr.bf16.mxu0 %v15505_v43 }
0x12a9   :  { %v2828_v23 = vpop.f32.mrb[8].mxu0 }
0x12aa   :  { %v14972_v12 = vadd.f32 %v2828_v23, %v16104_v61  ;;  %v16547_v24 = vpop.f32.mrb[9].mxu0  ;;  %v2504_v23 = vld [vmem:[%s18699_s2 + $0x18] sm:$0xff] }
0x12ac   :  { %v10394_v5 = vmul.f32 -1.442695, %v14972_v12 }
0x12ae   :  { %15060 = vpow2.f32 %v10394_v5  ;;  %v2521_v5 = vld [vmem:[%s18699_s2 + $0xa0] sm:$0xff] }
0x12b8   :  { %v15061_v25 = vpop.eup %15060 }
0x12b9   :  { %v2841_v26 = vadd.f32 1.0, %v15061_v25  ;;  %v2522_v25 = vld [vmem:[%s18699_s2 + $0xa8] sm:$0xff] }
0x12ba   :  { %v13700_v30 = vpack.c.bf16 %v2522_v25, %v2521_v5  ;;  %v2547_v25 = vld [vmem:[%s18699_s2 + $0x170] sm:$0xff] }
0x12bb   :  { %15062 = vrcp.f32 %v2841_v26 }
0x12c5   :  { %v15063_v27 = vpop.eup %15062 }
0x12c6   :  { %v16550_v29 = vmul.f32 %v15063_v27, %v16366_v39  ;;  %v13698_v27 = vpack.c.bf16 %v2504_v23, %v2503_v21  ;;  %v2515_v23 = vld [vmem:[%s18699_s2 + $0x70] sm:$0xff] }
0x12c8   :  { %11937 = vmatmul.mubr.f32.vlgmr.msra.gmra.mrb[34].mxu1 %v16550_v29 }
0x12c9   :  { %13670 = vmatpush3.bf16.msra.mxu1 %v15964_v9  ;;  %11971 = vmatprep.mubr.msk.f32.mxu1 %vm15507_vm3, %v15504_v42 }
0x12ca   :  { %13671 = vmatprep.subr.bf16.mxu1 %v15505_v43 }
0x12cd   :  { %13673 = vmatpush3.bf16.msra.mxu1 %v15976_v17 }
0x12ce   :  { %13674 = vmatprep.subr.bf16.mxu1 %v15505_v43 }
0x12d1   :  { %13676 = vmatpush3.bf16.msra.mxu1 %v15988_v22 }
0x12d2   :  { %13677 = vmatprep.subr.bf16.mxu1 %v15505_v43 }
0x12d5   :  { %13679 = vmatpush3.bf16.msra.mxu1 %v16000_v28 }
0x12d6   :  { %13680 = vmatprep.subr.bf16.mxu1 %v15505_v43 }
0x12d9   :  { %13682 = vmatpush3.bf16.msra.mxu1 %v16012_v34 }
0x12da   :  { %13683 = vmatprep.subr.bf16.mxu1 %v15505_v43 }
0x12dd   :  { %13685 = vmatpush3.bf16.msra.mxu1 %v16024_v40 }
0x12de   :  { %13686 = vmatprep.subr.bf16.mxu1 %v15505_v43 }
0x12e1   :  { %13688 = vmatpush3.bf16.msra.mxu1 %v16034_v44 }
0x12e2   :  { %13689 = vmatprep.subr.bf16.mxu1 %v15505_v43 }
0x12e5   :  { %13691 = vmatpush3.bf16.msra.mxu1 %v16042_v47 }
0x12e6   :  { %13693 = vmatprep.subr.bf16.mxu1 %v13692_v32  ;;  %v2506_v32 = vld [vmem:[%s18699_s2 + $0x28] sm:$0xff] }
0x12e7   :  { %v13702_v36 = vpack.c.bf16 %v2506_v32, %v2505_v6  ;;  %v3137_v6 = vld [vmem:[%s18627_s13 + $0x8] sm:$0xff]  ;;  %v3138_v32 = vld [vmem:[%s18627_s13 + $0x10] sm:$0xff] }
0x139b   :  { %v2914_v12 = vpop.f32.mrb[34].mxu1 }
0x139c   :  { %v11938_v26 = vpop.f32.mrb[35].mxu1  ;;  %11972 = vmatmul.mubr.f32.vlgmr.msra.gmra.mrb[36].mxu1 %v2914_v12 }
0x139d   :  { %13695 = vmatpush3.bf16.msra.mxu1 %v13694_v19  ;;  %3054 = vmatprep.mubr.f32.mxu1 %v2914_v12  ;;  %v2532_v19 = vld [vmem:[%s18699_s2 + $0xf8] sm:$0xff] }
0x139e   :  { %13697 = vmatprep.subr.bf16.mxu1 %v13696_v20  ;;  %v13718_v20 = vpack.c.bf16 %v2514_v18, %v2513_v16  ;;  %v13720_v21 = vpack.c.bf16 %v2532_v19, %v2531_v4  ;;  %v2516_v12 = vld [vmem:[%s18699_s2 + $0x78] sm:$0xff]  ;;  %v3149_v16 = vld [vmem:[%s18627_s13 + $0x68] sm:$0xff]  ;;  %v3150_v4 = vld [vmem:[%s18627_s13 + $0x70] sm:$0xff] }
0x139f   :  { %v13722_v5 = vpack.c.bf16 %v2516_v12, %v2515_v23  ;;  %v2548_v26 = vld [vmem:[%s18699_s2 + $0x178] sm:$0xff]  ;;  %v3230_v23 = vld [vmem:[%s18701_s3 + $0x8] sm:$0xff]  ;;  %v14973_v12 = vadd.f32 %v16547_v24, %v16354_v41 }
0x13a0   :  { %v3151_v19 = vld [vmem:[%s18627_s13 + $0x78] sm:$0xff]  ;;  %3236 = vrot.lane.b32.xlu1 %v3230_v23, %s18671_s6  ;;  %v3245_v24 = vld [vmem:[%s18630_s16 + $0x8] sm:$0xff] }
0x13a1   :  { %13699 = vmatpush3.bf16.msra.mxu1 %v13698_v27  ;;  %v13746_v27 = vpack.c.bf16 %v2548_v26, %v2547_v25 }
0x13a2   :  { %13701 = vmatprep.subr.bf16.mxu1 %v13700_v30  ;;  %v3136_v30 = vld [vmem:[%s18627_s13] sm:$0xff] }
0x13a3   :  { %13747 = vmatpush3.bf16.msra.mxu0 %v13746_v27  ;;  %v13749_v33 = vpack.c.bf16 %v3137_v6, %v3136_v30 }
0x13a4   :  { %13772 = vmatprep.subr.bf16.mxu0 %v15505_v43 }
0x13a5   :  { %13703 = vmatpush3.bf16.msra.mxu1 %v13702_v36  ;;  %v13752_v36 = vpack.c.bf16 %v3139_v35, %v3138_v32 }
0x13a6   :  { %13705 = vmatprep.subr.bf16.mxu1 %v13704_v37  ;;  %v3140_v37 = vld [vmem:[%s18627_s13 + $0x20] sm:$0xff] }
0x13a7   :  { %v13755_v46 = vpack.c.bf16 %v3141_v58, %v3140_v37 }
0x13a9   :  { %13707 = vmatpush3.bf16.msra.mxu1 %v13706_v55 }
0x13aa   :  { %13709 = vmatprep.subr.bf16.mxu1 %v13708_v56 }
0x13ad   :  { %13711 = vmatpush3.bf16.msra.mxu1 %v13710_v1  ;;  %v3143_v1 = vld [vmem:[%s18627_s13 + $0x38] sm:$0xff] }
0x13ae   :  { %13713 = vmatprep.subr.bf16.mxu1 %v13712_v3  ;;  %v13758_v3 = vpack.c.bf16 %v3143_v1, %v3142_v63 }
0x13b1   :  { %13715 = vmatpush3.bf16.msra.mxu1 %v13714_v13  ;;  %v13764_v13 = vpack.c.bf16 %v3147_v14, %v3146_v11 }
0x13b2   :  { %13717 = vmatprep.subr.bf16.mxu1 %v13716_v15  ;;  %v3148_v15 = vld [vmem:[%s18627_s13 + $0x60] sm:$0xff] }
0x13b3   :  { %v13767_v18 = vpack.c.bf16 %v3149_v16, %v3148_v15 }
0x13b5   :  { %13719 = vmatpush3.bf16.msra.mxu1 %v13718_v20  ;;  %v13770_v20 = vpack.c.bf16 %v3151_v19, %v3150_v4 }
0x13b6   :  { %13721 = vmatprep.subr.bf16.mxu1 %v13720_v21  ;;  %v3229_v21 = vld [vmem:[%s18700_s14 + $0x8] sm:$0xff] }
0x13b7   :  { %3232 = vrot.lane.b32.xlu0 %v3229_v21, %s18673_s10 }
0x13b9   :  { %13723 = vmatpush3.bf16.msra.mxu1 %v13722_v5  ;;  %v10395_v5 = vmul.f32 -1.442695, %v14973_v12 }
0x13ba   :  { %13748 = vmatprep.subr.bf16.mxu1 %v15505_v43 }
0x13bb   :  { %15064 = vpow2.f32 %v10395_v5 }
0x13bc   :  { %3055 = vmatmul.mubr.f32.vlgmr.msra.gmra.mrb[38].mxu1 %v16550_v29 }
0x13bd   :  { %12041 = vmatprep.mubr.msk.f32.mxu1 %vm15507_vm3, %v15504_v42  ;;  %13750 = vmatpush3.bf16.msra.mxu1 %v13749_v33 }
0x13be   :  { %13751 = vmatprep.subr.bf16.mxu1 %v15505_v43 }
0x13c1   :  { %13753 = vmatpush3.bf16.msra.mxu1 %v13752_v36  ;;  %v3244_v36 = vld [vmem:[%s18630_s16] sm:$0xff] }
0x13c2   :  { %13754 = vmatprep.subr.bf16.mxu1 %v15505_v43 }
0x13c5   :  { %13756 = vmatpush3.bf16.msra.mxu1 %v13755_v46  ;;  %v15065_v25 = vpop.eup %15064 }
0x13c6   :  { %13757 = vmatprep.subr.bf16.mxu1 %v15505_v43  ;;  %v2842_v26 = vadd.f32 1.0, %v15065_v25 }
0x13c8   :  { %15066 = vrcp.f32 %v2842_v26 }
0x13c9   :  { %13759 = vmatpush3.bf16.msra.mxu1 %v13758_v3  ;;  %v10400_v3 = vld [vmem:[%s18632_s18] ss:$0 sm:$0xff] }
0x13ca   :  { %13760 = vmatprep.subr.bf16.mxu1 %v15505_v43 }
0x13d2   :  { %v15067_v33 = vpop.eup %15066 }
0x13d3   :  { %v3133_v35 = vsub.f32 1.0, %v15067_v33  ;;  %v3132_v58 = vmul.f32 %v15067_v33, %v16366_v39  ;;  %v3242_v39 = vld [vmem:[#allocation12 + $0x8] sm:$0xff] }
0x146f   :  { %v2984_v51 = vpop.f32.mrb[36].mxu1 }
0x1470   :  { %v2988_v53 = vmul.f32 2.0, %v2984_v51  ;;  %v11973_v55 = vpop.f32.mrb[37].mxu1  ;;  %v13776_v51 = vpack.c.bf16 %v3245_v24, %v3244_v36  ;;  %v3508_v36 = vld [vmem:[#allocation15] sm:$0xff]  ;;  %v3509_v24 = vld [vmem:[#allocation15 + $0x8] sm:$0xff] }
0x1472   :  { %v2989_v56 = vsub.f32 %v2988_v53, %v16550_v29  ;;  %v3144_v29 = vld [vmem:[%s18627_s13 + $0x40] sm:$0xff] }
0x1473   :  { %v13761_v45 = vpack.c.bf16 %v3145_v10, %v3144_v29 }
0x1474   :  { %12007 = vmatmul.mubr.f32.vlgmr.msra.gmra.mrb[30].mxu0 %v2989_v56  ;;  %v3243_v56 = vld [vmem:[#allocation12 + $0x10] sm:$0xf] }
0x1475   :  { %12050 = vmatprep.mubr.msk.f32.mxu0 %vm15507_vm3, %v15504_v42  ;;  %13762 = vmatpush3.bf16.msra.mxu1 %v13761_v45 }
0x1476   :  { %13763 = vmatprep.subr.bf16.mxu1 %v15505_v43 }
0x1479   :  { %13765 = vmatpush3.bf16.msra.mxu1 %v13764_v13  ;;  %v10397_v13 = vld [vmem:[#allocation13] ss:$0 sm:$0xff] }
0x147a   :  { %13766 = vmatprep.subr.bf16.mxu1 %v15505_v43 }
0x147d   :  { %13768 = vmatpush3.bf16.msra.mxu1 %v13767_v18 }
0x147e   :  { %13769 = vmatprep.subr.bf16.mxu1 %v15505_v43 }
0x1481   :  { %13771 = vmatpush3.bf16.msra.mxu1 %v13770_v20 }
0x1482   :  { %13775 = vmatprep.subr.bf16.mxu1 %v15505_v43 }
0x148f   :  { %v10809_v57 = vpop.f32.mrb[38].mxu1 }
0x1490   :  { %v10810_v62 = vpop.f32.mrb[39].mxu1 }
0x1491   :  { %v10811_v0 = vadd.f32 %v10810_v62, %v10809_v57  ;;  %v10396_v57 = vld [vmem:[#allocation10] ss:$0 sm:$0xff] }
0x1547   :  { %v3126_v27 = vpop.f32.mrb[30].mxu0 }
0x1548   :  { %v3127_v30 = vadd.f32 %v10811_v0, %v3126_v27  ;;  %v12008_v6 = vpop.f32.mrb[31].mxu0  ;;  %v3233_v0 = vpop.permute.xlu0 %3232 }
0x154a   :  { %v3130_v32 = vadd.f32 %v3127_v30, %v16060_v8  ;;  %v3241_v8 = vld [vmem:[#allocation12] sm:$0xff] }
0x154b   :  { %v13773_v55 = vpack.c.bf16 %v3242_v39, %v3241_v8  ;;  %v10408_v30 = vld [vmem:[%s18703_s1 + $0x4] sm:$0xf] }
0x154c   :  { %15068 = vtanh.f32 %v3130_v32 }
0x154d   :  { %13774 = vmatpush3.bf16.msra.mxu0 %v13773_v55  ;;  %v15201_v55 = vld [vmem:[%s18704_s19] sm:$0xf] }
0x154e   :  { %12048 = vmatprep.subr.mxu0 %v15504_v42 }
0x1551   :  { %12049 = vmatpush3.msk.msra.mxu0 %vm1665_vm4, %v3243_v56 }
0x1552   :  { %12060 = vmatprep.subr.mxu0 %v15504_v42 }
0x1556   :  { %v15069_v37 = vpop.eup %15068 }
0x1557   :  { %v3134_v46 = vmul.f32 %v15069_v37, %v3133_v35  ;;  %v13779_v37 = vpack.c.bf16 %v3509_v24, %v3508_v36  ;;  %v10413_v36 = vld [vmem:[%s18638_s24] ss:$0 sm:$0xff] }
0x1559   :  { %v16803_v53 = vadd.f32 %v3134_v46, %v3132_v58 }
0x155b   :  { %12042 = vmatmul.mubr.f32.vlgmr.msra.gmra.mrb[40].mxu1 %v16803_v53 }
0x155c   :  { %13777 = vmatpush3.bf16.msra.mxu1 %v13776_v51  ;;  %12057 = vmatprep.mubr.msk.f32.mxu1 %vm15507_vm3, %v15504_v42  ;;  %v15200_v51 = vld [vmem:[%s18702_s23] sm:$0x3] }
0x155d   :  { %13778 = vmatprep.subr.bf16.mxu1 %v15505_v43 }
0x155f   :  { %12058 = vmatmul.mubr.msk.f32.vlgmr.msra.gmra.mrb[42].mxu1 %vm267_vm0, %v16397_v38  ;;  %v3237_v38 = vpop.permute.xlu1 %3236 }
0x1560   :  { %12069 = vmatprep.mubr.msk.f32.mxu1 %vm15507_vm3, %v15504_v42  ;;  %13780 = vmatpush3.bf16.msra.mxu1 %v13779_v37 }
0x1561   :  { %13781 = vmatprep.subr.bf16.mxu1 %v15505_v43 }
0x162e   :  { %v3225_v62 = vpop.f32.mrb[40].mxu1 }
0x162f   :  { %v3226_v63 = vadd.f32 %v10396_v57, %v3225_v62  ;;  %v12043_v1 = vpop.f32.mrb[41].mxu1 }
0x1631   :  { %v3239_v29 = vsel %vm267_vm0, %v3226_v63, %v3233_v0 }
0x1632   :  { %v3240_v10 = vsel %vm1646_vm5, %v3239_v29, %v3237_v38  ;;  %v3404_v45 = vpop.f32.mrb[42].mxu1 }
0x1633   :  { %v3405_v11 = vadd.f32 %v10400_v3, %v3404_v45  ;;  %12051 = vmatmul.mubr.msk.f32.vlgmr.msra.gmra.mrb[32].mxu0 %vm1661_vm6, %v3240_v10  ;;  %v12059_v14 = vpop.f32.mrb[43].mxu1  ;;  %v10404_v3 = vld [vmem:[#allocation16] ss:$0 sm:$0xff] }
0x1634   :  { %12062 = vmatprep.mubr.msk.f32.mxu0 %vm15507_vm3, %v15504_v42 }
0x1635   :  { %3416 = vrot.lane.b32.xlu0 %v3405_v11, %s18669_s12 }
0x16a7   :  { %v3417_v12 = vpop.permute.xlu0 %3416 }
0x1706   :  { %v3326_v15 = vpop.f32.mrb[32].mxu0 }
0x1707   :  { %v3327_v16 = vadd.f32 %v10397_v13, %v3326_v15  ;;  %v12052_v18 = vpop.f32.mrb[33].mxu0 }
0x1709   :  { %v3408_v4 = vadd.f32 %v3405_v11, %v3327_v16 }
0x170b   :  { %v10402_v19 = vmul.f32 -1.442695, %v3408_v4 }
0x170d   :  { %15070 = vpow2.f32 %v10402_v19 }
0x1717   :  { %v15071_v20 = vpop.eup %15070 }
0x1718   :  { %v3412_v21 = vadd.f32 1.0, %v15071_v20  ;;  %v3707_v20 = vld [vmem:[#allocation18] sm:$0xff] }
0x171a   :  { %15072 = vrcp.f32 %v3412_v21  ;;  %v3708_v21 = vld [vmem:[#allocation18 + $0x8] sm:$0xff] }
0x1724   :  { %v15073_v23 = vpop.eup %15072 }
0x1725   :  { %v3419_v5 = vmul.f32 %v15073_v23, %v3417_v12  ;;  %v3426_v6 = vsub.f32 1.0, %v15073_v23  ;;  %v3432_v33 = vmul.f32 %v15073_v23, %v16390_v7  ;;  %v3712_v7 = vld [vmem:[%s18636_s22 + $0x8] sm:$0xff] }
0x1726   :  { %v3709_v23 = vld [vmem:[#allocation18 + $0x10] sm:$0xff] }
0x1727   :  { %3421 = vrot.lane.b32.xlu1 %v3419_v5, %s18667_s0  ;;  %v13782_v5 = vpack.c.bf16 %v3708_v21, %v3707_v20  ;;  %v3994_v20 = vld [vmem:[#allocation7 + $0x18] sm:$0xff] }
0x1799   :  { %v3422_v25 = vpop.permute.xlu1 %3421 }
0x179a   :  { %v3424_v26 = vadd.f32 %v3422_v25, %v3327_v16  ;;  %v3710_v25 = vld [vmem:[#allocation18 + $0x18] sm:$0x3] }
0x179c   :  { %15074 = vtanh.f32 %v3424_v26 }
0x17a6   :  { %v15075_v27 = vpop.eup %15074 }
0x17a7   :  { %3428 = vrot.lane.b32.xlu0 %v15075_v27, %s18665_s11 }
0x17ab   :  { %3614 = vrot.lane.b32.xlu0 %v10408_v30, %s18694_s20  ;;  %v13785_v30 = vpack.c.bf16 %v3710_v25, %v3709_v23  ;;  %v3991_v23 = vld [vmem:[#allocation7] sm:$0xff]  ;;  %v3998_v25 = vld [vmem:[#allocation7 + $0x38] sm:$0xff] }
0x17af   :  { %3804 = vrot.lane.b32.xlu0 %v16491_v59, %s18665_s11 }
0x17b3   :  { %3702 = vrot.lane.b32.xlu0 %v16536_v2, %s18710_s4  ;;  %v3711_v2 = vld [vmem:[%s18636_s22] sm:$0xff] }
0x17b4   :  { %v13789_v39 = vpack.c.bf16 %v3712_v7, %v3711_v2 }
0x1819   :  { %v3429_v32 = vpop.permute.xlu0 %3428 }
0x181a   :  { %v3431_v35 = vmul.f32 %v3429_v32, %v3426_v6 }
0x181c   :  { %v16836_v58 = vadd.f32 %v3432_v33, %v3431_v35 }
0x181d   :  { %v3615_v8 = vpop.permute.xlu0 %3614 }
0x181e   :  { %3435 = vrot.lane.b32.xlu1 %v16836_v58, %s18665_s11 }
0x1821   :  { %v3805_v56 = vpop.permute.xlu0 %3804 }
0x1825   :  { %v3703_v2 = vpop.permute.xlu0 %3702 }
0x1890   :  { %v16841_v46 = vpop.permute.xlu1 %3435 }
0x1891   :  { %12061 = vmatpush3.msra.mxu0 %v16841_v46 }
0x1892   :  { %12063 = vmatmul.mubr.msk.f32.vlgmr.msra.gmra.mrb[34].mxu0 %vm1848_vm7, %v15200_v51  ;;  %12072 = vmatprep.subr.mxu0 %v15504_v42 }
0x1893   :  { %12073 = vmatpush3.msra.mxu0 %v3226_v63  ;;  %12074 = vmatprep.mubr.msk.f32.mxu0 %vm15507_vm3, %v15504_v42 }
0x1894   :  { %13788 = vmatprep.subr.bf16.mxu0 %v15505_v43 }
0x1896   :  { %12075 = vmatmul.mubr.msk.f32.vlgmr.msra.gmra.mrb[36].mxu0 %vm1848_vm7, %v15201_v55 }
0x1897   :  { %13790 = vmatpush3.bf16.msra.mxu0 %v13789_v39  ;;  %12092 = vmatprep.mubr.msk.f32.mxu0 %vm15507_vm3, %v15504_v42 }
0x1898   :  { %13791 = vmatprep.subr.bf16.mxu0 %v15505_v43 }
0x189a   :  { %12093 = vmatmul.mubr.msk.f32.vlgmr.msra.gmra.mrb[38].mxu0 %vm267_vm0, %v3805_v56 }
0x189b   :  { %13793 = vmatpush3.bf16.msra.mxu0 %v16486_v49  ;;  %12099 = vmatprep.mubr.msk.f32.mxu0 %vm15507_vm3, %v15504_v42 }
0x189c   :  { %13818 = vmatprep.subr.bf16.mxu0 %v15505_v43 }
0x1965   :  { %v3504_v57 = vpop.f32.mrb[34].mxu0 }
0x1966   :  { %v12064_v62 = vpop.f32.mrb[35].mxu0  ;;  %12070 = vmatmul.mubr.msk.f32.vlgmr.msra.gmra.mrb[44].mxu1 %vm267_vm0, %v3504_v57 }
0x1967   :  { %12085 = vmatprep.mubr.msk.f32.mxu1 %vm15507_vm3, %v15504_v42  ;;  %13783 = vmatpush3.bf16.msra.mxu1 %v13782_v5  ;;  %v3996_v5 = vld [vmem:[#allocation7 + $0x28] sm:$0xff] }
0x1968   :  { %13784 = vmatprep.subr.bf16.mxu1 %v15505_v43 }
0x1969   :  { %v3693_v0 = vpop.f32.mrb[36].mxu0 }
0x196a   :  { %v12076_v63 = vpop.f32.mrb[37].mxu0 }
0x196b   :  { %13787 = vmatpush3.bf16.msk.msra.mxu1 %vm16430_vm13, %v13785_v30  ;;  %v3995_v30 = vld [vmem:[#allocation7 + $0x20] sm:$0xff] }
0x196c   :  { %13794 = vmatprep.subr.bf16.mxu1 %v15505_v43 }
0x196d   :  { %v3874_v1 = vpop.f32.mrb[38].mxu0 }
0x196e   :  { %v12094_v38 = vpop.f32.mrb[39].mxu0  ;;  %v3875_v24 = vadd.f32 %v10413_v36, %v3874_v1 }
0x1a39   :  { %v3586_v29 = vpop.f32.mrb[44].mxu1 }
0x1a3a   :  { %v3587_v10 = vadd.f32 %v10404_v3, %v3586_v29  ;;  %v12071_v49 = vpop.f32.mrb[45].mxu1 }
0x1a3c   :  { %10406 = vst.msk [vmem:[%s18642_s28 + $0x2] sm:$0x3] %vm2004_vm8, %v3587_v10  ;;  %v10407_v45 = vmul.f32 -1.442695, %v3587_v10  ;;  %v3621_v32 = vrot.slane %v3587_v10, %v16100_v60 }
0x1a3e   :  { %15076 = vpow2.f32 %v10407_v45 }
0x1a48   :  { %v15077_v11 = vpop.eup %15076 }
0x1a49   :  { %v3595_v14 = vadd.f32 1.0, %v15077_v11 }
0x1a4b   :  { %15078 = vrcp.f32 %v3595_v14 }
0x1a55   :  { %v15079_v13 = vpop.eup %15078 }
0x1a56   :  { %v3598_v15 = vmul.f32 0.9, %v15079_v13 }
0x1a58   :  { %v3599_v16 = vadd.f32 0.1, %v3598_v15 }
0x1a5a   :  { %15080 = vrsqrt.f32 %v3599_v16  ;;  %vm3602_vm2 = vcmp.eq.f32.partialorder %v3599_v16, inf  ;;  %v3605_v19 = vand.u32 2147483648, %v3599_v16  ;;  %vm3604_vm9 = vcmp.eq.f32.partialorder %v3599_v16, 0.0 }
0x1a64   :  { %v15081_v18 = vpop.eup %15080 }
0x1a65   :  { %v3601_v4 = vmul.f32 %v15081_v18, %v3599_v16 }
0x1a67   :  { %v3603_v12 = vsel %vm3602_vm2, %v3599_v16, %v3601_v4 }
0x1a68   :  { %v3606_v26 = vsel %vm3604_vm9, %v3605_v19, %v3603_v12  ;;  %v3993_v12 = vld [vmem:[#allocation7 + $0x10] sm:$0xff] }
0x1a69   :  { %v3612_v27 = vrot.slane %v3606_v26, %v16100_v60  ;;  %v13844_v26 = vpack.c.bf16 %v3993_v12, %v3991_v23  ;;  %v4019_v23 = vld [vmem:[#allocation7 + $0xe0] sm:$0xff]  ;;  %v4021_v12 = vld [vmem:[#allocation7 + $0xf0] sm:$0xff] }
0x1a6b   :  { %v3617_v6 = vmul.f32 %v3615_v8, %v3612_v27  ;;  %v10410_v8 = vld [vmem:[#allocation19] ss:$0 sm:$0xff]  ;;  %v13846_v27 = vpack.c.bf16 %v3998_v25, %v3996_v5  ;;  %v4024_v5 = vld [vmem:[#allocation7 + $0x108] sm:$0xff]  ;;  %v4026_v25 = vld [vmem:[#allocation7 + $0x118] sm:$0xff] }
0x1a6d   :  { %3623 = vrot.lane.b32.xlu1 %v3617_v6, %s18711_s15  ;;  %v3997_v6 = vld [vmem:[#allocation7 + $0x30] sm:$0xff] }
0x1adf   :  { %v3624_v33 = vpop.permute.xlu1 %3623 }
0x1ae0   :  { %v3626_v35 = vadd.f32 %v3624_v33, %v3621_v32  ;;  %v4000_v32 = vld [vmem:[#allocation7 + $0x48] sm:$0xff]  ;;  %v4002_v33 = vld [vmem:[#allocation7 + $0x58] sm:$0xff] }
0x1ae1   :  { %v13850_v36 = vpack.c.bf16 %v4002_v33, %v4000_v32  ;;  %v4028_v32 = vld [vmem:[#allocation7 + $0x128] sm:$0xff]  ;;  %v4030_v33 = vld [vmem:[#allocation7 + $0x138] sm:$0xff] }
0x1ae2   :  { %3698 = vrot.lane.b32.xlu1 %v3626_v35, %s18673_s10  ;;  %v13848_v35 = vpack.c.bf16 %v3997_v6, %v3995_v30  ;;  %v4023_v30 = vld [vmem:[#allocation7 + $0x100] sm:$0xff]  ;;  %v4025_v6 = vld [vmem:[#allocation7 + $0x110] sm:$0xff] }
0x1ae6   :  { %3886 = vrot.lane.b32.xlu1 %v3875_v24, %s18669_s12 }
0x1b54   :  { %v3699_v37 = vpop.permute.xlu1 %3698 }
0x1b55   :  { %v3705_v7 = vsel %vm267_vm0, %v3693_v0, %v3699_v37  ;;  %v4001_v37 = vld [vmem:[#allocation7 + $0x50] sm:$0xff] }
0x1b56   :  { %v3706_v51 = vsel %vm2122_vm14, %v3705_v7, %v3703_v2  ;;  %v4004_v2 = vld [vmem:[#allocation7 + $0x68] sm:$0xff]  ;;  %v4006_v7 = vld [vmem:[#allocation7 + $0x78] sm:$0xff] }
0x1b57   :  { %12086 = vmatmul.mubr.msk.f32.vlgmr.msra.gmra.mrb[46].mxu1 %vm2138_vm15, %v3706_v51 }
0x1b58   :  { %13796 = vmatpush3.bf16.msra.mxu1 %v15964_v9  ;;  %12134 = vmatprep.mubr.msk.f32.mxu1 %vm15507_vm3, %v15504_v42  ;;  %v3887_v38 = vpop.permute.xlu1 %3886 }
0x1b59   :  { %13797 = vmatprep.subr.bf16.mxu1 %v15505_v43 }
0x1b5c   :  { %13799 = vmatpush3.bf16.msra.mxu1 %v15976_v17 }
0x1b5d   :  { %13800 = vmatprep.subr.bf16.mxu1 %v15505_v43 }
0x1b60   :  { %13802 = vmatpush3.bf16.msra.mxu1 %v15988_v22 }
0x1b61   :  { %13803 = vmatprep.subr.bf16.mxu1 %v15505_v43 }
0x1b64   :  { %13805 = vmatpush3.bf16.msra.mxu1 %v16000_v28 }
0x1b65   :  { %13806 = vmatprep.subr.bf16.mxu1 %v15505_v43 }
0x1b68   :  { %13808 = vmatpush3.bf16.msra.mxu1 %v16012_v34 }
0x1b69   :  { %13809 = vmatprep.subr.bf16.mxu1 %v15505_v43 }
0x1b6c   :  { %13811 = vmatpush3.bf16.msra.mxu1 %v16024_v40 }
0x1b6d   :  { %13812 = vmatprep.subr.bf16.mxu1 %v15505_v43 }
0x1b70   :  { %13814 = vmatpush3.bf16.msra.mxu1 %v16034_v44 }
0x1b71   :  { %13815 = vmatprep.subr.bf16.mxu1 %v15505_v43 }
0x1b74   :  { %13817 = vmatpush3.bf16.msra.mxu1 %v16042_v47 }
0x1b75   :  { %13938 = vmatprep.subr.bf16.mxu1 %v15505_v43 }
0x1b77   :  { %12135 = vmatmul.mubr.f32.vlgmr.msra.gmra.mrb[48].mxu1 %v16803_v53 }
0x1b78   :  { %13940 = vmatpush3.bf16.msra.mxu1 %v15964_v9  ;;  %12204 = vmatprep.mubr.msk.f32.mxu1 %vm15507_vm3, %v15504_v42 }
0x1b79   :  { %13941 = vmatprep.subr.bf16.mxu1 %v15505_v43 }
0x1b7c   :  { %13943 = vmatpush3.bf16.msra.mxu1 %v15976_v17 }
0x1b7d   :  { %13944 = vmatprep.subr.bf16.mxu1 %v15505_v43 }
0x1b80   :  { %13946 = vmatpush3.bf16.msra.mxu1 %v15988_v22 }
0x1b81   :  { %13947 = vmatprep.subr.bf16.mxu1 %v15505_v43 }
0x1b84   :  { %13949 = vmatpush3.bf16.msra.mxu1 %v16000_v28 }
0x1b85   :  { %13950 = vmatprep.subr.bf16.mxu1 %v15505_v43 }
0x1b88   :  { %13952 = vmatpush3.bf16.msra.mxu1 %v16012_v34 }
0x1b89   :  { %13953 = vmatprep.subr.bf16.mxu1 %v15505_v43 }
0x1b8c   :  { %13955 = vmatpush3.bf16.msra.mxu1 %v16024_v40 }
0x1b8d   :  { %13956 = vmatprep.subr.bf16.mxu1 %v15505_v43 }
0x1b90   :  { %13958 = vmatpush3.bf16.msra.mxu1 %v16034_v44 }
0x1b91   :  { %13959 = vmatprep.subr.bf16.mxu1 %v15505_v43 }
0x1b94   :  { %13961 = vmatpush3.bf16.msra.mxu1 %v16042_v47 }
0x1b95   :  { %13962 = vmatprep.subr.bf16.mxu1 %v15505_v43 }
0x1c2a   :  { %v3793_v39 = vpop.f32.mrb[46].mxu1 }
0x1c2b   :  { %v3794_v55 = vadd.f32 %v10410_v8, %v3793_v39  ;;  %v12087_v56 = vpop.f32.mrb[47].mxu1  ;;  %v13854_v8 = vpack.c.bf16 %v4006_v7, %v4004_v2  ;;  %v4003_v39 = vld [vmem:[#allocation7 + $0x60] sm:$0xff]  ;;  %v4032_v2 = vld [vmem:[#allocation7 + $0x148] sm:$0xff]  ;;  %v4034_v7 = vld [vmem:[#allocation7 + $0x158] sm:$0xff] }
0x1c2c   :  { %v4008_v56 = vld [vmem:[#allocation7 + $0x88] sm:$0xff] }
0x1c2d   :  { %v3878_v57 = vadd.f32 %v3875_v24, %v3794_v55  ;;  %v3999_v24 = vld [vmem:[#allocation7 + $0x40] sm:$0xff] }
0x1c2e   :  { %v13852_v51 = vpack.c.bf16 %v4001_v37, %v3999_v24  ;;  %v4027_v24 = vld [vmem:[#allocation7 + $0x120] sm:$0xff]  ;;  %v4029_v37 = vld [vmem:[#allocation7 + $0x130] sm:$0xff] }
0x1c2f   :  { %v10415_v62 = vmul.f32 -1.442695, %v3878_v57  ;;  %v4010_v57 = vld [vmem:[#allocation7 + $0x98] sm:$0xff] }
0x1c31   :  { %15082 = vpow2.f32 %v10415_v62 }
0x1c3b   :  { %v15083_v0 = vpop.eup %15082 }
0x1c3c   :  { %v3882_v63 = vadd.f32 1.0, %v15083_v0  ;;  %v13858_v0 = vpack.c.bf16 %v4010_v57, %v4008_v56  ;;  %v4036_v56 = vld [vmem:[#allocation7 + $0x168] sm:$0xff]  ;;  %v4038_v57 = vld [vmem:[#allocation7 + $0x178] sm:$0xff] }
0x1c3e   :  { %15084 = vrcp.f32 %v3882_v63  ;;  %v4007_v63 = vld [vmem:[#allocation7 + $0x80] sm:$0xff] }
0x1c48   :  { %v15085_v1 = vpop.eup %15084 }
0x1c49   :  { %v3889_v3 = vmul.f32 %v15085_v1, %v3887_v38  ;;  %v3896_v14 = vsub.f32 1.0, %v15085_v1  ;;  %v3902_v15 = vmul.f32 %v15085_v1, %v16491_v59  ;;  %v3992_v59 = vld [vmem:[#allocation7 + $0x8] sm:$0xff]  ;;  %v4009_v1 = vld [vmem:[#allocation7 + $0x90] sm:$0xff] }
0x1c4a   :  { %v4201_v29 = vpop.f32.mrb[48].mxu1  ;;  %v13842_v21 = vpack.c.bf16 %v3994_v20, %v3992_v59  ;;  %v4012_v38 = vld [vmem:[#allocation7 + $0xa8] sm:$0xff]  ;;  %v4022_v59 = vld [vmem:[#allocation7 + $0xf8] sm:$0xff] }
0x1c4b   :  { %v12136_v10 = vpop.f32.mrb[49].mxu1  ;;  %3891 = vrot.lane.b32.xlu0 %v3889_v3, %s18667_s0  ;;  %v4014_v3 = vld [vmem:[#allocation7 + $0xb8] sm:$0xff]  ;;  %s18712_s0 = smov 32  }
0x1c4c   :  { %v13862_v10 = vpack.c.bf16 %v4014_v3, %v4012_v38  ;;  %v4040_v38 = vld [vmem:[#allocation7 + $0x188] sm:$0xff]  ;;  %v4042_v3 = vld [vmem:[#allocation7 + $0x198] sm:$0xff] }
0x1cbd   :  { %v3892_v49 = vpop.permute.xlu0 %3891 }
0x1cbe   :  { %v3894_v45 = vadd.f32 %v3892_v49, %v3794_v55  ;;  %v4005_v55 = vld [vmem:[#allocation7 + $0x70] sm:$0xff]  ;;  %v4011_v49 = vld [vmem:[#allocation7 + $0xa0] sm:$0xff] }
0x1cbf   :  { %v13856_v62 = vpack.c.bf16 %v4005_v55, %v4003_v39  ;;  %v4031_v39 = vld [vmem:[#allocation7 + $0x140] sm:$0xff]  ;;  %v4033_v55 = vld [vmem:[#allocation7 + $0x150] sm:$0xff] }
0x1cc0   :  { %15086 = vtanh.f32 %v3894_v45  ;;  %v4013_v45 = vld [vmem:[#allocation7 + $0xb0] sm:$0xff] }
0x1cca   :  { %v15087_v11 = vpop.eup %15086 }
0x1ccb   :  { %3898 = vrot.lane.b32.xlu1 %v15087_v11, %s18665_s11  ;;  %v4016_v11 = vld [vmem:[#allocation7 + $0xc8] sm:$0xff] }
0x1d3d   :  { %v3899_v13 = vpop.permute.xlu1 %3898 }
0x1d3e   :  { %v3901_v16 = vmul.f32 %v3899_v13, %v3896_v14  ;;  %v4018_v14 = vld [vmem:[#allocation7 + $0xd8] sm:$0xff]  ;;  %v13864_v13 = vpack.c.bf16 %v4013_v45, %v4011_v49  ;;  %v4039_v49 = vld [vmem:[#allocation7 + $0x180] sm:$0xff]  ;;  %v4041_v45 = vld [vmem:[#allocation7 + $0x190] sm:$0xff] }
0x1d40   :  { %v16932_v18 = vadd.f32 %v3902_v15, %v3901_v16  ;;  %v13866_v15 = vpack.c.bf16 %v4018_v14, %v4016_v11  ;;  %v4015_v16 = vld [vmem:[#allocation7 + $0xc0] sm:$0xff]  ;;  %v4044_v11 = vld [vmem:[#allocation7 + $0x1a8] sm:$0xff]  ;;  %v4046_v14 = vld [vmem:[#allocation7 + $0x1b8] sm:$0xff] }
0x1d42   :  { %v3904_v4 = vmax.f32 %v16932_v18, 0.0 }
0x1d44   :  { %3915 = vrot.lane.b32.xlu0 %v3904_v4, %s18665_s11  ;;  %v4017_v4 = vld [vmem:[#allocation7 + $0xd0] sm:$0xff]  ;;  %s18713_s11 = smov 112  }
0x1d45   :  { %v13868_v20 = vpack.c.bf16 %v4017_v4, %v4015_v16  ;;  %v4043_v16 = vld [vmem:[#allocation7 + $0x1a0] sm:$0xff]  ;;  %v4045_v4 = vld [vmem:[#allocation7 + $0x1b0] sm:$0xff] }
0x1db6   :  { %v3916_v19 = vpop.permute.xlu0 %3915 }
0x1db7   :  { %12100 = vmatmul.mubr.msk.f32.vlgmr.msra.gmra.mrb[40].mxu0 %vm267_vm0, %v3916_v19  ;;  %v4020_v19 = vld [vmem:[#allocation7 + $0xe8] sm:$0xff] }
0x1db8   :  { %13820 = vmatpush3.bf16.msra.mxu0 %v15964_v9  ;;  %12169 = vmatprep.mubr.msk.f32.mxu0 %vm15507_vm3, %v15504_v42 }
0x1db9   :  { %13821 = vmatprep.subr.bf16.mxu0 %v15505_v43 }
0x1dbc   :  { %13823 = vmatpush3.bf16.msra.mxu0 %v15976_v17 }
0x1dbd   :  { %13824 = vmatprep.subr.bf16.mxu0 %v15505_v43 }
0x1dc0   :  { %13826 = vmatpush3.bf16.msra.mxu0 %v15988_v22 }
0x1dc1   :  { %13827 = vmatprep.subr.bf16.mxu0 %v15505_v43 }
0x1dc4   :  { %13829 = vmatpush3.bf16.msra.mxu0 %v16000_v28 }
0x1dc5   :  { %13830 = vmatprep.subr.bf16.mxu0 %v15505_v43 }
0x1dc8   :  { %13832 = vmatpush3.bf16.msra.mxu0 %v16012_v34 }
0x1dc9   :  { %13833 = vmatprep.subr.bf16.mxu0 %v15505_v43 }
0x1dcc   :  { %13835 = vmatpush3.bf16.msra.mxu0 %v16024_v40 }
0x1dcd   :  { %13836 = vmatprep.subr.bf16.mxu0 %v15505_v43 }
0x1dd0   :  { %13838 = vmatpush3.bf16.msra.mxu0 %v16034_v44 }
0x1dd1   :  { %13839 = vmatprep.subr.bf16.mxu0 %v15505_v43 }
0x1dd4   :  { %13841 = vmatpush3.bf16.msra.mxu0 %v16042_v47 }
0x1dd5   :  { %13843 = vmatprep.subr.bf16.mxu0 %v13842_v21  ;;  %v13870_v21 = vpack.c.bf16 %v4022_v59, %v4020_v19  ;;  %v4048_v19 = vld [vmem:[#allocation7 + $0x1c8] sm:$0xff]  ;;  %v4050_v59 = vld [vmem:[#allocation7 + $0x1d8] sm:$0xff] }
0x1dd7   :  { %12170 = vmatmul.mubr.f32.vlgmr.msra.gmra.mrb[42].mxu0 %v4201_v29 }
0x1dd8   :  { %13845 = vmatpush1.bf16.msra.mxu0 %v13844_v26  ;;  %4341 = vmatprep.mubr.f32.mxu0 %v4201_v29  ;;  %v13860_v29 = vpack.c.bf16 %v4009_v1, %v4007_v63  ;;  %v13872_v26 = vpack.c.bf16 %v4021_v12, %v4019_v23  ;;  %v4035_v63 = vld [vmem:[#allocation7 + $0x160] sm:$0xff]  ;;  %v4037_v1 = vld [vmem:[#allocation7 + $0x170] sm:$0xff] }
0x1dd9   :  { %13847 = vmatprep.subr.bf16.mxu0 %v13846_v27  ;;  %v13874_v27 = vpack.c.bf16 %v4026_v25, %v4024_v5  ;;  %v4047_v23 = vld [vmem:[#allocation7 + $0x1c0] sm:$0xff]  ;;  %v4049_v12 = vld [vmem:[#allocation7 + $0x1d0] sm:$0xff]  ;;  %v4052_v5 = vld [vmem:[#allocation7 + $0x1e8] sm:$0xff] }
0x1dda   :  { %v4054_v25 = vld [vmem:[#allocation7 + $0x1f8] sm:$0xff] }
0x1ddc   :  { %13849 = vmatpush1.bf16.msra.mxu0 %v13848_v35  ;;  %v13876_v35 = vpack.c.bf16 %v4025_v6, %v4023_v30  ;;  %v4051_v30 = vld [vmem:[#allocation7 + $0x1e0] sm:$0xff]  ;;  %v4053_v6 = vld [vmem:[#allocation7 + $0x1f0] sm:$0xff] }
0x1ddd   :  { %13851 = vmatprep.subr.bf16.mxu0 %v13850_v36  ;;  %v13878_v36 = vpack.c.bf16 %v4030_v33, %v4028_v32  ;;  %v4056_v32 = vld [vmem:[#allocation7 + $0x208] sm:$0xff]  ;;  %v4058_v33 = vld [vmem:[#allocation7 + $0x218] sm:$0xff] }
0x1de0   :  { %13853 = vmatpush1.bf16.msra.mxu0 %v13852_v51  ;;  %v13880_v51 = vpack.c.bf16 %v4029_v37, %v4027_v24  ;;  %v4055_v24 = vld [vmem:[#allocation7 + $0x200] sm:$0xff]  ;;  %v4057_v37 = vld [vmem:[#allocation7 + $0x210] sm:$0xff] }
0x1de1   :  { %13855 = vmatprep.subr.bf16.mxu0 %v13854_v8  ;;  %v13882_v8 = vpack.c.bf16 %v4034_v7, %v4032_v2  ;;  %v4060_v2 = vld [vmem:[#allocation7 + $0x228] sm:$0xff]  ;;  %v4062_v7 = vld [vmem:[#allocation7 + $0x238] sm:$0xff] }
0x1de4   :  { %13857 = vmatpush1.bf16.msra.mxu0 %v13856_v62  ;;  %v13884_v62 = vpack.c.bf16 %v4033_v55, %v4031_v39  ;;  %v4059_v39 = vld [vmem:[#allocation7 + $0x220] sm:$0xff]  ;;  %v4061_v55 = vld [vmem:[#allocation7 + $0x230] sm:$0xff] }
0x1de5   :  { %13859 = vmatprep.subr.bf16.mxu0 %v13858_v0  ;;  %v13886_v0 = vpack.c.bf16 %v4038_v57, %v4036_v56  ;;  %v4064_v56 = vld [vmem:[#allocation7 + $0x248] sm:$0xff]  ;;  %v4066_v57 = vld [vmem:[#allocation7 + $0x258] sm:$0xff] }
0x1de8   :  { %13861 = vmatpush1.bf16.msra.mxu0 %v13860_v29  ;;  %v13888_v29 = vpack.c.bf16 %v4037_v1, %v4035_v63  ;;  %v4063_v63 = vld [vmem:[#allocation7 + $0x240] sm:$0xff]  ;;  %v4065_v1 = vld [vmem:[#allocation7 + $0x250] sm:$0xff] }
0x1de9   :  { %13863 = vmatprep.subr.bf16.mxu0 %v13862_v10  ;;  %v13890_v10 = vpack.c.bf16 %v4042_v3, %v4040_v38  ;;  %v4068_v38 = vld [vmem:[#allocation7 + $0x268] sm:$0xff]  ;;  %v4070_v3 = vld [vmem:[#allocation7 + $0x278] sm:$0xff] }
0x1dec   :  { %13865 = vmatpush1.bf16.msra.mxu0 %v13864_v13  ;;  %v13892_v13 = vpack.c.bf16 %v4041_v45, %v4039_v49  ;;  %v4067_v49 = vld [vmem:[#allocation7 + $0x260] sm:$0xff]  ;;  %v4069_v45 = vld [vmem:[#allocation7 + $0x270] sm:$0xff] }
0x1ded   :  { %13867 = vmatprep.subr.bf16.mxu0 %v13866_v15  ;;  %v13894_v15 = vpack.c.bf16 %v4046_v14, %v4044_v11  ;;  %v4072_v11 = vld [vmem:[#allocation7 + $0x288] sm:$0xff]  ;;  %v4074_v14 = vld [vmem:[#allocation7 + $0x298] sm:$0xff] }
0x1df0   :  { %13869 = vmatpush1.bf16.msra.mxu0 %v13868_v20  ;;  %v13896_v20 = vpack.c.bf16 %v4045_v4, %v4043_v16  ;;  %v4071_v16 = vld [vmem:[#allocation7 + $0x280] sm:$0xff]  ;;  %v4073_v4 = vld [vmem:[#allocation7 + $0x290] sm:$0xff] }
0x1df1   :  { %13871 = vmatprep.subr.bf16.mxu0 %v13870_v21  ;;  %v13898_v21 = vpack.c.bf16 %v4050_v59, %v4048_v19  ;;  %v4076_v19 = vld [vmem:[#allocation7 + $0x2a8] sm:$0xff]  ;;  %v4078_v59 = vld [vmem:[#allocation7 + $0x2b8] sm:$0xff] }
0x1df4   :  { %13873 = vmatpush1.bf16.msra.mxu0 %v13872_v26  ;;  %v13900_v26 = vpack.c.bf16 %v4049_v12, %v4047_v23  ;;  %v4075_v23 = vld [vmem:[#allocation7 + $0x2a0] sm:$0xff]  ;;  %v4077_v12 = vld [vmem:[#allocation7 + $0x2b0] sm:$0xff] }
0x1df5   :  { %13875 = vmatprep.subr.bf16.mxu0 %v13874_v27  ;;  %v13902_v27 = vpack.c.bf16 %v4054_v25, %v4052_v5  ;;  %v4080_v5 = vld [vmem:[#allocation7 + $0x2c8] sm:$0xff]  ;;  %v4082_v25 = vld [vmem:[#allocation7 + $0x2d8] sm:$0xff] }
0x1df8   :  { %13877 = vmatpush1.bf16.msra.mxu0 %v13876_v35  ;;  %v13904_v35 = vpack.c.bf16 %v4053_v6, %v4051_v30  ;;  %v4079_v30 = vld [vmem:[#allocation7 + $0x2c0] sm:$0xff]  ;;  %v4081_v6 = vld [vmem:[#allocation7 + $0x2d0] sm:$0xff] }
0x1df9   :  { %13879 = vmatprep.subr.bf16.mxu0 %v13878_v36  ;;  %v13906_v36 = vpack.c.bf16 %v4058_v33, %v4056_v32  ;;  %v4084_v32 = vld [vmem:[#allocation7 + $0x2e8] sm:$0xff]  ;;  %v4086_v33 = vld [vmem:[#allocation7 + $0x2f8] sm:$0xff] }
0x1dfc   :  { %13881 = vmatpush1.bf16.msra.mxu0 %v13880_v51  ;;  %v13908_v51 = vpack.c.bf16 %v4057_v37, %v4055_v24  ;;  %v4083_v24 = vld [vmem:[#allocation7 + $0x2e0] sm:$0xff]  ;;  %v4085_v37 = vld [vmem:[#allocation7 + $0x2f0] sm:$0xff] }
0x1dfd   :  { %13883 = vmatprep.subr.bf16.mxu0 %v13882_v8  ;;  %v13910_v8 = vpack.c.bf16 %v4062_v7, %v4060_v2  ;;  %v13936_v2 = vpack.c.bf16 %v4085_v37, %v4083_v24  ;;  %v10416_v7 = vld [vmem:[%s18708_s27] ss:$0 sm:$0xff]  ;;  %v4093_v24 = vld [vmem:[%s18699_s2 + $0x30] sm:$0xff]  ;;  %v4094_v37 = vld [vmem:[%s18699_s2 + $0x38] sm:$0xff] }
0x1e00   :  { %13885 = vmatpush1.bf16.msra.mxu0 %v13884_v62  ;;  %v13912_v62 = vpack.c.bf16 %v4061_v55, %v4059_v39 }
0x1e01   :  { %13887 = vmatprep.subr.bf16.mxu0 %v13886_v0  ;;  %v13914_v0 = vpack.c.bf16 %v4066_v57, %v4064_v56 }
0x1e04   :  { %13889 = vmatpush1.bf16.msra.mxu0 %v13888_v29  ;;  %v13916_v29 = vpack.c.bf16 %v4065_v1, %v4063_v63 }
0x1e05   :  { %13891 = vmatprep.subr.bf16.mxu0 %v13890_v10  ;;  %v13918_v10 = vpack.c.bf16 %v4070_v3, %v4068_v38 }
0x1e08   :  { %13893 = vmatpush1.bf16.msra.mxu0 %v13892_v13  ;;  %v13920_v13 = vpack.c.bf16 %v4069_v45, %v4067_v49  ;;  %v4103_v45 = vld [vmem:[%s18699_s2 + $0x80] sm:$0xff] }
0x1e09   :  { %13895 = vmatprep.subr.bf16.mxu0 %v13894_v15  ;;  %v13922_v15 = vpack.c.bf16 %v4074_v14, %v4072_v11  ;;  %v4104_v11 = vld [vmem:[%s18699_s2 + $0x88] sm:$0xff] }
0x1e0a   :  { %v13986_v14 = vpack.c.bf16 %v4104_v11, %v4103_v45 }
0x1e0c   :  { %13897 = vmatpush1.bf16.msra.mxu0 %v13896_v20  ;;  %v13924_v20 = vpack.c.bf16 %v4073_v4, %v4071_v16  ;;  %v4105_v16 = vld [vmem:[%s18699_s2 + $0x90] sm:$0xff]  ;;  %v4106_v4 = vld [vmem:[%s18699_s2 + $0x98] sm:$0xff] }
0x1e0d   :  { %13899 = vmatprep.subr.bf16.mxu0 %v13898_v21  ;;  %v13926_v21 = vpack.c.bf16 %v4078_v59, %v4076_v19  ;;  %v13990_v59 = vpack.c.bf16 %v4106_v4, %v4105_v16  ;;  %v4118_v16 = vld [vmem:[%s18699_s2 + $0xf8] sm:$0xff] }
0x1e10   :  { %13901 = vmatpush1.bf16.msra.mxu0 %v13900_v26  ;;  %v13928_v26 = vpack.c.bf16 %v4077_v12, %v4075_v23  ;;  %v4107_v12 = vld [vmem:[%s18699_s2 + $0xa0] sm:$0xff] }
0x1e11   :  { %13903 = vmatprep.subr.bf16.mxu0 %v13902_v27  ;;  %v13930_v27 = vpack.c.bf16 %v4082_v25, %v4080_v5  ;;  %v4108_v5 = vld [vmem:[%s18699_s2 + $0xa8] sm:$0xff] }
0x1e14   :  { %13905 = vmatpush1.bf16.msra.mxu0 %v13904_v35  ;;  %v13932_v35 = vpack.c.bf16 %v4081_v6, %v4079_v30  ;;  %v4091_v30 = vld [vmem:[%s18699_s2 + $0x20] sm:$0xff]  ;;  %v4092_v6 = vld [vmem:[%s18699_s2 + $0x28] sm:$0xff] }
0x1e15   :  { %13907 = vmatprep.subr.bf16.mxu0 %v13906_v36  ;;  %v13934_v36 = vpack.c.bf16 %v4086_v33, %v4084_v32  ;;  %v4109_v32 = vld [vmem:[%s18699_s2 + $0xb0] sm:$0xff]  ;;  %v4110_v33 = vld [vmem:[%s18699_s2 + $0xb8] sm:$0xff] }
0x1e17   :  { %4342 = vmatmul.mubr.f32.vlgmr.msra.gmra.mrb[10].mxu0 %v16803_v53 }
0x1e18   :  { %13909 = vmatpush1.bf16.msra.mxu0 %v13908_v51  ;;  %4412 = vmatprep.mubr.f32.mxu0 %v15504_v42 }
0x1e19   :  { %13911 = vmatprep.subr.bf16.mxu0 %v13910_v8 }
0x1e1c   :  { %13913 = vmatpush1.bf16.msra.mxu0 %v13912_v62 }
0x1e1d   :  { %13915 = vmatprep.subr.bf16.mxu0 %v13914_v0 }
0x1e20   :  { %13917 = vmatpush1.bf16.msra.mxu0 %v13916_v29 }
0x1e21   :  { %13919 = vmatprep.subr.bf16.mxu0 %v13918_v10 }
0x1e24   :  { %13921 = vmatpush1.bf16.msra.mxu0 %v13920_v13  ;;  %v4087_v13 = vld [vmem:[%s18699_s2] sm:$0xff] }
0x1e25   :  { %13923 = vmatprep.subr.bf16.mxu0 %v13922_v15  ;;  %v4088_v15 = vld [vmem:[%s18699_s2 + $0x8] sm:$0xff] }
0x1e26   :  { %v13988_v19 = vpack.c.bf16 %v4088_v15, %v4087_v13  ;;  %v4100_v13 = vld [vmem:[%s18699_s2 + $0x68] sm:$0xff]  ;;  %v4117_v15 = vld [vmem:[%s18699_s2 + $0xf0] sm:$0xff] }
0x1e28   :  { %13925 = vmatpush1.bf16.msra.mxu0 %v13924_v20  ;;  %v4089_v20 = vld [vmem:[%s18699_s2 + $0x10] sm:$0xff] }
0x1e29   :  { %13927 = vmatprep.subr.bf16.mxu0 %v13926_v21  ;;  %v4090_v21 = vld [vmem:[%s18699_s2 + $0x18] sm:$0xff] }
0x1e2c   :  { %13929 = vmatpush1.bf16.msra.mxu0 %v13928_v26  ;;  %v13992_v26 = vpack.c.bf16 %v4090_v21, %v4089_v20  ;;  %v4102_v20 = vld [vmem:[%s18699_s2 + $0x78] sm:$0xff] }
0x1e2d   :  { %13931 = vmatprep.subr.bf16.mxu0 %v13930_v27  ;;  %v13994_v27 = vpack.c.bf16 %v4108_v5, %v4107_v12  ;;  %v4120_v12 = vld [vmem:[%s18699_s2 + $0x108] sm:$0xff] }
0x1e30   :  { %13933 = vmatpush1.bf16.msra.mxu0 %v13932_v35  ;;  %v13996_v35 = vpack.c.bf16 %v4092_v6, %v4091_v30  ;;  %v4123_v30 = vld [vmem:[%s18699_s2 + $0x120] sm:$0xff]  ;;  %v4124_v6 = vld [vmem:[%s18699_s2 + $0x128] sm:$0xff] }
0x1e31   :  { %13935 = vmatprep.subr.bf16.mxu0 %v13934_v36  ;;  %v13998_v36 = vpack.c.bf16 %v4110_v33, %v4109_v32  ;;  %v14025_v32 = vpack.c.bf16 %v4124_v6, %v4123_v30  ;;  %v4125_v33 = vld [vmem:[%s18699_s2 + $0x130] sm:$0xff]  ;;  %v4733_v6 = vld [vmem:[%s18627_s13 + $0x58] sm:$0xff] }
0x1e32   :  { %v4732_v30 = vld [vmem:[%s18627_s13 + $0x50] sm:$0xff] }
0x1e34   :  { %13937 = vmatpush1.bf16.msra.mxu0 %v13936_v2  ;;  %v4111_v2 = vld [vmem:[%s18699_s2 + $0xc0] sm:$0xff] }
0x1e35   :  { %14042 = vmatprep.subr.bf16.mxu0 %v15505_v43 }
0x1e8a   :  { %v3985_v51 = vpop.f32.mrb[40].mxu0 }
0x1e8b   :  { %v16960_v8 = vadd.f32 %v10416_v7, %v3985_v51  ;;  %v12101_v39 = vpop.f32.mrb[41].mxu0  ;;  %v4112_v7 = vld [vmem:[%s18699_s2 + $0xc8] sm:$0xff]  ;;  %v14000_v51 = vpack.c.bf16 %v4094_v37, %v4093_v24  ;;  %v4127_v24 = vld [vmem:[%s18699_s2 + $0x140] sm:$0xff] }
0x1e8c   :  { %v14002_v39 = vpack.c.bf16 %v4112_v7, %v4111_v2  ;;  %v4128_v37 = vld [vmem:[%s18699_s2 + $0x148] sm:$0xff]  ;;  %v4129_v7 = vld [vmem:[%s18699_s2 + $0x150] sm:$0xff] }
0x1e8d   :  { %10418 = vst.msk [vmem:[%s18709_s26 + $0x4] sm:$0xf] %vm2403_vm1, %v16960_v8  ;;  %v14031_v2 = vpack.c.bf16 %v4128_v37, %v4127_v24  ;;  %v4736_v24 = vld [vmem:[%s18627_s13 + $0x70] sm:$0xff]  ;;  %v4737_v37 = vld [vmem:[%s18627_s13 + $0x78] sm:$0xff] }
0x1eaa   :  { %v4271_v55 = vpop.f32.mrb[42].mxu0 }
0x1eab   :  { %v4275_v56 = vmul.f32 2.0, %v4271_v55  ;;  %v12171_v57 = vpop.f32.mrb[43].mxu0  ;;  %v4095_v55 = vld [vmem:[%s18699_s2 + $0x40] sm:$0xff] }
0x1eac   :  { %v4113_v57 = vld [vmem:[%s18699_s2 + $0xd0] sm:$0xff] }
0x1ead   :  { %v4276_v62 = vsub.f32 %v4275_v56, %v16803_v53  ;;  %v4096_v56 = vld [vmem:[%s18699_s2 + $0x48] sm:$0xff] }
0x1eaf   :  { %4413 = vmatmul.mubr.f32.vlgmr.msra.gmra.mrb[10].mxu0 %v4276_v62  ;;  %v4114_v62 = vld [vmem:[%s18699_s2 + $0xd8] sm:$0xff] }
0x1eb0   :  { %12309 = vmatprep.mubr.msk.f32.mxu0 %vm15507_vm3, %v15504_v42 }
0x1f82   :  { %v4414_v0 = vpop.f32.mrb[10].mxu0 }
0x1f83   :  { %v14974_v63 = vadd.f32 %v4414_v0, %v16104_v61  ;;  %v16971_v1 = vpop.f32.mrb[11].mxu0  ;;  %v14004_v0 = vpack.c.bf16 %v4096_v56, %v4095_v55  ;;  %v4131_v55 = vld [vmem:[%s18699_s2 + $0x160] sm:$0xff]  ;;  %v4132_v56 = vld [vmem:[%s18699_s2 + $0x168] sm:$0xff] }
0x1f85   :  { %v10419_v38 = vmul.f32 -1.442695, %v14974_v63  ;;  %v14006_v63 = vpack.c.bf16 %v4114_v62, %v4113_v57  ;;  %v14037_v57 = vpack.c.bf16 %v4132_v56, %v4131_v55  ;;  %v4133_v62 = vld [vmem:[%s18699_s2 + $0x170] sm:$0xff] }
0x1f87   :  { %15088 = vpow2.f32 %v10419_v38  ;;  %v4097_v38 = vld [vmem:[%s18699_s2 + $0x50] sm:$0xff] }
0x1f91   :  { %v15089_v3 = vpop.eup %15088 }
0x1f92   :  { %v4427_v29 = vadd.f32 1.0, %v15089_v3  ;;  %v4098_v3 = vld [vmem:[%s18699_s2 + $0x58] sm:$0xff] }
0x1f93   :  { %v14008_v45 = vpack.c.bf16 %v4098_v3, %v4097_v38  ;;  %v4722_v38 = vld [vmem:[%s18627_s13] sm:$0xff]  ;;  %v4723_v3 = vld [vmem:[%s18627_s13 + $0x8] sm:$0xff] }
0x1f94   :  { %15090 = vrcp.f32 %v4427_v29  ;;  %v4115_v29 = vld [vmem:[%s18699_s2 + $0xe0] sm:$0xff] }
0x1f9e   :  { %v15091_v10 = vpop.eup %15090 }
0x1f9f   :  { %v16974_v49 = vmul.f32 %v15091_v10, %v16803_v53  ;;  %v4116_v10 = vld [vmem:[%s18699_s2 + $0xe8] sm:$0xff] }
0x1fa0   :  { %v14010_v11 = vpack.c.bf16 %v4116_v10, %v4115_v29  ;;  %v4724_v29 = vld [vmem:[%s18627_s13 + $0x10] sm:$0xff]  ;;  %v14043_v10 = vpack.c.bf16 %v4723_v3, %v4722_v38 }
0x1fa1   :  { %12205 = vmatmul.mubr.f32.vlgmr.msra.gmra.mrb[50].mxu1 %v16974_v49 }
0x1fa2   :  { %13964 = vmatpush3.bf16.msra.mxu1 %v15964_v9  ;;  %12239 = vmatprep.mubr.msk.f32.mxu1 %vm15507_vm3, %v15504_v42 }
0x1fa3   :  { %13965 = vmatprep.subr.bf16.mxu1 %v15505_v43  ;;  %14044 = vmatpush3.bf16.msra.mxu0 %v14043_v10  ;;  %v4830_v10 = vld [vmem:[%s18630_s16] sm:$0xff] }
0x1fa4   :  { %14045 = vmatprep.subr.bf16.mxu0 %v15505_v43 }
0x1fa6   :  { %13967 = vmatpush3.bf16.msra.mxu1 %v15976_v17 }
0x1fa7   :  { %13968 = vmatprep.subr.bf16.mxu1 %v15505_v43 }
0x1faa   :  { %13970 = vmatpush3.bf16.msra.mxu1 %v15988_v22 }
0x1fab   :  { %13971 = vmatprep.subr.bf16.mxu1 %v15505_v43 }
0x1fae   :  { %13973 = vmatpush3.bf16.msra.mxu1 %v16000_v28 }
0x1faf   :  { %13974 = vmatprep.subr.bf16.mxu1 %v15505_v43 }
0x1fb2   :  { %13976 = vmatpush3.bf16.msra.mxu1 %v16012_v34 }
0x1fb3   :  { %13977 = vmatprep.subr.bf16.mxu1 %v15505_v43 }
0x1fb6   :  { %13979 = vmatpush3.bf16.msra.mxu1 %v16024_v40 }
0x1fb7   :  { %13980 = vmatprep.subr.bf16.mxu1 %v15505_v43 }
0x1fba   :  { %13982 = vmatpush3.bf16.msra.mxu1 %v16034_v44 }
0x1fbb   :  { %13983 = vmatprep.subr.bf16.mxu1 %v15505_v43 }
0x1fbe   :  { %13985 = vmatpush3.bf16.msra.mxu1 %v16042_v47 }
0x1fbf   :  { %13987 = vmatprep.subr.bf16.mxu1 %v13986_v14  ;;  %v4099_v14 = vld [vmem:[%s18699_s2 + $0x60] sm:$0xff] }
0x1fc0   :  { %v14012_v4 = vpack.c.bf16 %v4100_v13, %v4099_v14  ;;  %v4726_v14 = vld [vmem:[%s18627_s13 + $0x20] sm:$0xff]  ;;  %v4727_v13 = vld [vmem:[%s18627_s13 + $0x28] sm:$0xff] }
0x2074   :  { %v4500_v23 = vpop.f32.mrb[50].mxu1 }
0x2075   :  { %v12206_v25 = vpop.f32.mrb[51].mxu1  ;;  %12240 = vmatmul.mubr.f32.vlgmr.msra.gmra.mrb[52].mxu1 %v4500_v23 }
0x2076   :  { %13989 = vmatpush3.bf16.msra.mxu1 %v13988_v19  ;;  %4640 = vmatprep.mubr.f32.mxu1 %v4500_v23  ;;  %v14014_v19 = vpack.c.bf16 %v4118_v16, %v4117_v15  ;;  %v4119_v23 = vld [vmem:[%s18699_s2 + $0x100] sm:$0xff]  ;;  %v4121_v25 = vld [vmem:[%s18699_s2 + $0x110] sm:$0xff]  ;;  %v14049_v15 = vpack.c.bf16 %v4727_v13, %v4726_v14 }
0x2077   :  { %13991 = vmatprep.subr.bf16.mxu1 %v13990_v59  ;;  %v4101_v59 = vld [vmem:[%s18699_s2 + $0x70] sm:$0xff]  ;;  %v14019_v5 = vpack.c.bf16 %v4120_v12, %v4119_v23 }
0x2078   :  { %v14016_v21 = vpack.c.bf16 %v4102_v20, %v4101_v59  ;;  %v4728_v12 = vld [vmem:[%s18627_s13 + $0x30] sm:$0xff] }
0x207a   :  { %13993 = vmatpush3.bf16.msra.mxu1 %v13992_v26  ;;  %v4122_v26 = vld [vmem:[%s18699_s2 + $0x118] sm:$0xff] }
0x207b   :  { %13995 = vmatprep.subr.bf16.mxu1 %v13994_v27  ;;  %v14022_v27 = vpack.c.bf16 %v4122_v26, %v4121_v25  ;;  %v4731_v26 = vld [vmem:[%s18627_s13 + $0x48] sm:$0xff] }
0x207e   :  { %13997 = vmatpush3.bf16.msra.mxu1 %v13996_v35  ;;  %v4126_v35 = vld [vmem:[%s18699_s2 + $0x138] sm:$0xff] }
0x207f   :  { %13999 = vmatprep.subr.bf16.mxu1 %v13998_v36  ;;  %v14028_v36 = vpack.c.bf16 %v4126_v35, %v4125_v33  ;;  %v4734_v33 = vld [vmem:[%s18627_s13 + $0x60] sm:$0xff]  ;;  %v4735_v35 = vld [vmem:[%s18627_s13 + $0x68] sm:$0xff] }
0x2082   :  { %14001 = vmatpush3.bf16.msra.mxu1 %v14000_v51  ;;  %v4130_v51 = vld [vmem:[%s18699_s2 + $0x158] sm:$0xff] }
0x2083   :  { %14003 = vmatprep.subr.bf16.mxu1 %v14002_v39  ;;  %v14034_v39 = vpack.c.bf16 %v4130_v51, %v4129_v7  ;;  %v4815_v7 = vld [vmem:[%s18700_s14 + $0x10] sm:$0xff] }
0x2084   :  { %v4816_v51 = vld [vmem:[%s18701_s3 + $0x10] sm:$0xff]  ;;  %4818 = vrot.lane.b32.xlu1 %v4815_v7, %s18673_s10 }
0x2085   :  { %4822 = vrot.lane.b32.xlu0 %v4816_v51, %s18671_s6  ;;  %s18717_s6 = sld [smem:[#allocation42_spill]] }
0x2086   :  { %14005 = vmatpush3.bf16.msra.mxu1 %v14004_v0  ;;  %v4134_v0 = vld [vmem:[%s18699_s2 + $0x178] sm:$0xff] }
0x2087   :  { %14007 = vmatprep.subr.bf16.mxu1 %v14006_v63  ;;  %v14040_v63 = vpack.c.bf16 %v4134_v0, %v4133_v62 }
0x208a   :  { %14009 = vmatpush3.bf16.msra.mxu1 %v14008_v45  ;;  %v4725_v45 = vld [vmem:[%s18627_s13 + $0x18] sm:$0xff] }
0x208b   :  { %14011 = vmatprep.subr.bf16.mxu1 %v14010_v11  ;;  %v14046_v11 = vpack.c.bf16 %v4725_v45, %v4724_v29 }
0x208d   :  { %14047 = vmatpush3.bf16.msra.mxu0 %v14046_v11 }
0x208e   :  { %14013 = vmatpush3.bf16.msra.mxu1 %v14012_v4  ;;  %14048 = vmatprep.subr.bf16.mxu0 %v15505_v43 }
0x208f   :  { %14015 = vmatprep.subr.bf16.mxu1 %v14014_v19 }
0x2091   :  { %14050 = vmatpush3.bf16.msra.mxu0 %v14049_v15 }
0x2092   :  { %14017 = vmatpush3.bf16.msra.mxu1 %v14016_v21  ;;  %14051 = vmatprep.subr.bf16.mxu0 %v15505_v43 }
0x2093   :  { %14018 = vmatprep.subr.bf16.mxu1 %v15505_v43 }
0x2095   :  { %4641 = vmatmul.mubr.f32.vlgmr.msra.gmra.mrb[54].mxu1 %v16974_v49 }
0x2096   :  { %14020 = vmatpush3.bf16.msra.mxu1 %v14019_v5  ;;  %12274 = vmatprep.mubr.msk.f32.mxu1 %vm15507_vm3, %v15504_v42  ;;  %v4729_v5 = vld [vmem:[%s18627_s13 + $0x38] sm:$0xff] }
0x2097   :  { %14021 = vmatprep.subr.bf16.mxu1 %v15505_v43  ;;  %v14052_v25 = vpack.c.bf16 %v4729_v5, %v4728_v12  ;;  %v10425_v12 = vld [vmem:[%s18632_s18] ss:$0 sm:$0xff] }
0x2099   :  { %14053 = vmatpush3.bf16.msra.mxu0 %v14052_v25 }
0x209a   :  { %14023 = vmatpush3.bf16.msra.mxu1 %v14022_v27  ;;  %14054 = vmatprep.subr.bf16.mxu0 %v15505_v43 }
0x209b   :  { %14024 = vmatprep.subr.bf16.mxu1 %v15505_v43 }
0x209e   :  { %14026 = vmatpush3.bf16.msra.mxu1 %v14025_v32  ;;  %v14058_v32 = vpack.c.bf16 %v4733_v6, %v4732_v30  ;;  %v10422_v30 = vld [vmem:[#allocation13] ss:$0 sm:$0xff] }
0x209f   :  { %14027 = vmatprep.subr.bf16.mxu1 %v15505_v43 }
0x20a2   :  { %14029 = vmatpush3.bf16.msra.mxu1 %v14028_v36  ;;  %v14061_v36 = vpack.c.bf16 %v4735_v35, %v4734_v33 }
0x20a3   :  { %14030 = vmatprep.subr.bf16.mxu1 %v15505_v43 }
0x20a6   :  { %14032 = vmatpush3.bf16.msra.mxu1 %v14031_v2  ;;  %v14064_v2 = vpack.c.bf16 %v4737_v37, %v4736_v24 }
0x20a7   :  { %14033 = vmatprep.subr.bf16.mxu1 %v15505_v43 }
0x20aa   :  { %14035 = vmatpush3.bf16.msra.mxu1 %v14034_v39  ;;  %v14975_v39 = vadd.f32 %v16971_v1, %v16354_v41  ;;  %v4831_v1 = vld [vmem:[%s18630_s16 + $0x8] sm:$0xff] }
0x20ab   :  { %14036 = vmatprep.subr.bf16.mxu1 %v15505_v43  ;;  %v14070_v13 = vpack.c.bf16 %v4831_v1, %v4830_v10 }
0x20ac   :  { %v10420_v55 = vmul.f32 -1.442695, %v14975_v39 }
0x20ae   :  { %14038 = vmatpush3.bf16.msra.mxu1 %v14037_v57  ;;  %15092 = vpow2.f32 %v10420_v55 }
0x20af   :  { %14039 = vmatprep.subr.bf16.mxu1 %v15505_v43 }
0x20b2   :  { %14041 = vmatpush3.bf16.msra.mxu1 %v14040_v63 }
0x20b3   :  { %14066 = vmatprep.subr.bf16.mxu1 %v15505_v43 }
0x20b8   :  { %v15093_v56 = vpop.eup %15092 }
0x20b9   :  { %v4428_v57 = vadd.f32 1.0, %v15093_v56 }
0x20bb   :  { %15094 = vrcp.f32 %v4428_v57  ;;  %v10433_v57 = vld [vmem:[%s18703_s1 + $0x8] sm:$0xf] }
0x20c5   :  { %v15095_v3 = vpop.eup %15094 }
0x20c6   :  { %v4719_v29 = vsub.f32 1.0, %v15095_v3  ;;  %v4718_v11 = vmul.f32 %v15095_v3, %v16803_v53  ;;  %v4828_v53 = vld [vmem:[#allocation12 + $0x8] sm:$0xff]  ;;  %v5094_v3 = vld [vmem:[#allocation15] sm:$0xff] }
0x2148   :  { %v4570_v16 = vpop.f32.mrb[52].mxu1 }
0x2149   :  { %v4574_v4 = vmul.f32 2.0, %v4570_v16  ;;  %v12241_v19 = vpop.f32.mrb[53].mxu1 }
0x214a   :  { %v10421_v19 = vld [vmem:[#allocation10] ss:$0 sm:$0xff] }
0x214b   :  { %v4575_v59 = vsub.f32 %v4574_v4, %v16974_v49  ;;  %v4730_v49 = vld [vmem:[%s18627_s13 + $0x40] sm:$0xff]  ;;  %v4829_v4 = vld [vmem:[#allocation12 + $0x10] sm:$0xf] }
0x214c   :  { %v14055_v27 = vpack.c.bf16 %v4731_v26, %v4730_v49 }
0x214d   :  { %12275 = vmatmul.mubr.f32.vlgmr.msra.gmra.mrb[56].mxu1 %v4575_v59 }
0x214e   :  { %12318 = vmatprep.mubr.msk.f32.mxu1 %vm15507_vm3, %v15504_v42  ;;  %14056 = vmatpush3.bf16.msra.mxu0 %v14055_v27 }
0x214f   :  { %14057 = vmatprep.subr.bf16.mxu0 %v15505_v43 }
0x2152   :  { %14059 = vmatpush3.bf16.msra.mxu0 %v14058_v32 }
0x2153   :  { %14060 = vmatprep.subr.bf16.mxu0 %v15505_v43 }
0x2156   :  { %14062 = vmatpush3.bf16.msra.mxu0 %v14061_v36 }
0x2157   :  { %14063 = vmatprep.subr.bf16.mxu0 %v15505_v43 }
0x215a   :  { %14065 = vmatpush3.bf16.msra.mxu0 %v14064_v2 }
0x215b   :  { %14069 = vmatprep.subr.bf16.mxu0 %v15505_v43 }
0x2168   :  { %v10971_v20 = vpop.f32.mrb[54].mxu1 }
0x2169   :  { %v10972_v21 = vpop.f32.mrb[55].mxu1 }
0x216a   :  { %v10973_v23 = vadd.f32 %v10972_v21, %v10971_v20  ;;  %v4819_v20 = vpop.permute.xlu1 %4818 }
0x2220   :  { %v4712_v62 = vpop.f32.mrb[56].mxu1 }
0x2221   :  { %v4713_v0 = vadd.f32 %v10973_v23, %v4712_v62  ;;  %v12276_v63 = vpop.f32.mrb[57].mxu1 }
0x2223   :  { %v4716_v38 = vadd.f32 %v4713_v0, %v16068_v50  ;;  %v4827_v50 = vld [vmem:[#allocation12] sm:$0xff] }
0x2224   :  { %v14067_v16 = vpack.c.bf16 %v4828_v53, %v4827_v50  ;;  %v15203_v50 = vld [vmem:[%s18704_s19] sm:$0xf] }
0x2225   :  { %15096 = vtanh.f32 %v4716_v38 }
0x2226   :  { %14068 = vmatpush3.bf16.msra.mxu1 %v14067_v16 }
0x2227   :  { %12316 = vmatprep.subr.mxu1 %v15504_v42 }
0x222a   :  { %12317 = vmatpush3.msk.msra.mxu1 %vm1665_vm4, %v4829_v4 }
0x222b   :  { %12328 = vmatprep.subr.mxu1 %v15504_v42 }
0x222f   :  { %v15097_v45 = vpop.eup %15096 }
0x2230   :  { %v4720_v14 = vmul.f32 %v15097_v45, %v4719_v29  ;;  %v5095_v29 = vld [vmem:[#allocation15 + $0x8] sm:$0xff] }
0x2231   :  { %v14073_v10 = vpack.c.bf16 %v5095_v29, %v5094_v3 }
0x2232   :  { %v17227_v15 = vadd.f32 %v4720_v14, %v4718_v11  ;;  %v15202_v11 = vld [vmem:[%s18702_s23] sm:$0x3] }
0x2234   :  { %12310 = vmatmul.mubr.f32.vlgmr.msra.gmra.mrb[44].mxu0 %v17227_v15 }
0x2235   :  { %14071 = vmatpush3.bf16.msra.mxu0 %v14070_v13  ;;  %12325 = vmatprep.mubr.msk.f32.mxu0 %vm15507_vm3, %v15504_v42 }
0x2236   :  { %14072 = vmatprep.subr.bf16.mxu0 %v15505_v43 }
0x2238   :  { %12326 = vmatmul.mubr.msk.f32.vlgmr.msra.gmra.mrb[46].mxu0 %vm267_vm0, %v16841_v46  ;;  %v4823_v46 = vpop.permute.xlu0 %4822 }
0x2239   :  { %12337 = vmatprep.mubr.msk.f32.mxu0 %vm15507_vm3, %v15504_v42  ;;  %14074 = vmatpush3.bf16.msra.mxu0 %v14073_v10 }
0x223a   :  { %14075 = vmatprep.subr.bf16.mxu0 %v15505_v43 }
0x2307   :  { %v4811_v59 = vpop.f32.mrb[44].mxu0 }
0x2308   :  { %v4812_v21 = vadd.f32 %v10421_v19, %v4811_v59  ;;  %v12311_v23 = vpop.f32.mrb[45].mxu0 }
0x2309   :  { %v10429_v23 = vld [vmem:[#allocation16] ss:$0 sm:$0xff] }
0x230a   :  { %v4825_v5 = vsel %vm267_vm0, %v4812_v21, %v4819_v20 }
0x230b   :  { %v4826_v25 = vsel %vm1646_vm5, %v4825_v5, %v4823_v46  ;;  %v4990_v49 = vpop.f32.mrb[46].mxu0 }
0x230c   :  { %v4991_v26 = vadd.f32 %v10425_v12, %v4990_v49  ;;  %12319 = vmatmul.mubr.msk.f32.vlgmr.msra.gmra.mrb[58].mxu1 %vm1661_vm6, %v4826_v25  ;;  %v12327_v27 = vpop.f32.mrb[47].mxu0 }
0x230d   :  { %12330 = vmatprep.mubr.msk.f32.mxu1 %vm15507_vm3, %v15504_v42 }
0x230e   :  { %5002 = vrot.lane.b32.xlu1 %v4991_v26, %s18669_s12 }
0x2380   :  { %v5003_v7 = vpop.permute.xlu1 %5002 }
0x23df   :  { %v4912_v6 = vpop.f32.mrb[58].mxu1 }
0x23e0   :  { %v4913_v32 = vadd.f32 %v10422_v30, %v4912_v6  ;;  %v12320_v33 = vpop.f32.mrb[59].mxu1 }
0x23e2   :  { %v4994_v35 = vadd.f32 %v4991_v26, %v4913_v32 }
0x23e4   :  { %v10427_v36 = vmul.f32 -1.442695, %v4994_v35 }
0x23e6   :  { %15098 = vpow2.f32 %v10427_v36  ;;  %v5293_v36 = vld [vmem:[#allocation18] sm:$0xff] }
0x23f0   :  { %v15099_v24 = vpop.eup %15098 }
0x23f1   :  { %v4998_v37 = vadd.f32 1.0, %v15099_v24  ;;  %v5294_v24 = vld [vmem:[#allocation18 + $0x8] sm:$0xff] }
0x23f3   :  { %15100 = vrcp.f32 %v4998_v37  ;;  %v5295_v37 = vld [vmem:[#allocation18 + $0x10] sm:$0xff] }
0x23fd   :  { %v15101_v2 = vpop.eup %15100 }
0x23fe   :  { %v5005_v51 = vmul.f32 %v15101_v2, %v5003_v7  ;;  %v5012_v62 = vsub.f32 1.0, %v15101_v2  ;;  %v5018_v63 = vmul.f32 %v15101_v2, %v16836_v58  ;;  %v5298_v58 = vld [vmem:[%s18636_s22 + $0x8] sm:$0xff]  ;;  %v14076_v7 = vpack.c.bf16 %v5294_v24, %v5293_v36  ;;  %v5596_v36 = vld [vmem:[#allocation7 + $0x98] sm:$0xff] }
0x2400   :  { %5007 = vrot.lane.b32.xlu0 %v5005_v51, %s18712_s0  ;;  %v5296_v51 = vld [vmem:[#allocation18 + $0x18] sm:$0x3] }
0x2472   :  { %v5008_v39 = vpop.permute.xlu0 %5007 }
0x2473   :  { %v5010_v55 = vadd.f32 %v5008_v39, %v4913_v32 }
0x2475   :  { %15102 = vtanh.f32 %v5010_v55 }
0x247f   :  { %v15103_v56 = vpop.eup %15102 }
0x2480   :  { %5014 = vrot.lane.b32.xlu1 %v15103_v56, %s18713_s11  ;;  %v14079_v56 = vpack.c.bf16 %v5296_v51, %v5295_v37  ;;  %v5598_v51 = vld [vmem:[#allocation7 + $0xa8] sm:$0xff] }
0x2484   :  { %5200 = vrot.lane.b32.xlu1 %v10433_v57, %s18694_s20 }
0x2488   :  { %5390 = vrot.lane.b32.xlu1 %v16932_v18, %s18713_s11 }
0x248c   :  { %5288 = vrot.lane.b32.xlu1 %v16960_v8, %s18710_s4  ;;  %v5297_v8 = vld [vmem:[%s18636_s22] sm:$0xff] }
0x248d   :  { %v14083_v13 = vpack.c.bf16 %v5298_v58, %v5297_v8 }
0x24f2   :  { %v5015_v0 = vpop.permute.xlu1 %5014 }
0x24f3   :  { %v5017_v38 = vmul.f32 %v5015_v0, %v5012_v62 }
0x24f5   :  { %v17260_v1 = vadd.f32 %v5018_v63, %v5017_v38  ;;  %v10438_v38 = vld [vmem:[%s18638_s24] ss:$0 sm:$0xff] }
0x24f6   :  { %v5201_v14 = vpop.permute.xlu1 %5200 }
0x24f7   :  { %5021 = vrot.lane.b32.xlu0 %v17260_v1, %s18713_s11 }
0x24fa   :  { %v5391_v53 = vpop.permute.xlu1 %5390 }
0x24fe   :  { %v5289_v10 = vpop.permute.xlu1 %5288 }
0x2569   :  { %v17265_v45 = vpop.permute.xlu0 %5021 }
0x256a   :  { %12329 = vmatpush3.msra.mxu1 %v17265_v45 }
0x256b   :  { %12331 = vmatmul.mubr.msk.f32.vlgmr.msra.gmra.mrb[60].mxu1 %vm1848_vm7, %v15202_v11  ;;  %12340 = vmatprep.subr.mxu1 %v15504_v42  ;;  %v5578_v11 = vld [vmem:[#allocation7 + $0x8] sm:$0xff] }
0x256c   :  { %12341 = vmatpush3.msra.mxu1 %v4812_v21  ;;  %12342 = vmatprep.mubr.msk.f32.mxu1 %vm15507_vm3, %v15504_v42 }
0x256d   :  { %14082 = vmatprep.subr.bf16.mxu1 %v15505_v43 }
0x256f   :  { %12343 = vmatmul.mubr.msk.f32.vlgmr.msra.gmra.mrb[62].mxu1 %vm1848_vm7, %v15203_v50  ;;  %v5577_v50 = vld [vmem:[#allocation7] sm:$0xff] }
0x2570   :  { %14084 = vmatpush3.bf16.msra.mxu1 %v14083_v13  ;;  %12360 = vmatprep.mubr.msk.f32.mxu1 %vm15507_vm3, %v15504_v42 }
0x2571   :  { %14085 = vmatprep.subr.bf16.mxu1 %v15505_v43 }
0x2573   :  { %12361 = vmatmul.mubr.msk.f32.vlgmr.msra.gmra.mrb[64].mxu1 %vm267_vm0, %v5391_v53  ;;  %v5579_v53 = vld [vmem:[#allocation7 + $0x10] sm:$0xff] }
0x2574   :  { %12367 = vmatprep.mubr.msk.f32.mxu1 %vm15507_vm3, %v15504_v42 }
0x263e   :  { %v5090_v16 = vpop.f32.mrb[60].mxu1 }
0x263f   :  { %v12332_v4 = vpop.f32.mrb[61].mxu1  ;;  %12338 = vmatmul.mubr.msk.f32.vlgmr.msra.gmra.mrb[48].mxu0 %vm267_vm0, %v5090_v16  ;;  %v5582_v16 = vld [vmem:[#allocation7 + $0x28] sm:$0xff] }
0x2640   :  { %12353 = vmatprep.mubr.msk.f32.mxu0 %vm15507_vm3, %v15504_v42  ;;  %14077 = vmatpush3.bf16.msra.mxu0 %v14076_v7  ;;  %v5584_v4 = vld [vmem:[#allocation7 + $0x38] sm:$0xff]  ;;  %v5595_v7 = vld [vmem:[#allocation7 + $0x90] sm:$0xff] }
0x2641   :  { %14078 = vmatprep.subr.bf16.mxu0 %v15505_v43 }
0x2642   :  { %v5279_v19 = vpop.f32.mrb[62].mxu1 }
0x2643   :  { %v12344_v59 = vpop.f32.mrb[63].mxu1 }
0x2644   :  { %14081 = vmatpush3.bf16.msk.msra.mxu0 %vm16430_vm13, %v14079_v56  ;;  %v14140_v59 = vpack.c.bf16 %v5584_v4, %v5582_v16  ;;  %v5610_v4 = vld [vmem:[#allocation7 + $0x108] sm:$0xff] }
0x2645   :  { %14088 = vmatprep.subr.bf16.mxu0 %v15505_v43 }
0x2646   :  { %v5460_v20 = vpop.f32.mrb[64].mxu1 }
0x2647   :  { %v12362_v21 = vpop.f32.mrb[65].mxu1  ;;  %v17310_v3 = vadd.f32 %v10438_v38, %v5460_v20  ;;  %v5581_v20 = vld [vmem:[#allocation7 + $0x20] sm:$0xff] }
0x2648   :  { %v5583_v21 = vld [vmem:[#allocation7 + $0x30] sm:$0xff] }
0x2712   :  { %v5172_v46 = vpop.f32.mrb[48].mxu0 }
0x2713   :  { %v5173_v12 = vadd.f32 %v10429_v23, %v5172_v46  ;;  %v12339_v5 = vpop.f32.mrb[49].mxu0  ;;  %v5586_v23 = vld [vmem:[#allocation7 + $0x48] sm:$0xff]  ;;  %v5588_v46 = vld [vmem:[#allocation7 + $0x58] sm:$0xff] }
0x2714   :  { %v14144_v5 = vpack.c.bf16 %v5588_v46, %v5586_v23  ;;  %v5614_v46 = vld [vmem:[#allocation7 + $0x128] sm:$0xff] }
0x2715   :  { %10431 = vst.msk [vmem:[%s18642_s28 + $0x4] sm:$0x3] %vm2004_vm8, %v5173_v12  ;;  %v10432_v25 = vmul.f32 -1.442695, %v5173_v12  ;;  %v5207_v62 = vrot.slane %v5173_v12, %v16100_v60  ;;  %v14142_v12 = vpack.c.bf16 %v5583_v21, %v5581_v20  ;;  %v5609_v20 = vld [vmem:[#allocation7 + $0x100] sm:$0xff]  ;;  %v5611_v21 = vld [vmem:[#allocation7 + $0x110] sm:$0xff] }
0x2716   :  { %v14170_v23 = vpack.c.bf16 %v5611_v21, %v5609_v20  ;;  %v5637_v20 = vld [vmem:[#allocation7 + $0x1e0] sm:$0xff]  ;;  %v5639_v21 = vld [vmem:[#allocation7 + $0x1f0] sm:$0xff] }
0x2717   :  { %15104 = vpow2.f32 %v10432_v25  ;;  %v5585_v25 = vld [vmem:[#allocation7 + $0x40] sm:$0xff] }
0x2721   :  { %v15105_v49 = vpop.eup %15104 }
0x2722   :  { %v5181_v26 = vadd.f32 1.0, %v15105_v49  ;;  %v5587_v49 = vld [vmem:[#allocation7 + $0x50] sm:$0xff] }
0x2724   :  { %15106 = vrcp.f32 %v5181_v26  ;;  %v5590_v26 = vld [vmem:[#allocation7 + $0x68] sm:$0xff] }
0x272e   :  { %v15107_v27 = vpop.eup %15106 }
0x272f   :  { %v5184_v30 = vmul.f32 0.9, %v15107_v27  ;;  %v5592_v27 = vld [vmem:[#allocation7 + $0x78] sm:$0xff] }
0x2731   :  { %v5185_v6 = vadd.f32 0.1, %v5184_v30  ;;  %v14146_v30 = vpack.c.bf16 %v5587_v49, %v5585_v25  ;;  %v5613_v25 = vld [vmem:[#allocation7 + $0x120] sm:$0xff]  ;;  %v5615_v49 = vld [vmem:[#allocation7 + $0x130] sm:$0xff] }
0x2733   :  { %15108 = vrsqrt.f32 %v5185_v6  ;;  %vm5188_vm10 = vcmp.eq.f32.partialorder %v5185_v6, inf  ;;  %v5191_v35 = vand.u32 2147483648, %v5185_v6  ;;  %vm5190_vm11 = vcmp.eq.f32.partialorder %v5185_v6, 0.0 }
0x273d   :  { %v15109_v32 = vpop.eup %15108 }
0x273e   :  { %v5187_v33 = vmul.f32 %v15109_v32, %v5185_v6  ;;  %v5589_v32 = vld [vmem:[#allocation7 + $0x60] sm:$0xff] }
0x2740   :  { %v5189_v2 = vsel %vm5188_vm10, %v5185_v6, %v5187_v33  ;;  %v14148_v6 = vpack.c.bf16 %v5592_v27, %v5590_v26  ;;  %v5591_v33 = vld [vmem:[#allocation7 + $0x70] sm:$0xff]  ;;  %v14174_v26 = vpack.c.bf16 %v5615_v49, %v5613_v25  ;;  %v5618_v27 = vld [vmem:[#allocation7 + $0x148] sm:$0xff] }
0x2741   :  { %v5192_v39 = vsel %vm5190_vm11, %v5191_v35, %v5189_v2  ;;  %v5594_v35 = vld [vmem:[#allocation7 + $0x88] sm:$0xff]  ;;  %v14150_v24 = vpack.c.bf16 %v5591_v33, %v5589_v32  ;;  %v5593_v2 = vld [vmem:[#allocation7 + $0x80] sm:$0xff]  ;;  %v5619_v33 = vld [vmem:[#allocation7 + $0x150] sm:$0xff] }
0x2742   :  { %v5198_v55 = vrot.slane %v5192_v39, %v16100_v60  ;;  %v14152_v37 = vpack.c.bf16 %v5596_v36, %v5594_v35  ;;  %v5600_v39 = vld [vmem:[#allocation7 + $0xb8] sm:$0xff]  ;;  %v5617_v32 = vld [vmem:[#allocation7 + $0x140] sm:$0xff]  ;;  %v5622_v36 = vld [vmem:[#allocation7 + $0x168] sm:$0xff] }
0x2743   :  { %v14156_v56 = vpack.c.bf16 %v5600_v39, %v5598_v51  ;;  %v14178_v35 = vpack.c.bf16 %v5619_v33, %v5617_v32  ;;  %v5626_v39 = vld [vmem:[#allocation7 + $0x188] sm:$0xff] }
0x2744   :  { %v5203_v57 = vmul.f32 %v5201_v14, %v5198_v55  ;;  %v5580_v14 = vld [vmem:[#allocation7 + $0x18] sm:$0xff]  ;;  %v14154_v55 = vpack.c.bf16 %v5595_v7, %v5593_v2  ;;  %v5621_v2 = vld [vmem:[#allocation7 + $0x160] sm:$0xff]  ;;  %v5623_v7 = vld [vmem:[#allocation7 + $0x170] sm:$0xff] }
0x2745   :  { %v14136_v13 = vpack.c.bf16 %v5580_v14, %v5578_v11  ;;  %v5608_v11 = vld [vmem:[#allocation7 + $0xf8] sm:$0xff]  ;;  %v14182_v51 = vpack.c.bf16 %v5623_v7, %v5621_v2  ;;  %v5492_v2 = vld [vmem:[%s18639_s25 + $0x8] sm:$0xff] }
0x2746   :  { %5209 = vrot.lane.b32.xlu0 %v5203_v57, %s18711_s15  ;;  %v5597_v57 = vld [vmem:[#allocation7 + $0xa0] sm:$0xff] }
0x27b8   :  { %v5210_v0 = vpop.permute.xlu0 %5209 }
0x27b9   :  { %v5212_v63 = vadd.f32 %v5210_v0, %v5207_v62  ;;  %v5599_v62 = vld [vmem:[#allocation7 + $0xb0] sm:$0xff]  ;;  %v5602_v0 = vld [vmem:[#allocation7 + $0xc8] sm:$0xff] }
0x27ba   :  { %v14158_v38 = vpack.c.bf16 %v5599_v62, %v5597_v57  ;;  %v5625_v57 = vld [vmem:[#allocation7 + $0x180] sm:$0xff]  ;;  %v5627_v62 = vld [vmem:[#allocation7 + $0x190] sm:$0xff] }
0x27bb   :  { %5284 = vrot.lane.b32.xlu0 %v5212_v63, %s18673_s10  ;;  %v5604_v63 = vld [vmem:[#allocation7 + $0xd8] sm:$0xff] }
0x27bf   :  { %5472 = vrot.lane.b32.xlu0 %v17310_v3, %s18669_s12 }
0x282d   :  { %v5285_v29 = vpop.permute.xlu0 %5284 }
0x282e   :  { %v5291_v8 = vsel %vm267_vm0, %v5279_v19, %v5285_v29  ;;  %v14138_v19 = vpack.c.bf16 %v5579_v53, %v5577_v50  ;;  %v14160_v29 = vpack.c.bf16 %v5604_v63, %v5602_v0  ;;  %v5605_v50 = vld [vmem:[#allocation7 + $0xe0] sm:$0xff]  ;;  %v5607_v53 = vld [vmem:[#allocation7 + $0xf0] sm:$0xff]  ;;  %v14186_v0 = vpack.c.bf16 %v5627_v62, %v5625_v57  ;;  %v5630_v63 = vld [vmem:[#allocation7 + $0x1a8] sm:$0xff] }
0x282f   :  { %v5292_v58 = vsel %vm2122_vm14, %v5291_v8, %v5289_v10  ;;  %v5601_v10 = vld [vmem:[#allocation7 + $0xc0] sm:$0xff]  ;;  %v5603_v8 = vld [vmem:[#allocation7 + $0xd0] sm:$0xff]  ;;  %v14166_v16 = vpack.c.bf16 %v5607_v53, %v5605_v50 }
0x2830   :  { %12354 = vmatmul.mubr.msk.f32.vlgmr.msra.gmra.mrb[50].mxu0 %vm2138_vm15, %v5292_v58  ;;  %v5606_v58 = vld [vmem:[#allocation7 + $0xe8] sm:$0xff]  ;;  %v14162_v14 = vpack.c.bf16 %v5603_v8, %v5601_v10  ;;  %v5629_v10 = vld [vmem:[#allocation7 + $0x1a0] sm:$0xff]  ;;  %v5631_v8 = vld [vmem:[#allocation7 + $0x1b0] sm:$0xff] }
0x2831   :  { %14090 = vmatpush3.bf16.msra.mxu0 %v15964_v9  ;;  %12402 = vmatprep.mubr.msk.f32.mxu0 %vm15507_vm3, %v15504_v42  ;;  %v5635_v50 = vld [vmem:[#allocation7 + $0x1d0] sm:$0xff]  ;;  %v5473_v32 = vpop.permute.xlu0 %5472 }
0x2832   :  { %14091 = vmatprep.subr.bf16.mxu0 %v15505_v43 }
0x2835   :  { %14093 = vmatpush3.bf16.msra.mxu0 %v15976_v17 }
0x2836   :  { %14094 = vmatprep.subr.bf16.mxu0 %v15505_v43 }
0x2839   :  { %14096 = vmatpush3.bf16.msra.mxu0 %v15988_v22 }
0x283a   :  { %14097 = vmatprep.subr.bf16.mxu0 %v15505_v43 }
0x283d   :  { %14099 = vmatpush3.bf16.msra.mxu0 %v16000_v28 }
0x283e   :  { %14100 = vmatprep.subr.bf16.mxu0 %v15505_v43 }
0x2841   :  { %14102 = vmatpush3.bf16.msra.mxu0 %v16012_v34 }
0x2842   :  { %14103 = vmatprep.subr.bf16.mxu0 %v15505_v43 }
0x2845   :  { %14105 = vmatpush3.bf16.msra.mxu0 %v16024_v40 }
0x2846   :  { %14106 = vmatprep.subr.bf16.mxu0 %v15505_v43 }
0x2849   :  { %14108 = vmatpush3.bf16.msra.mxu0 %v16034_v44 }
0x284a   :  { %14109 = vmatprep.subr.bf16.mxu0 %v15505_v43 }
0x284d   :  { %14111 = vmatpush3.bf16.msra.mxu0 %v16042_v47 }
0x284e   :  { %14137 = vmatprep.subr.bf16.mxu0 %v14136_v13  ;;  %v14164_v13 = vpack.c.bf16 %v5608_v11, %v5606_v58  ;;  %v5634_v58 = vld [vmem:[#allocation7 + $0x1c8] sm:$0xff]  ;;  %v14190_v11 = vpack.c.bf16 %v5631_v8, %v5629_v10  ;;  %v5641_v10 = vld [vmem:[#allocation7 + $0x200] sm:$0xff]  ;;  %v5643_v8 = vld [vmem:[#allocation7 + $0x210] sm:$0xff] }
0x2850   :  { %12403 = vmatmul.mubr.f32.vlgmr.msra.gmra.mrb[52].mxu0 %v17227_v15 }
0x2851   :  { %14139 = vmatpush1.bf16.msra.mxu0 %v14138_v19  ;;  %v5612_v19 = vld [vmem:[#allocation7 + $0x118] sm:$0xff] }
0x2852   :  { %14141 = vmatprep.subr.bf16.mxu0 %v14140_v59  ;;  %v14168_v59 = vpack.c.bf16 %v5612_v19, %v5610_v4  ;;  %v5640_v4 = vld [vmem:[#allocation7 + $0x1f8] sm:$0xff] }
0x2855   :  { %14143 = vmatpush1.bf16.msra.mxu0 %v14142_v12  ;;  %v5616_v12 = vld [vmem:[#allocation7 + $0x138] sm:$0xff] }
0x2856   :  { %14145 = vmatprep.subr.bf16.mxu0 %v14144_v5  ;;  %v14172_v5 = vpack.c.bf16 %v5616_v12, %v5614_v46  ;;  %v10435_v46 = vld [vmem:[#allocation19] ss:$0 sm:$0xff] }
0x2859   :  { %14147 = vmatpush1.bf16.msra.mxu0 %v14146_v30  ;;  %v5620_v30 = vld [vmem:[#allocation7 + $0x158] sm:$0xff] }
0x285a   :  { %14149 = vmatprep.subr.bf16.mxu0 %v14148_v6  ;;  %v14176_v6 = vpack.c.bf16 %v5620_v30, %v5618_v27 }
0x285d   :  { %14151 = vmatpush1.bf16.msra.mxu0 %v14150_v24  ;;  %v5624_v24 = vld [vmem:[#allocation7 + $0x178] sm:$0xff] }
0x285e   :  { %14153 = vmatprep.subr.bf16.mxu0 %v14152_v37  ;;  %v14180_v37 = vpack.c.bf16 %v5624_v24, %v5622_v36 }
0x2861   :  { %14155 = vmatpush1.bf16.msra.mxu0 %v14154_v55  ;;  %v5628_v55 = vld [vmem:[#allocation7 + $0x198] sm:$0xff] }
0x2862   :  { %14157 = vmatprep.subr.bf16.mxu0 %v14156_v56  ;;  %v14184_v56 = vpack.c.bf16 %v5628_v55, %v5626_v39 }
0x2865   :  { %14159 = vmatpush1.bf16.msra.mxu0 %v14158_v38  ;;  %v5632_v38 = vld [vmem:[#allocation7 + $0x1b8] sm:$0xff] }
0x2866   :  { %14161 = vmatprep.subr.bf16.mxu0 %v14160_v29  ;;  %v14188_v29 = vpack.c.bf16 %v5632_v38, %v5630_v63  ;;  %v5644_v38 = vld [vmem:[#allocation7 + $0x218] sm:$0xff] }
0x2869   :  { %14163 = vmatpush1.bf16.msra.mxu0 %v14162_v14  ;;  %v5636_v14 = vld [vmem:[#allocation7 + $0x1d8] sm:$0xff] }
0x286a   :  { %14165 = vmatprep.subr.bf16.mxu0 %v14164_v13  ;;  %v5633_v13 = vld [vmem:[#allocation7 + $0x1c0] sm:$0xff]  ;;  %v14192_v53 = vpack.c.bf16 %v5636_v14, %v5634_v58  ;;  %v5646_v58 = vld [vmem:[#allocation7 + $0x228] sm:$0xff]  ;;  %v5648_v14 = vld [vmem:[#allocation7 + $0x238] sm:$0xff] }
0x286b   :  { %v14194_v19 = vpack.c.bf16 %v5635_v50, %v5633_v13  ;;  %v5645_v13 = vld [vmem:[#allocation7 + $0x220] sm:$0xff]  ;;  %v5647_v50 = vld [vmem:[#allocation7 + $0x230] sm:$0xff] }
0x286d   :  { %14167 = vmatpush1.bf16.msra.mxu0 %v14166_v16  ;;  %v5638_v16 = vld [vmem:[#allocation7 + $0x1e8] sm:$0xff] }
0x286e   :  { %14169 = vmatprep.subr.bf16.mxu0 %v14168_v59  ;;  %v14196_v59 = vpack.c.bf16 %v5640_v4, %v5638_v16  ;;  %v5650_v16 = vld [vmem:[#allocation7 + $0x248] sm:$0xff]  ;;  %v5652_v4 = vld [vmem:[#allocation7 + $0x258] sm:$0xff] }
0x2871   :  { %14171 = vmatpush1.bf16.msra.mxu0 %v14170_v23  ;;  %v14198_v23 = vpack.c.bf16 %v5639_v21, %v5637_v20  ;;  %v5649_v20 = vld [vmem:[#allocation7 + $0x240] sm:$0xff]  ;;  %v5651_v21 = vld [vmem:[#allocation7 + $0x250] sm:$0xff] }
0x2872   :  { %14173 = vmatprep.subr.bf16.mxu0 %v14172_v5 }
0x2875   :  { %14175 = vmatpush1.bf16.msra.mxu0 %v14174_v26 }
0x2876   :  { %14177 = vmatprep.subr.bf16.mxu0 %v14176_v6 }
0x2879   :  { %14179 = vmatpush1.bf16.msra.mxu0 %v14178_v35 }
0x287a   :  { %14181 = vmatprep.subr.bf16.mxu0 %v14180_v37 }
0x287d   :  { %14183 = vmatpush1.bf16.msra.mxu0 %v14182_v51 }
0x287e   :  { %14185 = vmatprep.subr.bf16.mxu0 %v14184_v56 }
0x2881   :  { %14187 = vmatpush1.bf16.msra.mxu0 %v14186_v0 }
0x2882   :  { %14189 = vmatprep.subr.bf16.mxu0 %v14188_v29 }
0x2885   :  { %14191 = vmatpush1.bf16.msra.mxu0 %v14190_v11  ;;  %v14202_v11 = vpack.c.bf16 %v5643_v8, %v5641_v10  ;;  %v5669_v10 = vld [vmem:[#allocation7 + $0x2e0] sm:$0xff]  ;;  %v5671_v8 = vld [vmem:[#allocation7 + $0x2f0] sm:$0xff] }
0x2886   :  { %14193 = vmatprep.subr.bf16.mxu0 %v14192_v53  ;;  %v14204_v53 = vpack.c.bf16 %v5648_v14, %v5646_v58  ;;  %v14230_v58 = vpack.c.bf16 %v5671_v8, %v5669_v10  ;;  %v5673_v8 = vld [vmem:[%s18699_s2] sm:$0xff] }
0x2889   :  { %14195 = vmatpush1.bf16.msra.mxu0 %v14194_v19  ;;  %v14206_v19 = vpack.c.bf16 %v5647_v50, %v5645_v13 }
0x288a   :  { %14197 = vmatprep.subr.bf16.mxu0 %v14196_v59  ;;  %v14208_v59 = vpack.c.bf16 %v5652_v4, %v5650_v16 }
0x288d   :  { %14199 = vmatpush1.bf16.msra.mxu0 %v14198_v23  ;;  %v5654_v23 = vld [vmem:[#allocation7 + $0x268] sm:$0xff] }
0x2903   :  { %v5379_v12 = vpop.f32.mrb[50].mxu0 }
0x2904   :  { %v5380_v5 = vadd.f32 %v10435_v46, %v5379_v12  ;;  %v12355_v25 = vpop.f32.mrb[51].mxu0  ;;  %v5656_v46 = vld [vmem:[#allocation7 + $0x278] sm:$0xff]  ;;  %v14210_v12 = vpack.c.bf16 %v5651_v21, %v5649_v20 }
0x2905   :  { %v5653_v25 = vld [vmem:[#allocation7 + $0x260] sm:$0xff] }
0x2906   :  { %v5464_v49 = vadd.f32 %v17310_v3, %v5380_v5  ;;  %v5491_v3 = vld [vmem:[%s18639_s25] sm:$0xff] }
0x2907   :  { %v17345_v7 = vpack.c.bf16 %v5492_v2, %v5491_v3  ;;  %v5661_v3 = vld [vmem:[#allocation7 + $0x2a0] sm:$0xff]  ;;  %v5663_v2 = vld [vmem:[#allocation7 + $0x2b0] sm:$0xff] }
0x2908   :  { %v10440_v26 = vmul.f32 -1.442695, %v5464_v49  ;;  %v5655_v49 = vld [vmem:[#allocation7 + $0x270] sm:$0xff] }
0x2909   :  { %14087 = vmatpush3.bf16.msra.mxu1 %v17345_v7 }
0x290a   :  { %15110 = vpow2.f32 %v10440_v26  ;;  %14112 = vmatprep.subr.bf16.mxu1 %v15505_v43  ;;  %v5658_v26 = vld [vmem:[#allocation7 + $0x288] sm:$0xff] }
0x2914   :  { %v15111_v27 = vpop.eup %15110 }
0x2915   :  { %v5468_v30 = vadd.f32 1.0, %v15111_v27  ;;  %v5660_v27 = vld [vmem:[#allocation7 + $0x298] sm:$0xff] }
0x2917   :  { %15112 = vrcp.f32 %v5468_v30  ;;  %v14214_v30 = vpack.c.bf16 %v5655_v49, %v5653_v25  ;;  %v5689_v49 = vld [vmem:[%s18699_s2 + $0x80] sm:$0xff] }
0x2921   :  { %v15113_v6 = vpop.eup %15112 }
0x2922   :  { %v5475_v33 = vmul.f32 %v15113_v6, %v5473_v32  ;;  %v5482_v39 = vsub.f32 1.0, %v15113_v6  ;;  %v5488_v56 = vmul.f32 %v15113_v6, %v16932_v18  ;;  %v5642_v18 = vld [vmem:[#allocation7 + $0x208] sm:$0xff]  ;;  %v14216_v6 = vpack.c.bf16 %v5660_v27, %v5658_v26  ;;  %v5657_v32 = vld [vmem:[#allocation7 + $0x280] sm:$0xff] }
0x2923   :  { %v5787_v35 = vpop.f32.mrb[52].mxu0  ;;  %v14200_v29 = vpack.c.bf16 %v5644_v38, %v5642_v18  ;;  %v5670_v18 = vld [vmem:[#allocation7 + $0x2e8] sm:$0xff]  ;;  %v5672_v38 = vld [vmem:[#allocation7 + $0x2f8] sm:$0xff] }
0x2924   :  { %v12404_v36 = vpop.f32.mrb[53].mxu0  ;;  %5927 = vmatprep.mubr.f32.mxu0 %v5787_v35  ;;  %5477 = vrot.lane.b32.xlu1 %v5475_v33, %s18712_s0  ;;  %v5659_v33 = vld [vmem:[#allocation7 + $0x290] sm:$0xff]  ;;  %v5690_v26 = vld [vmem:[%s18699_s2 + $0x88] sm:$0xff] }
0x2925   :  { %5928 = vmatmul.mubr.f32.vlgmr.msra.gmra.mrb[12].mxu0 %v17227_v15  ;;  %14201 = vmatprep.subr.bf16.mxu0 %v14200_v29  ;;  %v5664_v36 = vld [vmem:[#allocation7 + $0x2b8] sm:$0xff]  ;;  %v14228_v29 = vpack.c.bf16 %v5672_v38, %v5670_v18  ;;  %v14280_v27 = vpack.c.bf16 %v5690_v26, %v5689_v49  ;;  %v5717_v38 = vld [vmem:[%s18699_s2 + $0x160] sm:$0xff]  ;;  %v5678_v49 = vld [vmem:[%s18699_s2 + $0x28] sm:$0xff] }
0x2926   :  { %5998 = vmatprep.mubr.f32.mxu0 %v15504_v42  ;;  %14203 = vmatpush1.bf16.msra.mxu0 %v14202_v11  ;;  %v10441_v11 = vld [vmem:[%s18708_s27] ss:$0 sm:$0xff]  ;;  %v5695_v26 = vld [vmem:[%s18699_s2 + $0xb0] sm:$0xff] }
0x2927   :  { %14205 = vmatprep.subr.bf16.mxu0 %v14204_v53 }
0x292a   :  { %14207 = vmatpush1.bf16.msra.mxu0 %v14206_v19 }
0x292b   :  { %14209 = vmatprep.subr.bf16.mxu0 %v14208_v59 }
0x292e   :  { %14211 = vmatpush1.bf16.msra.mxu0 %v14210_v12 }
0x2996   :  { %v5478_v24 = vpop.permute.xlu1 %5477 }
0x2997   :  { %v5480_v37 = vadd.f32 %v5478_v24, %v5380_v5  ;;  %v14212_v5 = vpack.c.bf16 %v5656_v46, %v5654_v23  ;;  %v14218_v24 = vpack.c.bf16 %v5659_v33, %v5657_v32  ;;  %v5707_v32 = vld [vmem:[%s18699_s2 + $0x110] sm:$0xff] }
0x2999   :  { %15114 = vtanh.f32 %v5480_v37  ;;  %14213 = vmatprep.subr.bf16.mxu0 %v14212_v5 }
0x299a   :  { %14215 = vmatpush1.bf16.msra.mxu0 %v14214_v30  ;;  %v5705_v30 = vld [vmem:[%s18699_s2 + $0x100] sm:$0xff] }
0x299b   :  { %14217 = vmatprep.subr.bf16.mxu0 %v14216_v6  ;;  %v5706_v6 = vld [vmem:[%s18699_s2 + $0x108] sm:$0xff] }
0x299c   :  { %v14313_v33 = vpack.c.bf16 %v5706_v6, %v5705_v30 }
0x299e   :  { %14219 = vmatpush1.bf16.msra.mxu0 %v14218_v24  ;;  %v5709_v24 = vld [vmem:[%s18699_s2 + $0x120] sm:$0xff] }
0x29a3   :  { %v15115_v51 = vpop.eup %15114 }
0x29a4   :  { %5484 = vrot.lane.b32.xlu0 %v15115_v51, %s18713_s11  ;;  %v5666_v51 = vld [vmem:[#allocation7 + $0x2c8] sm:$0xff] }
0x2a16   :  { %v5485_v55 = vpop.permute.xlu0 %5484 }
0x2a17   :  { %v5487_v57 = vmul.f32 %v5485_v55, %v5482_v39  ;;  %v5668_v39 = vld [vmem:[#allocation7 + $0x2d8] sm:$0xff]  ;;  %v14222_v55 = vpack.c.bf16 %v5663_v2, %v5661_v3  ;;  %v5711_v2 = vld [vmem:[%s18699_s2 + $0x130] sm:$0xff] }
0x2a19   :  { %v17351_v62 = vadd.f32 %v5488_v56, %v5487_v57  ;;  %v14224_v56 = vpack.c.bf16 %v5668_v39, %v5666_v51  ;;  %v5665_v57 = vld [vmem:[#allocation7 + $0x2c0] sm:$0xff]  ;;  %v5712_v51 = vld [vmem:[%s18699_s2 + $0x138] sm:$0xff] }
0x2a1a   :  { %v14322_v39 = vpack.c.bf16 %v5712_v51, %v5711_v2  ;;  %v5682_v2 = vld [vmem:[%s18699_s2 + $0x48] sm:$0xff]  ;;  %v5699_v51 = vld [vmem:[%s18699_s2 + $0xd0] sm:$0xff] }
0x2a1b   :  { %v5490_v0 = vmax.f32 %v17351_v62, 0.0 }
0x2a1d   :  { %5501 = vrot.lane.b32.xlu1 %v5490_v0, %s18713_s11  ;;  %v5667_v0 = vld [vmem:[#allocation7 + $0x2d0] sm:$0xff] }
0x2a8f   :  { %v5502_v63 = vpop.permute.xlu1 %5501 }
0x2a90   :  { %12368 = vmatmul.mubr.msk.f32.vlgmr.msra.gmra.mrb[66].mxu1 %vm267_vm0, %v5502_v63  ;;  %v14226_v63 = vpack.c.bf16 %v5667_v0, %v5665_v57  ;;  %v5715_v0 = vld [vmem:[%s18699_s2 + $0x150] sm:$0xff] }
0x2a91   :  { %14114 = vmatpush3.bf16.msra.mxu1 %v15964_v9  ;;  %12437 = vmatprep.mubr.msk.f32.mxu1 %vm15507_vm3, %v15504_v42 }
0x2a92   :  { %14115 = vmatprep.subr.bf16.mxu1 %v15505_v43 }
0x2a95   :  { %14117 = vmatpush3.bf16.msra.mxu1 %v15976_v17 }
0x2a96   :  { %14118 = vmatprep.subr.bf16.mxu1 %v15505_v43 }
0x2a99   :  { %14120 = vmatpush3.bf16.msra.mxu1 %v15988_v22 }
0x2a9a   :  { %14121 = vmatprep.subr.bf16.mxu1 %v15505_v43 }
0x2a9d   :  { %14123 = vmatpush3.bf16.msra.mxu1 %v16000_v28 }
0x2a9e   :  { %14124 = vmatprep.subr.bf16.mxu1 %v15505_v43 }
0x2aa1   :  { %14126 = vmatpush3.bf16.msra.mxu1 %v16012_v34 }
0x2aa2   :  { %14127 = vmatprep.subr.bf16.mxu1 %v15505_v43 }
0x2aa5   :  { %14129 = vmatpush3.bf16.msra.mxu1 %v16024_v40 }
0x2aa6   :  { %14130 = vmatprep.subr.bf16.mxu1 %v15505_v43 }
0x2aa9   :  { %14132 = vmatpush3.bf16.msra.mxu1 %v16034_v44 }
0x2aaa   :  { %14133 = vmatprep.subr.bf16.mxu1 %v15505_v43 }
0x2aad   :  { %14135 = vmatpush3.bf16.msra.mxu1 %v16042_v47 }
0x2aae   :  { %14232 = vmatprep.subr.bf16.mxu1 %v15505_v43 }
0x2ab0   :  { %12438 = vmatmul.mubr.f32.vlgmr.msra.gmra.mrb[68].mxu1 %v5787_v35  ;;  %v5662_v35 = vld [vmem:[#allocation7 + $0x2a8] sm:$0xff] }
0x2ab1   :  { %14234 = vmatpush3.bf16.msra.mxu1 %v15964_v9  ;;  %12472 = vmatprep.mubr.msk.f32.mxu1 %vm15507_vm3, %v15504_v42  ;;  %v14220_v37 = vpack.c.bf16 %v5664_v36, %v5662_v35  ;;  %v5708_v35 = vld [vmem:[%s18699_s2 + $0x118] sm:$0xff] }
0x2ab2   :  { %14235 = vmatprep.subr.bf16.mxu1 %v15505_v43  ;;  %v14316_v36 = vpack.c.bf16 %v5708_v35, %v5707_v32  ;;  %v5679_v32 = vld [vmem:[%s18699_s2 + $0x30] sm:$0xff]  ;;  %v5697_v35 = vld [vmem:[%s18699_s2 + $0xc0] sm:$0xff] }
0x2ab3   :  { %14221 = vmatprep.subr.bf16.mxu0 %v14220_v37  ;;  %v5710_v37 = vld [vmem:[%s18699_s2 + $0x128] sm:$0xff] }
0x2ab4   :  { %14223 = vmatpush1.bf16.msra.mxu0 %v14222_v55  ;;  %v14319_v3 = vpack.c.bf16 %v5710_v37, %v5709_v24  ;;  %v5713_v55 = vld [vmem:[%s18699_s2 + $0x140] sm:$0xff] }
0x2ab5   :  { %14237 = vmatpush3.bf16.msra.mxu1 %v15976_v17  ;;  %14225 = vmatprep.subr.bf16.mxu0 %v14224_v56  ;;  %v5714_v56 = vld [vmem:[%s18699_s2 + $0x148] sm:$0xff] }
0x2ab6   :  { %14238 = vmatprep.subr.bf16.mxu1 %v15505_v43  ;;  %v14325_v57 = vpack.c.bf16 %v5714_v56, %v5713_v55 }
0x2ab8   :  { %14227 = vmatpush1.bf16.msra.mxu0 %v14226_v63  ;;  %v5716_v63 = vld [vmem:[%s18699_s2 + $0x158] sm:$0xff] }
0x2ab9   :  { %14240 = vmatpush3.bf16.msra.mxu1 %v15988_v22  ;;  %14229 = vmatprep.subr.bf16.mxu0 %v14228_v29  ;;  %v14328_v18 = vpack.c.bf16 %v5716_v63, %v5715_v0  ;;  %v5718_v29 = vld [vmem:[%s18699_s2 + $0x168] sm:$0xff]  ;;  %v5684_v0 = vld [vmem:[%s18699_s2 + $0x58] sm:$0xff]  ;;  %v5701_v63 = vld [vmem:[%s18699_s2 + $0xe0] sm:$0xff] }
0x2aba   :  { %14241 = vmatprep.subr.bf16.mxu1 %v15505_v43  ;;  %v14331_v10 = vpack.c.bf16 %v5718_v29, %v5717_v38 }
0x2abc   :  { %14231 = vmatpush1.bf16.msra.mxu0 %v14230_v58  ;;  %v5674_v58 = vld [vmem:[%s18699_s2 + $0x8] sm:$0xff] }
0x2abd   :  { %14243 = vmatpush3.bf16.msra.mxu1 %v16000_v28  ;;  %14312 = vmatprep.subr.bf16.mxu0 %v15505_v43 }
0x2abe   :  { %14244 = vmatprep.subr.bf16.mxu1 %v15505_v43 }
0x2ac1   :  { %14246 = vmatpush3.bf16.msra.mxu1 %v16012_v34 }
0x2ac2   :  { %14247 = vmatprep.subr.bf16.mxu1 %v15505_v43 }
0x2ac5   :  { %14249 = vmatpush3.bf16.msra.mxu1 %v16024_v40 }
0x2ac6   :  { %14250 = vmatprep.subr.bf16.mxu1 %v15505_v43 }
0x2ac9   :  { %14252 = vmatpush3.bf16.msra.mxu1 %v16034_v44 }
0x2aca   :  { %14253 = vmatprep.subr.bf16.mxu1 %v15505_v43 }
0x2acd   :  { %14255 = vmatpush3.bf16.msra.mxu1 %v16042_v47 }
0x2ace   :  { %14256 = vmatprep.subr.bf16.mxu1 %v15505_v43 }
0x2b63   :  { %v5571_v14 = vpop.f32.mrb[66].mxu1 }
0x2b64   :  { %v17396_v13 = vadd.f32 %v10441_v11, %v5571_v14  ;;  %v12369_v50 = vpop.f32.mrb[67].mxu1  ;;  %v5691_v11 = vld [vmem:[%s18699_s2 + $0x90] sm:$0xff]  ;;  %v5692_v14 = vld [vmem:[%s18699_s2 + $0x98] sm:$0xff] }
0x2b65   :  { %v14282_v50 = vpack.c.bf16 %v5674_v58, %v5673_v8  ;;  %v5686_v8 = vld [vmem:[%s18699_s2 + $0x68] sm:$0xff]  ;;  %v5703_v58 = vld [vmem:[%s18699_s2 + $0xf0] sm:$0xff] }
0x2b66   :  { %10443 = vst.msk [vmem:[%s18709_s26 + $0x8] sm:$0xf] %vm2403_vm1, %v17396_v13 }
0x2b83   :  { %v5857_v53 = vpop.f32.mrb[68].mxu1 }
0x2b84   :  { %v5861_v16 = vmul.f32 2.0, %v5857_v53  ;;  %v12439_v4 = vpop.f32.mrb[69].mxu1  ;;  %v14284_v53 = vpack.c.bf16 %v5692_v14, %v5691_v11  ;;  %v5704_v11 = vld [vmem:[%s18699_s2 + $0xf8] sm:$0xff] }
0x2b85   :  { %v5676_v4 = vld [vmem:[%s18699_s2 + $0x18] sm:$0xff] }
0x2b86   :  { %v5862_v19 = vsub.f32 %v5861_v16, %v17227_v15  ;;  %v5675_v16 = vld [vmem:[%s18699_s2 + $0x10] sm:$0xff] }
0x2b88   :  { %5999 = vmatmul.mubr.f32.vlgmr.msra.gmra.mrb[12].mxu0 %v5862_v19 }
0x2b89   :  { %12542 = vmatprep.mubr.msk.f32.mxu0 %vm15507_vm3, %v15504_v42  ;;  %14314 = vmatpush3.bf16.msra.mxu0 %v14313_v33  ;;  %v5680_v33 = vld [vmem:[%s18699_s2 + $0x38] sm:$0xff] }
0x2b8a   :  { %14315 = vmatprep.subr.bf16.mxu0 %v15505_v43  ;;  %v14294_v24 = vpack.c.bf16 %v5680_v33, %v5679_v32 }
0x2b8d   :  { %14317 = vmatpush3.bf16.msra.mxu0 %v14316_v36  ;;  %v5698_v36 = vld [vmem:[%s18699_s2 + $0xc8] sm:$0xff] }
0x2b8e   :  { %14318 = vmatprep.subr.bf16.mxu0 %v15505_v43  ;;  %v14296_v37 = vpack.c.bf16 %v5698_v36, %v5697_v35 }
0x2b91   :  { %14320 = vmatpush3.bf16.msra.mxu0 %v14319_v3  ;;  %v5681_v3 = vld [vmem:[%s18699_s2 + $0x40] sm:$0xff] }
0x2b92   :  { %14321 = vmatprep.subr.bf16.mxu0 %v15505_v43  ;;  %v14298_v55 = vpack.c.bf16 %v5682_v2, %v5681_v3  ;;  %v6314_v2 = vld [vmem:[%s18627_s13 + $0x30] sm:$0xff] }
0x2b95   :  { %14323 = vmatpush3.bf16.msra.mxu0 %v14322_v39  ;;  %v5700_v39 = vld [vmem:[%s18699_s2 + $0xd8] sm:$0xff] }
0x2b96   :  { %14324 = vmatprep.subr.bf16.mxu0 %v15505_v43  ;;  %v14300_v56 = vpack.c.bf16 %v5700_v39, %v5699_v51  ;;  %v6315_v51 = vld [vmem:[%s18627_s13 + $0x38] sm:$0xff] }
0x2b97   :  { %v14346_v39 = vpack.c.bf16 %v6315_v51, %v6314_v2  ;;  %v10450_v2 = vld [vmem:[%s18632_s18] ss:$0 sm:$0xff] }
0x2b99   :  { %14326 = vmatpush3.bf16.msra.mxu0 %v14325_v57  ;;  %v5683_v57 = vld [vmem:[%s18699_s2 + $0x50] sm:$0xff] }
0x2b9a   :  { %14327 = vmatprep.subr.bf16.mxu0 %v15505_v43  ;;  %v14302_v38 = vpack.c.bf16 %v5684_v0, %v5683_v57  ;;  %v6318_v57 = vld [vmem:[%s18627_s13 + $0x50] sm:$0xff]  ;;  %v6319_v0 = vld [vmem:[%s18627_s13 + $0x58] sm:$0xff] }
0x2b9d   :  { %14329 = vmatpush3.bf16.msra.mxu0 %v14328_v18  ;;  %v5702_v18 = vld [vmem:[%s18699_s2 + $0xe8] sm:$0xff] }
0x2b9e   :  { %14330 = vmatprep.subr.bf16.mxu0 %v15505_v43  ;;  %v14304_v29 = vpack.c.bf16 %v5702_v18, %v5701_v63  ;;  %v14352_v63 = vpack.c.bf16 %v6319_v0, %v6318_v57  ;;  %v6320_v18 = vld [vmem:[%s18627_s13 + $0x60] sm:$0xff]  ;;  %v10447_v57 = vld [vmem:[#allocation13] ss:$0 sm:$0xff] }
0x2ba1   :  { %14332 = vmatpush3.bf16.msra.mxu0 %v14331_v10  ;;  %v5685_v10 = vld [vmem:[%s18699_s2 + $0x60] sm:$0xff] }
0x2ba2   :  { %14333 = vmatprep.subr.bf16.mxu0 %v15505_v43  ;;  %v14306_v14 = vpack.c.bf16 %v5686_v8, %v5685_v10  ;;  %v6322_v10 = vld [vmem:[%s18627_s13 + $0x70] sm:$0xff]  ;;  %v6323_v8 = vld [vmem:[%s18627_s13 + $0x78] sm:$0xff] }
0x2c5b   :  { %v6000_v59 = vpop.f32.mrb[12].mxu0 }
0x2c5c   :  { %v14976_v20 = vadd.f32 %v6000_v59, %v16104_v61  ;;  %v17407_v21 = vpop.f32.mrb[13].mxu0  ;;  %v5693_v59 = vld [vmem:[%s18699_s2 + $0xa0] sm:$0xff] }
0x2c5e   :  { %v10444_v23 = vmul.f32 -1.442695, %v14976_v20  ;;  %v5694_v20 = vld [vmem:[%s18699_s2 + $0xa8] sm:$0xff] }
0x2c60   :  { %15116 = vpow2.f32 %v10444_v23 }
0x2c6a   :  { %v15117_v46 = vpop.eup %15116 }
0x2c6b   :  { %v6013_v12 = vadd.f32 1.0, %v15117_v46  ;;  %v14286_v46 = vpack.c.bf16 %v5676_v4, %v5675_v16  ;;  %v5688_v16 = vld [vmem:[%s18699_s2 + $0x78] sm:$0xff] }
0x2c6d   :  { %15118 = vrcp.f32 %v6013_v12  ;;  %v14288_v12 = vpack.c.bf16 %v5694_v20, %v5693_v59  ;;  %v5720_v59 = vld [vmem:[%s18699_s2 + $0x178] sm:$0xff] }
0x2c77   :  { %v15119_v5 = vpop.eup %15118 }
0x2c78   :  { %v17410_v25 = vmul.f32 %v15119_v5, %v17227_v15  ;;  %v5677_v5 = vld [vmem:[%s18699_s2 + $0x20] sm:$0xff] }
0x2c79   :  { %v14290_v30 = vpack.c.bf16 %v5678_v49, %v5677_v5  ;;  %v6311_v49 = vld [vmem:[%s18627_s13 + $0x18] sm:$0xff] }
0x2c7a   :  { %12473 = vmatmul.mubr.f32.vlgmr.msra.gmra.mrb[70].mxu1 %v17410_v25 }
0x2c7b   :  { %14258 = vmatpush3.bf16.msra.mxu1 %v15964_v9  ;;  %12507 = vmatprep.mubr.msk.f32.mxu1 %vm15507_vm3, %v15504_v42 }
0x2c7c   :  { %14259 = vmatprep.subr.bf16.mxu1 %v15505_v43 }
0x2c7f   :  { %14261 = vmatpush3.bf16.msra.mxu1 %v15976_v17 }
0x2c80   :  { %14262 = vmatprep.subr.bf16.mxu1 %v15505_v43 }
0x2c83   :  { %14264 = vmatpush3.bf16.msra.mxu1 %v15988_v22 }
0x2c84   :  { %14265 = vmatprep.subr.bf16.mxu1 %v15505_v43 }
0x2c87   :  { %14267 = vmatpush3.bf16.msra.mxu1 %v16000_v28 }
0x2c88   :  { %14268 = vmatprep.subr.bf16.mxu1 %v15505_v43 }
0x2c8b   :  { %14270 = vmatpush3.bf16.msra.mxu1 %v16012_v34 }
0x2c8c   :  { %14271 = vmatprep.subr.bf16.mxu1 %v15505_v43 }
0x2c8f   :  { %14273 = vmatpush3.bf16.msra.mxu1 %v16024_v40 }
0x2c90   :  { %14274 = vmatprep.subr.bf16.mxu1 %v15505_v43 }
0x2c93   :  { %14276 = vmatpush3.bf16.msra.mxu1 %v16034_v44 }
0x2c94   :  { %14277 = vmatprep.subr.bf16.mxu1 %v15505_v43 }
0x2c97   :  { %14279 = vmatpush3.bf16.msra.mxu1 %v16042_v47 }
0x2c98   :  { %14281 = vmatprep.subr.bf16.mxu1 %v14280_v27  ;;  %v5696_v27 = vld [vmem:[%s18699_s2 + $0xb8] sm:$0xff] }
0x2c99   :  { %v14292_v6 = vpack.c.bf16 %v5696_v27, %v5695_v26  ;;  %v6312_v27 = vld [vmem:[%s18627_s13 + $0x20] sm:$0xff] }
0x2d4d   :  { %v6086_v19 = vpop.f32.mrb[70].mxu1 }
0x2d4e   :  { %v12474_v23 = vpop.f32.mrb[71].mxu1  ;;  %12508 = vmatmul.mubr.f32.vlgmr.msra.gmra.mrb[72].mxu1 %v6086_v19 }
0x2d4f   :  { %14283 = vmatpush3.bf16.msra.mxu1 %v14282_v50  ;;  %6226 = vmatprep.mubr.f32.mxu1 %v6086_v19  ;;  %v14308_v50 = vpack.c.bf16 %v5704_v11, %v5703_v58  ;;  %v5719_v19 = vld [vmem:[%s18699_s2 + $0x170] sm:$0xff]  ;;  %v6308_v23 = vld [vmem:[%s18627_s13] sm:$0xff]  ;;  %v14358_v58 = vpack.c.bf16 %v6323_v8, %v6322_v10  ;;  %v6401_v11 = vld [vmem:[%s18700_s14 + $0x18] sm:$0xff] }
0x2d50   :  { %14285 = vmatprep.subr.bf16.mxu1 %v14284_v53  ;;  %v5687_v53 = vld [vmem:[%s18699_s2 + $0x70] sm:$0xff]  ;;  %v14334_v20 = vpack.c.bf16 %v5720_v59, %v5719_v19  ;;  %6404 = vrot.lane.b32.xlu0 %v6401_v11, %s18673_s10 }
0x2d51   :  { %v14310_v4 = vpack.c.bf16 %v5688_v16, %v5687_v53 }
0x2d52   :  { %14335 = vmatpush3.bf16.msra.mxu0 %v14334_v20 }
0x2d53   :  { %14287 = vmatpush3.bf16.msra.mxu1 %v14286_v46  ;;  %14360 = vmatprep.subr.bf16.mxu0 %v15505_v43  ;;  %v6309_v46 = vld [vmem:[%s18627_s13 + $0x8] sm:$0xff] }
0x2d54   :  { %14289 = vmatprep.subr.bf16.mxu1 %v14288_v12  ;;  %v6310_v12 = vld [vmem:[%s18627_s13 + $0x10] sm:$0xff]  ;;  %v14337_v5 = vpack.c.bf16 %v6309_v46, %v6308_v23 }
0x2d55   :  { %v14340_v26 = vpack.c.bf16 %v6311_v49, %v6310_v12 }
0x2d57   :  { %14291 = vmatpush3.bf16.msra.mxu1 %v14290_v30  ;;  %v6313_v30 = vld [vmem:[%s18627_s13 + $0x28] sm:$0xff] }
0x2d58   :  { %14293 = vmatprep.subr.bf16.mxu1 %v14292_v6  ;;  %v14343_v6 = vpack.c.bf16 %v6313_v30, %v6312_v27 }
0x2d5b   :  { %14295 = vmatpush3.bf16.msra.mxu1 %v14294_v24 }
0x2d5c   :  { %14297 = vmatprep.subr.bf16.mxu1 %v14296_v37 }
0x2d5f   :  { %14299 = vmatpush3.bf16.msra.mxu1 %v14298_v55  ;;  %v6317_v55 = vld [vmem:[%s18627_s13 + $0x48] sm:$0xff] }
0x2d60   :  { %14301 = vmatprep.subr.bf16.mxu1 %v14300_v56 }
0x2d63   :  { %14303 = vmatpush3.bf16.msra.mxu1 %v14302_v38  ;;  %v6321_v38 = vld [vmem:[%s18627_s13 + $0x68] sm:$0xff] }
0x2d64   :  { %14305 = vmatprep.subr.bf16.mxu1 %v14304_v29  ;;  %v14355_v29 = vpack.c.bf16 %v6321_v38, %v6320_v18 }
0x2d67   :  { %14307 = vmatpush3.bf16.msra.mxu1 %v14306_v14  ;;  %v6402_v14 = vld [vmem:[%s18701_s3 + $0x18] sm:$0xff] }
0x2d68   :  { %14309 = vmatprep.subr.bf16.mxu1 %v14308_v50  ;;  %6408 = vrot.lane.b32.xlu1 %v6402_v14, %s18714_s9  ;;  %v14977_v50 = vadd.f32 %v17407_v21, %v16354_v41  ;;  %v6417_v21 = vld [vmem:[%s18630_s16 + $0x8] sm:$0xff] }
0x2d6a   :  { %v10445_v53 = vmul.f32 -1.442695, %v14977_v50 }
0x2d6b   :  { %14311 = vmatpush3.bf16.msra.mxu1 %v14310_v4 }
0x2d6c   :  { %14336 = vmatprep.subr.bf16.mxu1 %v15505_v43  ;;  %15120 = vpow2.f32 %v10445_v53 }
0x2d6e   :  { %6227 = vmatmul.mubr.f32.vlgmr.msra.gmra.mrb[74].mxu1 %v17410_v25 }
0x2d6f   :  { %12577 = vmatprep.mubr.msk.f32.mxu1 %vm15507_vm3, %v15504_v42  ;;  %14338 = vmatpush3.bf16.msra.mxu1 %v14337_v5  ;;  %v6416_v5 = vld [vmem:[%s18630_s16] sm:$0xff] }
0x2d70   :  { %14339 = vmatprep.subr.bf16.mxu1 %v15505_v43  ;;  %v14364_v30 = vpack.c.bf16 %v6417_v21, %v6416_v5 }
0x2d73   :  { %14341 = vmatpush3.bf16.msra.mxu1 %v14340_v26 }
0x2d74   :  { %14342 = vmatprep.subr.bf16.mxu1 %v15505_v43 }
0x2d76   :  { %v15121_v16 = vpop.eup %15120 }
0x2d77   :  { %14344 = vmatpush3.bf16.msra.mxu1 %v14343_v6  ;;  %v6014_v4 = vadd.f32 1.0, %v15121_v16 }
0x2d78   :  { %14345 = vmatprep.subr.bf16.mxu1 %v15505_v43 }
0x2d79   :  { %15122 = vrcp.f32 %v6014_v4  ;;  %v10458_v4 = vld [vmem:[%s18703_s1 + $0xc] sm:$0xf] }
0x2d7b   :  { %14347 = vmatpush3.bf16.msra.mxu1 %v14346_v39 }
0x2d7c   :  { %14348 = vmatprep.subr.bf16.mxu1 %v15505_v43 }
0x2d83   :  { %v15123_v46 = vpop.eup %15122 }
0x2d84   :  { %v6305_v12 = vsub.f32 1.0, %v15123_v46  ;;  %v6304_v26 = vmul.f32 %v15123_v46, %v17227_v15  ;;  %v6414_v15 = vld [vmem:[#allocation12 + $0x8] sm:$0xff]  ;;  %v6680_v46 = vld [vmem:[#allocation15] sm:$0xff] }
0x2e21   :  { %v6156_v32 = vpop.f32.mrb[72].mxu1 }
0x2e22   :  { %v6160_v33 = vmul.f32 2.0, %v6156_v32  ;;  %v12509_v35 = vpop.f32.mrb[73].mxu1 }
0x2e23   :  { %v10446_v35 = vld [vmem:[#allocation10] ss:$0 sm:$0xff] }
0x2e24   :  { %v6161_v36 = vsub.f32 %v6160_v33, %v17410_v25  ;;  %v6316_v25 = vld [vmem:[%s18627_s13 + $0x40] sm:$0xff]  ;;  %v6415_v33 = vld [vmem:[#allocation12 + $0x10] sm:$0xf] }
0x2e25   :  { %v14349_v56 = vpack.c.bf16 %v6317_v55, %v6316_v25 }
0x2e26   :  { %12543 = vmatmul.mubr.f32.vlgmr.msra.gmra.mrb[54].mxu0 %v6161_v36 }
0x2e27   :  { %12586 = vmatprep.mubr.msk.f32.mxu0 %vm15507_vm3, %v15504_v42  ;;  %14350 = vmatpush3.bf16.msra.mxu1 %v14349_v56 }
0x2e28   :  { %14351 = vmatprep.subr.bf16.mxu1 %v15505_v43 }
0x2e2b   :  { %14353 = vmatpush3.bf16.msra.mxu1 %v14352_v63 }
0x2e2c   :  { %14354 = vmatprep.subr.bf16.mxu1 %v15505_v43 }
0x2e2f   :  { %14356 = vmatpush3.bf16.msra.mxu1 %v14355_v29 }
0x2e30   :  { %14357 = vmatprep.subr.bf16.mxu1 %v15505_v43 }
0x2e33   :  { %14359 = vmatpush3.bf16.msra.mxu1 %v14358_v58 }
0x2e34   :  { %14363 = vmatprep.subr.bf16.mxu1 %v15505_v43 }
0x2e41   :  { %v11133_v24 = vpop.f32.mrb[74].mxu1 }
0x2e42   :  { %v11134_v37 = vpop.f32.mrb[75].mxu1 }
0x2e43   :  { %v11135_v3 = vadd.f32 %v11134_v37, %v11133_v24  ;;  %v6405_v24 = vpop.permute.xlu0 %6404 }
0x2ef9   :  { %v6298_v19 = vpop.f32.mrb[54].mxu0 }
0x2efa   :  { %v6299_v59 = vadd.f32 %v11135_v3, %v6298_v19  ;;  %v12544_v20 = vpop.f32.mrb[55].mxu0 }
0x2efc   :  { %v6302_v23 = vadd.f32 %v6299_v59, %v16065_v48  ;;  %v6413_v48 = vld [vmem:[#allocation12] sm:$0xff] }
0x2efd   :  { %v14361_v32 = vpack.c.bf16 %v6414_v15, %v6413_v48  ;;  %v15205_v48 = vld [vmem:[%s18704_s19] sm:$0xf] }
0x2efe   :  { %15124 = vtanh.f32 %v6302_v23 }
0x2eff   :  { %14362 = vmatpush3.bf16.msra.mxu0 %v14361_v32 }
0x2f00   :  { %12584 = vmatprep.subr.mxu0 %v15504_v42 }
0x2f03   :  { %12585 = vmatpush3.msk.msra.mxu0 %vm1665_vm4, %v6415_v33 }
0x2f04   :  { %12596 = vmatprep.subr.mxu0 %v15504_v42 }
0x2f08   :  { %v15125_v49 = vpop.eup %15124 }
0x2f09   :  { %v6306_v27 = vmul.f32 %v15125_v49, %v6305_v12  ;;  %v6681_v12 = vld [vmem:[#allocation15 + $0x8] sm:$0xff] }
0x2f0a   :  { %v14367_v5 = vpack.c.bf16 %v6681_v12, %v6680_v46 }
0x2f0b   :  { %v17663_v6 = vadd.f32 %v6306_v27, %v6304_v26  ;;  %v15204_v26 = vld [vmem:[%s18702_s23] sm:$0x3] }
0x2f0d   :  { %12578 = vmatmul.mubr.f32.vlgmr.msra.gmra.mrb[76].mxu1 %v17663_v6 }
0x2f0e   :  { %14365 = vmatpush3.bf16.msra.mxu1 %v14364_v30  ;;  %12593 = vmatprep.mubr.msk.f32.mxu1 %vm15507_vm3, %v15504_v42 }
0x2f0f   :  { %14366 = vmatprep.subr.bf16.mxu1 %v15505_v43 }
0x2f11   :  { %12594 = vmatmul.mubr.msk.f32.vlgmr.msra.gmra.mrb[78].mxu1 %vm267_vm0, %v17265_v45  ;;  %v6409_v45 = vpop.permute.xlu1 %6408 }
0x2f12   :  { %12605 = vmatprep.mubr.msk.f32.mxu1 %vm15507_vm3, %v15504_v42  ;;  %14368 = vmatpush3.bf16.msra.mxu1 %v14367_v5 }
0x2f13   :  { %14369 = vmatprep.subr.bf16.mxu1 %v15505_v43 }
0x2fe0   :  { %v6397_v36 = vpop.f32.mrb[76].mxu1 }
0x2fe1   :  { %v6398_v37 = vadd.f32 %v10446_v35, %v6397_v36  ;;  %v12579_v3 = vpop.f32.mrb[77].mxu1 }
0x2fe2   :  { %v10454_v3 = vld [vmem:[#allocation16] ss:$0 sm:$0xff] }
0x2fe3   :  { %v6411_v51 = vsel %vm267_vm0, %v6398_v37, %v6405_v24 }
0x2fe4   :  { %v6412_v39 = vsel %vm1646_vm5, %v6411_v51, %v6409_v45  ;;  %v6576_v25 = vpop.f32.mrb[78].mxu1 }
0x2fe5   :  { %v6577_v55 = vadd.f32 %v10450_v2, %v6576_v25  ;;  %12587 = vmatmul.mubr.msk.f32.vlgmr.msra.gmra.mrb[56].mxu0 %vm1661_vm6, %v6412_v39  ;;  %v12595_v56 = vpop.f32.mrb[79].mxu1 }
0x2fe6   :  { %12598 = vmatprep.mubr.msk.f32.mxu0 %vm15507_vm3, %v15504_v42 }
0x2fe7   :  { %6588 = vrot.lane.b32.xlu0 %v6577_v55, %s18715_s21 }
0x3059   :  { %v6589_v11 = vpop.permute.xlu0 %6588 }
0x30b8   :  { %v6498_v0 = vpop.f32.mrb[56].mxu0 }
0x30b9   :  { %v6499_v63 = vadd.f32 %v10447_v57, %v6498_v0  ;;  %v12588_v18 = vpop.f32.mrb[57].mxu0 }
0x30bb   :  { %v6580_v38 = vadd.f32 %v6577_v55, %v6499_v63 }
0x30bd   :  { %v10452_v29 = vmul.f32 -1.442695, %v6580_v38  ;;  %v6879_v38 = vld [vmem:[#allocation18] sm:$0xff] }
0x30bf   :  { %15126 = vpow2.f32 %v10452_v29  ;;  %v6880_v29 = vld [vmem:[#allocation18 + $0x8] sm:$0xff] }
0x30c9   :  { %v15127_v10 = vpop.eup %15126 }
0x30ca   :  { %v6584_v8 = vadd.f32 1.0, %v15127_v10  ;;  %v6881_v10 = vld [vmem:[#allocation18 + $0x10] sm:$0xff] }
0x30cc   :  { %15128 = vrcp.f32 %v6584_v8 }
0x30d6   :  { %v15129_v58 = vpop.eup %15128 }
0x30d7   :  { %v6591_v14 = vmul.f32 %v15129_v58, %v6589_v11  ;;  %v6598_v19 = vsub.f32 1.0, %v15129_v58  ;;  %v6604_v20 = vmul.f32 %v15129_v58, %v17260_v1  ;;  %v6884_v1 = vld [vmem:[%s18636_s22 + $0x8] sm:$0xff]  ;;  %v14370_v58 = vpack.c.bf16 %v6880_v29, %v6879_v38  ;;  %v7163_v38 = vld [vmem:[#allocation7] sm:$0xff]  ;;  %v7165_v29 = vld [vmem:[#allocation7 + $0x10] sm:$0xff] }
0x30d8   :  { %v6882_v11 = vld [vmem:[#allocation18 + $0x18] sm:$0x3] }
0x30d9   :  { %6593 = vrot.lane.b32.xlu1 %v6591_v14, %s18712_s0 }
0x314b   :  { %v6594_v50 = vpop.permute.xlu1 %6593 }
0x314c   :  { %v6596_v53 = vadd.f32 %v6594_v50, %v6499_v63 }
0x314e   :  { %15130 = vtanh.f32 %v6596_v53  ;;  %v14373_v53 = vpack.c.bf16 %v6882_v11, %v6881_v10  ;;  %v7168_v10 = vld [vmem:[#allocation7 + $0x28] sm:$0xff] }
0x3158   :  { %v15131_v16 = vpop.eup %15130 }
0x3159   :  { %6600 = vrot.lane.b32.xlu0 %v15131_v16, %s18713_s11 }
0x315d   :  { %6786 = vrot.lane.b32.xlu0 %v10458_v4, %s18694_s20 }
0x3161   :  { %6976 = vrot.lane.b32.xlu0 %v17351_v62, %s18713_s11 }
0x3165   :  { %6874 = vrot.lane.b32.xlu0 %v17396_v13, %s18710_s4  ;;  %v6883_v13 = vld [vmem:[%s18636_s22] sm:$0xff] }
0x3166   :  { %v14377_v30 = vpack.c.bf16 %v6884_v1, %v6883_v13  ;;  %v10460_v1 = vld [vmem:[#allocation19] ss:$0 sm:$0xff] }
0x31cb   :  { %v6601_v59 = vpop.permute.xlu0 %6600 }
0x31cc   :  { %v6603_v23 = vmul.f32 %v6601_v59, %v6598_v19 }
0x31ce   :  { %v17696_v21 = vadd.f32 %v6604_v20, %v6603_v23  ;;  %v10463_v20 = vld [vmem:[%s18638_s24] ss:$0 sm:$0xff] }
0x31cf   :  { %v6787_v27 = vpop.permute.xlu0 %6786 }
0x31d0   :  { %6607 = vrot.lane.b32.xlu1 %v17696_v21, %s18713_s11 }
0x31d3   :  { %v6977_v15 = vpop.permute.xlu0 %6976 }
0x31d7   :  { %v6875_v12 = vpop.permute.xlu0 %6874 }
0x3242   :  { %v17701_v49 = vpop.permute.xlu1 %6607 }
0x3243   :  { %12597 = vmatpush3.msra.mxu0 %v17701_v49 }
0x3244   :  { %12599 = vmatmul.mubr.msk.f32.vlgmr.msra.gmra.mrb[58].mxu0 %vm1848_vm7, %v15204_v26  ;;  %12608 = vmatprep.subr.mxu0 %v15504_v42 }
0x3245   :  { %12609 = vmatpush3.msra.mxu0 %v6398_v37  ;;  %12610 = vmatprep.mubr.msk.f32.mxu0 %vm15507_vm3, %v15504_v42 }
0x3246   :  { %14376 = vmatprep.subr.bf16.mxu0 %v15505_v43 }
0x3248   :  { %12611 = vmatmul.mubr.msk.f32.vlgmr.msra.gmra.mrb[60].mxu0 %vm1848_vm7, %v15205_v48 }
0x3249   :  { %14378 = vmatpush3.bf16.msra.mxu0 %v14377_v30  ;;  %12628 = vmatprep.mubr.msk.f32.mxu0 %vm15507_vm3, %v15504_v42 }
0x324a   :  { %14379 = vmatprep.subr.bf16.mxu0 %v15505_v43 }
0x324c   :  { %12629 = vmatmul.mubr.msk.f32.vlgmr.msra.gmra.mrb[62].mxu0 %vm267_vm0, %v6977_v15 }
0x324d   :  { %14381 = vmatpush3.bf16.msra.mxu0 %v17345_v7  ;;  %12635 = vmatprep.mubr.msk.f32.mxu0 %vm15507_vm3, %v15504_v42 }
0x324e   :  { %14406 = vmatprep.subr.bf16.mxu0 %v15505_v43 }
0x3317   :  { %v6676_v32 = vpop.f32.mrb[58].mxu0 }
0x3318   :  { %v12600_v33 = vpop.f32.mrb[59].mxu0  ;;  %12606 = vmatmul.mubr.msk.f32.vlgmr.msra.gmra.mrb[80].mxu1 %vm267_vm0, %v6676_v32 }
0x3319   :  { %12621 = vmatprep.mubr.msk.f32.mxu1 %vm15507_vm3, %v15504_v42  ;;  %14371 = vmatpush3.bf16.msra.mxu1 %v14370_v58  ;;  %v14432_v58 = vpack.c.bf16 %v7165_v29, %v7163_v38  ;;  %v7196_v38 = vld [vmem:[#allocation7 + $0x108] sm:$0xff]  ;;  %v7198_v29 = vld [vmem:[#allocation7 + $0x118] sm:$0xff] }
0x331a   :  { %14372 = vmatprep.subr.bf16.mxu1 %v15505_v43 }
0x331b   :  { %v6865_v35 = vpop.f32.mrb[60].mxu0 }
0x331c   :  { %v12612_v36 = vpop.f32.mrb[61].mxu0 }
0x331d   :  { %14375 = vmatpush3.bf16.msk.msra.mxu1 %vm16430_vm13, %v14373_v53  ;;  %v7172_v53 = vld [vmem:[#allocation7 + $0x48] sm:$0xff] }
0x331e   :  { %14382 = vmatprep.subr.bf16.mxu1 %v15505_v43 }
0x331f   :  { %v7046_v24 = vpop.f32.mrb[62].mxu0 }
0x3320   :  { %v12630_v37 = vpop.f32.mrb[63].mxu0  ;;  %v7047_v23 = vadd.f32 %v10463_v20, %v7046_v24  ;;  %v7173_v20 = vld [vmem:[#allocation7 + $0x50] sm:$0xff] }
0x33eb   :  { %v6758_v45 = vpop.f32.mrb[80].mxu1 }
0x33ec   :  { %v6759_v2 = vadd.f32 %v10454_v3, %v6758_v45  ;;  %v12607_v7 = vpop.f32.mrb[81].mxu1 }
0x33ee   :  { %10456 = vst.msk [vmem:[%s18642_s28 + $0x6] sm:$0x3] %vm2004_vm8, %v6759_v2  ;;  %v10457_v51 = vmul.f32 -1.442695, %v6759_v2  ;;  %v6793_v4 = vrot.slane %v6759_v2, %v16100_v60 }
0x33f0   :  { %15132 = vpow2.f32 %v10457_v51 }
0x33fa   :  { %v15133_v39 = vpop.eup %15132 }
0x33fb   :  { %v6767_v25 = vadd.f32 1.0, %v15133_v39 }
0x33fd   :  { %15134 = vrcp.f32 %v6767_v25 }
0x3407   :  { %v15135_v55 = vpop.eup %15134 }
0x3408   :  { %v6770_v56 = vmul.f32 0.9, %v15135_v55 }
0x340a   :  { %v6771_v57 = vadd.f32 0.1, %v6770_v56 }
0x340c   :  { %15136 = vrsqrt.f32 %v6771_v57  ;;  %vm6774_vm12 = vcmp.eq.f32.partialorder %v6771_v57, inf  ;;  %v6777_v18 = vand.u32 2147483648, %v6771_v57  ;;  %vm6776_vm2 = vcmp.eq.f32.partialorder %v6771_v57, 0.0 }
0x3416   :  { %v15137_v0 = vpop.eup %15136 }
0x3417   :  { %v6773_v63 = vmul.f32 %v15137_v0, %v6771_v57 }
0x3419   :  { %v6775_v8 = vsel %vm6774_vm12, %v6771_v57, %v6773_v63  ;;  %v7166_v63 = vld [vmem:[#allocation7 + $0x18] sm:$0xff] }
0x341a   :  { %v6778_v14 = vsel %vm6776_vm2, %v6777_v18, %v6775_v8  ;;  %v7170_v8 = vld [vmem:[#allocation7 + $0x38] sm:$0xff] }
0x341b   :  { %v6784_v50 = vrot.slane %v6778_v14, %v16100_v60  ;;  %v14434_v11 = vpack.c.bf16 %v7170_v8, %v7168_v10  ;;  %v7167_v14 = vld [vmem:[#allocation7 + $0x20] sm:$0xff]  ;;  %v14462_v8 = vpack.c.bf16 %v7198_v29, %v7196_v38 }
0x341d   :  { %v6789_v16 = vmul.f32 %v6787_v27, %v6784_v50  ;;  %v7169_v50 = vld [vmem:[#allocation7 + $0x30] sm:$0xff] }
0x341f   :  { %6795 = vrot.lane.b32.xlu1 %v6789_v16, %s18711_s15  ;;  %v7174_v16 = vld [vmem:[#allocation7 + $0x58] sm:$0xff] }
0x3491   :  { %v6796_v19 = vpop.permute.xlu1 %6795 }
0x3492   :  { %v6798_v59 = vadd.f32 %v6796_v19, %v6793_v4  ;;  %v14436_v4 = vpack.c.bf16 %v7169_v50, %v7167_v14  ;;  %v14438_v19 = vpack.c.bf16 %v7174_v16, %v7172_v53  ;;  %v7200_v14 = vld [vmem:[#allocation7 + $0x128] sm:$0xff]  ;;  %v7202_v50 = vld [vmem:[#allocation7 + $0x138] sm:$0xff] }
0x3493   :  { %v14466_v16 = vpack.c.bf16 %v7202_v50, %v7200_v14 }
0x3494   :  { %6870 = vrot.lane.b32.xlu1 %v6798_v59, %s18673_s10  ;;  %v7171_v59 = vld [vmem:[#allocation7 + $0x40] sm:$0xff] }
0x3498   :  { %7058 = vrot.lane.b32.xlu1 %v7047_v23, %s18715_s21 }
0x3506   :  { %v6871_v46 = vpop.permute.xlu1 %6870 }
0x3507   :  { %v6877_v5 = vsel %vm267_vm0, %v6865_v35, %v6871_v46  ;;  %v7178_v46 = vld [vmem:[#allocation7 + $0x78] sm:$0xff] }
0x3508   :  { %v6878_v13 = vsel %vm2122_vm14, %v6877_v5, %v6875_v12  ;;  %v14440_v12 = vpack.c.bf16 %v7173_v20, %v7171_v59  ;;  %v7204_v59 = vld [vmem:[#allocation7 + $0x148] sm:$0xff]  ;;  %v7206_v20 = vld [vmem:[#allocation7 + $0x158] sm:$0xff] }
0x3509   :  { %12622 = vmatmul.mubr.msk.f32.vlgmr.msra.gmra.mrb[82].mxu1 %vm2138_vm15, %v6878_v13  ;;  %v7175_v13 = vld [vmem:[#allocation7 + $0x60] sm:$0xff] }
0x350a   :  { %14384 = vmatpush3.bf16.msra.mxu1 %v15964_v9  ;;  %12670 = vmatprep.mubr.msk.f32.mxu1 %vm15507_vm3, %v15504_v42  ;;  %v7059_v36 = vpop.permute.xlu1 %7058 }
0x350b   :  { %14385 = vmatprep.subr.bf16.mxu1 %v15505_v43 }
0x350e   :  { %14387 = vmatpush3.bf16.msra.mxu1 %v15976_v17 }
0x350f   :  { %14388 = vmatprep.subr.bf16.mxu1 %v15505_v43 }
0x3512   :  { %14390 = vmatpush3.bf16.msra.mxu1 %v15988_v22 }
0x3513   :  { %14391 = vmatprep.subr.bf16.mxu1 %v15505_v43 }
0x3516   :  { %14393 = vmatpush3.bf16.msra.mxu1 %v16000_v28 }
0x3517   :  { %14394 = vmatprep.subr.bf16.mxu1 %v15505_v43 }
0x351a   :  { %14396 = vmatpush3.bf16.msra.mxu1 %v16012_v34 }
0x351b   :  { %14397 = vmatprep.subr.bf16.mxu1 %v15505_v43 }
0x351e   :  { %14399 = vmatpush3.bf16.msra.mxu1 %v16024_v40 }
0x351f   :  { %14400 = vmatprep.subr.bf16.mxu1 %v15505_v43 }
0x3522   :  { %14402 = vmatpush3.bf16.msra.mxu1 %v16034_v44 }
0x3523   :  { %14403 = vmatprep.subr.bf16.mxu1 %v15505_v43 }
0x3526   :  { %14405 = vmatpush3.bf16.msra.mxu1 %v16042_v47 }
0x3527   :  { %14526 = vmatprep.subr.bf16.mxu1 %v15505_v43 }
0x3529   :  { %12671 = vmatmul.mubr.f32.vlgmr.msra.gmra.mrb[84].mxu1 %v17663_v6 }
0x352a   :  { %14528 = vmatpush3.bf16.msra.mxu1 %v15964_v9  ;;  %12740 = vmatprep.mubr.msk.f32.mxu1 %vm15507_vm3, %v15504_v42 }
0x352b   :  { %14529 = vmatprep.subr.bf16.mxu1 %v15505_v43 }
0x352e   :  { %14531 = vmatpush3.bf16.msra.mxu1 %v15976_v17 }
0x352f   :  { %14532 = vmatprep.subr.bf16.mxu1 %v15505_v43 }
0x3532   :  { %14534 = vmatpush3.bf16.msra.mxu1 %v15988_v22 }
0x3533   :  { %14535 = vmatprep.subr.bf16.mxu1 %v15505_v43 }
0x3536   :  { %14537 = vmatpush3.bf16.msra.mxu1 %v16000_v28 }
0x3537   :  { %14538 = vmatprep.subr.bf16.mxu1 %v15505_v43 }
0x353a   :  { %14540 = vmatpush3.bf16.msra.mxu1 %v16012_v34 }
0x353b   :  { %14541 = vmatprep.subr.bf16.mxu1 %v15505_v43 }
0x353e   :  { %14543 = vmatpush3.bf16.msra.mxu1 %v16024_v40 }
0x353f   :  { %14544 = vmatprep.subr.bf16.mxu1 %v15505_v43 }
0x3542   :  { %14546 = vmatpush3.bf16.msra.mxu1 %v16034_v44 }
0x3543   :  { %14547 = vmatprep.subr.bf16.mxu1 %v15505_v43 }
0x3546   :  { %14549 = vmatpush3.bf16.msra.mxu1 %v16042_v47 }
0x3547   :  { %14550 = vmatprep.subr.bf16.mxu1 %v15505_v43 }
0x35dc   :  { %v6965_v26 = vpop.f32.mrb[82].mxu1 }
0x35dd   :  { %v6966_v27 = vadd.f32 %v10460_v1, %v6965_v26  ;;  %v12623_v30 = vpop.f32.mrb[83].mxu1  ;;  %v7177_v1 = vld [vmem:[#allocation7 + $0x70] sm:$0xff]  ;;  %v7180_v26 = vld [vmem:[#allocation7 + $0x88] sm:$0xff] }
0x35de   :  { %v14444_v30 = vpack.c.bf16 %v7177_v1, %v7175_v13  ;;  %v7208_v13 = vld [vmem:[#allocation7 + $0x168] sm:$0xff]  ;;  %v7210_v1 = vld [vmem:[#allocation7 + $0x178] sm:$0xff] }
0x35df   :  { %v7050_v48 = vadd.f32 %v7047_v23, %v6966_v27  ;;  %v7176_v23 = vld [vmem:[#allocation7 + $0x68] sm:$0xff] }
0x35e0   :  { %v14442_v5 = vpack.c.bf16 %v7178_v46, %v7176_v23  ;;  %v14470_v46 = vpack.c.bf16 %v7206_v20, %v7204_v59 }
0x35e1   :  { %v10465_v15 = vmul.f32 -1.442695, %v7050_v48 }
0x35e3   :  { %15138 = vpow2.f32 %v10465_v15  ;;  %v7179_v15 = vld [vmem:[#allocation7 + $0x80] sm:$0xff] }
0x35ed   :  { %v15139_v32 = vpop.eup %15138 }
0x35ee   :  { %v7054_v33 = vadd.f32 1.0, %v15139_v32  ;;  %v7181_v32 = vld [vmem:[#allocation7 + $0x90] sm:$0xff] }
0x35f0   :  { %15140 = vrcp.f32 %v7054_v33  ;;  %v7184_v33 = vld [vmem:[#allocation7 + $0xa8] sm:$0xff] }
0x35fa   :  { %v15141_v35 = vpop.eup %15140 }
0x35fb   :  { %v7061_v24 = vmul.f32 %v15141_v35, %v7059_v36  ;;  %v7068_v51 = vsub.f32 1.0, %v15141_v35  ;;  %v7074_v25 = vmul.f32 %v15141_v35, %v17351_v62  ;;  %v7164_v62 = vld [vmem:[#allocation7 + $0x8] sm:$0xff]  ;;  %v7186_v35 = vld [vmem:[#allocation7 + $0xb8] sm:$0xff]  ;;  %v14448_v36 = vpack.c.bf16 %v7181_v32, %v7179_v15 }
0x35fc   :  { %v7373_v37 = vpop.f32.mrb[84].mxu1  ;;  %v14430_v18 = vpack.c.bf16 %v7166_v63, %v7164_v62  ;;  %v7191_v63 = vld [vmem:[#allocation7 + $0xe0] sm:$0xff]  ;;  %v7212_v15 = vld [vmem:[#allocation7 + $0x188] sm:$0xff]  ;;  %v7214_v32 = vld [vmem:[#allocation7 + $0x198] sm:$0xff] }
0x35fd   :  { %v12672_v3 = vpop.f32.mrb[85].mxu1  ;;  %7063 = vrot.lane.b32.xlu0 %v7061_v24, %s18712_s0  ;;  %v14450_v24 = vpack.c.bf16 %v7186_v35, %v7184_v33  ;;  %v14478_v35 = vpack.c.bf16 %v7214_v32, %v7212_v15 }
0x35fe   :  { %v7185_v3 = vld [vmem:[#allocation7 + $0xb0] sm:$0xff] }
0x366f   :  { %v7064_v45 = vpop.permute.xlu0 %7063 }
0x3670   :  { %v7066_v2 = vadd.f32 %v7064_v45, %v6966_v27  ;;  %v7182_v27 = vld [vmem:[#allocation7 + $0x98] sm:$0xff]  ;;  %v7188_v45 = vld [vmem:[#allocation7 + $0xc8] sm:$0xff] }
0x3671   :  { %v14446_v48 = vpack.c.bf16 %v7182_v27, %v7180_v26  ;;  %v14474_v27 = vpack.c.bf16 %v7210_v1, %v7208_v13 }
0x3672   :  { %15142 = vtanh.f32 %v7066_v2  ;;  %v7190_v2 = vld [vmem:[#allocation7 + $0xd8] sm:$0xff] }
0x367c   :  { %v15143_v7 = vpop.eup %15142 }
0x367d   :  { %7070 = vrot.lane.b32.xlu1 %v15143_v7, %s18713_s11 }
0x36ef   :  { %v7071_v39 = vpop.permute.xlu1 %7070 }
0x36f0   :  { %v7073_v55 = vmul.f32 %v7071_v39, %v7068_v51  ;;  %v14454_v51 = vpack.c.bf16 %v7190_v2, %v7188_v45  ;;  %v7187_v39 = vld [vmem:[#allocation7 + $0xc0] sm:$0xff] }
0x36f2   :  { %v17792_v56 = vadd.f32 %v7074_v25, %v7073_v55  ;;  %v7189_v25 = vld [vmem:[#allocation7 + $0xd0] sm:$0xff]  ;;  %v7192_v55 = vld [vmem:[#allocation7 + $0xe8] sm:$0xff] }
0x36f4   :  { %v7076_v57 = vmax.f32 %v17792_v56, 0.0 }
0x36f6   :  { %7087 = vrot.lane.b32.xlu0 %v7076_v57, %s18713_s11  ;;  %v7194_v57 = vld [vmem:[#allocation7 + $0xf8] sm:$0xff] }
0x36f7   :  { %v14458_v62 = vpack.c.bf16 %v7194_v57, %v7192_v55 }
0x3768   :  { %v7088_v0 = vpop.permute.xlu0 %7087 }
0x3769   :  { %12636 = vmatmul.mubr.msk.f32.vlgmr.msra.gmra.mrb[64].mxu0 %vm267_vm0, %v7088_v0  ;;  %v14456_v0 = vpack.c.bf16 %v7189_v25, %v7187_v39  ;;  %v7220_v39 = vld [vmem:[#allocation7 + $0x1c8] sm:$0xff]  ;;  %v7222_v25 = vld [vmem:[#allocation7 + $0x1d8] sm:$0xff] }
0x376a   :  { %14408 = vmatpush3.bf16.msra.mxu0 %v15964_v9  ;;  %12705 = vmatprep.mubr.msk.f32.mxu0 %vm15507_vm3, %v15504_v42  ;;  %v14486_v57 = vpack.c.bf16 %v7222_v25, %v7220_v39 }
0x376b   :  { %14409 = vmatprep.subr.bf16.mxu0 %v15505_v43 }
0x376e   :  { %14411 = vmatpush3.bf16.msra.mxu0 %v15976_v17 }
0x376f   :  { %14412 = vmatprep.subr.bf16.mxu0 %v15505_v43 }
0x3772   :  { %14414 = vmatpush3.bf16.msra.mxu0 %v15988_v22 }
0x3773   :  { %14415 = vmatprep.subr.bf16.mxu0 %v15505_v43 }
0x3776   :  { %14417 = vmatpush3.bf16.msra.mxu0 %v16000_v28 }
0x3777   :  { %14418 = vmatprep.subr.bf16.mxu0 %v15505_v43 }
0x377a   :  { %14420 = vmatpush3.bf16.msra.mxu0 %v16012_v34 }
0x377b   :  { %14421 = vmatprep.subr.bf16.mxu0 %v15505_v43 }
0x377e   :  { %14423 = vmatpush3.bf16.msra.mxu0 %v16024_v40 }
0x377f   :  { %14424 = vmatprep.subr.bf16.mxu0 %v15505_v43 }
0x3782   :  { %14426 = vmatpush3.bf16.msra.mxu0 %v16034_v44 }
0x3783   :  { %14427 = vmatprep.subr.bf16.mxu0 %v15505_v43 }
0x3786   :  { %14429 = vmatpush3.bf16.msra.mxu0 %v16042_v47 }
0x3787   :  { %14431 = vmatprep.subr.bf16.mxu0 %v14430_v18  ;;  %v7193_v18 = vld [vmem:[#allocation7 + $0xf0] sm:$0xff] }
0x3788   :  { %v14460_v10 = vpack.c.bf16 %v7193_v18, %v7191_v63  ;;  %v7224_v63 = vld [vmem:[#allocation7 + $0x1e8] sm:$0xff]  ;;  %v7226_v18 = vld [vmem:[#allocation7 + $0x1f8] sm:$0xff] }
0x3789   :  { %12706 = vmatmul.mubr.f32.vlgmr.msra.gmra.mrb[66].mxu0 %v7373_v37  ;;  %v14490_v29 = vpack.c.bf16 %v7226_v18, %v7224_v63 }
0x378a   :  { %14433 = vmatpush1.bf16.msra.mxu0 %v14432_v58  ;;  %7513 = vmatprep.mubr.f32.mxu0 %v7373_v37  ;;  %v7183_v37 = vld [vmem:[#allocation7 + $0xa0] sm:$0xff] }
0x378b   :  { %14435 = vmatprep.subr.bf16.mxu0 %v14434_v11  ;;  %v14452_v7 = vpack.c.bf16 %v7185_v3, %v7183_v37  ;;  %v7195_v58 = vld [vmem:[#allocation7 + $0x100] sm:$0xff]  ;;  %v7197_v11 = vld [vmem:[#allocation7 + $0x110] sm:$0xff]  ;;  %v7216_v37 = vld [vmem:[#allocation7 + $0x1a8] sm:$0xff] }
0x378c   :  { %v14464_v53 = vpack.c.bf16 %v7197_v11, %v7195_v58  ;;  %v7218_v3 = vld [vmem:[#allocation7 + $0x1b8] sm:$0xff]  ;;  %v7228_v58 = vld [vmem:[#allocation7 + $0x208] sm:$0xff] }
0x378d   :  { %v14482_v2 = vpack.c.bf16 %v7218_v3, %v7216_v37  ;;  %v7230_v11 = vld [vmem:[#allocation7 + $0x218] sm:$0xff] }
0x378e   :  { %14437 = vmatpush1.bf16.msra.mxu0 %v14436_v4  ;;  %v7199_v4 = vld [vmem:[#allocation7 + $0x120] sm:$0xff]  ;;  %v14494_v50 = vpack.c.bf16 %v7230_v11, %v7228_v58 }
0x378f   :  { %14439 = vmatprep.subr.bf16.mxu0 %v14438_v19  ;;  %v7201_v19 = vld [vmem:[#allocation7 + $0x130] sm:$0xff] }
0x3790   :  { %v14468_v23 = vpack.c.bf16 %v7201_v19, %v7199_v4  ;;  %v7232_v4 = vld [vmem:[#allocation7 + $0x228] sm:$0xff]  ;;  %v7234_v19 = vld [vmem:[#allocation7 + $0x238] sm:$0xff] }
0x3791   :  { %v14498_v20 = vpack.c.bf16 %v7234_v19, %v7232_v4 }
0x3792   :  { %14441 = vmatpush1.bf16.msra.mxu0 %v14440_v12  ;;  %v7203_v12 = vld [vmem:[#allocation7 + $0x140] sm:$0xff] }
0x3793   :  { %14443 = vmatprep.subr.bf16.mxu0 %v14442_v5  ;;  %v7205_v5 = vld [vmem:[#allocation7 + $0x150] sm:$0xff] }
0x3794   :  { %v14472_v26 = vpack.c.bf16 %v7205_v5, %v7203_v12  ;;  %v7236_v12 = vld [vmem:[#allocation7 + $0x248] sm:$0xff]  ;;  %v7238_v5 = vld [vmem:[#allocation7 + $0x258] sm:$0xff] }
0x3795   :  { %v14502_v1 = vpack.c.bf16 %v7238_v5, %v7236_v12 }
0x3796   :  { %14445 = vmatpush1.bf16.msra.mxu0 %v14444_v30  ;;  %v7207_v30 = vld [vmem:[#allocation7 + $0x160] sm:$0xff] }
0x3797   :  { %14447 = vmatprep.subr.bf16.mxu0 %v14446_v48  ;;  %v7209_v48 = vld [vmem:[#allocation7 + $0x170] sm:$0xff] }
0x3798   :  { %v14476_v33 = vpack.c.bf16 %v7209_v48, %v7207_v30  ;;  %v7240_v30 = vld [vmem:[#allocation7 + $0x268] sm:$0xff]  ;;  %v7242_v48 = vld [vmem:[#allocation7 + $0x278] sm:$0xff] }
0x3799   :  { %v14506_v32 = vpack.c.bf16 %v7242_v48, %v7240_v30 }
0x379a   :  { %14449 = vmatpush1.bf16.msra.mxu0 %v14448_v36  ;;  %v7211_v36 = vld [vmem:[#allocation7 + $0x180] sm:$0xff] }
0x379b   :  { %14451 = vmatprep.subr.bf16.mxu0 %v14450_v24  ;;  %v7213_v24 = vld [vmem:[#allocation7 + $0x190] sm:$0xff] }
0x379c   :  { %v14480_v45 = vpack.c.bf16 %v7213_v24, %v7211_v36  ;;  %v7244_v36 = vld [vmem:[#allocation7 + $0x288] sm:$0xff]  ;;  %v7246_v24 = vld [vmem:[#allocation7 + $0x298] sm:$0xff] }
0x379d   :  { %v14510_v3 = vpack.c.bf16 %v7246_v24, %v7244_v36  ;;  %v7259_v36 = vld [vmem:[%s18699_s2] sm:$0xff]  ;;  %v7260_v24 = vld [vmem:[%s18699_s2 + $0x8] sm:$0xff] }
0x379e   :  { %14453 = vmatpush1.bf16.msra.mxu0 %v14452_v7  ;;  %v7215_v7 = vld [vmem:[#allocation7 + $0x1a0] sm:$0xff] }
0x379f   :  { %14455 = vmatprep.subr.bf16.mxu0 %v14454_v51  ;;  %v7217_v51 = vld [vmem:[#allocation7 + $0x1b0] sm:$0xff] }
0x37a0   :  { %v14484_v55 = vpack.c.bf16 %v7217_v51, %v7215_v7  ;;  %v7248_v7 = vld [vmem:[#allocation7 + $0x2a8] sm:$0xff]  ;;  %v7250_v51 = vld [vmem:[#allocation7 + $0x2b8] sm:$0xff] }
0x37a1   :  { %v14514_v25 = vpack.c.bf16 %v7250_v51, %v7248_v7  ;;  %v7261_v7 = vld [vmem:[%s18699_s2 + $0x10] sm:$0xff]  ;;  %v7262_v51 = vld [vmem:[%s18699_s2 + $0x18] sm:$0xff] }
0x37a2   :  { %14457 = vmatpush1.bf16.msra.mxu0 %v14456_v0  ;;  %v7219_v0 = vld [vmem:[#allocation7 + $0x1c0] sm:$0xff] }
0x37a3   :  { %14459 = vmatprep.subr.bf16.mxu0 %v14458_v62  ;;  %v7221_v62 = vld [vmem:[#allocation7 + $0x1d0] sm:$0xff] }
0x37a4   :  { %v14488_v38 = vpack.c.bf16 %v7221_v62, %v7219_v0  ;;  %v7252_v0 = vld [vmem:[#allocation7 + $0x2c8] sm:$0xff]  ;;  %v7254_v62 = vld [vmem:[#allocation7 + $0x2d8] sm:$0xff] }
0x37a5   :  { %v14518_v18 = vpack.c.bf16 %v7254_v62, %v7252_v0  ;;  %v14580_v0 = vpack.c.bf16 %v7262_v51, %v7261_v7  ;;  %v7291_v7 = vld [vmem:[%s18699_s2 + $0x100] sm:$0xff]  ;;  %v7292_v51 = vld [vmem:[%s18699_s2 + $0x108] sm:$0xff] }
0x37a6   :  { %14461 = vmatpush1.bf16.msra.mxu0 %v14460_v10  ;;  %v7223_v10 = vld [vmem:[#allocation7 + $0x1e0] sm:$0xff] }
0x37a7   :  { %14463 = vmatprep.subr.bf16.mxu0 %v14462_v8  ;;  %v7225_v8 = vld [vmem:[#allocation7 + $0x1f0] sm:$0xff] }
0x37a8   :  { %v14492_v14 = vpack.c.bf16 %v7225_v8, %v7223_v10  ;;  %v7256_v10 = vld [vmem:[#allocation7 + $0x2e8] sm:$0xff]  ;;  %v7258_v8 = vld [vmem:[#allocation7 + $0x2f8] sm:$0xff] }
0x37a9   :  { %v14522_v11 = vpack.c.bf16 %v7258_v8, %v7256_v10 }
0x37aa   :  { %14465 = vmatpush1.bf16.msra.mxu0 %v14464_v53  ;;  %v7227_v53 = vld [vmem:[#allocation7 + $0x200] sm:$0xff] }
0x37ab   :  { %14467 = vmatprep.subr.bf16.mxu0 %v14466_v16  ;;  %v7229_v16 = vld [vmem:[#allocation7 + $0x210] sm:$0xff] }
0x37ac   :  { %v14496_v59 = vpack.c.bf16 %v7229_v16, %v7227_v53  ;;  %v10466_v16 = vld [vmem:[%s18708_s27] ss:$0 sm:$0xff] }
0x37ae   :  { %14469 = vmatpush1.bf16.msra.mxu0 %v14468_v23  ;;  %v7231_v23 = vld [vmem:[#allocation7 + $0x220] sm:$0xff] }
0x37af   :  { %14471 = vmatprep.subr.bf16.mxu0 %v14470_v46  ;;  %v7233_v46 = vld [vmem:[#allocation7 + $0x230] sm:$0xff] }
0x37b0   :  { %v14500_v13 = vpack.c.bf16 %v7233_v46, %v7231_v23 }
0x37b2   :  { %14473 = vmatpush1.bf16.msra.mxu0 %v14472_v26  ;;  %v7235_v26 = vld [vmem:[#allocation7 + $0x240] sm:$0xff] }
0x37b3   :  { %14475 = vmatprep.subr.bf16.mxu0 %v14474_v27  ;;  %v7237_v27 = vld [vmem:[#allocation7 + $0x250] sm:$0xff] }
0x37b4   :  { %v14504_v15 = vpack.c.bf16 %v7237_v27, %v7235_v26 }
0x37b6   :  { %14477 = vmatpush1.bf16.msra.mxu0 %v14476_v33  ;;  %v7239_v33 = vld [vmem:[#allocation7 + $0x260] sm:$0xff] }
0x37b7   :  { %14479 = vmatprep.subr.bf16.mxu0 %v14478_v35  ;;  %v7241_v35 = vld [vmem:[#allocation7 + $0x270] sm:$0xff] }
0x37b8   :  { %v14508_v37 = vpack.c.bf16 %v7241_v35, %v7239_v33  ;;  %v7276_v33 = vld [vmem:[%s18699_s2 + $0x88] sm:$0xff] }
0x37ba   :  { %14481 = vmatpush1.bf16.msra.mxu0 %v14480_v45  ;;  %v7243_v45 = vld [vmem:[#allocation7 + $0x280] sm:$0xff] }
0x37bb   :  { %14483 = vmatprep.subr.bf16.mxu0 %v14482_v2  ;;  %v7245_v2 = vld [vmem:[#allocation7 + $0x290] sm:$0xff] }
0x37bc   :  { %v14512_v39 = vpack.c.bf16 %v7245_v2, %v7243_v45  ;;  %v14576_v45 = vpack.c.bf16 %v7260_v24, %v7259_v36  ;;  %v7290_v36 = vld [vmem:[%s18699_s2 + $0xf8] sm:$0xff] }
0x37be   :  { %14485 = vmatpush1.bf16.msra.mxu0 %v14484_v55  ;;  %v7247_v55 = vld [vmem:[#allocation7 + $0x2a0] sm:$0xff] }
0x37bf   :  { %14487 = vmatprep.subr.bf16.mxu0 %v14486_v57  ;;  %v7249_v57 = vld [vmem:[#allocation7 + $0x2b0] sm:$0xff] }
0x37c0   :  { %v14516_v63 = vpack.c.bf16 %v7249_v57, %v7247_v55  ;;  %v7280_v55 = vld [vmem:[%s18699_s2 + $0xa8] sm:$0xff] }
0x37c2   :  { %14489 = vmatpush1.bf16.msra.mxu0 %v14488_v38  ;;  %v7251_v38 = vld [vmem:[#allocation7 + $0x2c0] sm:$0xff] }
0x37c3   :  { %14491 = vmatprep.subr.bf16.mxu0 %v14490_v29  ;;  %v7253_v29 = vld [vmem:[#allocation7 + $0x2d0] sm:$0xff] }
0x37c4   :  { %v14520_v58 = vpack.c.bf16 %v7253_v29, %v7251_v38  ;;  %v7281_v38 = vld [vmem:[%s18699_s2 + $0xb0] sm:$0xff]  ;;  %v7282_v29 = vld [vmem:[%s18699_s2 + $0xb8] sm:$0xff] }
0x37c5   :  { %v14586_v8 = vpack.c.bf16 %v7282_v29, %v7281_v38  ;;  %v7298_v38 = vld [vmem:[%s18699_s2 + $0x138] sm:$0xff] }
0x37c6   :  { %14493 = vmatpush1.bf16.msra.mxu0 %v14492_v14  ;;  %v7255_v14 = vld [vmem:[#allocation7 + $0x2e0] sm:$0xff] }
0x37c7   :  { %14495 = vmatprep.subr.bf16.mxu0 %v14494_v50  ;;  %v7257_v50 = vld [vmem:[#allocation7 + $0x2f0] sm:$0xff] }
0x37c8   :  { %v14524_v53 = vpack.c.bf16 %v7257_v50, %v7255_v14  ;;  %v7283_v14 = vld [vmem:[%s18699_s2 + $0xc0] sm:$0xff]  ;;  %v7284_v50 = vld [vmem:[%s18699_s2 + $0xc8] sm:$0xff] }
0x37c9   :  { %7514 = vmatmul.mubr.f32.vlgmr.msra.gmra.mrb[14].mxu0 %v17663_v6 }
0x37ca   :  { %14497 = vmatpush1.bf16.msra.mxu0 %v14496_v59  ;;  %7584 = vmatprep.mubr.f32.mxu0 %v15504_v42 }
0x37cb   :  { %14499 = vmatprep.subr.bf16.mxu0 %v14498_v20 }
0x37ce   :  { %14501 = vmatpush1.bf16.msra.mxu0 %v14500_v13 }
0x37cf   :  { %14503 = vmatprep.subr.bf16.mxu0 %v14502_v1 }
0x37d2   :  { %14505 = vmatpush1.bf16.msra.mxu0 %v14504_v15 }
0x37d3   :  { %14507 = vmatprep.subr.bf16.mxu0 %v14506_v32  ;;  %v7275_v32 = vld [vmem:[%s18699_s2 + $0x80] sm:$0xff] }
0x37d4   :  { %v14574_v35 = vpack.c.bf16 %v7276_v33, %v7275_v32  ;;  %v7271_v32 = vld [vmem:[%s18699_s2 + $0x60] sm:$0xff]  ;;  %v7272_v33 = vld [vmem:[%s18699_s2 + $0x68] sm:$0xff] }
0x37d5   :  { %v14600_v24 = vpack.c.bf16 %v7272_v33, %v7271_v32 }
0x37d6   :  { %14509 = vmatpush1.bf16.msra.mxu0 %v14508_v37  ;;  %v7277_v37 = vld [vmem:[%s18699_s2 + $0x90] sm:$0xff] }
0x37d7   :  { %14511 = vmatprep.subr.bf16.mxu0 %v14510_v3  ;;  %v7278_v3 = vld [vmem:[%s18699_s2 + $0x98] sm:$0xff] }
0x37d8   :  { %v14578_v2 = vpack.c.bf16 %v7278_v3, %v7277_v37  ;;  %v7273_v3 = vld [vmem:[%s18699_s2 + $0x70] sm:$0xff] }
0x37da   :  { %14513 = vmatpush1.bf16.msra.mxu0 %v14512_v39 }
0x37db   :  { %14515 = vmatprep.subr.bf16.mxu0 %v14514_v25  ;;  %v7279_v25 = vld [vmem:[%s18699_s2 + $0xa0] sm:$0xff] }
0x37dc   :  { %v14582_v62 = vpack.c.bf16 %v7280_v55, %v7279_v25  ;;  %v7293_v25 = vld [vmem:[%s18699_s2 + $0x110] sm:$0xff]  ;;  %v7294_v55 = vld [vmem:[%s18699_s2 + $0x118] sm:$0xff] }
0x37de   :  { %14517 = vmatpush1.bf16.msra.mxu0 %v14516_v63  ;;  %v7263_v63 = vld [vmem:[%s18699_s2 + $0x20] sm:$0xff] }
0x37df   :  { %14519 = vmatprep.subr.bf16.mxu0 %v14518_v18  ;;  %v7264_v18 = vld [vmem:[%s18699_s2 + $0x28] sm:$0xff] }
0x37e0   :  { %v14584_v10 = vpack.c.bf16 %v7264_v18, %v7263_v63  ;;  %v7297_v18 = vld [vmem:[%s18699_s2 + $0x130] sm:$0xff] }
0x37e1   :  { %v14616_v29 = vpack.c.bf16 %v7298_v38, %v7297_v18  ;;  %v7908_v38 = vld [vmem:[%s18627_s13 + $0x70] sm:$0xff] }
0x37e2   :  { %14521 = vmatpush1.bf16.msra.mxu0 %v14520_v58  ;;  %v7265_v58 = vld [vmem:[%s18699_s2 + $0x30] sm:$0xff] }
0x37e3   :  { %14523 = vmatprep.subr.bf16.mxu0 %v14522_v11  ;;  %v7266_v11 = vld [vmem:[%s18699_s2 + $0x38] sm:$0xff] }
0x37e6   :  { %14525 = vmatpush1.bf16.msra.mxu0 %v14524_v53  ;;  %v14588_v53 = vpack.c.bf16 %v7266_v11, %v7265_v58  ;;  %v7301_v11 = vld [vmem:[%s18699_s2 + $0x150] sm:$0xff] }
0x37e7   :  { %14630 = vmatprep.subr.bf16.mxu0 %v15505_v43 }
0x383c   :  { %v7157_v4 = vpop.f32.mrb[64].mxu0 }
0x383d   :  { %v17820_v19 = vadd.f32 %v10466_v16, %v7157_v4  ;;  %v12637_v59 = vpop.f32.mrb[65].mxu0  ;;  %v14590_v16 = vpack.c.bf16 %v7284_v50, %v7283_v14  ;;  %v7267_v4 = vld [vmem:[%s18699_s2 + $0x40] sm:$0xff]  ;;  %v7302_v14 = vld [vmem:[%s18699_s2 + $0x158] sm:$0xff] }
0x383e   :  { %v7268_v59 = vld [vmem:[%s18699_s2 + $0x48] sm:$0xff]  ;;  %v14622_v50 = vpack.c.bf16 %v7302_v14, %v7301_v11 }
0x383f   :  { %10468 = vst.msk [vmem:[%s18709_s26 + $0xc] sm:$0xf] %vm2403_vm1, %v17820_v19 }
0x385c   :  { %v7443_v20 = vpop.f32.mrb[66].mxu0 }
0x385d   :  { %v7447_v23 = vmul.f32 2.0, %v7443_v20  ;;  %v12707_v46 = vpop.f32.mrb[67].mxu0  ;;  %v7285_v20 = vld [vmem:[%s18699_s2 + $0xd0] sm:$0xff] }
0x385e   :  { %v14592_v46 = vpack.c.bf16 %v7268_v59, %v7267_v4  ;;  %v7305_v59 = vld [vmem:[%s18699_s2 + $0x170] sm:$0xff] }
0x385f   :  { %v7448_v12 = vsub.f32 %v7447_v23, %v17663_v6  ;;  %v7286_v23 = vld [vmem:[%s18699_s2 + $0xd8] sm:$0xff] }
0x3861   :  { %7585 = vmatmul.mubr.f32.vlgmr.msra.gmra.mrb[14].mxu0 %v7448_v12  ;;  %v14594_v12 = vpack.c.bf16 %v7286_v23, %v7285_v20  ;;  %v7306_v20 = vld [vmem:[%s18699_s2 + $0x178] sm:$0xff] }
0x3862   :  { %12845 = vmatprep.mubr.msk.f32.mxu0 %vm15507_vm3, %v15504_v42  ;;  %v14628_v23 = vpack.c.bf16 %v7306_v20, %v7305_v59 }
0x3934   :  { %v7586_v5 = vpop.f32.mrb[14].mxu0 }
0x3935   :  { %v14978_v13 = vadd.f32 %v7586_v5, %v16104_v61  ;;  %v17831_v1 = vpop.f32.mrb[15].mxu0  ;;  %v7269_v5 = vld [vmem:[%s18699_s2 + $0x50] sm:$0xff] }
0x3936   :  { %v14979_v11 = vadd.f32 %v17831_v1, %v16354_v41  ;;  %v8003_v1 = vld [vmem:[%s18630_s16 + $0x8] sm:$0xff] }
0x3937   :  { %v10469_v26 = vmul.f32 -1.442695, %v14978_v13  ;;  %v7270_v13 = vld [vmem:[%s18699_s2 + $0x58] sm:$0xff] }
0x3938   :  { %v10470_v14 = vmul.f32 -1.442695, %v14979_v11 }
0x3939   :  { %15144 = vpow2.f32 %v10469_v26  ;;  %v7287_v26 = vld [vmem:[%s18699_s2 + $0xe0] sm:$0xff] }
0x3943   :  { %v15145_v27 = vpop.eup %15144 }
0x3944   :  { %v7599_v30 = vadd.f32 1.0, %v15145_v27  ;;  %v7288_v27 = vld [vmem:[%s18699_s2 + $0xe8] sm:$0xff] }
0x3946   :  { %15146 = vrcp.f32 %v7599_v30  ;;  %v14596_v30 = vpack.c.bf16 %v7270_v13, %v7269_v5  ;;  %v7896_v5 = vld [vmem:[%s18627_s13 + $0x10] sm:$0xff] }
0x3947   :  { %15148 = vpow2.f32 %v10470_v14  ;;  %v10483_v14 = vld [vmem:[%s18703_s1 + $0x10] sm:$0xf] }
0x3950   :  { %v15147_v48 = vpop.eup %15146 }
0x3951   :  { %v17834_v15 = vmul.f32 %v15147_v48, %v17663_v6  ;;  %v14598_v48 = vpack.c.bf16 %v7288_v27, %v7287_v26  ;;  %v7897_v26 = vld [vmem:[%s18627_s13 + $0x18] sm:$0xff] }
0x3952   :  { %v14634_v27 = vpack.c.bf16 %v7897_v26, %v7896_v5 }
0x3953   :  { %12741 = vmatmul.mubr.f32.vlgmr.msra.gmra.mrb[86].mxu1 %v17834_v15 }
0x3954   :  { %14552 = vmatpush3.bf16.msra.mxu1 %v15964_v9  ;;  %12775 = vmatprep.mubr.msk.f32.mxu1 %vm15507_vm3, %v15504_v42 }
0x3955   :  { %14553 = vmatprep.subr.bf16.mxu1 %v15505_v43 }
0x3958   :  { %14555 = vmatpush3.bf16.msra.mxu1 %v15976_v17 }
0x3959   :  { %14556 = vmatprep.subr.bf16.mxu1 %v15505_v43 }
0x395c   :  { %14558 = vmatpush3.bf16.msra.mxu1 %v15988_v22 }
0x395d   :  { %14559 = vmatprep.subr.bf16.mxu1 %v15505_v43 }
0x3960   :  { %14561 = vmatpush3.bf16.msra.mxu1 %v16000_v28 }
0x3961   :  { %14562 = vmatprep.subr.bf16.mxu1 %v15505_v43 }
0x3964   :  { %14564 = vmatpush3.bf16.msra.mxu1 %v16012_v34 }
0x3965   :  { %14565 = vmatprep.subr.bf16.mxu1 %v15505_v43 }
0x3968   :  { %14567 = vmatpush3.bf16.msra.mxu1 %v16024_v40 }
0x3969   :  { %14568 = vmatprep.subr.bf16.mxu1 %v15505_v43 }
0x396c   :  { %14570 = vmatpush3.bf16.msra.mxu1 %v16034_v44 }
0x396d   :  { %14571 = vmatprep.subr.bf16.mxu1 %v15505_v43 }
0x3970   :  { %14573 = vmatpush3.bf16.msra.mxu1 %v16042_v47 }
0x3971   :  { %14575 = vmatprep.subr.bf16.mxu1 %v14574_v35  ;;  %v7289_v35 = vld [vmem:[%s18699_s2 + $0xf0] sm:$0xff] }
0x3972   :  { %v14602_v37 = vpack.c.bf16 %v7290_v36, %v7289_v35 }
0x3a26   :  { %v7672_v39 = vpop.f32.mrb[86].mxu1 }
0x3a27   :  { %v12742_v57 = vpop.f32.mrb[87].mxu1  ;;  %12776 = vmatmul.mubr.f32.vlgmr.msra.gmra.mrb[88].mxu1 %v7672_v39 }
0x3a28   :  { %14577 = vmatpush3.bf16.msra.mxu1 %v14576_v45  ;;  %7812 = vmatprep.mubr.f32.mxu1 %v7672_v39  ;;  %v7274_v45 = vld [vmem:[%s18699_s2 + $0x78] sm:$0xff]  ;;  %v14607_v39 = vpack.c.bf16 %v7292_v51, %v7291_v7  ;;  %v14610_v57 = vpack.c.bf16 %v7294_v55, %v7293_v25  ;;  %v7904_v55 = vld [vmem:[%s18627_s13 + $0x50] sm:$0xff] }
0x3a29   :  { %14579 = vmatprep.subr.bf16.mxu1 %v14578_v2  ;;  %v14604_v2 = vpack.c.bf16 %v7274_v45, %v7273_v3  ;;  %v7901_v7 = vld [vmem:[%s18627_s13 + $0x38] sm:$0xff] }
0x3a2c   :  { %14581 = vmatpush3.bf16.msra.mxu1 %v14580_v0  ;;  %v7295_v0 = vld [vmem:[%s18699_s2 + $0x120] sm:$0xff] }
0x3a2d   :  { %14583 = vmatprep.subr.bf16.mxu1 %v14582_v62  ;;  %v7296_v62 = vld [vmem:[%s18699_s2 + $0x128] sm:$0xff] }
0x3a2e   :  { %v14613_v63 = vpack.c.bf16 %v7296_v62, %v7295_v0  ;;  %v7906_v62 = vld [vmem:[%s18627_s13 + $0x60] sm:$0xff] }
0x3a30   :  { %14585 = vmatpush3.bf16.msra.mxu1 %v14584_v10  ;;  %v7299_v10 = vld [vmem:[%s18699_s2 + $0x140] sm:$0xff] }
0x3a31   :  { %14587 = vmatprep.subr.bf16.mxu1 %v14586_v8  ;;  %v7300_v8 = vld [vmem:[%s18699_s2 + $0x148] sm:$0xff] }
0x3a32   :  { %v14619_v58 = vpack.c.bf16 %v7300_v8, %v7299_v10  ;;  %v7987_v8 = vld [vmem:[%s18700_s14 + $0x20] sm:$0xff] }
0x3a33   :  { %7990 = vrot.lane.b32.xlu1 %v7987_v8, %s18716_s7 }
0x3a34   :  { %14589 = vmatpush3.bf16.msra.mxu1 %v14588_v53  ;;  %v7303_v53 = vld [vmem:[%s18699_s2 + $0x160] sm:$0xff] }
0x3a35   :  { %14591 = vmatprep.subr.bf16.mxu1 %v14590_v16  ;;  %v7304_v16 = vld [vmem:[%s18699_s2 + $0x168] sm:$0xff] }
0x3a36   :  { %v14625_v4 = vpack.c.bf16 %v7304_v16, %v7303_v53 }
0x3a38   :  { %14593 = vmatpush3.bf16.msra.mxu1 %v14592_v46  ;;  %v7894_v46 = vld [vmem:[%s18627_s13] sm:$0xff] }
0x3a39   :  { %14595 = vmatprep.subr.bf16.mxu1 %v14594_v12  ;;  %v7895_v12 = vld [vmem:[%s18627_s13 + $0x8] sm:$0xff] }
0x3a3a   :  { %v14631_v13 = vpack.c.bf16 %v7895_v12, %v7894_v46  ;;  %v8002_v12 = vld [vmem:[%s18630_s16] sm:$0xff] }
0x3a3c   :  { %14597 = vmatpush3.bf16.msra.mxu1 %v14596_v30  ;;  %14632 = vmatpush3.bf16.msra.mxu0 %v14631_v13  ;;  %v7898_v30 = vld [vmem:[%s18627_s13 + $0x20] sm:$0xff] }
0x3a3d   :  { %14599 = vmatprep.subr.bf16.mxu1 %v14598_v48  ;;  %14633 = vmatprep.subr.bf16.mxu0 %v15505_v43  ;;  %v7899_v48 = vld [vmem:[%s18627_s13 + $0x28] sm:$0xff] }
0x3a3e   :  { %v14637_v32 = vpack.c.bf16 %v7899_v48, %v7898_v30 }
0x3a40   :  { %14601 = vmatpush3.bf16.msra.mxu1 %v14600_v24  ;;  %14635 = vmatpush3.bf16.msra.mxu0 %v14634_v27  ;;  %v14658_v27 = vpack.c.bf16 %v8003_v1, %v8002_v12  ;;  %v15206_v1 = vld [vmem:[%s18702_s23] sm:$0x3] }
0x3a41   :  { %14603 = vmatprep.subr.bf16.mxu1 %v14602_v37  ;;  %14636 = vmatprep.subr.bf16.mxu0 %v15505_v43 }
0x3a44   :  { %14605 = vmatpush3.bf16.msra.mxu1 %v14604_v2  ;;  %14638 = vmatpush3.bf16.msra.mxu0 %v14637_v32  ;;  %v7900_v2 = vld [vmem:[%s18627_s13 + $0x30] sm:$0xff] }
0x3a45   :  { %14606 = vmatprep.subr.bf16.mxu1 %v15505_v43  ;;  %14639 = vmatprep.subr.bf16.mxu0 %v15505_v43  ;;  %v14640_v51 = vpack.c.bf16 %v7901_v7, %v7900_v2  ;;  %v8001_v32 = vld [vmem:[#allocation12 + $0x10] sm:$0xf] }
0x3a47   :  { %7813 = vmatmul.mubr.f32.vlgmr.msra.gmra.mrb[90].mxu1 %v17834_v15 }
0x3a48   :  { %14608 = vmatpush3.bf16.msra.mxu1 %v14607_v39  ;;  %12810 = vmatprep.mubr.msk.f32.mxu1 %vm15507_vm3, %v15504_v42  ;;  %v7903_v39 = vld [vmem:[%s18627_s13 + $0x48] sm:$0xff] }
0x3a49   :  { %14609 = vmatprep.subr.bf16.mxu1 %v15505_v43  ;;  %14641 = vmatpush3.bf16.msra.mxu0 %v14640_v51 }
0x3a4a   :  { %14642 = vmatprep.subr.bf16.mxu0 %v15505_v43 }
0x3a4c   :  { %14611 = vmatpush3.bf16.msra.mxu1 %v14610_v57  ;;  %v7905_v57 = vld [vmem:[%s18627_s13 + $0x58] sm:$0xff] }
0x3a4d   :  { %14612 = vmatprep.subr.bf16.mxu1 %v15505_v43  ;;  %v14646_v0 = vpack.c.bf16 %v7905_v57, %v7904_v55 }
0x3a50   :  { %14614 = vmatpush3.bf16.msra.mxu1 %v14613_v63  ;;  %v7907_v63 = vld [vmem:[%s18627_s13 + $0x68] sm:$0xff] }
0x3a51   :  { %14615 = vmatprep.subr.bf16.mxu1 %v15505_v43  ;;  %v14649_v18 = vpack.c.bf16 %v7907_v63, %v7906_v62 }
0x3a54   :  { %14617 = vmatpush3.bf16.msra.mxu1 %v14616_v29  ;;  %v7909_v29 = vld [vmem:[%s18627_s13 + $0x78] sm:$0xff] }
0x3a55   :  { %14618 = vmatprep.subr.bf16.mxu1 %v15505_v43  ;;  %v14652_v10 = vpack.c.bf16 %v7909_v29, %v7908_v38 }
0x3a58   :  { %14620 = vmatpush3.bf16.msra.mxu1 %v14619_v58  ;;  %v7988_v58 = vld [vmem:[%s18701_s3 + $0x20] sm:$0xff] }
0x3a59   :  { %14621 = vmatprep.subr.bf16.mxu1 %v15505_v43  ;;  %7994 = vrot.lane.b32.xlu0 %v7988_v58, %s18714_s9 }
0x3a5c   :  { %14623 = vmatpush3.bf16.msra.mxu1 %v14622_v50  ;;  %v15149_v50 = vpop.eup %15148 }
0x3a5d   :  { %14624 = vmatprep.subr.bf16.mxu1 %v15505_v43  ;;  %v7600_v53 = vadd.f32 1.0, %v15149_v50 }
0x3a5f   :  { %15150 = vrcp.f32 %v7600_v53 }
0x3a60   :  { %14626 = vmatpush3.bf16.msra.mxu1 %v14625_v4 }
0x3a61   :  { %14627 = vmatprep.subr.bf16.mxu1 %v15505_v43 }
0x3a64   :  { %14629 = vmatpush3.bf16.msra.mxu1 %v14628_v23 }
0x3a65   :  { %14654 = vmatprep.subr.bf16.mxu1 %v15505_v43 }
0x3a69   :  { %v15151_v23 = vpop.eup %15150 }
0x3a6a   :  { %v7891_v46 = vsub.f32 1.0, %v15151_v23  ;;  %v7890_v13 = vmul.f32 %v15151_v23, %v17663_v6  ;;  %v8000_v6 = vld [vmem:[#allocation12 + $0x8] sm:$0xff] }
0x3afa   :  { %v7742_v33 = vpop.f32.mrb[88].mxu1 }
0x3afb   :  { %v7746_v35 = vmul.f32 2.0, %v7742_v33  ;;  %v12777_v36 = vpop.f32.mrb[89].mxu1  ;;  %v10471_v33 = vld [vmem:[#allocation10] ss:$0 sm:$0xff] }
0x3afc   :  { %v7991_v36 = vpop.permute.xlu1 %7990 }
0x3afd   :  { %v7747_v24 = vsub.f32 %v7746_v35, %v17834_v15  ;;  %v7902_v15 = vld [vmem:[%s18627_s13 + $0x40] sm:$0xff] }
0x3afe   :  { %v14643_v25 = vpack.c.bf16 %v7903_v39, %v7902_v15  ;;  %v10472_v39 = vld [vmem:[#allocation13] ss:$0 sm:$0xff] }
0x3aff   :  { %12811 = vmatmul.mubr.f32.vlgmr.msra.gmra.mrb[92].mxu1 %v7747_v24 }
0x3b00   :  { %12854 = vmatprep.mubr.msk.f32.mxu1 %vm15507_vm3, %v15504_v42  ;;  %14644 = vmatpush3.bf16.msra.mxu0 %v14643_v25 }
0x3b01   :  { %14645 = vmatprep.subr.bf16.mxu0 %v15505_v43 }
0x3b04   :  { %14647 = vmatpush3.bf16.msra.mxu0 %v14646_v0 }
0x3b05   :  { %14648 = vmatprep.subr.bf16.mxu0 %v15505_v43 }
0x3b08   :  { %14650 = vmatpush3.bf16.msra.mxu0 %v14649_v18 }
0x3b09   :  { %14651 = vmatprep.subr.bf16.mxu0 %v15505_v43 }
0x3b0c   :  { %14653 = vmatpush3.bf16.msra.mxu0 %v14652_v10 }
0x3b0d   :  { %14657 = vmatprep.subr.bf16.mxu0 %v15505_v43 }
0x3b1a   :  { %v11295_v37 = vpop.f32.mrb[90].mxu1 }
0x3b1b   :  { %v11296_v3 = vpop.f32.mrb[91].mxu1 }
0x3b1c   :  { %v11297_v45 = vadd.f32 %v11296_v3, %v11295_v37  ;;  %v10475_v3 = vld [vmem:[%s18632_s18] ss:$0 sm:$0xff] }
0x3bd2   :  { %v7884_v16 = vpop.f32.mrb[92].mxu1 }
0x3bd3   :  { %v7885_v4 = vadd.f32 %v11297_v45, %v7884_v16  ;;  %v12812_v59 = vpop.f32.mrb[93].mxu1 }
0x3bd4   :  { %v8266_v59 = vld [vmem:[#allocation15] sm:$0xff] }
0x3bd5   :  { %v7888_v20 = vadd.f32 %v7885_v4, %v16074_v54  ;;  %v7999_v54 = vld [vmem:[#allocation12] sm:$0xff] }
0x3bd6   :  { %v14655_v48 = vpack.c.bf16 %v8000_v6, %v7999_v54 }
0x3bd7   :  { %15152 = vtanh.f32 %v7888_v20  ;;  %v8267_v20 = vld [vmem:[#allocation15 + $0x8] sm:$0xff] }
0x3bd8   :  { %14656 = vmatpush3.bf16.msra.mxu1 %v14655_v48  ;;  %v14661_v23 = vpack.c.bf16 %v8267_v20, %v8266_v59 }
0x3bd9   :  { %12852 = vmatprep.subr.mxu1 %v15504_v42 }
0x3bdc   :  { %12853 = vmatpush3.msk.msra.mxu1 %vm1665_vm4, %v8001_v32 }
0x3bdd   :  { %12864 = vmatprep.subr.mxu1 %v15504_v42 }
0x3be1   :  { %v15153_v5 = vpop.eup %15152 }
0x3be2   :  { %v7892_v26 = vmul.f32 %v15153_v5, %v7891_v46 }
0x3be4   :  { %v18087_v30 = vadd.f32 %v7892_v26, %v7890_v13  ;;  %v15207_v26 = vld [vmem:[%s18704_s19] sm:$0xf] }
0x3be6   :  { %12846 = vmatmul.mubr.f32.vlgmr.msra.gmra.mrb[68].mxu0 %v18087_v30 }
0x3be7   :  { %14659 = vmatpush3.bf16.msra.mxu0 %v14658_v27  ;;  %12861 = vmatprep.mubr.msk.f32.mxu0 %vm15507_vm3, %v15504_v42 }
0x3be8   :  { %14660 = vmatprep.subr.bf16.mxu0 %v15505_v43 }
0x3bea   :  { %12862 = vmatmul.mubr.msk.f32.vlgmr.msra.gmra.mrb[70].mxu0 %vm267_vm0, %v17701_v49  ;;  %v7995_v49 = vpop.permute.xlu0 %7994 }
0x3beb   :  { %12873 = vmatprep.mubr.msk.f32.mxu0 %vm15507_vm3, %v15504_v42  ;;  %14662 = vmatpush3.bf16.msra.mxu0 %v14661_v23 }
0x3bec   :  { %14663 = vmatprep.subr.bf16.mxu0 %v15505_v43 }
0x3cb9   :  { %v7983_v35 = vpop.f32.mrb[68].mxu0 }
0x3cba   :  { %v7984_v24 = vadd.f32 %v10471_v33, %v7983_v35  ;;  %v12847_v37 = vpop.f32.mrb[69].mxu0 }
0x3cbc   :  { %v7997_v45 = vsel %vm267_vm0, %v7984_v24, %v7991_v36  ;;  %v10479_v36 = vld [vmem:[#allocation16] ss:$0 sm:$0xff] }
0x3cbd   :  { %v7998_v2 = vsel %vm1646_vm5, %v7997_v45, %v7995_v49  ;;  %v8162_v7 = vpop.f32.mrb[70].mxu0 }
0x3cbe   :  { %v8163_v51 = vadd.f32 %v10475_v3, %v8162_v7  ;;  %12855 = vmatmul.mubr.msk.f32.vlgmr.msra.gmra.mrb[94].mxu1 %vm1661_vm6, %v7998_v2  ;;  %v12863_v15 = vpop.f32.mrb[71].mxu0 }
0x3cbf   :  { %12866 = vmatprep.mubr.msk.f32.mxu1 %vm15507_vm3, %v15504_v42 }
0x3cc0   :  { %8174 = vrot.lane.b32.xlu1 %v8163_v51, %s18715_s21 }
0x3d32   :  { %v8175_v29 = vpop.permute.xlu1 %8174 }
0x3d91   :  { %v8084_v25 = vpop.f32.mrb[94].mxu1 }
0x3d92   :  { %v8085_v55 = vadd.f32 %v10472_v39, %v8084_v25  ;;  %v12856_v57 = vpop.f32.mrb[95].mxu1 }
0x3d93   :  { %v8465_v57 = vld [vmem:[#allocation18] sm:$0xff] }
0x3d94   :  { %v8166_v0 = vadd.f32 %v8163_v51, %v8085_v55 }
0x3d96   :  { %v10477_v62 = vmul.f32 -1.442695, %v8166_v0  ;;  %v8466_v0 = vld [vmem:[#allocation18 + $0x8] sm:$0xff] }
0x3d98   :  { %15154 = vpow2.f32 %v10477_v62  ;;  %v8467_v62 = vld [vmem:[#allocation18 + $0x10] sm:$0xff] }
0x3da2   :  { %v15155_v63 = vpop.eup %15154 }
0x3da3   :  { %v8170_v18 = vadd.f32 1.0, %v15155_v63 }
0x3da5   :  { %15156 = vrcp.f32 %v8170_v18  ;;  %v14664_v18 = vpack.c.bf16 %v8466_v0, %v8465_v57  ;;  %v8765_v0 = vld [vmem:[#allocation7 + $0x80] sm:$0xff] }
0x3daf   :  { %v15157_v38 = vpop.eup %15156 }
0x3db0   :  { %v8177_v10 = vmul.f32 %v15157_v38, %v8175_v29  ;;  %v8184_v50 = vsub.f32 1.0, %v15157_v38  ;;  %v8190_v16 = vmul.f32 %v15157_v38, %v17696_v21  ;;  %v8470_v21 = vld [vmem:[%s18636_s22 + $0x8] sm:$0xff] }
0x3db1   :  { %v8468_v38 = vld [vmem:[#allocation18 + $0x18] sm:$0x3] }
0x3db2   :  { %8179 = vrot.lane.b32.xlu0 %v8177_v10, %s18712_s0 }
0x3e24   :  { %v8180_v8 = vpop.permute.xlu0 %8179 }
0x3e25   :  { %v8182_v58 = vadd.f32 %v8180_v8, %v8085_v55  ;;  %v14667_v8 = vpack.c.bf16 %v8468_v38, %v8467_v62  ;;  %v8767_v62 = vld [vmem:[#allocation7 + $0x90] sm:$0xff] }
0x3e26   :  { %v14742_v38 = vpack.c.bf16 %v8767_v62, %v8765_v0  ;;  %v8798_v62 = vld [vmem:[#allocation7 + $0x188] sm:$0xff] }
0x3e27   :  { %15158 = vtanh.f32 %v8182_v58 }
0x3e31   :  { %v15159_v11 = vpop.eup %15158 }
0x3e32   :  { %8186 = vrot.lane.b32.xlu1 %v15159_v11, %s18713_s11 }
0x3e36   :  { %8372 = vrot.lane.b32.xlu1 %v10483_v14, %s18694_s20 }
0x3e3a   :  { %8562 = vrot.lane.b32.xlu1 %v17792_v56, %s18713_s11 }
0x3e3e   :  { %8460 = vrot.lane.b32.xlu1 %v17820_v19, %s18710_s4  ;;  %v8469_v19 = vld [vmem:[%s18636_s22] sm:$0xff] }
0x3e3f   :  { %v14671_v13 = vpack.c.bf16 %v8470_v21, %v8469_v19  ;;  %v8750_v19 = vld [vmem:[#allocation7 + $0x8] sm:$0xff]  ;;  %v8752_v21 = vld [vmem:[#allocation7 + $0x18] sm:$0xff] }
0x3ea4   :  { %v8187_v53 = vpop.permute.xlu1 %8186 }
0x3ea5   :  { %v8189_v4 = vmul.f32 %v8187_v53, %v8184_v50  ;;  %v10488_v53 = vld [vmem:[%s18638_s24] ss:$0 sm:$0xff] }
0x3ea7   :  { %v18120_v46 = vadd.f32 %v8190_v16, %v8189_v4 }
0x3ea8   :  { %v8373_v5 = vpop.permute.xlu1 %8372 }
0x3ea9   :  { %8193 = vrot.lane.b32.xlu0 %v18120_v46, %s18713_s11 }
0x3eac   :  { %v8563_v27 = vpop.permute.xlu1 %8562 }
0x3eb0   :  { %v8461_v59 = vpop.permute.xlu1 %8460 }
0x3f1b   :  { %v18125_v12 = vpop.permute.xlu0 %8193 }
0x3f1c   :  { %12865 = vmatpush3.msra.mxu1 %v18125_v12 }
0x3f1d   :  { %12867 = vmatmul.mubr.msk.f32.vlgmr.msra.gmra.mrb[96].mxu1 %vm1848_vm7, %v15206_v1  ;;  %12876 = vmatprep.subr.mxu1 %v15504_v42  ;;  %v14724_v1 = vpack.c.bf16 %v8752_v21, %v8750_v19  ;;  %v8777_v21 = vld [vmem:[#allocation7 + $0xe0] sm:$0xff] }
0x3f1e   :  { %12877 = vmatpush3.msra.mxu1 %v7984_v24  ;;  %12878 = vmatprep.mubr.msk.f32.mxu1 %vm15507_vm3, %v15504_v42 }
0x3f1f   :  { %14670 = vmatprep.subr.bf16.mxu1 %v15505_v43 }
0x3f21   :  { %12879 = vmatmul.mubr.msk.f32.vlgmr.msra.gmra.mrb[98].mxu1 %vm1848_vm7, %v15207_v26  ;;  %v8754_v26 = vld [vmem:[#allocation7 + $0x28] sm:$0xff] }
0x3f22   :  { %14672 = vmatpush3.bf16.msra.mxu1 %v14671_v13  ;;  %12896 = vmatprep.mubr.msk.f32.mxu1 %vm15507_vm3, %v15504_v42  ;;  %v8751_v13 = vld [vmem:[#allocation7 + $0x10] sm:$0xff] }
0x3f23   :  { %14673 = vmatprep.subr.bf16.mxu1 %v15505_v43 }
0x3f25   :  { %12897 = vmatmul.mubr.msk.f32.vlgmr.msra.gmra.mrb[100].mxu1 %vm267_vm0, %v8563_v27  ;;  %v8756_v27 = vld [vmem:[#allocation7 + $0x38] sm:$0xff] }
0x3f26   :  { %12903 = vmatprep.mubr.msk.f32.mxu1 %vm15507_vm3, %v15504_v42 }
0x3ff0   :  { %v8262_v54 = vpop.f32.mrb[96].mxu1 }
0x3ff1   :  { %v12868_v6 = vpop.f32.mrb[97].mxu1  ;;  %12874 = vmatmul.mubr.msk.f32.vlgmr.msra.gmra.mrb[72].mxu0 %vm267_vm0, %v8262_v54 }
0x3ff2   :  { %12889 = vmatprep.mubr.msk.f32.mxu0 %vm15507_vm3, %v15504_v42  ;;  %14665 = vmatpush3.bf16.msra.mxu0 %v14664_v18  ;;  %v14728_v6 = vpack.c.bf16 %v8756_v27, %v8754_v26  ;;  %v8772_v18 = vld [vmem:[#allocation7 + $0xb8] sm:$0xff] }
0x3ff3   :  { %14666 = vmatprep.subr.bf16.mxu0 %v15505_v43  ;;  %v8784_v26 = vld [vmem:[#allocation7 + $0x118] sm:$0xff] }
0x3ff4   :  { %v8451_v48 = vpop.f32.mrb[98].mxu1 }
0x3ff5   :  { %v12880_v32 = vpop.f32.mrb[99].mxu1 }
0x3ff6   :  { %14669 = vmatpush3.bf16.msk.msra.mxu0 %vm16430_vm13, %v14667_v8  ;;  %v8755_v32 = vld [vmem:[#allocation7 + $0x30] sm:$0xff] }
0x3ff7   :  { %14676 = vmatprep.subr.bf16.mxu0 %v15505_v43  ;;  %v8771_v8 = vld [vmem:[#allocation7 + $0xb0] sm:$0xff] }
0x3ff8   :  { %v8632_v33 = vpop.f32.mrb[100].mxu1 }
0x3ff9   :  { %v12898_v35 = vpop.f32.mrb[101].mxu1  ;;  %v18170_v16 = vadd.f32 %v10488_v53, %v8632_v33  ;;  %v8758_v33 = vld [vmem:[#allocation7 + $0x48] sm:$0xff]  ;;  %v8773_v53 = vld [vmem:[#allocation7 + $0xc0] sm:$0xff] }
0x3ffa   :  { %v8760_v35 = vld [vmem:[#allocation7 + $0x58] sm:$0xff] }
0x40c4   :  { %v8344_v24 = vpop.f32.mrb[72].mxu0 }
0x40c5   :  { %v8345_v37 = vadd.f32 %v10479_v36, %v8344_v24  ;;  %v12875_v49 = vpop.f32.mrb[73].mxu0  ;;  %v14732_v24 = vpack.c.bf16 %v8760_v35, %v8758_v33  ;;  %v8788_v33 = vld [vmem:[#allocation7 + $0x138] sm:$0xff] }
0x40c6   :  { %v8759_v49 = vld [vmem:[#allocation7 + $0x50] sm:$0xff] }
0x40c7   :  { %10481 = vst.msk [vmem:[%s18642_s28 + $0x8] sm:$0x3] %vm2004_vm8, %v8345_v37  ;;  %v10482_v3 = vmul.f32 -1.442695, %v8345_v37  ;;  %v8379_v11 = vrot.slane %v8345_v37, %v16100_v60  ;;  %v8757_v37 = vld [vmem:[#allocation7 + $0x40] sm:$0xff] }
0x40c9   :  { %15160 = vpow2.f32 %v10482_v3  ;;  %v8762_v3 = vld [vmem:[#allocation7 + $0x68] sm:$0xff] }
0x40d3   :  { %v15161_v45 = vpop.eup %15160 }
0x40d4   :  { %v8353_v2 = vadd.f32 1.0, %v15161_v45  ;;  %v8764_v45 = vld [vmem:[#allocation7 + $0x78] sm:$0xff] }
0x40d6   :  { %15162 = vrcp.f32 %v8353_v2  ;;  %v14734_v2 = vpack.c.bf16 %v8759_v49, %v8757_v37  ;;  %v8790_v49 = vld [vmem:[#allocation7 + $0x148] sm:$0xff] }
0x40e0   :  { %v15163_v7 = vpop.eup %15162 }
0x40e1   :  { %v8356_v51 = vmul.f32 0.9, %v15163_v7  ;;  %v14736_v7 = vpack.c.bf16 %v8764_v45, %v8762_v3  ;;  %v8792_v3 = vld [vmem:[#allocation7 + $0x158] sm:$0xff] }
0x40e2   :  { %v14764_v45 = vpack.c.bf16 %v8792_v3, %v8790_v49 }
0x40e3   :  { %v8357_v15 = vadd.f32 0.1, %v8356_v51  ;;  %v8761_v51 = vld [vmem:[#allocation7 + $0x60] sm:$0xff] }
0x40e5   :  { %15164 = vrsqrt.f32 %v8357_v15  ;;  %vm8360_vm9 = vcmp.eq.f32.partialorder %v8357_v15, inf  ;;  %v8363_v55 = vand.u32 2147483648, %v8357_v15  ;;  %vm8362_vm10 = vcmp.eq.f32.partialorder %v8357_v15, 0.0 }
0x40ef   :  { %v15165_v39 = vpop.eup %15164 }
0x40f0   :  { %v8359_v25 = vmul.f32 %v15165_v39, %v8357_v15  ;;  %v8766_v39 = vld [vmem:[#allocation7 + $0x88] sm:$0xff] }
0x40f2   :  { %v8361_v63 = vsel %vm8360_vm9, %v8357_v15, %v8359_v25  ;;  %v8763_v15 = vld [vmem:[#allocation7 + $0x70] sm:$0xff]  ;;  %v8768_v25 = vld [vmem:[#allocation7 + $0x98] sm:$0xff] }
0x40f3   :  { %v8364_v29 = vsel %vm8362_vm10, %v8363_v55, %v8361_v63  ;;  %v14738_v55 = vpack.c.bf16 %v8763_v15, %v8761_v51  ;;  %v14740_v57 = vpack.c.bf16 %v8768_v25, %v8766_v39  ;;  %v8770_v63 = vld [vmem:[#allocation7 + $0xa8] sm:$0xff]  ;;  %v8796_v39 = vld [vmem:[#allocation7 + $0x178] sm:$0xff] }
0x40f4   :  { %v8370_v10 = vrot.slane %v8364_v29, %v16100_v60  ;;  %v14744_v29 = vpack.c.bf16 %v8772_v18, %v8770_v63  ;;  %v8794_v15 = vld [vmem:[#allocation7 + $0x168] sm:$0xff]  ;;  %v8800_v63 = vld [vmem:[#allocation7 + $0x198] sm:$0xff] }
0x40f5   :  { %v14768_v25 = vpack.c.bf16 %v8796_v39, %v8794_v15  ;;  %v14772_v18 = vpack.c.bf16 %v8800_v63, %v8798_v62  ;;  %v8664_v39 = vld [vmem:[%s18639_s25 + $0x8] sm:$0xff] }
0x40f6   :  { %v8375_v58 = vmul.f32 %v8373_v5, %v8370_v10  ;;  %v8749_v5 = vld [vmem:[#allocation7] sm:$0xff] }
0x40f7   :  { %v14726_v54 = vpack.c.bf16 %v8751_v13, %v8749_v5  ;;  %v8769_v10 = vld [vmem:[#allocation7 + $0xa0] sm:$0xff]  ;;  %v8782_v13 = vld [vmem:[#allocation7 + $0x108] sm:$0xff] }
0x40f8   :  { %8381 = vrot.lane.b32.xlu0 %v8375_v58, %s18711_s15  ;;  %v8774_v58 = vld [vmem:[#allocation7 + $0xc8] sm:$0xff]  ;;  %v14756_v27 = vpack.c.bf16 %v8784_v26, %v8782_v13  ;;  %v8809_v26 = vld [vmem:[#allocation7 + $0x1e0] sm:$0xff] }
0x416a   :  { %v8382_v14 = vpop.permute.xlu0 %8381 }
0x416b   :  { %v8384_v50 = vadd.f32 %v8382_v14, %v8379_v11  ;;  %v8776_v11 = vld [vmem:[#allocation7 + $0xd8] sm:$0xff]  ;;  %v14746_v14 = vpack.c.bf16 %v8771_v8, %v8769_v10  ;;  %v8802_v8 = vld [vmem:[#allocation7 + $0x1a8] sm:$0xff] }
0x416d   :  { %8456 = vrot.lane.b32.xlu0 %v8384_v50, %s18716_s7  ;;  %v14748_v50 = vpack.c.bf16 %v8776_v11, %v8774_v58  ;;  %v8804_v58 = vld [vmem:[#allocation7 + $0x1b8] sm:$0xff] }
0x416e   :  { %v14776_v11 = vpack.c.bf16 %v8804_v58, %v8802_v8  ;;  %v8813_v58 = vld [vmem:[#allocation7 + $0x200] sm:$0xff] }
0x4171   :  { %8644 = vrot.lane.b32.xlu0 %v18170_v16, %s18715_s21 }
0x41df   :  { %v8457_v4 = vpop.permute.xlu0 %8456 }
0x41e0   :  { %v8463_v20 = vsel %vm267_vm0, %v8451_v48, %v8457_v4  ;;  %v8753_v48 = vld [vmem:[#allocation7 + $0x20] sm:$0xff]  ;;  %v8775_v4 = vld [vmem:[#allocation7 + $0xd0] sm:$0xff] }
0x41e1   :  { %v8464_v23 = vsel %vm2122_vm14, %v8463_v20, %v8461_v59  ;;  %v14730_v36 = vpack.c.bf16 %v8755_v32, %v8753_v48  ;;  %v8778_v59 = vld [vmem:[#allocation7 + $0xe8] sm:$0xff]  ;;  %v8780_v20 = vld [vmem:[#allocation7 + $0xf8] sm:$0xff] }
0x41e2   :  { %12890 = vmatmul.mubr.msk.f32.vlgmr.msra.gmra.mrb[74].mxu0 %vm2138_vm15, %v8464_v23  ;;  %v14750_v23 = vpack.c.bf16 %v8775_v4, %v8773_v53  ;;  %v14752_v19 = vpack.c.bf16 %v8780_v20, %v8778_v59  ;;  %v8786_v32 = vld [vmem:[#allocation7 + $0x128] sm:$0xff]  ;;  %v8808_v59 = vld [vmem:[#allocation7 + $0x1d8] sm:$0xff]  ;;  %v8805_v20 = vld [vmem:[#allocation7 + $0x1c0] sm:$0xff] }
0x41e3   :  { %14678 = vmatpush3.bf16.msra.mxu0 %v15964_v9  ;;  %12938 = vmatprep.mubr.msk.f32.mxu0 %vm15507_vm3, %v15504_v42  ;;  %v14760_v35 = vpack.c.bf16 %v8788_v33, %v8786_v32  ;;  %v8806_v53 = vld [vmem:[#allocation7 + $0x1c8] sm:$0xff]  ;;  %v8645_v3 = vpop.permute.xlu0 %8644 }
0x41e4   :  { %14679 = vmatprep.subr.bf16.mxu0 %v15505_v43 }
0x41e7   :  { %14681 = vmatpush3.bf16.msra.mxu0 %v15976_v17 }
0x41e8   :  { %14682 = vmatprep.subr.bf16.mxu0 %v15505_v43 }
0x41eb   :  { %14684 = vmatpush3.bf16.msra.mxu0 %v15988_v22 }
0x41ec   :  { %14685 = vmatprep.subr.bf16.mxu0 %v15505_v43 }
0x41ef   :  { %14687 = vmatpush3.bf16.msra.mxu0 %v16000_v28 }
0x41f0   :  { %14688 = vmatprep.subr.bf16.mxu0 %v15505_v43 }
0x41f3   :  { %14690 = vmatpush3.bf16.msra.mxu0 %v16012_v34 }
0x41f4   :  { %14691 = vmatprep.subr.bf16.mxu0 %v15505_v43 }
0x41f7   :  { %14693 = vmatpush3.bf16.msra.mxu0 %v16024_v40 }
0x41f8   :  { %14694 = vmatprep.subr.bf16.mxu0 %v15505_v43 }
0x41fb   :  { %14696 = vmatpush3.bf16.msra.mxu0 %v16034_v44 }
0x41fc   :  { %14697 = vmatprep.subr.bf16.mxu0 %v15505_v43 }
0x41ff   :  { %14699 = vmatpush3.bf16.msra.mxu0 %v16042_v47 }
0x4200   :  { %14725 = vmatprep.subr.bf16.mxu0 %v14724_v1  ;;  %v8779_v1 = vld [vmem:[#allocation7 + $0xf0] sm:$0xff] }
0x4201   :  { %v14754_v5 = vpack.c.bf16 %v8779_v1, %v8777_v21  ;;  %v8810_v21 = vld [vmem:[#allocation7 + $0x1e8] sm:$0xff]  ;;  %v8812_v1 = vld [vmem:[#allocation7 + $0x1f8] sm:$0xff] }
0x4202   :  { %12939 = vmatmul.mubr.f32.vlgmr.msra.gmra.mrb[76].mxu0 %v18087_v30  ;;  %v14784_v13 = vpack.c.bf16 %v8812_v1, %v8810_v21 }
0x4203   :  { %14727 = vmatpush1.bf16.msra.mxu0 %v14726_v54  ;;  %v8781_v54 = vld [vmem:[#allocation7 + $0x100] sm:$0xff] }
0x4204   :  { %14729 = vmatprep.subr.bf16.mxu0 %v14728_v6  ;;  %v8783_v6 = vld [vmem:[#allocation7 + $0x110] sm:$0xff] }
0x4205   :  { %v14758_v48 = vpack.c.bf16 %v8783_v6, %v8781_v54  ;;  %v10485_v6 = vld [vmem:[#allocation19] ss:$0 sm:$0xff] }
0x4207   :  { %14731 = vmatpush1.bf16.msra.mxu0 %v14730_v36  ;;  %v8785_v36 = vld [vmem:[#allocation7 + $0x120] sm:$0xff] }
0x4208   :  { %14733 = vmatprep.subr.bf16.mxu0 %v14732_v24  ;;  %v8787_v24 = vld [vmem:[#allocation7 + $0x130] sm:$0xff] }
0x4209   :  { %v14762_v37 = vpack.c.bf16 %v8787_v24, %v8785_v36 }
0x420b   :  { %14735 = vmatpush1.bf16.msra.mxu0 %v14734_v2  ;;  %v8789_v2 = vld [vmem:[#allocation7 + $0x140] sm:$0xff] }
0x420c   :  { %14737 = vmatprep.subr.bf16.mxu0 %v14736_v7  ;;  %v8791_v7 = vld [vmem:[#allocation7 + $0x150] sm:$0xff] }
0x420d   :  { %v14766_v51 = vpack.c.bf16 %v8791_v7, %v8789_v2 }
0x420f   :  { %14739 = vmatpush1.bf16.msra.mxu0 %v14738_v55  ;;  %v8793_v55 = vld [vmem:[#allocation7 + $0x160] sm:$0xff] }
0x4210   :  { %14741 = vmatprep.subr.bf16.mxu0 %v14740_v57  ;;  %v8795_v57 = vld [vmem:[#allocation7 + $0x170] sm:$0xff] }
0x4211   :  { %v14770_v0 = vpack.c.bf16 %v8795_v57, %v8793_v55 }
0x4213   :  { %14743 = vmatpush1.bf16.msra.mxu0 %v14742_v38  ;;  %v8797_v38 = vld [vmem:[#allocation7 + $0x180] sm:$0xff] }
0x4214   :  { %14745 = vmatprep.subr.bf16.mxu0 %v14744_v29  ;;  %v8799_v29 = vld [vmem:[#allocation7 + $0x190] sm:$0xff] }
0x4215   :  { %v14774_v10 = vpack.c.bf16 %v8799_v29, %v8797_v38 }
0x4217   :  { %14747 = vmatpush1.bf16.msra.mxu0 %v14746_v14  ;;  %v8801_v14 = vld [vmem:[#allocation7 + $0x1a0] sm:$0xff] }
0x4218   :  { %14749 = vmatprep.subr.bf16.mxu0 %v14748_v50  ;;  %v8803_v50 = vld [vmem:[#allocation7 + $0x1b0] sm:$0xff] }
0x4219   :  { %v14778_v4 = vpack.c.bf16 %v8803_v50, %v8801_v14  ;;  %v8818_v14 = vld [vmem:[#allocation7 + $0x228] sm:$0xff] }
0x421b   :  { %14751 = vmatpush1.bf16.msra.mxu0 %v14750_v23  ;;  %v8807_v23 = vld [vmem:[#allocation7 + $0x1d0] sm:$0xff] }
0x421c   :  { %14753 = vmatprep.subr.bf16.mxu0 %v14752_v19  ;;  %v14780_v19 = vpack.c.bf16 %v8808_v59, %v8806_v53  ;;  %v8820_v53 = vld [vmem:[#allocation7 + $0x238] sm:$0xff]  ;;  %v8819_v59 = vld [vmem:[#allocation7 + $0x230] sm:$0xff] }
0x421f   :  { %14755 = vmatpush1.bf16.msra.mxu0 %v14754_v5  ;;  %v14782_v5 = vpack.c.bf16 %v8807_v23, %v8805_v20  ;;  %v14792_v20 = vpack.c.bf16 %v8820_v53, %v8818_v14  ;;  %v8822_v23 = vld [vmem:[#allocation7 + $0x248] sm:$0xff] }
0x4220   :  { %14757 = vmatprep.subr.bf16.mxu0 %v14756_v27  ;;  %v8811_v27 = vld [vmem:[#allocation7 + $0x1f0] sm:$0xff] }
0x4221   :  { %v14786_v54 = vpack.c.bf16 %v8811_v27, %v8809_v26  ;;  %v8826_v26 = vld [vmem:[#allocation7 + $0x268] sm:$0xff]  ;;  %v8828_v27 = vld [vmem:[#allocation7 + $0x278] sm:$0xff] }
0x4223   :  { %14759 = vmatpush1.bf16.msra.mxu0 %v14758_v48 }
0x4224   :  { %14761 = vmatprep.subr.bf16.mxu0 %v14760_v35 }
0x4227   :  { %14763 = vmatpush1.bf16.msra.mxu0 %v14762_v37 }
0x4228   :  { %14765 = vmatprep.subr.bf16.mxu0 %v14764_v45 }
0x422b   :  { %14767 = vmatpush1.bf16.msra.mxu0 %v14766_v51 }
0x422c   :  { %14769 = vmatprep.subr.bf16.mxu0 %v14768_v25 }
0x422f   :  { %14771 = vmatpush1.bf16.msra.mxu0 %v14770_v0 }
0x4230   :  { %14773 = vmatprep.subr.bf16.mxu0 %v14772_v18 }
0x4233   :  { %14775 = vmatpush1.bf16.msra.mxu0 %v14774_v10  ;;  %v8816_v10 = vld [vmem:[#allocation7 + $0x218] sm:$0xff] }
0x4234   :  { %14777 = vmatprep.subr.bf16.mxu0 %v14776_v11  ;;  %v8815_v11 = vld [vmem:[#allocation7 + $0x210] sm:$0xff] }
0x4235   :  { %v14790_v50 = vpack.c.bf16 %v8815_v11, %v8813_v58  ;;  %v18256_v11 = vld [vmem:[%s18708_s27] ss:$0 sm:$0xff] }
0x4237   :  { %14779 = vmatpush1.bf16.msra.mxu0 %v14778_v4  ;;  %v8817_v4 = vld [vmem:[#allocation7 + $0x220] sm:$0xff] }
0x4238   :  { %14781 = vmatprep.subr.bf16.mxu0 %v14780_v19  ;;  %v8824_v19 = vld [vmem:[#allocation7 + $0x258] sm:$0xff]  ;;  %v14794_v21 = vpack.c.bf16 %v8819_v59, %v8817_v4 }
0x4239   :  { %v14796_v1 = vpack.c.bf16 %v8824_v19, %v8822_v23 }
0x423b   :  { %14783 = vmatpush1.bf16.msra.mxu0 %v14782_v5  ;;  %v8821_v5 = vld [vmem:[#allocation7 + $0x240] sm:$0xff] }
0x423c   :  { %14785 = vmatprep.subr.bf16.mxu0 %v14784_v13  ;;  %v8823_v13 = vld [vmem:[#allocation7 + $0x250] sm:$0xff] }
0x423f   :  { %14787 = vmatpush1.bf16.msra.mxu0 %v14786_v54  ;;  %v14798_v54 = vpack.c.bf16 %v8823_v13, %v8821_v5 }
0x42b5   :  { %v8551_v48 = vpop.f32.mrb[74].mxu0 }
0x42b6   :  { %v8552_v32 = vadd.f32 %v10485_v6, %v8551_v48  ;;  %v12891_v33 = vpop.f32.mrb[75].mxu0  ;;  %v14800_v6 = vpack.c.bf16 %v8828_v27, %v8826_v26  ;;  %v8825_v48 = vld [vmem:[#allocation7 + $0x260] sm:$0xff] }
0x42b7   :  { %v8830_v33 = vld [vmem:[#allocation7 + $0x288] sm:$0xff] }
0x42b8   :  { %v8636_v35 = vadd.f32 %v18170_v16, %v8552_v32  ;;  %v8663_v16 = vld [vmem:[%s18639_s25] sm:$0xff] }
0x42b9   :  { %v18205_v25 = vpack.c.bf16 %v8664_v39, %v8663_v16  ;;  %v8838_v16 = vld [vmem:[#allocation7 + $0x2c8] sm:$0xff]  ;;  %v8840_v39 = vld [vmem:[#allocation7 + $0x2d8] sm:$0xff] }
0x42ba   :  { %v10490_v36 = vmul.f32 -1.442695, %v8636_v35  ;;  %v8832_v35 = vld [vmem:[#allocation7 + $0x298] sm:$0xff] }
0x42bb   :  { %14675 = vmatpush3.bf16.msra.mxu1 %v18205_v25 }
0x42bc   :  { %15166 = vpow2.f32 %v10490_v36  ;;  %14700 = vmatprep.subr.bf16.mxu1 %v15505_v43 }
0x42c6   :  { %v15167_v24 = vpop.eup %15166 }
0x42c7   :  { %v8640_v37 = vadd.f32 1.0, %v15167_v24  ;;  %v14804_v24 = vpack.c.bf16 %v8832_v35, %v8830_v33  ;;  %v8883_v33 = vld [vmem:[%s18699_s2 + $0x130] sm:$0xff]  ;;  %v8884_v35 = vld [vmem:[%s18699_s2 + $0x138] sm:$0xff] }
0x42c9   :  { %15168 = vrcp.f32 %v8640_v37  ;;  %v8829_v37 = vld [vmem:[#allocation7 + $0x280] sm:$0xff] }
0x42d3   :  { %v15169_v49 = vpop.eup %15168 }
0x42d4   :  { %v8647_v45 = vmul.f32 %v15169_v49, %v8645_v3  ;;  %v8654_v57 = vsub.f32 1.0, %v15169_v49  ;;  %v8660_v62 = vmul.f32 %v15169_v49, %v17792_v56  ;;  %v8814_v56 = vld [vmem:[#allocation7 + $0x208] sm:$0xff]  ;;  %v8831_v49 = vld [vmem:[#allocation7 + $0x290] sm:$0xff] }
0x42d5   :  { %v8959_v2 = vpop.f32.mrb[76].mxu0  ;;  %v14788_v8 = vpack.c.bf16 %v8816_v10, %v8814_v56  ;;  %v8834_v3 = vld [vmem:[#allocation7 + $0x2a8] sm:$0xff]  ;;  %v8841_v10 = vld [vmem:[#allocation7 + $0x2e0] sm:$0xff] }
0x42d6   :  { %v12940_v7 = vpop.f32.mrb[77].mxu0  ;;  %9099 = vmatprep.mubr.f32.mxu0 %v8959_v2  ;;  %8649 = vrot.lane.b32.xlu1 %v8647_v45, %s18712_s0  ;;  %v8836_v45 = vld [vmem:[#allocation7 + $0x2b8] sm:$0xff] }
0x42d7   :  { %9100 = vmatmul.mubr.f32.vlgmr.msra.gmra.mrb[16].mxu0 %v18087_v30  ;;  %14789 = vmatprep.subr.bf16.mxu0 %v14788_v8  ;;  %v14808_v7 = vpack.c.bf16 %v8836_v45, %v8834_v3  ;;  %v8843_v8 = vld [vmem:[#allocation7 + $0x2f0] sm:$0xff]  ;;  %v8888_v45 = vld [vmem:[%s18699_s2 + $0x158] sm:$0xff] }
0x42d8   :  { %9170 = vmatprep.mubr.f32.mxu0 %v15504_v42  ;;  %14791 = vmatpush1.bf16.msra.mxu0 %v14790_v50  ;;  %v14818_v58 = vpack.c.bf16 %v8843_v8, %v8841_v10  ;;  %v8887_v3 = vld [vmem:[%s18699_s2 + $0x150] sm:$0xff]  ;;  %v8866_v10 = vld [vmem:[%s18699_s2 + $0xa8] sm:$0xff] }
0x42d9   :  { %14793 = vmatprep.subr.bf16.mxu0 %v14792_v20 }
0x42dc   :  { %14795 = vmatpush1.bf16.msra.mxu0 %v14794_v21 }
0x42dd   :  { %14797 = vmatprep.subr.bf16.mxu0 %v14796_v1 }
0x42e0   :  { %14799 = vmatpush1.bf16.msra.mxu0 %v14798_v54 }
0x42e1   :  { %14801 = vmatprep.subr.bf16.mxu0 %v14800_v6  ;;  %v8881_v6 = vld [vmem:[%s18699_s2 + $0x120] sm:$0xff] }
0x4348   :  { %v8650_v51 = vpop.permute.xlu1 %8649 }
0x4349   :  { %v8652_v15 = vadd.f32 %v8650_v51, %v8552_v32  ;;  %v8827_v32 = vld [vmem:[#allocation7 + $0x270] sm:$0xff]  ;;  %v8833_v51 = vld [vmem:[#allocation7 + $0x2a0] sm:$0xff] }
0x434a   :  { %v14802_v36 = vpack.c.bf16 %v8827_v32, %v8825_v48  ;;  %v8882_v48 = vld [vmem:[%s18699_s2 + $0x128] sm:$0xff] }
0x434b   :  { %15170 = vtanh.f32 %v8652_v15  ;;  %v8835_v15 = vld [vmem:[#allocation7 + $0x2b0] sm:$0xff]  ;;  %v14907_v32 = vpack.c.bf16 %v8882_v48, %v8881_v6  ;;  %v8873_v6 = vld [vmem:[%s18699_s2 + $0xe0] sm:$0xff]  ;;  %v8874_v48 = vld [vmem:[%s18699_s2 + $0xe8] sm:$0xff] }
0x434c   :  { %14803 = vmatpush1.bf16.msra.mxu0 %v14802_v36  ;;  %v14910_v36 = vpack.c.bf16 %v8884_v35, %v8883_v33  ;;  %v14892_v33 = vpack.c.bf16 %v8874_v48, %v8873_v6  ;;  %v8857_v35 = vld [vmem:[%s18699_s2 + $0x60] sm:$0xff] }
0x434d   :  { %14805 = vmatprep.subr.bf16.mxu0 %v14804_v24  ;;  %v8885_v24 = vld [vmem:[%s18699_s2 + $0x140] sm:$0xff] }
0x4355   :  { %v15171_v55 = vpop.eup %15170 }
0x4356   :  { %8656 = vrot.lane.b32.xlu0 %v15171_v55, %s18713_s11  ;;  %v14810_v55 = vpack.c.bf16 %v8835_v15, %v8833_v51  ;;  %v8890_v51 = vld [vmem:[%s18699_s2 + $0x168] sm:$0xff] }
0x43c8   :  { %v8657_v0 = vpop.permute.xlu0 %8656 }
0x43c9   :  { %v8659_v63 = vmul.f32 %v8657_v0, %v8654_v57  ;;  %v14812_v57 = vpack.c.bf16 %v8840_v39, %v8838_v16  ;;  %v8837_v0 = vld [vmem:[#allocation7 + $0x2c0] sm:$0xff]  ;;  %v8846_v39 = vld [vmem:[%s18699_s2 + $0x8] sm:$0xff] }
0x43ca   :  { %v8845_v16 = vld [vmem:[%s18699_s2] sm:$0xff] }
0x43cb   :  { %v18211_v18 = vadd.f32 %v8660_v62, %v8659_v63  ;;  %v8839_v62 = vld [vmem:[#allocation7 + $0x2d0] sm:$0xff] }
0x43cc   :  { %v14814_v63 = vpack.c.bf16 %v8839_v62, %v8837_v0  ;;  %v14870_v0 = vpack.c.bf16 %v8846_v39, %v8845_v16  ;;  %v9480_v39 = vld [vmem:[%s18627_s13] sm:$0xff] }
0x43cd   :  { %v8662_v38 = vmax.f32 %v18211_v18, 0.0 }
0x43cf   :  { %8673 = vrot.lane.b32.xlu1 %v8662_v38, %s18713_s11  ;;  %v8842_v38 = vld [vmem:[#allocation7 + $0x2e8] sm:$0xff] }
0x4441   :  { %v8674_v29 = vpop.permute.xlu1 %8673 }
0x4442   :  { %12904 = vmatmul.mubr.msk.f32.vlgmr.msra.gmra.mrb[102].mxu1 %vm267_vm0, %v8674_v29  ;;  %v8844_v29 = vld [vmem:[#allocation7 + $0x2f8] sm:$0xff] }
0x4443   :  { %14702 = vmatpush3.bf16.msra.mxu1 %v15964_v9  ;;  %12973 = vmatprep.mubr.msk.f32.mxu1 %vm15507_vm3, %v15504_v42  ;;  %v14816_v56 = vpack.c.bf16 %v8844_v29, %v8842_v38  ;;  %v8848_v38 = vld [vmem:[%s18699_s2 + $0x18] sm:$0xff] }
0x4444   :  { %14703 = vmatprep.subr.bf16.mxu1 %v15505_v43 }
0x4447   :  { %14705 = vmatpush3.bf16.msra.mxu1 %v15976_v17 }
0x4448   :  { %14706 = vmatprep.subr.bf16.mxu1 %v15505_v43 }
0x444b   :  { %14708 = vmatpush3.bf16.msra.mxu1 %v15988_v22 }
0x444c   :  { %14709 = vmatprep.subr.bf16.mxu1 %v15505_v43 }
0x444f   :  { %14711 = vmatpush3.bf16.msra.mxu1 %v16000_v28 }
0x4450   :  { %14712 = vmatprep.subr.bf16.mxu1 %v15505_v43 }
0x4453   :  { %14714 = vmatpush3.bf16.msra.mxu1 %v16012_v34 }
0x4454   :  { %14715 = vmatprep.subr.bf16.mxu1 %v15505_v43 }
0x4457   :  { %14717 = vmatpush3.bf16.msra.mxu1 %v16024_v40 }
0x4458   :  { %14718 = vmatprep.subr.bf16.mxu1 %v15505_v43 }
0x445b   :  { %14720 = vmatpush3.bf16.msra.mxu1 %v16034_v44 }
0x445c   :  { %14721 = vmatprep.subr.bf16.mxu1 %v15505_v43 }
0x445f   :  { %14723 = vmatpush3.bf16.msra.mxu1 %v16042_v47 }
0x4460   :  { %14820 = vmatprep.subr.bf16.mxu1 %v15505_v43 }
0x4462   :  { %12974 = vmatmul.mubr.f32.vlgmr.msra.gmra.mrb[104].mxu1 %v8959_v2  ;;  %v14806_v2 = vpack.c.bf16 %v8831_v49, %v8829_v37  ;;  %v8886_v37 = vld [vmem:[%s18699_s2 + $0x148] sm:$0xff] }
0x4463   :  { %14822 = vmatpush3.bf16.msra.mxu1 %v15964_v9  ;;  %13008 = vmatprep.mubr.msk.f32.mxu1 %vm15507_vm3, %v15504_v42  ;;  %v14913_v49 = vpack.c.bf16 %v8886_v37, %v8885_v24  ;;  %v8875_v24 = vld [vmem:[%s18699_s2 + $0xf0] sm:$0xff]  ;;  %v8876_v37 = vld [vmem:[%s18699_s2 + $0xf8] sm:$0xff] }
0x4464   :  { %14823 = vmatprep.subr.bf16.mxu1 %v15505_v43  ;;  %14807 = vmatpush1.bf16.msra.mxu0 %v14806_v2  ;;  %v14916_v2 = vpack.c.bf16 %v8888_v45, %v8887_v3  ;;  %v14896_v3 = vpack.c.bf16 %v8876_v37, %v8875_v24  ;;  %v8859_v45 = vld [vmem:[%s18699_s2 + $0x70] sm:$0xff] }
0x4465   :  { %14809 = vmatprep.subr.bf16.mxu0 %v14808_v7  ;;  %v8889_v7 = vld [vmem:[%s18699_s2 + $0x160] sm:$0xff] }
0x4466   :  { %v14919_v15 = vpack.c.bf16 %v8890_v51, %v8889_v7  ;;  %v8891_v51 = vld [vmem:[%s18699_s2 + $0x170] sm:$0xff] }
0x4467   :  { %14825 = vmatpush3.bf16.msra.mxu1 %v15976_v17 }
0x4468   :  { %14826 = vmatprep.subr.bf16.mxu1 %v15505_v43  ;;  %14811 = vmatpush1.bf16.msra.mxu0 %v14810_v55  ;;  %v8863_v55 = vld [vmem:[%s18699_s2 + $0x90] sm:$0xff] }
0x4469   :  { %14813 = vmatprep.subr.bf16.mxu0 %v14812_v57  ;;  %v8864_v57 = vld [vmem:[%s18699_s2 + $0x98] sm:$0xff] }
0x446a   :  { %v14872_v62 = vpack.c.bf16 %v8864_v57, %v8863_v55  ;;  %v9481_v55 = vld [vmem:[%s18627_s13 + $0x8] sm:$0xff]  ;;  %v9482_v57 = vld [vmem:[%s18627_s13 + $0x10] sm:$0xff] }
0x446b   :  { %14828 = vmatpush3.bf16.msra.mxu1 %v15988_v22 }
0x446c   :  { %14829 = vmatprep.subr.bf16.mxu1 %v15505_v43  ;;  %14815 = vmatpush1.bf16.msra.mxu0 %v14814_v63  ;;  %v8847_v63 = vld [vmem:[%s18699_s2 + $0x10] sm:$0xff] }
0x446d   :  { %14817 = vmatprep.subr.bf16.mxu0 %v14816_v56  ;;  %v8865_v56 = vld [vmem:[%s18699_s2 + $0xa0] sm:$0xff] }
0x446f   :  { %14831 = vmatpush3.bf16.msra.mxu1 %v16000_v28 }
0x4470   :  { %14832 = vmatprep.subr.bf16.mxu1 %v15505_v43  ;;  %14819 = vmatpush1.bf16.msra.mxu0 %v14818_v58  ;;  %v14874_v58 = vpack.c.bf16 %v8848_v38, %v8847_v63  ;;  %v9484_v38 = vld [vmem:[%s18627_s13 + $0x20] sm:$0xff] }
0x4471   :  { %14900 = vmatprep.subr.bf16.mxu0 %v15505_v43 }
0x4473   :  { %14834 = vmatpush3.bf16.msra.mxu1 %v16012_v34 }
0x4474   :  { %14835 = vmatprep.subr.bf16.mxu1 %v15505_v43 }
0x4477   :  { %14837 = vmatpush3.bf16.msra.mxu1 %v16024_v40 }
0x4478   :  { %14838 = vmatprep.subr.bf16.mxu1 %v15505_v43 }
0x447b   :  { %14840 = vmatpush3.bf16.msra.mxu1 %v16034_v44 }
0x447c   :  { %14841 = vmatprep.subr.bf16.mxu1 %v15505_v43 }
0x447f   :  { %14843 = vmatpush3.bf16.msra.mxu1 %v16042_v47 }
0x4480   :  { %14844 = vmatprep.subr.bf16.mxu1 %v15505_v43 }
0x4515   :  { %v8743_v14 = vpop.f32.mrb[102].mxu1 }
0x4516   :  { %v18259_v50 = vadd.f32 %v18256_v11, %v8743_v14  ;;  %v12905_v53 = vpop.f32.mrb[103].mxu1  ;;  %v14876_v14 = vpack.c.bf16 %v8866_v10, %v8865_v56 }
0x4517   :  { %v8849_v53 = vld [vmem:[%s18699_s2 + $0x20] sm:$0xff] }
0x4518   :  { %10493 = vst.msk [vmem:[%s18717_s6 + $0x10] sm:$0xf] %vm2403_vm1, %v18259_v50 }
0x4535   :  { %v9029_v4 = vpop.f32.mrb[104].mxu1 }
0x4536   :  { %v9033_v59 = vmul.f32 2.0, %v9029_v4  ;;  %v12975_v20 = vpop.f32.mrb[105].mxu1  ;;  %v8850_v4 = vld [vmem:[%s18699_s2 + $0x28] sm:$0xff] }
0x4537   :  { %v8868_v20 = vld [vmem:[%s18699_s2 + $0xb8] sm:$0xff] }
0x4538   :  { %v9034_v23 = vsub.f32 %v9033_v59, %v18087_v30  ;;  %v8867_v59 = vld [vmem:[%s18699_s2 + $0xb0] sm:$0xff] }
0x453a   :  { %9171 = vmatmul.mubr.f32.vlgmr.msra.gmra.mrb[16].mxu0 %v9034_v23  ;;  %v14878_v23 = vpack.c.bf16 %v8850_v4, %v8849_v53 }
0x453b   :  { %13078 = vmatprep.mubr.msk.f32.mxu0 %vm15507_vm3, %v15504_v42 }
0x460d   :  { %v9172_v19 = vpop.f32.mrb[16].mxu0 }
0x460e   :  { %v14980_v21 = vadd.f32 %v9172_v19, %v16104_v61  ;;  %v18270_v1 = vpop.f32.mrb[17].mxu0  ;;  %v14880_v19 = vpack.c.bf16 %v8868_v20, %v8867_v59  ;;  %v9486_v20 = vld [vmem:[%s18627_s13 + $0x30] sm:$0xff] }
0x4610   :  { %v10494_v5 = vmul.f32 -1.442695, %v14980_v21  ;;  %v8851_v21 = vld [vmem:[%s18699_s2 + $0x30] sm:$0xff] }
0x4612   :  { %15172 = vpow2.f32 %v10494_v5  ;;  %v8852_v5 = vld [vmem:[%s18699_s2 + $0x38] sm:$0xff] }
0x461c   :  { %v15173_v13 = vpop.eup %15172 }
0x461d   :  { %v9185_v26 = vadd.f32 1.0, %v15173_v13  ;;  %v8869_v13 = vld [vmem:[%s18699_s2 + $0xc0] sm:$0xff] }
0x461f   :  { %15174 = vrcp.f32 %v9185_v26  ;;  %v8870_v26 = vld [vmem:[%s18699_s2 + $0xc8] sm:$0xff] }
0x4629   :  { %v15175_v27 = vpop.eup %15174 }
0x462a   :  { %v18273_v54 = vmul.f32 %v15175_v27, %v18087_v30  ;;  %v14882_v27 = vpack.c.bf16 %v8852_v5, %v8851_v21  ;;  %v9489_v21 = vld [vmem:[%s18627_s13 + $0x48] sm:$0xff] }
0x462c   :  { %13009 = vmatmul.mubr.f32.vlgmr.msra.gmra.mrb[106].mxu1 %v18273_v54 }
0x462d   :  { %14846 = vmatpush3.bf16.msra.mxu1 %v15964_v9  ;;  %13043 = vmatprep.mubr.msk.f32.mxu1 %vm15507_vm3, %v15504_v42  ;;  %v8861_v9 = vld [vmem:[%s18699_s2 + $0x80] sm:$0xff] }
0x462e   :  { %14847 = vmatprep.subr.bf16.mxu1 %v15505_v43 }
0x4631   :  { %14849 = vmatpush3.bf16.msra.mxu1 %v15976_v17  ;;  %v8862_v17 = vld [vmem:[%s18699_s2 + $0x88] sm:$0xff] }
0x4632   :  { %14850 = vmatprep.subr.bf16.mxu1 %v15505_v43 }
0x4635   :  { %14852 = vmatpush3.bf16.msra.mxu1 %v15988_v22  ;;  %v14868_v22 = vpack.c.bf16 %v8862_v17, %v8861_v9  ;;  %v14884_v9 = vpack.c.bf16 %v8870_v26, %v8869_v13  ;;  %v8853_v17 = vld [vmem:[%s18699_s2 + $0x40] sm:$0xff]  ;;  %v9490_v13 = vld [vmem:[%s18627_s13 + $0x50] sm:$0xff]  ;;  %v9491_v26 = vld [vmem:[%s18627_s13 + $0x58] sm:$0xff] }
0x4636   :  { %14853 = vmatprep.subr.bf16.mxu1 %v15505_v43 }
0x4639   :  { %14855 = vmatpush3.bf16.msra.mxu1 %v16000_v28  ;;  %v8877_v28 = vld [vmem:[%s18699_s2 + $0x100] sm:$0xff] }
0x463a   :  { %14856 = vmatprep.subr.bf16.mxu1 %v15505_v43 }
0x463d   :  { %14858 = vmatpush3.bf16.msra.mxu1 %v16012_v34  ;;  %v8878_v34 = vld [vmem:[%s18699_s2 + $0x108] sm:$0xff] }
0x463e   :  { %14859 = vmatprep.subr.bf16.mxu1 %v15505_v43 }
0x4641   :  { %14861 = vmatpush3.bf16.msra.mxu1 %v16024_v40  ;;  %v8879_v40 = vld [vmem:[%s18699_s2 + $0x110] sm:$0xff] }
0x4642   :  { %14862 = vmatprep.subr.bf16.mxu1 %v15505_v43 }
0x4645   :  { %14864 = vmatpush3.bf16.msra.mxu1 %v16034_v44  ;;  %v14901_v44 = vpack.c.bf16 %v8878_v34, %v8877_v28  ;;  %v8871_v28 = vld [vmem:[%s18699_s2 + $0xd0] sm:$0xff]  ;;  %v8872_v34 = vld [vmem:[%s18699_s2 + $0xd8] sm:$0xff] }
0x4646   :  { %14865 = vmatprep.subr.bf16.mxu1 %v15505_v43 }
0x4647   :  { %14902 = vmatpush3.bf16.msra.mxu0 %v14901_v44  ;;  %v14888_v44 = vpack.c.bf16 %v8872_v34, %v8871_v28  ;;  %v9494_v28 = vld [vmem:[%s18627_s13 + $0x70] sm:$0xff]  ;;  %v9495_v34 = vld [vmem:[%s18627_s13 + $0x78] sm:$0xff] }
0x4648   :  { %14903 = vmatprep.subr.bf16.mxu0 %v15505_v43 }
0x4649   :  { %14867 = vmatpush3.bf16.msra.mxu1 %v16042_v47  ;;  %v8880_v47 = vld [vmem:[%s18699_s2 + $0x118] sm:$0xff] }
0x464a   :  { %14869 = vmatprep.subr.bf16.mxu1 %v14868_v22  ;;  %v14904_v61 = vpack.c.bf16 %v8880_v47, %v8879_v40  ;;  %v8854_v22 = vld [vmem:[%s18699_s2 + $0x48] sm:$0xff]  ;;  %v8855_v47 = vld [vmem:[%s18699_s2 + $0x50] sm:$0xff] }
0x464b   :  { %v14886_v40 = vpack.c.bf16 %v8854_v22, %v8853_v17  ;;  %v9493_v17 = vld [vmem:[%s18627_s13 + $0x68] sm:$0xff] }
0x464c   :  { %14905 = vmatpush3.bf16.msra.mxu0 %v14904_v61  ;;  %v8856_v61 = vld [vmem:[%s18699_s2 + $0x58] sm:$0xff] }
0x464d   :  { %14906 = vmatprep.subr.bf16.mxu0 %v15505_v43 }
0x4650   :  { %14908 = vmatpush3.bf16.msra.mxu0 %v14907_v32  ;;  %v14890_v32 = vpack.c.bf16 %v8856_v61, %v8855_v47  ;;  %v9574_v47 = vld [vmem:[%s18701_s3 + $0x28] sm:$0xff]  ;;  %v14981_v61 = vadd.f32 %v18270_v1, %v16354_v41 }
0x4651   :  { %14909 = vmatprep.subr.bf16.mxu0 %v15505_v43  ;;  %9580 = vrot.lane.b32.xlu1 %v9574_v47, %s18714_s9  ;;  %v9589_v41 = vld [vmem:[%s18630_s16 + $0x8] sm:$0xff] }
0x4652   :  { %v10495_v6 = vmul.f32 -1.442695, %v14981_v61 }
0x4654   :  { %14911 = vmatpush3.bf16.msra.mxu0 %v14910_v36  ;;  %v8858_v36 = vld [vmem:[%s18699_s2 + $0x68] sm:$0xff]  ;;  %15176 = vpow2.f32 %v10495_v6 }
0x4655   :  { %14912 = vmatprep.subr.bf16.mxu0 %v15505_v43 }
0x4658   :  { %14914 = vmatpush3.bf16.msra.mxu0 %v14913_v49  ;;  %v14894_v49 = vpack.c.bf16 %v8858_v36, %v8857_v35 }
0x4659   :  { %14915 = vmatprep.subr.bf16.mxu0 %v15505_v43 }
0x465c   :  { %14917 = vmatpush3.bf16.msra.mxu0 %v14916_v2  ;;  %v8860_v2 = vld [vmem:[%s18699_s2 + $0x78] sm:$0xff] }
0x465d   :  { %14918 = vmatprep.subr.bf16.mxu0 %v15505_v43  ;;  %v14898_v7 = vpack.c.bf16 %v8860_v2, %v8859_v45 }
0x465e   :  { %v15177_v48 = vpop.eup %15176 }
0x4660   :  { %14920 = vmatpush3.bf16.msra.mxu0 %v14919_v15  ;;  %v8892_v15 = vld [vmem:[%s18699_s2 + $0x178] sm:$0xff] }
0x4661   :  { %14921 = vmatprep.subr.bf16.mxu0 %v15505_v43  ;;  %v14922_v16 = vpack.c.bf16 %v8892_v15, %v8891_v51  ;;  %v9586_v15 = vld [vmem:[#allocation12 + $0x8] sm:$0xff] }
0x4664   :  { %14923 = vmatpush3.bf16.msra.mxu0 %v14922_v16 }
0x4665   :  { %14948 = vmatprep.subr.bf16.mxu0 %v15505_v43 }
0x46ff   :  { %v9258_v29 = vpop.f32.mrb[106].mxu1 }
0x4700   :  { %v13010_v8 = vpop.f32.mrb[107].mxu1  ;;  %13044 = vmatmul.mubr.f32.vlgmr.msra.gmra.mrb[108].mxu1 %v9258_v29 }
0x4701   :  { %14871 = vmatpush3.bf16.msra.mxu1 %v14870_v0  ;;  %9398 = vmatprep.mubr.f32.mxu1 %v9258_v29  ;;  %v14925_v0 = vpack.c.bf16 %v9481_v55, %v9480_v39  ;;  %v9485_v29 = vld [vmem:[%s18627_s13 + $0x28] sm:$0xff]  ;;  %v10496_v39 = vld [vmem:[#allocation10] ss:$0 sm:$0xff] }
0x4702   :  { %14873 = vmatprep.subr.bf16.mxu1 %v14872_v62  ;;  %v9483_v62 = vld [vmem:[%s18627_s13 + $0x18] sm:$0xff]  ;;  %v14931_v56 = vpack.c.bf16 %v9485_v29, %v9484_v38 }
0x4703   :  { %v14928_v63 = vpack.c.bf16 %v9483_v62, %v9482_v57 }
0x4705   :  { %14875 = vmatpush3.bf16.msra.mxu1 %v14874_v58 }
0x4706   :  { %14877 = vmatprep.subr.bf16.mxu1 %v14876_v14 }
0x4709   :  { %14879 = vmatpush3.bf16.msra.mxu1 %v14878_v23  ;;  %v9487_v23 = vld [vmem:[%s18627_s13 + $0x38] sm:$0xff] }
0x470a   :  { %14881 = vmatprep.subr.bf16.mxu1 %v14880_v19  ;;  %v14934_v19 = vpack.c.bf16 %v9487_v23, %v9486_v20 }
0x470d   :  { %14883 = vmatpush3.bf16.msra.mxu1 %v14882_v27  ;;  %v14940_v27 = vpack.c.bf16 %v9491_v26, %v9490_v13 }
0x470e   :  { %14885 = vmatprep.subr.bf16.mxu1 %v14884_v9  ;;  %v9492_v9 = vld [vmem:[%s18627_s13 + $0x60] sm:$0xff] }
0x470f   :  { %v14943_v22 = vpack.c.bf16 %v9493_v17, %v9492_v9  ;;  %v10508_v9 = vld [vmem:[%s18703_s1 + $0x14] sm:$0xf] }
0x4711   :  { %14887 = vmatpush3.bf16.msra.mxu1 %v14886_v40  ;;  %v14946_v40 = vpack.c.bf16 %v9495_v34, %v9494_v28 }
0x4712   :  { %14889 = vmatprep.subr.bf16.mxu1 %v14888_v44  ;;  %v9573_v44 = vld [vmem:[%s18700_s14 + $0x28] sm:$0xff] }
0x4713   :  { %9576 = vrot.lane.b32.xlu0 %v9573_v44, %s18716_s7  ;;  %v9853_v44 = vld [vmem:[#allocation15 + $0x8] sm:$0xff] }
0x4715   :  { %14891 = vmatpush3.bf16.msra.mxu1 %v14890_v32  ;;  %v9186_v32 = vadd.f32 1.0, %v15177_v48  ;;  %v10055_v48 = vld [vmem:[%s18636_s22] sm:$0xff] }
0x4716   :  { %14893 = vmatprep.subr.bf16.mxu1 %v14892_v33 }
0x4717   :  { %15178 = vrcp.f32 %v9186_v32 }
0x4719   :  { %14895 = vmatpush3.bf16.msra.mxu1 %v14894_v49 }
0x471a   :  { %14897 = vmatprep.subr.bf16.mxu1 %v14896_v3  ;;  %v9588_v3 = vld [vmem:[%s18630_s16] sm:$0xff] }
0x471d   :  { %14899 = vmatpush3.bf16.msra.mxu1 %v14898_v7  ;;  %v14952_v7 = vpack.c.bf16 %v9589_v41, %v9588_v3 }
0x471e   :  { %14924 = vmatprep.subr.bf16.mxu1 %v15505_v43 }
0x4720   :  { %9399 = vmatmul.mubr.f32.vlgmr.msra.gmra.mrb[110].mxu1 %v18273_v54 }
0x4721   :  { %13113 = vmatprep.mubr.msk.f32.mxu1 %vm15507_vm3, %v15504_v42  ;;  %14926 = vmatpush3.bf16.msra.mxu1 %v14925_v0  ;;  %v15179_v37 = vpop.eup %15178 }
0x4722   :  { %14927 = vmatprep.subr.bf16.mxu1 %v15505_v43  ;;  %v9477_v49 = vsub.f32 1.0, %v15179_v37  ;;  %v9476_v45 = vmul.f32 %v15179_v37, %v18087_v30  ;;  %v9587_v30 = vld [vmem:[#allocation12 + $0x10] sm:$0xf] }
0x4725   :  { %14929 = vmatpush3.bf16.msra.mxu1 %v14928_v63  ;;  %v10500_v63 = vld [vmem:[%s18632_s18] ss:$0 sm:$0xff] }
0x4726   :  { %14930 = vmatprep.subr.bf16.mxu1 %v15505_v43 }
0x4729   :  { %14932 = vmatpush3.bf16.msra.mxu1 %v14931_v56 }
0x472a   :  { %14933 = vmatprep.subr.bf16.mxu1 %v15505_v43 }
0x472d   :  { %14935 = vmatpush3.bf16.msra.mxu1 %v14934_v19 }
0x472e   :  { %14936 = vmatprep.subr.bf16.mxu1 %v15505_v43 }
0x4785   :  { %v9577_v57 = vpop.permute.xlu0 %9576 }
0x47d3   :  { %v9328_v10 = vpop.f32.mrb[108].mxu1 }
0x47d4   :  { %v9332_v8 = vmul.f32 2.0, %v9328_v10  ;;  %v13045_v58 = vpop.f32.mrb[109].mxu1 }
0x47d5   :  { %v10497_v58 = vld [vmem:[#allocation13] ss:$0 sm:$0xff] }
0x47d6   :  { %v9333_v14 = vsub.f32 %v9332_v8, %v18273_v54  ;;  %v9488_v54 = vld [vmem:[%s18627_s13 + $0x40] sm:$0xff] }
0x47d7   :  { %v14937_v5 = vpack.c.bf16 %v9489_v21, %v9488_v54 }
0x47d8   :  { %13079 = vmatmul.mubr.f32.vlgmr.msra.gmra.mrb[78].mxu0 %v9333_v14 }
0x47d9   :  { %13122 = vmatprep.mubr.msk.f32.mxu0 %vm15507_vm3, %v15504_v42  ;;  %14938 = vmatpush3.bf16.msra.mxu1 %v14937_v5 }
0x47da   :  { %14939 = vmatprep.subr.bf16.mxu1 %v15505_v43 }
0x47dd   :  { %14941 = vmatpush3.bf16.msra.mxu1 %v14940_v27 }
0x47de   :  { %14942 = vmatprep.subr.bf16.mxu1 %v15505_v43 }
0x47e1   :  { %14944 = vmatpush3.bf16.msra.mxu1 %v14943_v22 }
0x47e2   :  { %14945 = vmatprep.subr.bf16.mxu1 %v15505_v43 }
0x47e5   :  { %14947 = vmatpush3.bf16.msra.mxu1 %v14946_v40  ;;  %v9852_v40 = vld [vmem:[#allocation15] sm:$0xff] }
0x47e6   :  { %14951 = vmatprep.subr.bf16.mxu1 %v15505_v43  ;;  %v14955_v47 = vpack.c.bf16 %v9853_v44, %v9852_v40 }
0x47f3   :  { %v11457_v53 = vpop.f32.mrb[110].mxu1 }
0x47f4   :  { %v11458_v4 = vpop.f32.mrb[111].mxu1 }
0x47f5   :  { %v11459_v59 = vadd.f32 %v11458_v4, %v11457_v53 }
0x48ab   :  { %v9470_v33 = vpop.f32.mrb[78].mxu0 }
0x48ac   :  { %v9471_v35 = vadd.f32 %v11459_v59, %v9470_v33  ;;  %v13080_v36 = vpop.f32.mrb[79].mxu0 }
0x48ae   :  { %v9474_v24 = vadd.f32 %v9471_v35, %v16071_v52  ;;  %v9585_v52 = vld [vmem:[#allocation12] sm:$0xff]  ;;  %v15209_v35 = vld [vmem:[%s18704_s19] sm:$0xf] }
0x48af   :  { %v14949_v16 = vpack.c.bf16 %v9586_v15, %v9585_v52 }
0x48b0   :  { %15180 = vtanh.f32 %v9474_v24 }
0x48b1   :  { %14950 = vmatpush3.bf16.msra.mxu0 %v14949_v16 }
0x48b2   :  { %13120 = vmatprep.subr.mxu0 %v15504_v42 }
0x48b5   :  { %13121 = vmatpush3.msk.msra.mxu0 %vm1665_vm4, %v9587_v30 }
0x48b6   :  { %13132 = vmatprep.subr.mxu0 %v15504_v42 }
0x48ba   :  { %v15181_v1 = vpop.eup %15180 }
0x48bb   :  { %v9478_v2 = vmul.f32 %v15181_v1, %v9477_v49 }
0x48bd   :  { %v9479_v51 = vadd.f32 %v9478_v2, %v9476_v45  ;;  %v10504_v45 = vld [vmem:[#allocation16] ss:$0 sm:$0xff] }
0x48bf   :  { %13114 = vmatmul.mubr.f32.vlgmr.msra.gmra.mrb[112].mxu1 %v9479_v51 }
0x48c0   :  { %14953 = vmatpush3.bf16.msra.mxu1 %v14952_v7  ;;  %13129 = vmatprep.mubr.msk.f32.mxu1 %vm15507_vm3, %v15504_v42 }
0x48c1   :  { %14954 = vmatprep.subr.bf16.mxu1 %v15505_v43 }
0x48c3   :  { %13130 = vmatmul.mubr.msk.f32.vlgmr.msra.gmra.mrb[114].mxu1 %vm267_vm0, %v18125_v12  ;;  %v9581_v12 = vpop.permute.xlu1 %9580 }
0x48c4   :  { %13141 = vmatprep.mubr.msk.f32.mxu1 %vm15507_vm3, %v15504_v42  ;;  %14956 = vmatpush3.bf16.msra.mxu1 %v14955_v47 }
0x48c5   :  { %14957 = vmatprep.subr.bf16.mxu1 %v15505_v43 }
0x4992   :  { %v9569_v55 = vpop.f32.mrb[112].mxu1 }
0x4993   :  { %v9570_v0 = vadd.f32 %v10496_v39, %v9569_v55  ;;  %v13115_v62 = vpop.f32.mrb[113].mxu1 }
0x4994   :  { %v10052_v62 = vld [vmem:[#allocation18 + $0x8] sm:$0xff] }
0x4995   :  { %v9583_v38 = vsel %vm267_vm0, %v9570_v0, %v9577_v57 }
0x4996   :  { %v9584_v29 = vsel %vm1646_vm5, %v9583_v38, %v9581_v12  ;;  %v9748_v56 = vpop.f32.mrb[114].mxu1  ;;  %v10053_v12 = vld [vmem:[#allocation18 + $0x10] sm:$0xff] }
0x4997   :  { %v9749_v10 = vadd.f32 %v10500_v63, %v9748_v56  ;;  %13123 = vmatmul.mubr.msk.f32.vlgmr.msra.gmra.mrb[80].mxu0 %vm1661_vm6, %v9584_v29  ;;  %v13131_v8 = vpop.f32.mrb[115].mxu1  ;;  %v10054_v29 = vld [vmem:[#allocation18 + $0x18] sm:$0x3] }
0x4998   :  { %13134 = vmatprep.mubr.msk.f32.mxu0 %vm15507_vm3, %v15504_v42  ;;  %v14961_v8 = vpack.c.bf16 %v10054_v29, %v10053_v12 }
0x4999   :  { %9760 = vrot.lane.b32.xlu0 %v9749_v10, %s18715_s21 }
0x4a0b   :  { %v9761_v21 = vpop.permute.xlu0 %9760 }
0x4a6a   :  { %v9670_v14 = vpop.f32.mrb[80].mxu0 }
0x4a6b   :  { %v9671_v53 = vadd.f32 %v10497_v58, %v9670_v14  ;;  %v13124_v4 = vpop.f32.mrb[81].mxu0 }
0x4a6d   :  { %v9752_v59 = vadd.f32 %v9749_v10, %v9671_v53 }
0x4a6f   :  { %v10502_v20 = vmul.f32 -1.442695, %v9752_v59  ;;  %v10513_v59 = vld [vmem:[%s18638_s24] ss:$0 sm:$0xff] }
0x4a71   :  { %15182 = vpow2.f32 %v10502_v20 }
0x4a7b   :  { %v15183_v23 = vpop.eup %15182 }
0x4a7c   :  { %v9756_v19 = vadd.f32 1.0, %v15183_v23 }
0x4a7e   :  { %15184 = vrcp.f32 %v9756_v19 }
0x4a88   :  { %v15185_v54 = vpop.eup %15184 }
0x4a89   :  { %v9763_v5 = vmul.f32 %v15185_v54, %v9761_v21  ;;  %v9770_v17 = vsub.f32 1.0, %v15185_v54  ;;  %v9776_v28 = vmul.f32 %v15185_v54, %v18120_v46  ;;  %v15208_v46 = vld [vmem:[%s18702_s23] sm:$0x3] }
0x4a8b   :  { %9765 = vrot.lane.b32.xlu1 %v9763_v5, %s18712_s0 }
0x4afd   :  { %v9766_v13 = vpop.permute.xlu1 %9765 }
0x4afe   :  { %v9768_v26 = vadd.f32 %v9766_v13, %v9671_v53 }
0x4b00   :  { %15186 = vtanh.f32 %v9768_v26 }
0x4b0a   :  { %v15187_v27 = vpop.eup %15186 }
0x4b0b   :  { %9772 = vrot.lane.b32.xlu0 %v15187_v27, %s18713_s11 }
0x4b0f   :  { %9958 = vrot.lane.b32.xlu0 %v10508_v9, %s18694_s20 }
0x4b13   :  { %10148 = vrot.lane.b32.xlu0 %v18211_v18, %s18713_s11 }
0x4b17   :  { %10046 = vrot.lane.b32.xlu0 %v18259_v50, %s18710_s4  ;;  %v10056_v50 = vld [vmem:[%s18636_s22 + $0x8] sm:$0xff] }
0x4b18   :  { %v14965_v33 = vpack.c.bf16 %v10056_v50, %v10055_v48 }
0x4b7d   :  { %v9773_v22 = vpop.permute.xlu0 %9772 }
0x4b7e   :  { %v9775_v34 = vmul.f32 %v9773_v22, %v9770_v17 }
0x4b80   :  { %v9777_v61 = vadd.f32 %v9776_v28, %v9775_v34 }
0x4b81   :  { %v9959_v32 = vpop.permute.xlu0 %9958 }
0x4b82   :  { %9779 = vrot.lane.b32.xlu1 %v9777_v61, %s18713_s11 }
0x4b85   :  { %v10149_v36 = vpop.permute.xlu0 %10148 }
0x4b89   :  { %v10047_v23 = vpop.permute.xlu0 %10046 }
0x4bf4   :  { %v9780_v6 = vpop.permute.xlu1 %9779 }
0x4bf5   :  { %13133 = vmatpush3.msra.mxu0 %v9780_v6 }
0x4bf6   :  { %13135 = vmatmul.mubr.msk.f32.vlgmr.msra.gmra.mrb[82].mxu0 %vm1848_vm7, %v15208_v46  ;;  %13144 = vmatprep.subr.mxu0 %v15504_v42 }
0x4bf7   :  { %13145 = vmatpush3.msra.mxu0 %v9570_v0  ;;  %13146 = vmatprep.mubr.msk.f32.mxu0 %vm15507_vm3, %v15504_v42  ;;  %v10051_v0 = vld [vmem:[#allocation18] sm:$0xff] }
0x4bf8   :  { %14964 = vmatprep.subr.bf16.mxu0 %v15505_v43  ;;  %v14958_v38 = vpack.c.bf16 %v10052_v62, %v10051_v0 }
0x4bfa   :  { %13147 = vmatmul.mubr.msk.f32.vlgmr.msra.gmra.mrb[84].mxu0 %vm1848_vm7, %v15209_v35 }
0x4bfb   :  { %14966 = vmatpush3.bf16.msra.mxu0 %v14965_v33  ;;  %13164 = vmatprep.mubr.msk.f32.mxu0 %vm15507_vm3, %v15504_v42 }
0x4bfc   :  { %14967 = vmatprep.subr.bf16.mxu0 %v15505_v43 }
0x4bfe   :  { %13165 = vmatmul.mubr.msk.f32.vlgmr.msra.gmra.mrb[86].mxu0 %vm267_vm0, %v10149_v36 }
0x4bff   :  { %14969 = vmatpush3.bf16.msra.mxu0 %v18205_v25  ;;  %13171 = vmatprep.mubr.msk.f32.mxu0 %vm15507_vm3, %v15504_v42 }
0x4cc9   :  { %v9848_v24 = vpop.f32.mrb[82].mxu0 }
0x4cca   :  { %13142 = vmatmul.mubr.msk.f32.vlgmr.msra.gmra.mrb[116].mxu1 %vm267_vm0, %v9848_v24  ;;  %v13136_v37 = vpop.f32.mrb[83].mxu0 }
0x4ccb   :  { %13157 = vmatprep.mubr.msk.f32.mxu1 %vm15507_vm3, %v15504_v42  ;;  %14959 = vmatpush3.bf16.msra.mxu1 %v14958_v38 }
0x4ccc   :  { %14960 = vmatprep.subr.bf16.mxu1 %v15505_v43 }
0x4ccd   :  { %v10037_v49 = vpop.f32.mrb[84].mxu0 }
0x4cce   :  { %v13148_v3 = vpop.f32.mrb[85].mxu0 }
0x4ccf   :  { %14963 = vmatpush3.bf16.msk.msra.mxu1 %vm16430_vm13, %v14961_v8 }
0x4cd1   :  { %v10218_v41 = vpop.f32.mrb[86].mxu0 }
0x4cd2   :  { %v13166_v1 = vpop.f32.mrb[87].mxu0  ;;  %v10219_v20 = vadd.f32 %v10513_v59, %v10218_v41 }
0x4d9d   :  { %v9930_v2 = vpop.f32.mrb[116].mxu1 }
0x4d9e   :  { %v9931_v7 = vadd.f32 %v10504_v45, %v9930_v2  ;;  %v13143_v51 = vpop.f32.mrb[117].mxu1 }
0x4da0   :  { %10506 = vst.msk [vmem:[%s18642_s28 + $0xa] sm:$0x3] %vm2004_vm8, %v9931_v7  ;;  %v10507_v25 = vmul.f32 -1.442695, %v9931_v7  ;;  %v9965_v14 = vrot.slane %v9931_v7, %v16100_v60 }
0x4da2   :  { %15188 = vpow2.f32 %v10507_v25 }
0x4dac   :  { %v15189_v52 = vpop.eup %15188 }
0x4dad   :  { %v9939_v15 = vadd.f32 1.0, %v15189_v52 }
0x4daf   :  { %15190 = vrcp.f32 %v9939_v15 }
0x4db9   :  { %v15191_v16 = vpop.eup %15190 }
0x4dba   :  { %v9942_v42 = vmul.f32 0.9, %v15191_v16 }
0x4dbc   :  { %v9943_v30 = vadd.f32 0.1, %v9942_v42 }
0x4dbe   :  { %15192 = vrsqrt.f32 %v9943_v30  ;;  %vm9946_vm3 = vcmp.eq.f32.partialorder %v9943_v30, inf  ;;  %v9949_v57 = vand.u32 2147483648, %v9943_v30  ;;  %vm9948_vm4 = vcmp.eq.f32.partialorder %v9943_v30, 0.0 }
0x4dc8   :  { %v15193_v39 = vpop.eup %15192 }
0x4dc9   :  { %v9945_v55 = vmul.f32 %v15193_v39, %v9943_v30 }
0x4dcb   :  { %v9947_v63 = vsel %vm9946_vm3, %v9943_v30, %v9945_v55 }
0x4dcc   :  { %v9950_v56 = vsel %vm9948_vm4, %v9949_v57, %v9947_v63 }
0x4dcd   :  { %v9956_v10 = vrot.slane %v9950_v56, %v16100_v60  ;;  %v10510_v60 = vld [vmem:[#allocation19] ss:$0 sm:$0xff] }
0x4dcf   :  { %v9961_v58 = vmul.f32 %v9959_v32, %v9956_v10 }
0x4dd1   :  { %9967 = vrot.lane.b32.xlu1 %v9961_v58, %s18711_s15 }
0x4e43   :  { %v9968_v53 = vpop.permute.xlu1 %9967 }
0x4e44   :  { %v9970_v4 = vadd.f32 %v9968_v53, %v9965_v14 }
0x4e46   :  { %10042 = vrot.lane.b32.xlu1 %v9970_v4, %s18716_s7 }
0x4e4a   :  { %10230 = vrot.lane.b32.xlu1 %v10219_v20, %s18715_s21 }
0x4eb8   :  { %v10043_v43 = vpop.permute.xlu1 %10042 }
0x4eb9   :  { %v10049_v19 = vsel %vm267_vm0, %v10037_v49, %v10043_v43 }
0x4eba   :  { %v10050_v31 = vsel %vm2122_vm14, %v10049_v19, %v10047_v23 }
0x4ebb   :  { %13158 = vmatmul.mubr.msk.f32.vlgmr.msra.gmra.mrb[118].mxu1 %vm2138_vm15, %v10050_v31 }
0x4ebc   :  { %v10231_v22 = vpop.permute.xlu1 %10230 }
0x4f8e   :  { %v10137_v54 = vpop.f32.mrb[118].mxu1 }
0x4f8f   :  { %v10138_v21 = vadd.f32 %v10510_v60, %v10137_v54  ;;  %v13159_v5 = vpop.f32.mrb[119].mxu1 }
0x4f91   :  { %v10222_v13 = vadd.f32 %v10219_v20, %v10138_v21 }
0x4f93   :  { %v10515_v26 = vmul.f32 -1.442695, %v10222_v13 }
0x4f95   :  { %15194 = vpow2.f32 %v10515_v26 }
0x4f9f   :  { %v15195_v27 = vpop.eup %15194 }
0x4fa0   :  { %v10226_v9 = vadd.f32 1.0, %v15195_v27 }
0x4fa2   :  { %15196 = vrcp.f32 %v10226_v9 }
0x4fac   :  { %v15197_v17 = vpop.eup %15196 }
0x4fad   :  { %v10233_v28 = vmul.f32 %v15197_v17, %v10231_v22  ;;  %v10240_v47 = vsub.f32 1.0, %v15197_v17  ;;  %v10246_v6 = vmul.f32 %v15197_v17, %v18211_v18 }
0x4faf   :  { %10235 = vrot.lane.b32.xlu0 %v10233_v28, %s18712_s0 }
0x5021   :  { %v10236_v34 = vpop.permute.xlu0 %10235 }
0x5022   :  { %v10238_v40 = vadd.f32 %v10236_v34, %v10138_v21 }
0x5024   :  { %15198 = vtanh.f32 %v10238_v40 }
0x502e   :  { %v15199_v44 = vpop.eup %15198 }
0x502f   :  { %10242 = vrot.lane.b32.xlu1 %v15199_v44, %s18713_s11 }
0x50a1   :  { %v10243_v61 = vpop.permute.xlu1 %10242 }
0x50a2   :  { %v10245_v48 = vmul.f32 %v10243_v61, %v10240_v47 }
0x50a4   :  { %v10247_v50 = vadd.f32 %v10246_v6, %v10245_v48 }
0x50a6   :  { %v10248_v46 = vmax.f32 %v10247_v50, 0.0 }
0x50a8   :  { %10259 = vrot.lane.b32.xlu0 %v10248_v46, %s18713_s11 }
0x511a   :  { %v10260_v32 = vpop.permute.xlu0 %10259 }
0x511b   :  { %13172 = vmatmul.mubr.msk.f32.vlgmr.msra.gmra.mrb[88].mxu0 %vm267_vm0, %v10260_v32 }
0x51ee   :  { %v10329_v33 = vpop.f32.mrb[88].mxu0 }
0x51ef   :  { %v10330_v35 = vadd.f32 %v18256_v11, %v10329_v33  ;;  %v13173_v36 = vpop.f32.mrb[89].mxu0 }
0x51f1   :  { %10518 = vst.msk [vmem:[%s18717_s6 + $0x14] sm:$0xf] %vm2403_vm1, %v10330_v35 }
0x51f2   :  { %10343 = vsyncpa [#allocation3], 1 }
0x51f3   :  { %10344 = vsyncpa [#allocation5], 1 }
0x51f4   :  { %10345 = vsyncpa [#allocation8], 1 }
0x51f5   :  { %10346 = vsyncpa [#allocation11], 1 }
0x51f6   :  { %10347 = vsyncpa [#allocation14], 1 }
0x51f7   :  { %10348 = vsyncpa [#allocation17], 1 }
0x51f8   :  { %10349 = vsyncpa [#allocation20], 1 }

</bundles_post_ra>
